<compile_context>
chip_gen: v6e
topology: v6e:2x2x1
jax: 0.10.0
libtpu: 0.0.40
codegen_flags: <defaults>
</compile_context>

<pallas_src>
import functools
import math

import numpy as np
import jax
import jax.numpy as jnp
from jax.experimental import pallas as pl
from jax.experimental.pallas import tpu as pltpu


# ---------------------------------------------------------------------------
# Helpers
# ---------------------------------------------------------------------------

def _full_spec(shape):
    """Whole-array block, replicated across the batch grid."""
    nd = len(shape)
    return pl.BlockSpec(tuple(shape), lambda i, _nd=nd: (0,) * _nd)


def _conv1x1_cf(w, b, x):
    """1x1 conv in channels-first flat layout (tiny channel counts -> VPU MAC).
    w: [Cout, Cin]  b: [Cout, 1]  x: [Cin, P]  ->  [Cout, P] (f32)."""
    return jnp.sum(w[:, :, None] * x[None, :, :], axis=1) + b


def _roll_lanes(x, off):
    """result[..., p] = x[..., (p + off) mod P]  (static shift on the lane axis)."""
    p = x.shape[-1]
    s = (-off) % p
    if s == 0:
        return x
    return jnp.concatenate([x[..., p - s:], x[..., :p - s]], axis=-1)


def _shift2d(x, mask_row, dy, dx, w):
    """Sample x at spatial offset (dy, dx) in the flattened [*, H*W] layout,
    with zero outside the image (mask_row: precomputed [1, H*W] validity)."""
    if dy == 0 and dx == 0:
        return x
    r = _roll_lanes(x, dy * w + dx)
    if x.dtype == jnp.float32:
        return r * mask_row
    return jnp.where(mask_row != 0, r, 0)       # keeps bf16 dtype


def _build_masks(h, w, k):
    """[(2k+1)^2, H*W] f32 validity masks for every (dy, dx) displacement."""
    ys, xs = np.meshgrid(np.arange(h), np.arange(w), indexing="ij")
    rows = []
    for dy in range(-k, k + 1):
        for dx in range(-k, k + 1):
            ok = (ys + dy >= 0) & (ys + dy < h) & (xs + dx >= 0) & (xs + dx < w)
            rows.append(ok.reshape(-1))
    return np.stack(rows).astype(np.float32)


# ---------------------------------------------------------------------------
# Fused kernel: projections + correlation + softmax + assemble + conv_out
#               + conv_final + residual combine
# ---------------------------------------------------------------------------

def _ca_kernel(x_ref, xr_ref, m_att_ref, m3_ref,
               qkv_w_ref, qkv_b_ref, out_w_ref, out_b_ref,
               w1_ref, b1_ref, w2_ref, b2_ref, w3_ref, b3_ref, w4_ref, b4_ref,
               o_ref, *, k, w, scale):
    f32 = jnp.float32
    bf16 = jnp.bfloat16
    hw = x_ref.shape[2]
    win = 2 * k + 1

    x_cf = x_ref[0].astype(f32)                 # [C, HW]   current frame
    xr_cf = xr_ref[0].astype(f32)               # [C, HW]   reference frame

    # ---- theta / phi / g 1x1 projections (channels-first VPU MACs) ---------
    theta = _conv1x1_cf(qkv_w_ref[0], qkv_b_ref[0], x_cf)     # [Ci, HW]
    phi = _conv1x1_cf(qkv_w_ref[1], qkv_b_ref[1], xr_cf)      # [Ci, HW]
    g = _conv1x1_cf(qkv_w_ref[2], qkv_b_ref[2], xr_cf)        # [Ci, HW]
    ci = theta.shape[0]

    # ---- MxCorrelation + softmax(displacements) + MxAssemble ----------------
    # Online softmax over the (2k+1)^2 displacements; each displacement is a
    # masked lane-rotation of phi / g (zero-padding semantics), so all VPU work
    # runs on dense 256-wide rows and nothing is stacked or spilled.
    m_run = jnp.full((1, hw), -jnp.inf, f32)
    l_run = jnp.zeros((1, hw), f32)
    acc = jnp.zeros((ci, hw), f32)
    for d in range(win * win):
        dy, dx = d // win - k, d % win - k
        mrow = m_att_ref[d:d + 1, :]
        phi_s = _shift2d(phi, mrow, dy, dx, w)
        logit = jnp.sum(theta * phi_s, axis=0, keepdims=True) * scale  # [1, HW]
        m_new = jnp.maximum(m_run, logit)
        alpha = jnp.exp(m_run - m_new)
        e_d = jnp.exp(logit - m_new)
        g_s = _shift2d(g, mrow, dy, dx, w)
        l_run = alpha * l_run + e_d
        acc = alpha * acc + e_d * g_s
        m_run = m_new
    y_att = acc * (1.0 / l_run)                 # exact divide (review note)

    # ---- conv_out: 1x1 (Ci -> C) --------------------------------------------
    y_cf = _conv1x1_cf(out_w_ref[...], out_b_ref[...], y_att)  # [C, HW]

    # ---- conv_final[0]: 1x1 (2C -> 256) + ReLU ------------------------------
    # cat([x, y], dim=channel) is a sublane concat; one small-K MXU dot.
    xy = jnp.concatenate([x_cf, y_cf], axis=0)                 # [2C, HW]
    f1 = jnp.dot(w1_ref[...], xy, preferred_element_type=f32) + b1_ref[...]
    f1 = jnp.maximum(f1, 0.0).astype(bf16)                     # [256, HW] bf16

    # ---- conv_final[1]: 3x3 (256 -> 16) + ReLU ------------------------------
    # 9 accumulated MXU dots, bf16 operands / f32 accumulation; taps are masked
    # lane rotations of the bf16 activation (no padded scratch, half the traffic).
    c2 = w2_ref.shape[1]
    f2 = jnp.zeros((c2, hw), f32)
    for t in range(9):
        dy, dx = t // 3 - 1, t % 3 - 1
        tap = _shift2d(f1, m3_ref[t:t + 1, :], dy, dx, w)      # [256, HW] bf16
        f2 = f2 + jnp.dot(w2_ref[t].astype(bf16), tap,
                          preferred_element_type=f32)
    f2 = jnp.maximum(f2 + b2_ref[...], 0.0)                    # [16, HW]

    # ---- conv_final[2]: 3x3 (16 -> 3), linear -------------------------------
    c3 = w3_ref.shape[1]
    f3 = jnp.zeros((c3, hw), f32)
    for t in range(9):
        dy, dx = t // 3 - 1, t % 3 - 1
        tap = _shift2d(f2, m3_ref[t:t + 1, :], dy, dx, w)      # [16, HW]
        f3 = f3 + jnp.dot(w3_ref[t], tap, preferred_element_type=f32)
    f3 = f3 + b3_ref[...]                                      # [3, HW]

    # ---- conv_final[3]: 3x3 (3 -> 1), fused with  out = x + f * y ----------
    fmap = jnp.zeros((1, hw), f32)
    for t in range(9):
        dy, dx = t // 3 - 1, t % 3 - 1
        tap = _shift2d(f3, m3_ref[t:t + 1, :], dy, dx, w)      # [3, HW]
        fmap = fmap + jnp.sum(w4_ref[t] * tap, axis=0, keepdims=True)
    fmap = fmap + b4_ref[...]                                  # [1, HW]

    o_ref[0] = (x_cf + fmap * y_cf).astype(o_ref.dtype)


# ---------------------------------------------------------------------------
# CA forward (mode='embedded_gaussian', use_scale=True, conv_final=True)
# ---------------------------------------------------------------------------

def ca_forward(x, x_prev, params, corr_disp):
    """x, x_prev: NCHW float32 (x = current frame, x_prev = reference frame)."""
    n, c, h, w = x.shape
    hw = h * w
    k = corr_disp
    ci = params["qkv_w"].shape[1]
    # corr (kernel_size=1) divides by Ci; embedded_gaussian then *256/sqrt(W)
    # (theta_x is NCHW so theta_x.shape[-1] == W).  Folded into one logit scale.
    scale = 256.0 / (ci * math.sqrt(w))

    m_att = jnp.asarray(_build_masks(h, w, k))   # [(2k+1)^2, HW]
    m3 = jnp.asarray(_build_masks(h, w, 1))      # [9, HW]

    x_flat = x.reshape(n, c, hw)                 # lane-dense I/O (last dim 256)
    xr_flat = x_prev.reshape(n, c, hw)

    batched = pl.BlockSpec((1, c, hw), lambda i: (i, 0, 0))
    const_args = (m_att, m3,
                  params["qkv_w"], params["qkv_b"],
                  params["out_w"], params["out_b"],
                  params["f1_w"], params["f1_b"], params["f2_w"], params["f2_b"],
                  params["f3_w"], params["f3_b"], params["f4_w"], params["f4_b"])

    out_flat = pl.pallas_call(
        functools.partial(_ca_kernel, k=k, w=w, scale=scale),
        out_shape=jax.ShapeDtypeStruct((n, c, hw), jnp.float32),
        grid=(n,),
        in_specs=[batched, batched] + [_full_spec(a.shape) for a in const_args],
        out_specs=batched,
        compiler_params=pltpu.CompilerParams(dimension_semantics=("parallel",)),
    )(x_flat, xr_flat, *const_args)

    return out_flat.reshape(n, c, h, w)


# ---------------------------------------------------------------------------
# Parameters (deterministic synthetic init: normal(std=0.01) weights, zero bias,
# final-conv bias fixed to 0 -- matching the module's init_weights path)
# ---------------------------------------------------------------------------

def init_params(key, in_channels, reduction=2):
    ci = in_channels // reduction
    ks = jax.random.split(key, 6)

    def wi(kk, shape, std=0.01):
        return std * jax.random.normal(kk, shape, dtype=jnp.float32)

    zeros = lambda *s: jnp.zeros(s, jnp.float32)
    return {
        # attention path: channels-first [Cout, Cin] weights, [Cout, 1] biases
        "qkv_w": wi(ks[0], (3, ci, in_channels)),   # packed [theta, phi, g]
        "qkv_b": zeros(3, ci, 1),
        "out_w": wi(ks[1], (in_channels, ci)),
        "out_b": zeros(in_channels, 1),
        # conv_final path: [tap, Cout, Cin] (tap = 3*dy+dx); f4 as [tap, Cin, 1]
        "f1_w": wi(ks[2], (256, 2 * in_channels)),  "f1_b": zeros(256, 1),
        "f2_w": wi(ks[3], (9, 16, 256)),            "f2_b": zeros(16, 1),
        "f3_w": wi(ks[4], (9, 3, 16)),              "f3_b": zeros(3, 1),
        "f4_w": wi(ks[5], (9, 3, 1)),               "f4_b": zeros(1, 1),  # bias==0
    }


# ---------------------------------------------------------------------------

if __name__ == "__main__":
    key = jax.random.PRNGKey(0)
    kx, kr, kp = jax.random.split(key, 3)

    N, C, H, W = 2, 4, 16, 16
    corr_disp = 2                               # -> 25 displacement bins

    x = jax.random.normal(kx, (N, C, H, W), dtype=jnp.float32)
    x_prev = jax.random.normal(kr, (N, C, H, W), dtype=jnp.float32)
    params = init_params(kp, C, reduction=2)

    fwd = jax.jit(ca_forward, static_argnums=3)
    out = fwd(x, x_prev, params, corr_disp)
    out = jax.block_until_ready(out)
    assert out.shape == (N, C, H, W) and out.dtype == jnp.float32
    assert bool(jnp.all(jnp.isfinite(out)))
    print("KERNEL_OK")
</pallas_src>

<mosaic_0001>
module attributes {stable_mosaic.version = 11 : i64} {
  func.func @_ca_kernel(%arg0: i32, %arg1: memref<1x4x256xf32, #tpu.memory_space<vmem>>, %arg2: memref<1x4x256xf32, #tpu.memory_space<vmem>>, %arg3: memref<25x256xf32, #tpu.memory_space<vmem>>, %arg4: memref<9x256xf32, #tpu.memory_space<vmem>>, %arg5: memref<3x2x4xf32, #tpu.memory_space<vmem>>, %arg6: memref<3x2x1xf32, #tpu.memory_space<vmem>>, %arg7: memref<4x2xf32, #tpu.memory_space<vmem>>, %arg8: memref<4x1xf32, #tpu.memory_space<vmem>>, %arg9: memref<256x8xf32, #tpu.memory_space<vmem>>, %arg10: memref<256x1xf32, #tpu.memory_space<vmem>>, %arg11: memref<9x16x256xf32, #tpu.memory_space<vmem>>, %arg12: memref<16x1xf32, #tpu.memory_space<vmem>>, %arg13: memref<9x3x16xf32, #tpu.memory_space<vmem>>, %arg14: memref<3x1xf32, #tpu.memory_space<vmem>>, %arg15: memref<9x3x1xf32, #tpu.memory_space<vmem>>, %arg16: memref<1x1xf32, #tpu.memory_space<vmem>>, %arg17: memref<1x4x256xf32, #tpu.memory_space<vmem>>) attributes {dimension_semantics = [#tpu.dimension_semantics<parallel>], iteration_bounds = array<i64: 2>, scalar_prefetch = 0 : i64, scratch_operands = 0 : i64, tpu.core_type = #tpu.core_type<tc>, window_params = [{transform_indices = @transform_0, window_bounds = array<i64: 1, 4, 256>}, {transform_indices = @transform_1, window_bounds = array<i64: 1, 4, 256>}, {pipeline_mode = #tpu.pipeline_mode<synchronous>, transform_indices = @transform_2, window_bounds = array<i64: 25, 256>}, {pipeline_mode = #tpu.pipeline_mode<synchronous>, transform_indices = @transform_3, window_bounds = array<i64: 9, 256>}, {pipeline_mode = #tpu.pipeline_mode<synchronous>, transform_indices = @transform_4, window_bounds = array<i64: 3, 2, 4>}, {pipeline_mode = #tpu.pipeline_mode<synchronous>, transform_indices = @transform_5, window_bounds = array<i64: 3, 2, 1>}, {pipeline_mode = #tpu.pipeline_mode<synchronous>, transform_indices = @transform_6, window_bounds = array<i64: 4, 2>}, {pipeline_mode = #tpu.pipeline_mode<synchronous>, transform_indices = @transform_7, window_bounds = array<i64: 4, 1>}, {pipeline_mode = #tpu.pipeline_mode<synchronous>, transform_indices = @transform_8, window_bounds = array<i64: 256, 8>}, {pipeline_mode = #tpu.pipeline_mode<synchronous>, transform_indices = @transform_9, window_bounds = array<i64: 256, 1>}, {pipeline_mode = #tpu.pipeline_mode<synchronous>, transform_indices = @transform_10, window_bounds = array<i64: 9, 16, 256>}, {pipeline_mode = #tpu.pipeline_mode<synchronous>, transform_indices = @transform_11, window_bounds = array<i64: 16, 1>}, {pipeline_mode = #tpu.pipeline_mode<synchronous>, transform_indices = @transform_12, window_bounds = array<i64: 9, 3, 16>}, {pipeline_mode = #tpu.pipeline_mode<synchronous>, transform_indices = @transform_13, window_bounds = array<i64: 3, 1>}, {pipeline_mode = #tpu.pipeline_mode<synchronous>, transform_indices = @transform_14, window_bounds = array<i64: 9, 3, 1>}, {pipeline_mode = #tpu.pipeline_mode<synchronous>, transform_indices = @transform_15, window_bounds = array<i64: 1, 1>}, {transform_indices = @transform_16, window_bounds = array<i64: 1, 4, 256>}]} {
    %c0 = arith.constant 0 : index
    %c0_0 = arith.constant 0 : index
    %c0_1 = arith.constant 0 : index
    %0 = vector.load %arg1[%c0, %c0_0, %c0_1] : memref<1x4x256xf32, #tpu.memory_space<vmem>>, vector<1x4x256xf32>
    %1 = vector.shape_cast %0 : vector<1x4x256xf32> to vector<4x256xf32>
    %c0_2 = arith.constant 0 : index
    %c0_3 = arith.constant 0 : index
    %c0_4 = arith.constant 0 : index
    %2 = vector.load %arg2[%c0_2, %c0_3, %c0_4] : memref<1x4x256xf32, #tpu.memory_space<vmem>>, vector<1x4x256xf32>
    %3 = vector.shape_cast %2 : vector<1x4x256xf32> to vector<4x256xf32>
    %c0_5 = arith.constant 0 : index
    %c0_6 = arith.constant 0 : index
    %c0_7 = arith.constant 0 : index
    %4 = vector.load %arg5[%c0_5, %c0_6, %c0_7] : memref<3x2x4xf32, #tpu.memory_space<vmem>>, vector<1x2x4xf32>
    %5 = vector.shape_cast %4 : vector<1x2x4xf32> to vector<2x4xf32>
    %c0_8 = arith.constant 0 : index
    %c0_9 = arith.constant 0 : index
    %c0_10 = arith.constant 0 : index
    %6 = vector.load %arg6[%c0_8, %c0_9, %c0_10] : memref<3x2x1xf32, #tpu.memory_space<vmem>>, vector<1x2x1xf32>
    %7 = vector.shape_cast %6 : vector<1x2x1xf32> to vector<2x1xf32>
    %8 = vector.shape_cast %5 : vector<2x4xf32> to vector<2x4x1xf32>
    %9 = vector.shape_cast %1 : vector<4x256xf32> to vector<1x4x256xf32>
    %10 = vector.broadcast %8 : vector<2x4x1xf32> to vector<2x4x256xf32>
    %11 = vector.broadcast %9 : vector<1x4x256xf32> to vector<2x4x256xf32>
    %12 = arith.mulf %10, %11 : vector<2x4x256xf32>
    %cst = arith.constant dense<0.000000e+00> : vector<2x256xf32>
    %13 = vector.multi_reduction <add>, %12, %cst [1] : vector<2x4x256xf32> to vector<2x256xf32>
    %14 = vector.broadcast %7 : vector<2x1xf32> to vector<2x256xf32>
    %15 = arith.addf %13, %14 : vector<2x256xf32>
    %c1 = arith.constant 1 : index
    %c0_11 = arith.constant 0 : index
    %c0_12 = arith.constant 0 : index
    %16 = vector.load %arg5[%c1, %c0_11, %c0_12] : memref<3x2x4xf32, #tpu.memory_space<vmem>>, vector<1x2x4xf32>
    %17 = vector.shape_cast %16 : vector<1x2x4xf32> to vector<2x4xf32>
    %c1_13 = arith.constant 1 : index
    %c0_14 = arith.constant 0 : index
    %c0_15 = arith.constant 0 : index
    %18 = vector.load %arg6[%c1_13, %c0_14, %c0_15] : memref<3x2x1xf32, #tpu.memory_space<vmem>>, vector<1x2x1xf32>
    %19 = vector.shape_cast %18 : vector<1x2x1xf32> to vector<2x1xf32>
    %20 = vector.shape_cast %17 : vector<2x4xf32> to vector<2x4x1xf32>
    %21 = vector.shape_cast %3 : vector<4x256xf32> to vector<1x4x256xf32>
    %22 = vector.broadcast %20 : vector<2x4x1xf32> to vector<2x4x256xf32>
    %23 = vector.broadcast %21 : vector<1x4x256xf32> to vector<2x4x256xf32>
    %24 = arith.mulf %22, %23 : vector<2x4x256xf32>
    %cst_16 = arith.constant dense<0.000000e+00> : vector<2x256xf32>
    %25 = vector.multi_reduction <add>, %24, %cst_16 [1] : vector<2x4x256xf32> to vector<2x256xf32>
    %26 = vector.broadcast %19 : vector<2x1xf32> to vector<2x256xf32>
    %27 = arith.addf %25, %26 : vector<2x256xf32>
    %c2 = arith.constant 2 : index
    %c0_17 = arith.constant 0 : index
    %c0_18 = arith.constant 0 : index
    %28 = vector.load %arg5[%c2, %c0_17, %c0_18] : memref<3x2x4xf32, #tpu.memory_space<vmem>>, vector<1x2x4xf32>
    %29 = vector.shape_cast %28 : vector<1x2x4xf32> to vector<2x4xf32>
    %c2_19 = arith.constant 2 : index
    %c0_20 = arith.constant 0 : index
    %c0_21 = arith.constant 0 : index
    %30 = vector.load %arg6[%c2_19, %c0_20, %c0_21] : memref<3x2x1xf32, #tpu.memory_space<vmem>>, vector<1x2x1xf32>
    %31 = vector.shape_cast %30 : vector<1x2x1xf32> to vector<2x1xf32>
    %32 = vector.shape_cast %29 : vector<2x4xf32> to vector<2x4x1xf32>
    %33 = vector.shape_cast %3 : vector<4x256xf32> to vector<1x4x256xf32>
    %34 = vector.broadcast %32 : vector<2x4x1xf32> to vector<2x4x256xf32>
    %35 = vector.broadcast %33 : vector<1x4x256xf32> to vector<2x4x256xf32>
    %36 = arith.mulf %34, %35 : vector<2x4x256xf32>
    %cst_22 = arith.constant dense<0.000000e+00> : vector<2x256xf32>
    %37 = vector.multi_reduction <add>, %36, %cst_22 [1] : vector<2x4x256xf32> to vector<2x256xf32>
    %38 = vector.broadcast %31 : vector<2x1xf32> to vector<2x256xf32>
    %39 = arith.addf %37, %38 : vector<2x256xf32>
    %cst_23 = arith.constant 0xFF800000 : f32
    %40 = vector.broadcast %cst_23 : f32 to vector<1x256xf32>
    %cst_24 = arith.constant 0.000000e+00 : f32
    %41 = vector.broadcast %cst_24 : f32 to vector<1x256xf32>
    %cst_25 = arith.constant 0.000000e+00 : f32
    %42 = vector.broadcast %cst_25 : f32 to vector<2x256xf32>
    %c0_26 = arith.constant 0 : index
    %c0_27 = arith.constant 0 : index
    %43 = vector.load %arg3[%c0_26, %c0_27] : memref<25x256xf32, #tpu.memory_space<vmem>>, vector<1x256xf32>
    %44 = vector.extract_strided_slice %27 {offsets = [0, 222], sizes = [2, 34], strides = [1, 1]} : vector<2x256xf32> to vector<2x34xf32>
    %45 = vector.extract_strided_slice %27 {offsets = [0, 0], sizes = [2, 222], strides = [1, 1]} : vector<2x256xf32> to vector<2x222xf32>
    %46 = tpu.concatenate %44, %45 in 1 : vector<2x34xf32>, vector<2x222xf32> -> vector<2x256xf32>
    %47 = vector.broadcast %43 : vector<1x256xf32> to vector<2x256xf32>
    %48 = arith.mulf %46, %47 : vector<2x256xf32>
    %49 = arith.mulf %15, %48 : vector<2x256xf32>
    %cst_28 = arith.constant dense<0.000000e+00> : vector<256xf32>
    %50 = vector.multi_reduction <add>, %49, %cst_28 [0] : vector<2x256xf32> to vector<256xf32>
    %51 = vector.shape_cast %50 : vector<256xf32> to vector<1x256xf32>
    %cst_29 = arith.constant 3.200000e+01 : f32
    %52 = vector.broadcast %cst_29 : f32 to vector<1x256xf32>
    %53 = arith.mulf %51, %52 : vector<1x256xf32>
    %54 = arith.maximumf %40, %53 : vector<1x256xf32>
    %55 = arith.subf %40, %54 : vector<1x256xf32>
    %56 = math.exp %55 : vector<1x256xf32>
    %57 = arith.subf %53, %54 : vector<1x256xf32>
    %58 = math.exp %57 : vector<1x256xf32>
    %59 = vector.extract_strided_slice %39 {offsets = [0, 222], sizes = [2, 34], strides = [1, 1]} : vector<2x256xf32> to vector<2x34xf32>
    %60 = vector.extract_strided_slice %39 {offsets = [0, 0], sizes = [2, 222], strides = [1, 1]} : vector<2x256xf32> to vector<2x222xf32>
    %61 = tpu.concatenate %59, %60 in 1 : vector<2x34xf32>, vector<2x222xf32> -> vector<2x256xf32>
    %62 = vector.broadcast %43 : vector<1x256xf32> to vector<2x256xf32>
    %63 = arith.mulf %61, %62 : vector<2x256xf32>
    %64 = arith.mulf %56, %41 : vector<1x256xf32>
    %65 = arith.addf %64, %58 : vector<1x256xf32>
    %66 = vector.broadcast %56 : vector<1x256xf32> to vector<2x256xf32>
    %67 = arith.mulf %66, %42 : vector<2x256xf32>
    %68 = vector.broadcast %58 : vector<1x256xf32> to vector<2x256xf32>
    %69 = arith.mulf %68, %63 : vector<2x256xf32>
    %70 = arith.addf %67, %69 : vector<2x256xf32>
    %c1_30 = arith.constant 1 : index
    %c0_31 = arith.constant 0 : index
    %71 = vector.load %arg3[%c1_30, %c0_31] : memref<25x256xf32, #tpu.memory_space<vmem>>, vector<1x256xf32>
    %72 = vector.extract_strided_slice %27 {offsets = [0, 223], sizes = [2, 33], strides = [1, 1]} : vector<2x256xf32> to vector<2x33xf32>
    %73 = vector.extract_strided_slice %27 {offsets = [0, 0], sizes = [2, 223], strides = [1, 1]} : vector<2x256xf32> to vector<2x223xf32>
    %74 = tpu.concatenate %72, %73 in 1 : vector<2x33xf32>, vector<2x223xf32> -> vector<2x256xf32>
    %75 = vector.broadcast %71 : vector<1x256xf32> to vector<2x256xf32>
    %76 = arith.mulf %74, %75 : vector<2x256xf32>
    %77 = arith.mulf %15, %76 : vector<2x256xf32>
    %cst_32 = arith.constant dense<0.000000e+00> : vector<256xf32>
    %78 = vector.multi_reduction <add>, %77, %cst_32 [0] : vector<2x256xf32> to vector<256xf32>
    %79 = vector.shape_cast %78 : vector<256xf32> to vector<1x256xf32>
    %cst_33 = arith.constant 3.200000e+01 : f32
    %80 = vector.broadcast %cst_33 : f32 to vector<1x256xf32>
    %81 = arith.mulf %79, %80 : vector<1x256xf32>
    %82 = arith.maximumf %54, %81 : vector<1x256xf32>
    %83 = arith.subf %54, %82 : vector<1x256xf32>
    %84 = math.exp %83 : vector<1x256xf32>
    %85 = arith.subf %81, %82 : vector<1x256xf32>
    %86 = math.exp %85 : vector<1x256xf32>
    %87 = vector.extract_strided_slice %39 {offsets = [0, 223], sizes = [2, 33], strides = [1, 1]} : vector<2x256xf32> to vector<2x33xf32>
    %88 = vector.extract_strided_slice %39 {offsets = [0, 0], sizes = [2, 223], strides = [1, 1]} : vector<2x256xf32> to vector<2x223xf32>
    %89 = tpu.concatenate %87, %88 in 1 : vector<2x33xf32>, vector<2x223xf32> -> vector<2x256xf32>
    %90 = vector.broadcast %71 : vector<1x256xf32> to vector<2x256xf32>
    %91 = arith.mulf %89, %90 : vector<2x256xf32>
    %92 = arith.mulf %84, %65 : vector<1x256xf32>
    %93 = arith.addf %92, %86 : vector<1x256xf32>
    %94 = vector.broadcast %84 : vector<1x256xf32> to vector<2x256xf32>
    %95 = arith.mulf %94, %70 : vector<2x256xf32>
    %96 = vector.broadcast %86 : vector<1x256xf32> to vector<2x256xf32>
    %97 = arith.mulf %96, %91 : vector<2x256xf32>
    %98 = arith.addf %95, %97 : vector<2x256xf32>
    %c2_34 = arith.constant 2 : index
    %c0_35 = arith.constant 0 : index
    %99 = vector.load %arg3[%c2_34, %c0_35] : memref<25x256xf32, #tpu.memory_space<vmem>>, vector<1x256xf32>
    %100 = vector.extract_strided_slice %27 {offsets = [0, 224], sizes = [2, 32], strides = [1, 1]} : vector<2x256xf32> to vector<2x32xf32>
    %101 = vector.extract_strided_slice %27 {offsets = [0, 0], sizes = [2, 224], strides = [1, 1]} : vector<2x256xf32> to vector<2x224xf32>
    %102 = tpu.concatenate %100, %101 in 1 : vector<2x32xf32>, vector<2x224xf32> -> vector<2x256xf32>
    %103 = vector.broadcast %99 : vector<1x256xf32> to vector<2x256xf32>
    %104 = arith.mulf %102, %103 : vector<2x256xf32>
    %105 = arith.mulf %15, %104 : vector<2x256xf32>
    %cst_36 = arith.constant dense<0.000000e+00> : vector<256xf32>
    %106 = vector.multi_reduction <add>, %105, %cst_36 [0] : vector<2x256xf32> to vector<256xf32>
    %107 = vector.shape_cast %106 : vector<256xf32> to vector<1x256xf32>
    %cst_37 = arith.constant 3.200000e+01 : f32
    %108 = vector.broadcast %cst_37 : f32 to vector<1x256xf32>
    %109 = arith.mulf %107, %108 : vector<1x256xf32>
    %110 = arith.maximumf %82, %109 : vector<1x256xf32>
    %111 = arith.subf %82, %110 : vector<1x256xf32>
    %112 = math.exp %111 : vector<1x256xf32>
    %113 = arith.subf %109, %110 : vector<1x256xf32>
    %114 = math.exp %113 : vector<1x256xf32>
    %115 = vector.extract_strided_slice %39 {offsets = [0, 224], sizes = [2, 32], strides = [1, 1]} : vector<2x256xf32> to vector<2x32xf32>
    %116 = vector.extract_strided_slice %39 {offsets = [0, 0], sizes = [2, 224], strides = [1, 1]} : vector<2x256xf32> to vector<2x224xf32>
    %117 = tpu.concatenate %115, %116 in 1 : vector<2x32xf32>, vector<2x224xf32> -> vector<2x256xf32>
    %118 = vector.broadcast %99 : vector<1x256xf32> to vector<2x256xf32>
    %119 = arith.mulf %117, %118 : vector<2x256xf32>
    %120 = arith.mulf %112, %93 : vector<1x256xf32>
    %121 = arith.addf %120, %114 : vector<1x256xf32>
    %122 = vector.broadcast %112 : vector<1x256xf32> to vector<2x256xf32>
    %123 = arith.mulf %122, %98 : vector<2x256xf32>
    %124 = vector.broadcast %114 : vector<1x256xf32> to vector<2x256xf32>
    %125 = arith.mulf %124, %119 : vector<2x256xf32>
    %126 = arith.addf %123, %125 : vector<2x256xf32>
    %c3 = arith.constant 3 : index
    %c0_38 = arith.constant 0 : index
    %127 = vector.load %arg3[%c3, %c0_38] : memref<25x256xf32, #tpu.memory_space<vmem>>, vector<1x256xf32>
    %128 = vector.extract_strided_slice %27 {offsets = [0, 225], sizes = [2, 31], strides = [1, 1]} : vector<2x256xf32> to vector<2x31xf32>
    %129 = vector.extract_strided_slice %27 {offsets = [0, 0], sizes = [2, 225], strides = [1, 1]} : vector<2x256xf32> to vector<2x225xf32>
    %130 = tpu.concatenate %128, %129 in 1 : vector<2x31xf32>, vector<2x225xf32> -> vector<2x256xf32>
    %131 = vector.broadcast %127 : vector<1x256xf32> to vector<2x256xf32>
    %132 = arith.mulf %130, %131 : vector<2x256xf32>
    %133 = arith.mulf %15, %132 : vector<2x256xf32>
    %cst_39 = arith.constant dense<0.000000e+00> : vector<256xf32>
    %134 = vector.multi_reduction <add>, %133, %cst_39 [0] : vector<2x256xf32> to vector<256xf32>
    %135 = vector.shape_cast %134 : vector<256xf32> to vector<1x256xf32>
    %cst_40 = arith.constant 3.200000e+01 : f32
    %136 = vector.broadcast %cst_40 : f32 to vector<1x256xf32>
    %137 = arith.mulf %135, %136 : vector<1x256xf32>
    %138 = arith.maximumf %110, %137 : vector<1x256xf32>
    %139 = arith.subf %110, %138 : vector<1x256xf32>
    %140 = math.exp %139 : vector<1x256xf32>
    %141 = arith.subf %137, %138 : vector<1x256xf32>
    %142 = math.exp %141 : vector<1x256xf32>
    %143 = vector.extract_strided_slice %39 {offsets = [0, 225], sizes = [2, 31], strides = [1, 1]} : vector<2x256xf32> to vector<2x31xf32>
    %144 = vector.extract_strided_slice %39 {offsets = [0, 0], sizes = [2, 225], strides = [1, 1]} : vector<2x256xf32> to vector<2x225xf32>
    %145 = tpu.concatenate %143, %144 in 1 : vector<2x31xf32>, vector<2x225xf32> -> vector<2x256xf32>
    %146 = vector.broadcast %127 : vector<1x256xf32> to vector<2x256xf32>
    %147 = arith.mulf %145, %146 : vector<2x256xf32>
    %148 = arith.mulf %140, %121 : vector<1x256xf32>
    %149 = arith.addf %148, %142 : vector<1x256xf32>
    %150 = vector.broadcast %140 : vector<1x256xf32> to vector<2x256xf32>
    %151 = arith.mulf %150, %126 : vector<2x256xf32>
    %152 = vector.broadcast %142 : vector<1x256xf32> to vector<2x256xf32>
    %153 = arith.mulf %152, %147 : vector<2x256xf32>
    %154 = arith.addf %151, %153 : vector<2x256xf32>
    %c4 = arith.constant 4 : index
    %c0_41 = arith.constant 0 : index
    %155 = vector.load %arg3[%c4, %c0_41] : memref<25x256xf32, #tpu.memory_space<vmem>>, vector<1x256xf32>
    %156 = vector.extract_strided_slice %27 {offsets = [0, 226], sizes = [2, 30], strides = [1, 1]} : vector<2x256xf32> to vector<2x30xf32>
    %157 = vector.extract_strided_slice %27 {offsets = [0, 0], sizes = [2, 226], strides = [1, 1]} : vector<2x256xf32> to vector<2x226xf32>
    %158 = tpu.concatenate %156, %157 in 1 : vector<2x30xf32>, vector<2x226xf32> -> vector<2x256xf32>
    %159 = vector.broadcast %155 : vector<1x256xf32> to vector<2x256xf32>
    %160 = arith.mulf %158, %159 : vector<2x256xf32>
    %161 = arith.mulf %15, %160 : vector<2x256xf32>
    %cst_42 = arith.constant dense<0.000000e+00> : vector<256xf32>
    %162 = vector.multi_reduction <add>, %161, %cst_42 [0] : vector<2x256xf32> to vector<256xf32>
    %163 = vector.shape_cast %162 : vector<256xf32> to vector<1x256xf32>
    %cst_43 = arith.constant 3.200000e+01 : f32
    %164 = vector.broadcast %cst_43 : f32 to vector<1x256xf32>
    %165 = arith.mulf %163, %164 : vector<1x256xf32>
    %166 = arith.maximumf %138, %165 : vector<1x256xf32>
    %167 = arith.subf %138, %166 : vector<1x256xf32>
    %168 = math.exp %167 : vector<1x256xf32>
    %169 = arith.subf %165, %166 : vector<1x256xf32>
    %170 = math.exp %169 : vector<1x256xf32>
    %171 = vector.extract_strided_slice %39 {offsets = [0, 226], sizes = [2, 30], strides = [1, 1]} : vector<2x256xf32> to vector<2x30xf32>
    %172 = vector.extract_strided_slice %39 {offsets = [0, 0], sizes = [2, 226], strides = [1, 1]} : vector<2x256xf32> to vector<2x226xf32>
    %173 = tpu.concatenate %171, %172 in 1 : vector<2x30xf32>, vector<2x226xf32> -> vector<2x256xf32>
    %174 = vector.broadcast %155 : vector<1x256xf32> to vector<2x256xf32>
    %175 = arith.mulf %173, %174 : vector<2x256xf32>
    %176 = arith.mulf %168, %149 : vector<1x256xf32>
    %177 = arith.addf %176, %170 : vector<1x256xf32>
    %178 = vector.broadcast %168 : vector<1x256xf32> to vector<2x256xf32>
    %179 = arith.mulf %178, %154 : vector<2x256xf32>
    %180 = vector.broadcast %170 : vector<1x256xf32> to vector<2x256xf32>
    %181 = arith.mulf %180, %175 : vector<2x256xf32>
    %182 = arith.addf %179, %181 : vector<2x256xf32>
    %c5 = arith.constant 5 : index
    %c0_44 = arith.constant 0 : index
    %183 = vector.load %arg3[%c5, %c0_44] : memref<25x256xf32, #tpu.memory_space<vmem>>, vector<1x256xf32>
    %184 = vector.extract_strided_slice %27 {offsets = [0, 238], sizes = [2, 18], strides = [1, 1]} : vector<2x256xf32> to vector<2x18xf32>
    %185 = vector.extract_strided_slice %27 {offsets = [0, 0], sizes = [2, 238], strides = [1, 1]} : vector<2x256xf32> to vector<2x238xf32>
    %186 = tpu.concatenate %184, %185 in 1 : vector<2x18xf32>, vector<2x238xf32> -> vector<2x256xf32>
    %187 = vector.broadcast %183 : vector<1x256xf32> to vector<2x256xf32>
    %188 = arith.mulf %186, %187 : vector<2x256xf32>
    %189 = arith.mulf %15, %188 : vector<2x256xf32>
    %cst_45 = arith.constant dense<0.000000e+00> : vector<256xf32>
    %190 = vector.multi_reduction <add>, %189, %cst_45 [0] : vector<2x256xf32> to vector<256xf32>
    %191 = vector.shape_cast %190 : vector<256xf32> to vector<1x256xf32>
    %cst_46 = arith.constant 3.200000e+01 : f32
    %192 = vector.broadcast %cst_46 : f32 to vector<1x256xf32>
    %193 = arith.mulf %191, %192 : vector<1x256xf32>
    %194 = arith.maximumf %166, %193 : vector<1x256xf32>
    %195 = arith.subf %166, %194 : vector<1x256xf32>
    %196 = math.exp %195 : vector<1x256xf32>
    %197 = arith.subf %193, %194 : vector<1x256xf32>
    %198 = math.exp %197 : vector<1x256xf32>
    %199 = vector.extract_strided_slice %39 {offsets = [0, 238], sizes = [2, 18], strides = [1, 1]} : vector<2x256xf32> to vector<2x18xf32>
    %200 = vector.extract_strided_slice %39 {offsets = [0, 0], sizes = [2, 238], strides = [1, 1]} : vector<2x256xf32> to vector<2x238xf32>
    %201 = tpu.concatenate %199, %200 in 1 : vector<2x18xf32>, vector<2x238xf32> -> vector<2x256xf32>
    %202 = vector.broadcast %183 : vector<1x256xf32> to vector<2x256xf32>
    %203 = arith.mulf %201, %202 : vector<2x256xf32>
    %204 = arith.mulf %196, %177 : vector<1x256xf32>
    %205 = arith.addf %204, %198 : vector<1x256xf32>
    %206 = vector.broadcast %196 : vector<1x256xf32> to vector<2x256xf32>
    %207 = arith.mulf %206, %182 : vector<2x256xf32>
    %208 = vector.broadcast %198 : vector<1x256xf32> to vector<2x256xf32>
    %209 = arith.mulf %208, %203 : vector<2x256xf32>
    %210 = arith.addf %207, %209 : vector<2x256xf32>
    %c6 = arith.constant 6 : index
    %c0_47 = arith.constant 0 : index
    %211 = vector.load %arg3[%c6, %c0_47] : memref<25x256xf32, #tpu.memory_space<vmem>>, vector<1x256xf32>
    %212 = vector.extract_strided_slice %27 {offsets = [0, 239], sizes = [2, 17], strides = [1, 1]} : vector<2x256xf32> to vector<2x17xf32>
    %213 = vector.extract_strided_slice %27 {offsets = [0, 0], sizes = [2, 239], strides = [1, 1]} : vector<2x256xf32> to vector<2x239xf32>
    %214 = tpu.concatenate %212, %213 in 1 : vector<2x17xf32>, vector<2x239xf32> -> vector<2x256xf32>
    %215 = vector.broadcast %211 : vector<1x256xf32> to vector<2x256xf32>
    %216 = arith.mulf %214, %215 : vector<2x256xf32>
    %217 = arith.mulf %15, %216 : vector<2x256xf32>
    %cst_48 = arith.constant dense<0.000000e+00> : vector<256xf32>
    %218 = vector.multi_reduction <add>, %217, %cst_48 [0] : vector<2x256xf32> to vector<256xf32>
    %219 = vector.shape_cast %218 : vector<256xf32> to vector<1x256xf32>
    %cst_49 = arith.constant 3.200000e+01 : f32
    %220 = vector.broadcast %cst_49 : f32 to vector<1x256xf32>
    %221 = arith.mulf %219, %220 : vector<1x256xf32>
    %222 = arith.maximumf %194, %221 : vector<1x256xf32>
    %223 = arith.subf %194, %222 : vector<1x256xf32>
    %224 = math.exp %223 : vector<1x256xf32>
    %225 = arith.subf %221, %222 : vector<1x256xf32>
    %226 = math.exp %225 : vector<1x256xf32>
    %227 = vector.extract_strided_slice %39 {offsets = [0, 239], sizes = [2, 17], strides = [1, 1]} : vector<2x256xf32> to vector<2x17xf32>
    %228 = vector.extract_strided_slice %39 {offsets = [0, 0], sizes = [2, 239], strides = [1, 1]} : vector<2x256xf32> to vector<2x239xf32>
    %229 = tpu.concatenate %227, %228 in 1 : vector<2x17xf32>, vector<2x239xf32> -> vector<2x256xf32>
    %230 = vector.broadcast %211 : vector<1x256xf32> to vector<2x256xf32>
    %231 = arith.mulf %229, %230 : vector<2x256xf32>
    %232 = arith.mulf %224, %205 : vector<1x256xf32>
    %233 = arith.addf %232, %226 : vector<1x256xf32>
    %234 = vector.broadcast %224 : vector<1x256xf32> to vector<2x256xf32>
    %235 = arith.mulf %234, %210 : vector<2x256xf32>
    %236 = vector.broadcast %226 : vector<1x256xf32> to vector<2x256xf32>
    %237 = arith.mulf %236, %231 : vector<2x256xf32>
    %238 = arith.addf %235, %237 : vector<2x256xf32>
    %c7 = arith.constant 7 : index
    %c0_50 = arith.constant 0 : index
    %239 = vector.load %arg3[%c7, %c0_50] : memref<25x256xf32, #tpu.memory_space<vmem>>, vector<1x256xf32>
    %240 = vector.extract_strided_slice %27 {offsets = [0, 240], sizes = [2, 16], strides = [1, 1]} : vector<2x256xf32> to vector<2x16xf32>
    %241 = vector.extract_strided_slice %27 {offsets = [0, 0], sizes = [2, 240], strides = [1, 1]} : vector<2x256xf32> to vector<2x240xf32>
    %242 = tpu.concatenate %240, %241 in 1 : vector<2x16xf32>, vector<2x240xf32> -> vector<2x256xf32>
    %243 = vector.broadcast %239 : vector<1x256xf32> to vector<2x256xf32>
    %244 = arith.mulf %242, %243 : vector<2x256xf32>
    %245 = arith.mulf %15, %244 : vector<2x256xf32>
    %cst_51 = arith.constant dense<0.000000e+00> : vector<256xf32>
    %246 = vector.multi_reduction <add>, %245, %cst_51 [0] : vector<2x256xf32> to vector<256xf32>
    %247 = vector.shape_cast %246 : vector<256xf32> to vector<1x256xf32>
    %cst_52 = arith.constant 3.200000e+01 : f32
    %248 = vector.broadcast %cst_52 : f32 to vector<1x256xf32>
    %249 = arith.mulf %247, %248 : vector<1x256xf32>
    %250 = arith.maximumf %222, %249 : vector<1x256xf32>
    %251 = arith.subf %222, %250 : vector<1x256xf32>
    %252 = math.exp %251 : vector<1x256xf32>
    %253 = arith.subf %249, %250 : vector<1x256xf32>
    %254 = math.exp %253 : vector<1x256xf32>
    %255 = vector.extract_strided_slice %39 {offsets = [0, 240], sizes = [2, 16], strides = [1, 1]} : vector<2x256xf32> to vector<2x16xf32>
    %256 = vector.extract_strided_slice %39 {offsets = [0, 0], sizes = [2, 240], strides = [1, 1]} : vector<2x256xf32> to vector<2x240xf32>
    %257 = tpu.concatenate %255, %256 in 1 : vector<2x16xf32>, vector<2x240xf32> -> vector<2x256xf32>
    %258 = vector.broadcast %239 : vector<1x256xf32> to vector<2x256xf32>
    %259 = arith.mulf %257, %258 : vector<2x256xf32>
    %260 = arith.mulf %252, %233 : vector<1x256xf32>
    %261 = arith.addf %260, %254 : vector<1x256xf32>
    %262 = vector.broadcast %252 : vector<1x256xf32> to vector<2x256xf32>
    %263 = arith.mulf %262, %238 : vector<2x256xf32>
    %264 = vector.broadcast %254 : vector<1x256xf32> to vector<2x256xf32>
    %265 = arith.mulf %264, %259 : vector<2x256xf32>
    %266 = arith.addf %263, %265 : vector<2x256xf32>
    %c8 = arith.constant 8 : index
    %c0_53 = arith.constant 0 : index
    %267 = vector.load %arg3[%c8, %c0_53] : memref<25x256xf32, #tpu.memory_space<vmem>>, vector<1x256xf32>
    %268 = vector.extract_strided_slice %27 {offsets = [0, 241], sizes = [2, 15], strides = [1, 1]} : vector<2x256xf32> to vector<2x15xf32>
    %269 = vector.extract_strided_slice %27 {offsets = [0, 0], sizes = [2, 241], strides = [1, 1]} : vector<2x256xf32> to vector<2x241xf32>
    %270 = tpu.concatenate %268, %269 in 1 : vector<2x15xf32>, vector<2x241xf32> -> vector<2x256xf32>
    %271 = vector.broadcast %267 : vector<1x256xf32> to vector<2x256xf32>
    %272 = arith.mulf %270, %271 : vector<2x256xf32>
    %273 = arith.mulf %15, %272 : vector<2x256xf32>
    %cst_54 = arith.constant dense<0.000000e+00> : vector<256xf32>
    %274 = vector.multi_reduction <add>, %273, %cst_54 [0] : vector<2x256xf32> to vector<256xf32>
    %275 = vector.shape_cast %274 : vector<256xf32> to vector<1x256xf32>
    %cst_55 = arith.constant 3.200000e+01 : f32
    %276 = vector.broadcast %cst_55 : f32 to vector<1x256xf32>
    %277 = arith.mulf %275, %276 : vector<1x256xf32>
    %278 = arith.maximumf %250, %277 : vector<1x256xf32>
    %279 = arith.subf %250, %278 : vector<1x256xf32>
    %280 = math.exp %279 : vector<1x256xf32>
    %281 = arith.subf %277, %278 : vector<1x256xf32>
    %282 = math.exp %281 : vector<1x256xf32>
    %283 = vector.extract_strided_slice %39 {offsets = [0, 241], sizes = [2, 15], strides = [1, 1]} : vector<2x256xf32> to vector<2x15xf32>
    %284 = vector.extract_strided_slice %39 {offsets = [0, 0], sizes = [2, 241], strides = [1, 1]} : vector<2x256xf32> to vector<2x241xf32>
    %285 = tpu.concatenate %283, %284 in 1 : vector<2x15xf32>, vector<2x241xf32> -> vector<2x256xf32>
    %286 = vector.broadcast %267 : vector<1x256xf32> to vector<2x256xf32>
    %287 = arith.mulf %285, %286 : vector<2x256xf32>
    %288 = arith.mulf %280, %261 : vector<1x256xf32>
    %289 = arith.addf %288, %282 : vector<1x256xf32>
    %290 = vector.broadcast %280 : vector<1x256xf32> to vector<2x256xf32>
    %291 = arith.mulf %290, %266 : vector<2x256xf32>
    %292 = vector.broadcast %282 : vector<1x256xf32> to vector<2x256xf32>
    %293 = arith.mulf %292, %287 : vector<2x256xf32>
    %294 = arith.addf %291, %293 : vector<2x256xf32>
    %c9 = arith.constant 9 : index
    %c0_56 = arith.constant 0 : index
    %295 = vector.load %arg3[%c9, %c0_56] : memref<25x256xf32, #tpu.memory_space<vmem>>, vector<1x256xf32>
    %296 = vector.extract_strided_slice %27 {offsets = [0, 242], sizes = [2, 14], strides = [1, 1]} : vector<2x256xf32> to vector<2x14xf32>
    %297 = vector.extract_strided_slice %27 {offsets = [0, 0], sizes = [2, 242], strides = [1, 1]} : vector<2x256xf32> to vector<2x242xf32>
    %298 = tpu.concatenate %296, %297 in 1 : vector<2x14xf32>, vector<2x242xf32> -> vector<2x256xf32>
    %299 = vector.broadcast %295 : vector<1x256xf32> to vector<2x256xf32>
    %300 = arith.mulf %298, %299 : vector<2x256xf32>
    %301 = arith.mulf %15, %300 : vector<2x256xf32>
    %cst_57 = arith.constant dense<0.000000e+00> : vector<256xf32>
    %302 = vector.multi_reduction <add>, %301, %cst_57 [0] : vector<2x256xf32> to vector<256xf32>
    %303 = vector.shape_cast %302 : vector<256xf32> to vector<1x256xf32>
    %cst_58 = arith.constant 3.200000e+01 : f32
    %304 = vector.broadcast %cst_58 : f32 to vector<1x256xf32>
    %305 = arith.mulf %303, %304 : vector<1x256xf32>
    %306 = arith.maximumf %278, %305 : vector<1x256xf32>
    %307 = arith.subf %278, %306 : vector<1x256xf32>
    %308 = math.exp %307 : vector<1x256xf32>
    %309 = arith.subf %305, %306 : vector<1x256xf32>
    %310 = math.exp %309 : vector<1x256xf32>
    %311 = vector.extract_strided_slice %39 {offsets = [0, 242], sizes = [2, 14], strides = [1, 1]} : vector<2x256xf32> to vector<2x14xf32>
    %312 = vector.extract_strided_slice %39 {offsets = [0, 0], sizes = [2, 242], strides = [1, 1]} : vector<2x256xf32> to vector<2x242xf32>
    %313 = tpu.concatenate %311, %312 in 1 : vector<2x14xf32>, vector<2x242xf32> -> vector<2x256xf32>
    %314 = vector.broadcast %295 : vector<1x256xf32> to vector<2x256xf32>
    %315 = arith.mulf %313, %314 : vector<2x256xf32>
    %316 = arith.mulf %308, %289 : vector<1x256xf32>
    %317 = arith.addf %316, %310 : vector<1x256xf32>
    %318 = vector.broadcast %308 : vector<1x256xf32> to vector<2x256xf32>
    %319 = arith.mulf %318, %294 : vector<2x256xf32>
    %320 = vector.broadcast %310 : vector<1x256xf32> to vector<2x256xf32>
    %321 = arith.mulf %320, %315 : vector<2x256xf32>
    %322 = arith.addf %319, %321 : vector<2x256xf32>
    %c10 = arith.constant 10 : index
    %c0_59 = arith.constant 0 : index
    %323 = vector.load %arg3[%c10, %c0_59] : memref<25x256xf32, #tpu.memory_space<vmem>>, vector<1x256xf32>
    %324 = vector.extract_strided_slice %27 {offsets = [0, 254], sizes = [2, 2], strides = [1, 1]} : vector<2x256xf32> to vector<2x2xf32>
    %325 = vector.extract_strided_slice %27 {offsets = [0, 0], sizes = [2, 254], strides = [1, 1]} : vector<2x256xf32> to vector<2x254xf32>
    %326 = tpu.concatenate %324, %325 in 1 : vector<2x2xf32>, vector<2x254xf32> -> vector<2x256xf32>
    %327 = vector.broadcast %323 : vector<1x256xf32> to vector<2x256xf32>
    %328 = arith.mulf %326, %327 : vector<2x256xf32>
    %329 = arith.mulf %15, %328 : vector<2x256xf32>
    %cst_60 = arith.constant dense<0.000000e+00> : vector<256xf32>
    %330 = vector.multi_reduction <add>, %329, %cst_60 [0] : vector<2x256xf32> to vector<256xf32>
    %331 = vector.shape_cast %330 : vector<256xf32> to vector<1x256xf32>
    %cst_61 = arith.constant 3.200000e+01 : f32
    %332 = vector.broadcast %cst_61 : f32 to vector<1x256xf32>
    %333 = arith.mulf %331, %332 : vector<1x256xf32>
    %334 = arith.maximumf %306, %333 : vector<1x256xf32>
    %335 = arith.subf %306, %334 : vector<1x256xf32>
    %336 = math.exp %335 : vector<1x256xf32>
    %337 = arith.subf %333, %334 : vector<1x256xf32>
    %338 = math.exp %337 : vector<1x256xf32>
    %339 = vector.extract_strided_slice %39 {offsets = [0, 254], sizes = [2, 2], strides = [1, 1]} : vector<2x256xf32> to vector<2x2xf32>
    %340 = vector.extract_strided_slice %39 {offsets = [0, 0], sizes = [2, 254], strides = [1, 1]} : vector<2x256xf32> to vector<2x254xf32>
    %341 = tpu.concatenate %339, %340 in 1 : vector<2x2xf32>, vector<2x254xf32> -> vector<2x256xf32>
    %342 = vector.broadcast %323 : vector<1x256xf32> to vector<2x256xf32>
    %343 = arith.mulf %341, %342 : vector<2x256xf32>
    %344 = arith.mulf %336, %317 : vector<1x256xf32>
    %345 = arith.addf %344, %338 : vector<1x256xf32>
    %346 = vector.broadcast %336 : vector<1x256xf32> to vector<2x256xf32>
    %347 = arith.mulf %346, %322 : vector<2x256xf32>
    %348 = vector.broadcast %338 : vector<1x256xf32> to vector<2x256xf32>
    %349 = arith.mulf %348, %343 : vector<2x256xf32>
    %350 = arith.addf %347, %349 : vector<2x256xf32>
    %c11 = arith.constant 11 : index
    %c0_62 = arith.constant 0 : index
    %351 = vector.load %arg3[%c11, %c0_62] : memref<25x256xf32, #tpu.memory_space<vmem>>, vector<1x256xf32>
    %352 = vector.extract_strided_slice %27 {offsets = [0, 255], sizes = [2, 1], strides = [1, 1]} : vector<2x256xf32> to vector<2x1xf32>
    %353 = vector.extract_strided_slice %27 {offsets = [0, 0], sizes = [2, 255], strides = [1, 1]} : vector<2x256xf32> to vector<2x255xf32>
    %354 = tpu.concatenate %352, %353 in 1 : vector<2x1xf32>, vector<2x255xf32> -> vector<2x256xf32>
    %355 = vector.broadcast %351 : vector<1x256xf32> to vector<2x256xf32>
    %356 = arith.mulf %354, %355 : vector<2x256xf32>
    %357 = arith.mulf %15, %356 : vector<2x256xf32>
    %cst_63 = arith.constant dense<0.000000e+00> : vector<256xf32>
    %358 = vector.multi_reduction <add>, %357, %cst_63 [0] : vector<2x256xf32> to vector<256xf32>
    %359 = vector.shape_cast %358 : vector<256xf32> to vector<1x256xf32>
    %cst_64 = arith.constant 3.200000e+01 : f32
    %360 = vector.broadcast %cst_64 : f32 to vector<1x256xf32>
    %361 = arith.mulf %359, %360 : vector<1x256xf32>
    %362 = arith.maximumf %334, %361 : vector<1x256xf32>
    %363 = arith.subf %334, %362 : vector<1x256xf32>
    %364 = math.exp %363 : vector<1x256xf32>
    %365 = arith.subf %361, %362 : vector<1x256xf32>
    %366 = math.exp %365 : vector<1x256xf32>
    %367 = vector.extract_strided_slice %39 {offsets = [0, 255], sizes = [2, 1], strides = [1, 1]} : vector<2x256xf32> to vector<2x1xf32>
    %368 = vector.extract_strided_slice %39 {offsets = [0, 0], sizes = [2, 255], strides = [1, 1]} : vector<2x256xf32> to vector<2x255xf32>
    %369 = tpu.concatenate %367, %368 in 1 : vector<2x1xf32>, vector<2x255xf32> -> vector<2x256xf32>
    %370 = vector.broadcast %351 : vector<1x256xf32> to vector<2x256xf32>
    %371 = arith.mulf %369, %370 : vector<2x256xf32>
    %372 = arith.mulf %364, %345 : vector<1x256xf32>
    %373 = arith.addf %372, %366 : vector<1x256xf32>
    %374 = vector.broadcast %364 : vector<1x256xf32> to vector<2x256xf32>
    %375 = arith.mulf %374, %350 : vector<2x256xf32>
    %376 = vector.broadcast %366 : vector<1x256xf32> to vector<2x256xf32>
    %377 = arith.mulf %376, %371 : vector<2x256xf32>
    %378 = arith.addf %375, %377 : vector<2x256xf32>
    %379 = arith.mulf %15, %27 : vector<2x256xf32>
    %cst_65 = arith.constant dense<0.000000e+00> : vector<256xf32>
    %380 = vector.multi_reduction <add>, %379, %cst_65 [0] : vector<2x256xf32> to vector<256xf32>
    %381 = vector.shape_cast %380 : vector<256xf32> to vector<1x256xf32>
    %cst_66 = arith.constant 3.200000e+01 : f32
    %382 = vector.broadcast %cst_66 : f32 to vector<1x256xf32>
    %383 = arith.mulf %381, %382 : vector<1x256xf32>
    %384 = arith.maximumf %362, %383 : vector<1x256xf32>
    %385 = arith.subf %362, %384 : vector<1x256xf32>
    %386 = math.exp %385 : vector<1x256xf32>
    %387 = arith.subf %383, %384 : vector<1x256xf32>
    %388 = math.exp %387 : vector<1x256xf32>
    %389 = arith.mulf %386, %373 : vector<1x256xf32>
    %390 = arith.addf %389, %388 : vector<1x256xf32>
    %391 = vector.broadcast %386 : vector<1x256xf32> to vector<2x256xf32>
    %392 = arith.mulf %391, %378 : vector<2x256xf32>
    %393 = vector.broadcast %388 : vector<1x256xf32> to vector<2x256xf32>
    %394 = arith.mulf %393, %39 : vector<2x256xf32>
    %395 = arith.addf %392, %394 : vector<2x256xf32>
    %c13 = arith.constant 13 : index
    %c0_67 = arith.constant 0 : index
    %396 = vector.load %arg3[%c13, %c0_67] : memref<25x256xf32, #tpu.memory_space<vmem>>, vector<1x256xf32>
    %397 = vector.extract_strided_slice %27 {offsets = [0, 1], sizes = [2, 255], strides = [1, 1]} : vector<2x256xf32> to vector<2x255xf32>
    %398 = vector.extract_strided_slice %27 {offsets = [0, 0], sizes = [2, 1], strides = [1, 1]} : vector<2x256xf32> to vector<2x1xf32>
    %399 = tpu.concatenate %397, %398 in 1 : vector<2x255xf32>, vector<2x1xf32> -> vector<2x256xf32>
    %400 = vector.broadcast %396 : vector<1x256xf32> to vector<2x256xf32>
    %401 = arith.mulf %399, %400 : vector<2x256xf32>
    %402 = arith.mulf %15, %401 : vector<2x256xf32>
    %cst_68 = arith.constant dense<0.000000e+00> : vector<256xf32>
    %403 = vector.multi_reduction <add>, %402, %cst_68 [0] : vector<2x256xf32> to vector<256xf32>
    %404 = vector.shape_cast %403 : vector<256xf32> to vector<1x256xf32>
    %cst_69 = arith.constant 3.200000e+01 : f32
    %405 = vector.broadcast %cst_69 : f32 to vector<1x256xf32>
    %406 = arith.mulf %404, %405 : vector<1x256xf32>
    %407 = arith.maximumf %384, %406 : vector<1x256xf32>
    %408 = arith.subf %384, %407 : vector<1x256xf32>
    %409 = math.exp %408 : vector<1x256xf32>
    %410 = arith.subf %406, %407 : vector<1x256xf32>
    %411 = math.exp %410 : vector<1x256xf32>
    %412 = vector.extract_strided_slice %39 {offsets = [0, 1], sizes = [2, 255], strides = [1, 1]} : vector<2x256xf32> to vector<2x255xf32>
    %413 = vector.extract_strided_slice %39 {offsets = [0, 0], sizes = [2, 1], strides = [1, 1]} : vector<2x256xf32> to vector<2x1xf32>
    %414 = tpu.concatenate %412, %413 in 1 : vector<2x255xf32>, vector<2x1xf32> -> vector<2x256xf32>
    %415 = vector.broadcast %396 : vector<1x256xf32> to vector<2x256xf32>
    %416 = arith.mulf %414, %415 : vector<2x256xf32>
    %417 = arith.mulf %409, %390 : vector<1x256xf32>
    %418 = arith.addf %417, %411 : vector<1x256xf32>
    %419 = vector.broadcast %409 : vector<1x256xf32> to vector<2x256xf32>
    %420 = arith.mulf %419, %395 : vector<2x256xf32>
    %421 = vector.broadcast %411 : vector<1x256xf32> to vector<2x256xf32>
    %422 = arith.mulf %421, %416 : vector<2x256xf32>
    %423 = arith.addf %420, %422 : vector<2x256xf32>
    %c14 = arith.constant 14 : index
    %c0_70 = arith.constant 0 : index
    %424 = vector.load %arg3[%c14, %c0_70] : memref<25x256xf32, #tpu.memory_space<vmem>>, vector<1x256xf32>
    %425 = vector.extract_strided_slice %27 {offsets = [0, 2], sizes = [2, 254], strides = [1, 1]} : vector<2x256xf32> to vector<2x254xf32>
    %426 = vector.extract_strided_slice %27 {offsets = [0, 0], sizes = [2, 2], strides = [1, 1]} : vector<2x256xf32> to vector<2x2xf32>
    %427 = tpu.concatenate %425, %426 in 1 : vector<2x254xf32>, vector<2x2xf32> -> vector<2x256xf32>
    %428 = vector.broadcast %424 : vector<1x256xf32> to vector<2x256xf32>
    %429 = arith.mulf %427, %428 : vector<2x256xf32>
    %430 = arith.mulf %15, %429 : vector<2x256xf32>
    %cst_71 = arith.constant dense<0.000000e+00> : vector<256xf32>
    %431 = vector.multi_reduction <add>, %430, %cst_71 [0] : vector<2x256xf32> to vector<256xf32>
    %432 = vector.shape_cast %431 : vector<256xf32> to vector<1x256xf32>
    %cst_72 = arith.constant 3.200000e+01 : f32
    %433 = vector.broadcast %cst_72 : f32 to vector<1x256xf32>
    %434 = arith.mulf %432, %433 : vector<1x256xf32>
    %435 = arith.maximumf %407, %434 : vector<1x256xf32>
    %436 = arith.subf %407, %435 : vector<1x256xf32>
    %437 = math.exp %436 : vector<1x256xf32>
    %438 = arith.subf %434, %435 : vector<1x256xf32>
    %439 = math.exp %438 : vector<1x256xf32>
    %440 = vector.extract_strided_slice %39 {offsets = [0, 2], sizes = [2, 254], strides = [1, 1]} : vector<2x256xf32> to vector<2x254xf32>
    %441 = vector.extract_strided_slice %39 {offsets = [0, 0], sizes = [2, 2], strides = [1, 1]} : vector<2x256xf32> to vector<2x2xf32>
    %442 = tpu.concatenate %440, %441 in 1 : vector<2x254xf32>, vector<2x2xf32> -> vector<2x256xf32>
    %443 = vector.broadcast %424 : vector<1x256xf32> to vector<2x256xf32>
    %444 = arith.mulf %442, %443 : vector<2x256xf32>
    %445 = arith.mulf %437, %418 : vector<1x256xf32>
    %446 = arith.addf %445, %439 : vector<1x256xf32>
    %447 = vector.broadcast %437 : vector<1x256xf32> to vector<2x256xf32>
    %448 = arith.mulf %447, %423 : vector<2x256xf32>
    %449 = vector.broadcast %439 : vector<1x256xf32> to vector<2x256xf32>
    %450 = arith.mulf %449, %444 : vector<2x256xf32>
    %451 = arith.addf %448, %450 : vector<2x256xf32>
    %c15 = arith.constant 15 : index
    %c0_73 = arith.constant 0 : index
    %452 = vector.load %arg3[%c15, %c0_73] : memref<25x256xf32, #tpu.memory_space<vmem>>, vector<1x256xf32>
    %453 = vector.extract_strided_slice %27 {offsets = [0, 14], sizes = [2, 242], strides = [1, 1]} : vector<2x256xf32> to vector<2x242xf32>
    %454 = vector.extract_strided_slice %27 {offsets = [0, 0], sizes = [2, 14], strides = [1, 1]} : vector<2x256xf32> to vector<2x14xf32>
    %455 = tpu.concatenate %453, %454 in 1 : vector<2x242xf32>, vector<2x14xf32> -> vector<2x256xf32>
    %456 = vector.broadcast %452 : vector<1x256xf32> to vector<2x256xf32>
    %457 = arith.mulf %455, %456 : vector<2x256xf32>
    %458 = arith.mulf %15, %457 : vector<2x256xf32>
    %cst_74 = arith.constant dense<0.000000e+00> : vector<256xf32>
    %459 = vector.multi_reduction <add>, %458, %cst_74 [0] : vector<2x256xf32> to vector<256xf32>
    %460 = vector.shape_cast %459 : vector<256xf32> to vector<1x256xf32>
    %cst_75 = arith.constant 3.200000e+01 : f32
    %461 = vector.broadcast %cst_75 : f32 to vector<1x256xf32>
    %462 = arith.mulf %460, %461 : vector<1x256xf32>
    %463 = arith.maximumf %435, %462 : vector<1x256xf32>
    %464 = arith.subf %435, %463 : vector<1x256xf32>
    %465 = math.exp %464 : vector<1x256xf32>
    %466 = arith.subf %462, %463 : vector<1x256xf32>
    %467 = math.exp %466 : vector<1x256xf32>
    %468 = vector.extract_strided_slice %39 {offsets = [0, 14], sizes = [2, 242], strides = [1, 1]} : vector<2x256xf32> to vector<2x242xf32>
    %469 = vector.extract_strided_slice %39 {offsets = [0, 0], sizes = [2, 14], strides = [1, 1]} : vector<2x256xf32> to vector<2x14xf32>
    %470 = tpu.concatenate %468, %469 in 1 : vector<2x242xf32>, vector<2x14xf32> -> vector<2x256xf32>
    %471 = vector.broadcast %452 : vector<1x256xf32> to vector<2x256xf32>
    %472 = arith.mulf %470, %471 : vector<2x256xf32>
    %473 = arith.mulf %465, %446 : vector<1x256xf32>
    %474 = arith.addf %473, %467 : vector<1x256xf32>
    %475 = vector.broadcast %465 : vector<1x256xf32> to vector<2x256xf32>
    %476 = arith.mulf %475, %451 : vector<2x256xf32>
    %477 = vector.broadcast %467 : vector<1x256xf32> to vector<2x256xf32>
    %478 = arith.mulf %477, %472 : vector<2x256xf32>
    %479 = arith.addf %476, %478 : vector<2x256xf32>
    %c16 = arith.constant 16 : index
    %c0_76 = arith.constant 0 : index
    %480 = vector.load %arg3[%c16, %c0_76] : memref<25x256xf32, #tpu.memory_space<vmem>>, vector<1x256xf32>
    %481 = vector.extract_strided_slice %27 {offsets = [0, 15], sizes = [2, 241], strides = [1, 1]} : vector<2x256xf32> to vector<2x241xf32>
    %482 = vector.extract_strided_slice %27 {offsets = [0, 0], sizes = [2, 15], strides = [1, 1]} : vector<2x256xf32> to vector<2x15xf32>
    %483 = tpu.concatenate %481, %482 in 1 : vector<2x241xf32>, vector<2x15xf32> -> vector<2x256xf32>
    %484 = vector.broadcast %480 : vector<1x256xf32> to vector<2x256xf32>
    %485 = arith.mulf %483, %484 : vector<2x256xf32>
    %486 = arith.mulf %15, %485 : vector<2x256xf32>
    %cst_77 = arith.constant dense<0.000000e+00> : vector<256xf32>
    %487 = vector.multi_reduction <add>, %486, %cst_77 [0] : vector<2x256xf32> to vector<256xf32>
    %488 = vector.shape_cast %487 : vector<256xf32> to vector<1x256xf32>
    %cst_78 = arith.constant 3.200000e+01 : f32
    %489 = vector.broadcast %cst_78 : f32 to vector<1x256xf32>
    %490 = arith.mulf %488, %489 : vector<1x256xf32>
    %491 = arith.maximumf %463, %490 : vector<1x256xf32>
    %492 = arith.subf %463, %491 : vector<1x256xf32>
    %493 = math.exp %492 : vector<1x256xf32>
    %494 = arith.subf %490, %491 : vector<1x256xf32>
    %495 = math.exp %494 : vector<1x256xf32>
    %496 = vector.extract_strided_slice %39 {offsets = [0, 15], sizes = [2, 241], strides = [1, 1]} : vector<2x256xf32> to vector<2x241xf32>
    %497 = vector.extract_strided_slice %39 {offsets = [0, 0], sizes = [2, 15], strides = [1, 1]} : vector<2x256xf32> to vector<2x15xf32>
    %498 = tpu.concatenate %496, %497 in 1 : vector<2x241xf32>, vector<2x15xf32> -> vector<2x256xf32>
    %499 = vector.broadcast %480 : vector<1x256xf32> to vector<2x256xf32>
    %500 = arith.mulf %498, %499 : vector<2x256xf32>
    %501 = arith.mulf %493, %474 : vector<1x256xf32>
    %502 = arith.addf %501, %495 : vector<1x256xf32>
    %503 = vector.broadcast %493 : vector<1x256xf32> to vector<2x256xf32>
    %504 = arith.mulf %503, %479 : vector<2x256xf32>
    %505 = vector.broadcast %495 : vector<1x256xf32> to vector<2x256xf32>
    %506 = arith.mulf %505, %500 : vector<2x256xf32>
    %507 = arith.addf %504, %506 : vector<2x256xf32>
    %c17 = arith.constant 17 : index
    %c0_79 = arith.constant 0 : index
    %508 = vector.load %arg3[%c17, %c0_79] : memref<25x256xf32, #tpu.memory_space<vmem>>, vector<1x256xf32>
    %509 = vector.extract_strided_slice %27 {offsets = [0, 16], sizes = [2, 240], strides = [1, 1]} : vector<2x256xf32> to vector<2x240xf32>
    %510 = vector.extract_strided_slice %27 {offsets = [0, 0], sizes = [2, 16], strides = [1, 1]} : vector<2x256xf32> to vector<2x16xf32>
    %511 = tpu.concatenate %509, %510 in 1 : vector<2x240xf32>, vector<2x16xf32> -> vector<2x256xf32>
    %512 = vector.broadcast %508 : vector<1x256xf32> to vector<2x256xf32>
    %513 = arith.mulf %511, %512 : vector<2x256xf32>
    %514 = arith.mulf %15, %513 : vector<2x256xf32>
    %cst_80 = arith.constant dense<0.000000e+00> : vector<256xf32>
    %515 = vector.multi_reduction <add>, %514, %cst_80 [0] : vector<2x256xf32> to vector<256xf32>
    %516 = vector.shape_cast %515 : vector<256xf32> to vector<1x256xf32>
    %cst_81 = arith.constant 3.200000e+01 : f32
    %517 = vector.broadcast %cst_81 : f32 to vector<1x256xf32>
    %518 = arith.mulf %516, %517 : vector<1x256xf32>
    %519 = arith.maximumf %491, %518 : vector<1x256xf32>
    %520 = arith.subf %491, %519 : vector<1x256xf32>
    %521 = math.exp %520 : vector<1x256xf32>
    %522 = arith.subf %518, %519 : vector<1x256xf32>
    %523 = math.exp %522 : vector<1x256xf32>
    %524 = vector.extract_strided_slice %39 {offsets = [0, 16], sizes = [2, 240], strides = [1, 1]} : vector<2x256xf32> to vector<2x240xf32>
    %525 = vector.extract_strided_slice %39 {offsets = [0, 0], sizes = [2, 16], strides = [1, 1]} : vector<2x256xf32> to vector<2x16xf32>
    %526 = tpu.concatenate %524, %525 in 1 : vector<2x240xf32>, vector<2x16xf32> -> vector<2x256xf32>
    %527 = vector.broadcast %508 : vector<1x256xf32> to vector<2x256xf32>
    %528 = arith.mulf %526, %527 : vector<2x256xf32>
    %529 = arith.mulf %521, %502 : vector<1x256xf32>
    %530 = arith.addf %529, %523 : vector<1x256xf32>
    %531 = vector.broadcast %521 : vector<1x256xf32> to vector<2x256xf32>
    %532 = arith.mulf %531, %507 : vector<2x256xf32>
    %533 = vector.broadcast %523 : vector<1x256xf32> to vector<2x256xf32>
    %534 = arith.mulf %533, %528 : vector<2x256xf32>
    %535 = arith.addf %532, %534 : vector<2x256xf32>
    %c18 = arith.constant 18 : index
    %c0_82 = arith.constant 0 : index
    %536 = vector.load %arg3[%c18, %c0_82] : memref<25x256xf32, #tpu.memory_space<vmem>>, vector<1x256xf32>
    %537 = vector.extract_strided_slice %27 {offsets = [0, 17], sizes = [2, 239], strides = [1, 1]} : vector<2x256xf32> to vector<2x239xf32>
    %538 = vector.extract_strided_slice %27 {offsets = [0, 0], sizes = [2, 17], strides = [1, 1]} : vector<2x256xf32> to vector<2x17xf32>
    %539 = tpu.concatenate %537, %538 in 1 : vector<2x239xf32>, vector<2x17xf32> -> vector<2x256xf32>
    %540 = vector.broadcast %536 : vector<1x256xf32> to vector<2x256xf32>
    %541 = arith.mulf %539, %540 : vector<2x256xf32>
    %542 = arith.mulf %15, %541 : vector<2x256xf32>
    %cst_83 = arith.constant dense<0.000000e+00> : vector<256xf32>
    %543 = vector.multi_reduction <add>, %542, %cst_83 [0] : vector<2x256xf32> to vector<256xf32>
    %544 = vector.shape_cast %543 : vector<256xf32> to vector<1x256xf32>
    %cst_84 = arith.constant 3.200000e+01 : f32
    %545 = vector.broadcast %cst_84 : f32 to vector<1x256xf32>
    %546 = arith.mulf %544, %545 : vector<1x256xf32>
    %547 = arith.maximumf %519, %546 : vector<1x256xf32>
    %548 = arith.subf %519, %547 : vector<1x256xf32>
    %549 = math.exp %548 : vector<1x256xf32>
    %550 = arith.subf %546, %547 : vector<1x256xf32>
    %551 = math.exp %550 : vector<1x256xf32>
    %552 = vector.extract_strided_slice %39 {offsets = [0, 17], sizes = [2, 239], strides = [1, 1]} : vector<2x256xf32> to vector<2x239xf32>
    %553 = vector.extract_strided_slice %39 {offsets = [0, 0], sizes = [2, 17], strides = [1, 1]} : vector<2x256xf32> to vector<2x17xf32>
    %554 = tpu.concatenate %552, %553 in 1 : vector<2x239xf32>, vector<2x17xf32> -> vector<2x256xf32>
    %555 = vector.broadcast %536 : vector<1x256xf32> to vector<2x256xf32>
    %556 = arith.mulf %554, %555 : vector<2x256xf32>
    %557 = arith.mulf %549, %530 : vector<1x256xf32>
    %558 = arith.addf %557, %551 : vector<1x256xf32>
    %559 = vector.broadcast %549 : vector<1x256xf32> to vector<2x256xf32>
    %560 = arith.mulf %559, %535 : vector<2x256xf32>
    %561 = vector.broadcast %551 : vector<1x256xf32> to vector<2x256xf32>
    %562 = arith.mulf %561, %556 : vector<2x256xf32>
    %563 = arith.addf %560, %562 : vector<2x256xf32>
    %c19 = arith.constant 19 : index
    %c0_85 = arith.constant 0 : index
    %564 = vector.load %arg3[%c19, %c0_85] : memref<25x256xf32, #tpu.memory_space<vmem>>, vector<1x256xf32>
    %565 = vector.extract_strided_slice %27 {offsets = [0, 18], sizes = [2, 238], strides = [1, 1]} : vector<2x256xf32> to vector<2x238xf32>
    %566 = vector.extract_strided_slice %27 {offsets = [0, 0], sizes = [2, 18], strides = [1, 1]} : vector<2x256xf32> to vector<2x18xf32>
    %567 = tpu.concatenate %565, %566 in 1 : vector<2x238xf32>, vector<2x18xf32> -> vector<2x256xf32>
    %568 = vector.broadcast %564 : vector<1x256xf32> to vector<2x256xf32>
    %569 = arith.mulf %567, %568 : vector<2x256xf32>
    %570 = arith.mulf %15, %569 : vector<2x256xf32>
    %cst_86 = arith.constant dense<0.000000e+00> : vector<256xf32>
    %571 = vector.multi_reduction <add>, %570, %cst_86 [0] : vector<2x256xf32> to vector<256xf32>
    %572 = vector.shape_cast %571 : vector<256xf32> to vector<1x256xf32>
    %cst_87 = arith.constant 3.200000e+01 : f32
    %573 = vector.broadcast %cst_87 : f32 to vector<1x256xf32>
    %574 = arith.mulf %572, %573 : vector<1x256xf32>
    %575 = arith.maximumf %547, %574 : vector<1x256xf32>
    %576 = arith.subf %547, %575 : vector<1x256xf32>
    %577 = math.exp %576 : vector<1x256xf32>
    %578 = arith.subf %574, %575 : vector<1x256xf32>
    %579 = math.exp %578 : vector<1x256xf32>
    %580 = vector.extract_strided_slice %39 {offsets = [0, 18], sizes = [2, 238], strides = [1, 1]} : vector<2x256xf32> to vector<2x238xf32>
    %581 = vector.extract_strided_slice %39 {offsets = [0, 0], sizes = [2, 18], strides = [1, 1]} : vector<2x256xf32> to vector<2x18xf32>
    %582 = tpu.concatenate %580, %581 in 1 : vector<2x238xf32>, vector<2x18xf32> -> vector<2x256xf32>
    %583 = vector.broadcast %564 : vector<1x256xf32> to vector<2x256xf32>
    %584 = arith.mulf %582, %583 : vector<2x256xf32>
    %585 = arith.mulf %577, %558 : vector<1x256xf32>
    %586 = arith.addf %585, %579 : vector<1x256xf32>
    %587 = vector.broadcast %577 : vector<1x256xf32> to vector<2x256xf32>
    %588 = arith.mulf %587, %563 : vector<2x256xf32>
    %589 = vector.broadcast %579 : vector<1x256xf32> to vector<2x256xf32>
    %590 = arith.mulf %589, %584 : vector<2x256xf32>
    %591 = arith.addf %588, %590 : vector<2x256xf32>
    %c20 = arith.constant 20 : index
    %c0_88 = arith.constant 0 : index
    %592 = vector.load %arg3[%c20, %c0_88] : memref<25x256xf32, #tpu.memory_space<vmem>>, vector<1x256xf32>
    %593 = vector.extract_strided_slice %27 {offsets = [0, 30], sizes = [2, 226], strides = [1, 1]} : vector<2x256xf32> to vector<2x226xf32>
    %594 = vector.extract_strided_slice %27 {offsets = [0, 0], sizes = [2, 30], strides = [1, 1]} : vector<2x256xf32> to vector<2x30xf32>
    %595 = tpu.concatenate %593, %594 in 1 : vector<2x226xf32>, vector<2x30xf32> -> vector<2x256xf32>
    %596 = vector.broadcast %592 : vector<1x256xf32> to vector<2x256xf32>
    %597 = arith.mulf %595, %596 : vector<2x256xf32>
    %598 = arith.mulf %15, %597 : vector<2x256xf32>
    %cst_89 = arith.constant dense<0.000000e+00> : vector<256xf32>
    %599 = vector.multi_reduction <add>, %598, %cst_89 [0] : vector<2x256xf32> to vector<256xf32>
    %600 = vector.shape_cast %599 : vector<256xf32> to vector<1x256xf32>
    %cst_90 = arith.constant 3.200000e+01 : f32
    %601 = vector.broadcast %cst_90 : f32 to vector<1x256xf32>
    %602 = arith.mulf %600, %601 : vector<1x256xf32>
    %603 = arith.maximumf %575, %602 : vector<1x256xf32>
    %604 = arith.subf %575, %603 : vector<1x256xf32>
    %605 = math.exp %604 : vector<1x256xf32>
    %606 = arith.subf %602, %603 : vector<1x256xf32>
    %607 = math.exp %606 : vector<1x256xf32>
    %608 = vector.extract_strided_slice %39 {offsets = [0, 30], sizes = [2, 226], strides = [1, 1]} : vector<2x256xf32> to vector<2x226xf32>
    %609 = vector.extract_strided_slice %39 {offsets = [0, 0], sizes = [2, 30], strides = [1, 1]} : vector<2x256xf32> to vector<2x30xf32>
    %610 = tpu.concatenate %608, %609 in 1 : vector<2x226xf32>, vector<2x30xf32> -> vector<2x256xf32>
    %611 = vector.broadcast %592 : vector<1x256xf32> to vector<2x256xf32>
    %612 = arith.mulf %610, %611 : vector<2x256xf32>
    %613 = arith.mulf %605, %586 : vector<1x256xf32>
    %614 = arith.addf %613, %607 : vector<1x256xf32>
    %615 = vector.broadcast %605 : vector<1x256xf32> to vector<2x256xf32>
    %616 = arith.mulf %615, %591 : vector<2x256xf32>
    %617 = vector.broadcast %607 : vector<1x256xf32> to vector<2x256xf32>
    %618 = arith.mulf %617, %612 : vector<2x256xf32>
    %619 = arith.addf %616, %618 : vector<2x256xf32>
    %c21 = arith.constant 21 : index
    %c0_91 = arith.constant 0 : index
    %620 = vector.load %arg3[%c21, %c0_91] : memref<25x256xf32, #tpu.memory_space<vmem>>, vector<1x256xf32>
    %621 = vector.extract_strided_slice %27 {offsets = [0, 31], sizes = [2, 225], strides = [1, 1]} : vector<2x256xf32> to vector<2x225xf32>
    %622 = vector.extract_strided_slice %27 {offsets = [0, 0], sizes = [2, 31], strides = [1, 1]} : vector<2x256xf32> to vector<2x31xf32>
    %623 = tpu.concatenate %621, %622 in 1 : vector<2x225xf32>, vector<2x31xf32> -> vector<2x256xf32>
    %624 = vector.broadcast %620 : vector<1x256xf32> to vector<2x256xf32>
    %625 = arith.mulf %623, %624 : vector<2x256xf32>
    %626 = arith.mulf %15, %625 : vector<2x256xf32>
    %cst_92 = arith.constant dense<0.000000e+00> : vector<256xf32>
    %627 = vector.multi_reduction <add>, %626, %cst_92 [0] : vector<2x256xf32> to vector<256xf32>
    %628 = vector.shape_cast %627 : vector<256xf32> to vector<1x256xf32>
    %cst_93 = arith.constant 3.200000e+01 : f32
    %629 = vector.broadcast %cst_93 : f32 to vector<1x256xf32>
    %630 = arith.mulf %628, %629 : vector<1x256xf32>
    %631 = arith.maximumf %603, %630 : vector<1x256xf32>
    %632 = arith.subf %603, %631 : vector<1x256xf32>
    %633 = math.exp %632 : vector<1x256xf32>
    %634 = arith.subf %630, %631 : vector<1x256xf32>
    %635 = math.exp %634 : vector<1x256xf32>
    %636 = vector.extract_strided_slice %39 {offsets = [0, 31], sizes = [2, 225], strides = [1, 1]} : vector<2x256xf32> to vector<2x225xf32>
    %637 = vector.extract_strided_slice %39 {offsets = [0, 0], sizes = [2, 31], strides = [1, 1]} : vector<2x256xf32> to vector<2x31xf32>
    %638 = tpu.concatenate %636, %637 in 1 : vector<2x225xf32>, vector<2x31xf32> -> vector<2x256xf32>
    %639 = vector.broadcast %620 : vector<1x256xf32> to vector<2x256xf32>
    %640 = arith.mulf %638, %639 : vector<2x256xf32>
    %641 = arith.mulf %633, %614 : vector<1x256xf32>
    %642 = arith.addf %641, %635 : vector<1x256xf32>
    %643 = vector.broadcast %633 : vector<1x256xf32> to vector<2x256xf32>
    %644 = arith.mulf %643, %619 : vector<2x256xf32>
    %645 = vector.broadcast %635 : vector<1x256xf32> to vector<2x256xf32>
    %646 = arith.mulf %645, %640 : vector<2x256xf32>
    %647 = arith.addf %644, %646 : vector<2x256xf32>
    %c22 = arith.constant 22 : index
    %c0_94 = arith.constant 0 : index
    %648 = vector.load %arg3[%c22, %c0_94] : memref<25x256xf32, #tpu.memory_space<vmem>>, vector<1x256xf32>
    %649 = vector.extract_strided_slice %27 {offsets = [0, 32], sizes = [2, 224], strides = [1, 1]} : vector<2x256xf32> to vector<2x224xf32>
    %650 = vector.extract_strided_slice %27 {offsets = [0, 0], sizes = [2, 32], strides = [1, 1]} : vector<2x256xf32> to vector<2x32xf32>
    %651 = tpu.concatenate %649, %650 in 1 : vector<2x224xf32>, vector<2x32xf32> -> vector<2x256xf32>
    %652 = vector.broadcast %648 : vector<1x256xf32> to vector<2x256xf32>
    %653 = arith.mulf %651, %652 : vector<2x256xf32>
    %654 = arith.mulf %15, %653 : vector<2x256xf32>
    %cst_95 = arith.constant dense<0.000000e+00> : vector<256xf32>
    %655 = vector.multi_reduction <add>, %654, %cst_95 [0] : vector<2x256xf32> to vector<256xf32>
    %656 = vector.shape_cast %655 : vector<256xf32> to vector<1x256xf32>
    %cst_96 = arith.constant 3.200000e+01 : f32
    %657 = vector.broadcast %cst_96 : f32 to vector<1x256xf32>
    %658 = arith.mulf %656, %657 : vector<1x256xf32>
    %659 = arith.maximumf %631, %658 : vector<1x256xf32>
    %660 = arith.subf %631, %659 : vector<1x256xf32>
    %661 = math.exp %660 : vector<1x256xf32>
    %662 = arith.subf %658, %659 : vector<1x256xf32>
    %663 = math.exp %662 : vector<1x256xf32>
    %664 = vector.extract_strided_slice %39 {offsets = [0, 32], sizes = [2, 224], strides = [1, 1]} : vector<2x256xf32> to vector<2x224xf32>
    %665 = vector.extract_strided_slice %39 {offsets = [0, 0], sizes = [2, 32], strides = [1, 1]} : vector<2x256xf32> to vector<2x32xf32>
    %666 = tpu.concatenate %664, %665 in 1 : vector<2x224xf32>, vector<2x32xf32> -> vector<2x256xf32>
    %667 = vector.broadcast %648 : vector<1x256xf32> to vector<2x256xf32>
    %668 = arith.mulf %666, %667 : vector<2x256xf32>
    %669 = arith.mulf %661, %642 : vector<1x256xf32>
    %670 = arith.addf %669, %663 : vector<1x256xf32>
    %671 = vector.broadcast %661 : vector<1x256xf32> to vector<2x256xf32>
    %672 = arith.mulf %671, %647 : vector<2x256xf32>
    %673 = vector.broadcast %663 : vector<1x256xf32> to vector<2x256xf32>
    %674 = arith.mulf %673, %668 : vector<2x256xf32>
    %675 = arith.addf %672, %674 : vector<2x256xf32>
    %c23 = arith.constant 23 : index
    %c0_97 = arith.constant 0 : index
    %676 = vector.load %arg3[%c23, %c0_97] : memref<25x256xf32, #tpu.memory_space<vmem>>, vector<1x256xf32>
    %677 = vector.extract_strided_slice %27 {offsets = [0, 33], sizes = [2, 223], strides = [1, 1]} : vector<2x256xf32> to vector<2x223xf32>
    %678 = vector.extract_strided_slice %27 {offsets = [0, 0], sizes = [2, 33], strides = [1, 1]} : vector<2x256xf32> to vector<2x33xf32>
    %679 = tpu.concatenate %677, %678 in 1 : vector<2x223xf32>, vector<2x33xf32> -> vector<2x256xf32>
    %680 = vector.broadcast %676 : vector<1x256xf32> to vector<2x256xf32>
    %681 = arith.mulf %679, %680 : vector<2x256xf32>
    %682 = arith.mulf %15, %681 : vector<2x256xf32>
    %cst_98 = arith.constant dense<0.000000e+00> : vector<256xf32>
    %683 = vector.multi_reduction <add>, %682, %cst_98 [0] : vector<2x256xf32> to vector<256xf32>
    %684 = vector.shape_cast %683 : vector<256xf32> to vector<1x256xf32>
    %cst_99 = arith.constant 3.200000e+01 : f32
    %685 = vector.broadcast %cst_99 : f32 to vector<1x256xf32>
    %686 = arith.mulf %684, %685 : vector<1x256xf32>
    %687 = arith.maximumf %659, %686 : vector<1x256xf32>
    %688 = arith.subf %659, %687 : vector<1x256xf32>
    %689 = math.exp %688 : vector<1x256xf32>
    %690 = arith.subf %686, %687 : vector<1x256xf32>
    %691 = math.exp %690 : vector<1x256xf32>
    %692 = vector.extract_strided_slice %39 {offsets = [0, 33], sizes = [2, 223], strides = [1, 1]} : vector<2x256xf32> to vector<2x223xf32>
    %693 = vector.extract_strided_slice %39 {offsets = [0, 0], sizes = [2, 33], strides = [1, 1]} : vector<2x256xf32> to vector<2x33xf32>
    %694 = tpu.concatenate %692, %693 in 1 : vector<2x223xf32>, vector<2x33xf32> -> vector<2x256xf32>
    %695 = vector.broadcast %676 : vector<1x256xf32> to vector<2x256xf32>
    %696 = arith.mulf %694, %695 : vector<2x256xf32>
    %697 = arith.mulf %689, %670 : vector<1x256xf32>
    %698 = arith.addf %697, %691 : vector<1x256xf32>
    %699 = vector.broadcast %689 : vector<1x256xf32> to vector<2x256xf32>
    %700 = arith.mulf %699, %675 : vector<2x256xf32>
    %701 = vector.broadcast %691 : vector<1x256xf32> to vector<2x256xf32>
    %702 = arith.mulf %701, %696 : vector<2x256xf32>
    %703 = arith.addf %700, %702 : vector<2x256xf32>
    %c24 = arith.constant 24 : index
    %c0_100 = arith.constant 0 : index
    %704 = vector.load %arg3[%c24, %c0_100] : memref<25x256xf32, #tpu.memory_space<vmem>>, vector<1x256xf32>
    %705 = vector.extract_strided_slice %27 {offsets = [0, 34], sizes = [2, 222], strides = [1, 1]} : vector<2x256xf32> to vector<2x222xf32>
    %706 = vector.extract_strided_slice %27 {offsets = [0, 0], sizes = [2, 34], strides = [1, 1]} : vector<2x256xf32> to vector<2x34xf32>
    %707 = tpu.concatenate %705, %706 in 1 : vector<2x222xf32>, vector<2x34xf32> -> vector<2x256xf32>
    %708 = vector.broadcast %704 : vector<1x256xf32> to vector<2x256xf32>
    %709 = arith.mulf %707, %708 : vector<2x256xf32>
    %710 = arith.mulf %15, %709 : vector<2x256xf32>
    %cst_101 = arith.constant dense<0.000000e+00> : vector<256xf32>
    %711 = vector.multi_reduction <add>, %710, %cst_101 [0] : vector<2x256xf32> to vector<256xf32>
    %712 = vector.shape_cast %711 : vector<256xf32> to vector<1x256xf32>
    %cst_102 = arith.constant 3.200000e+01 : f32
    %713 = vector.broadcast %cst_102 : f32 to vector<1x256xf32>
    %714 = arith.mulf %712, %713 : vector<1x256xf32>
    %715 = arith.maximumf %687, %714 : vector<1x256xf32>
    %716 = arith.subf %687, %715 : vector<1x256xf32>
    %717 = math.exp %716 : vector<1x256xf32>
    %718 = arith.subf %714, %715 : vector<1x256xf32>
    %719 = math.exp %718 : vector<1x256xf32>
    %720 = vector.extract_strided_slice %39 {offsets = [0, 34], sizes = [2, 222], strides = [1, 1]} : vector<2x256xf32> to vector<2x222xf32>
    %721 = vector.extract_strided_slice %39 {offsets = [0, 0], sizes = [2, 34], strides = [1, 1]} : vector<2x256xf32> to vector<2x34xf32>
    %722 = tpu.concatenate %720, %721 in 1 : vector<2x222xf32>, vector<2x34xf32> -> vector<2x256xf32>
    %723 = vector.broadcast %704 : vector<1x256xf32> to vector<2x256xf32>
    %724 = arith.mulf %722, %723 : vector<2x256xf32>
    %725 = arith.mulf %717, %698 : vector<1x256xf32>
    %726 = arith.addf %725, %719 : vector<1x256xf32>
    %727 = vector.broadcast %717 : vector<1x256xf32> to vector<2x256xf32>
    %728 = arith.mulf %727, %703 : vector<2x256xf32>
    %729 = vector.broadcast %719 : vector<1x256xf32> to vector<2x256xf32>
    %730 = arith.mulf %729, %724 : vector<2x256xf32>
    %731 = arith.addf %728, %730 : vector<2x256xf32>
    %cst_103 = arith.constant 1.000000e+00 : f32
    %732 = vector.broadcast %cst_103 : f32 to vector<1x256xf32>
    %733 = arith.divf %732, %726 : vector<1x256xf32>
    %734 = vector.broadcast %733 : vector<1x256xf32> to vector<2x256xf32>
    %735 = arith.mulf %731, %734 : vector<2x256xf32>
    %c0_104 = arith.constant 0 : index
    %c0_105 = arith.constant 0 : index
    %736 = vector.load %arg7[%c0_104, %c0_105] : memref<4x2xf32, #tpu.memory_space<vmem>>, vector<4x2xf32>
    %c0_106 = arith.constant 0 : index
    %c0_107 = arith.constant 0 : index
    %737 = vector.load %arg8[%c0_106, %c0_107] : memref<4x1xf32, #tpu.memory_space<vmem>>, vector<4x1xf32>
    %738 = vector.shape_cast %736 : vector<4x2xf32> to vector<4x2x1xf32>
    %739 = vector.shape_cast %735 : vector<2x256xf32> to vector<1x2x256xf32>
    %740 = vector.broadcast %738 : vector<4x2x1xf32> to vector<4x2x256xf32>
    %741 = vector.broadcast %739 : vector<1x2x256xf32> to vector<4x2x256xf32>
    %742 = arith.mulf %740, %741 : vector<4x2x256xf32>
    %cst_108 = arith.constant dense<0.000000e+00> : vector<4x256xf32>
    %743 = vector.multi_reduction <add>, %742, %cst_108 [1] : vector<4x2x256xf32> to vector<4x256xf32>
    %744 = vector.broadcast %737 : vector<4x1xf32> to vector<4x256xf32>
    %745 = arith.addf %743, %744 : vector<4x256xf32>
    %746 = tpu.concatenate %1, %745 in 0 : vector<4x256xf32>, vector<4x256xf32> -> vector<8x256xf32>
    %c0_109 = arith.constant 0 : index
    %c0_110 = arith.constant 0 : index
    %747 = vector.load %arg9[%c0_109, %c0_110] : memref<256x8xf32, #tpu.memory_space<vmem>>, vector<256x8xf32>
    %cst_111 = arith.constant dense<0.000000e+00> : vector<256x256xf32>
    %748 = tpu.matmul %747, %746, %cst_111 {dimension_numbers = #tpu.dot_dimension_numbers<[1], [0], [0], [1], [0, 0, 1, 1], [], []>} : vector<256x8xf32>, vector<8x256xf32>, vector<256x256xf32> -> vector<256x256xf32>
    %c0_112 = arith.constant 0 : index
    %c0_113 = arith.constant 0 : index
    %749 = vector.load %arg10[%c0_112, %c0_113] : memref<256x1xf32, #tpu.memory_space<vmem>>, vector<256x1xf32>
    %750 = vector.broadcast %749 : vector<256x1xf32> to vector<256x256xf32>
    %751 = arith.addf %748, %750 : vector<256x256xf32>
    %cst_114 = arith.constant 0.000000e+00 : f32
    %752 = vector.broadcast %cst_114 : f32 to vector<256x256xf32>
    %753 = arith.maximumf %751, %752 : vector<256x256xf32>
    %754 = arith.truncf %753 : vector<256x256xf32> to vector<256x256xbf16>
    %cst_115 = arith.constant 0.000000e+00 : f32
    %755 = vector.broadcast %cst_115 : f32 to vector<16x256xf32>
    %c0_116 = arith.constant 0 : index
    %c0_117 = arith.constant 0 : index
    %756 = vector.load %arg4[%c0_116, %c0_117] : memref<9x256xf32, #tpu.memory_space<vmem>>, vector<1x256xf32>
    %757 = vector.extract_strided_slice %754 {offsets = [0, 239], sizes = [256, 17], strides = [1, 1]} : vector<256x256xbf16> to vector<256x17xbf16>
    %758 = vector.extract_strided_slice %754 {offsets = [0, 0], sizes = [256, 239], strides = [1, 1]} : vector<256x256xbf16> to vector<256x239xbf16>
    %759 = tpu.concatenate %757, %758 in 1 : vector<256x17xbf16>, vector<256x239xbf16> -> vector<256x256xbf16>
    %cst_118 = arith.constant 0.000000e+00 : f32
    %760 = vector.broadcast %cst_118 : f32 to vector<1x256xf32>
    %761 = arith.cmpf one, %756, %760 : vector<1x256xf32>
    %c0_i32 = arith.constant 0 : i32
    %762 = arith.sitofp %c0_i32 : i32 to bf16
    %763 = vector.shape_cast %761 : vector<1x256xi1> to vector<1x256xi1>
    %764 = vector.broadcast %763 : vector<1x256xi1> to vector<256x256xi1>
    %765 = vector.broadcast %762 : bf16 to vector<256x256xbf16>
    %766 = arith.select %764, %759, %765 : vector<256x256xi1>, vector<256x256xbf16>
    %c0_119 = arith.constant 0 : index
    %c0_120 = arith.constant 0 : index
    %c0_121 = arith.constant 0 : index
    %767 = vector.load %arg11[%c0_119, %c0_120, %c0_121] : memref<9x16x256xf32, #tpu.memory_space<vmem>>, vector<1x16x256xf32>
    %768 = vector.shape_cast %767 : vector<1x16x256xf32> to vector<16x256xf32>
    %769 = arith.truncf %768 : vector<16x256xf32> to vector<16x256xbf16>
    %cst_122 = arith.constant dense<0.000000e+00> : vector<16x256xf32>
    %770 = tpu.matmul %769, %766, %cst_122 {dimension_numbers = #tpu.dot_dimension_numbers<[1], [0], [0], [1], [0, 0, 1, 1], [], []>} : vector<16x256xbf16>, vector<256x256xbf16>, vector<16x256xf32> -> vector<16x256xf32>
    %771 = arith.addf %755, %770 : vector<16x256xf32>
    %c1_123 = arith.constant 1 : index
    %c0_124 = arith.constant 0 : index
    %772 = vector.load %arg4[%c1_123, %c0_124] : memref<9x256xf32, #tpu.memory_space<vmem>>, vector<1x256xf32>
    %773 = vector.extract_strided_slice %754 {offsets = [0, 240], sizes = [256, 16], strides = [1, 1]} : vector<256x256xbf16> to vector<256x16xbf16>
    %774 = vector.extract_strided_slice %754 {offsets = [0, 0], sizes = [256, 240], strides = [1, 1]} : vector<256x256xbf16> to vector<256x240xbf16>
    %775 = tpu.concatenate %773, %774 in 1 : vector<256x16xbf16>, vector<256x240xbf16> -> vector<256x256xbf16>
    %cst_125 = arith.constant 0.000000e+00 : f32
    %776 = vector.broadcast %cst_125 : f32 to vector<1x256xf32>
    %777 = arith.cmpf one, %772, %776 : vector<1x256xf32>
    %c0_i32_126 = arith.constant 0 : i32
    %778 = arith.sitofp %c0_i32_126 : i32 to bf16
    %779 = vector.shape_cast %777 : vector<1x256xi1> to vector<1x256xi1>
    %780 = vector.broadcast %779 : vector<1x256xi1> to vector<256x256xi1>
    %781 = vector.broadcast %778 : bf16 to vector<256x256xbf16>
    %782 = arith.select %780, %775, %781 : vector<256x256xi1>, vector<256x256xbf16>
    %c1_127 = arith.constant 1 : index
    %c0_128 = arith.constant 0 : index
    %c0_129 = arith.constant 0 : index
    %783 = vector.load %arg11[%c1_127, %c0_128, %c0_129] : memref<9x16x256xf32, #tpu.memory_space<vmem>>, vector<1x16x256xf32>
    %784 = vector.shape_cast %783 : vector<1x16x256xf32> to vector<16x256xf32>
    %785 = arith.truncf %784 : vector<16x256xf32> to vector<16x256xbf16>
    %cst_130 = arith.constant dense<0.000000e+00> : vector<16x256xf32>
    %786 = tpu.matmul %785, %782, %cst_130 {dimension_numbers = #tpu.dot_dimension_numbers<[1], [0], [0], [1], [0, 0, 1, 1], [], []>} : vector<16x256xbf16>, vector<256x256xbf16>, vector<16x256xf32> -> vector<16x256xf32>
    %787 = arith.addf %771, %786 : vector<16x256xf32>
    %c2_131 = arith.constant 2 : index
    %c0_132 = arith.constant 0 : index
    %788 = vector.load %arg4[%c2_131, %c0_132] : memref<9x256xf32, #tpu.memory_space<vmem>>, vector<1x256xf32>
    %789 = vector.extract_strided_slice %754 {offsets = [0, 241], sizes = [256, 15], strides = [1, 1]} : vector<256x256xbf16> to vector<256x15xbf16>
    %790 = vector.extract_strided_slice %754 {offsets = [0, 0], sizes = [256, 241], strides = [1, 1]} : vector<256x256xbf16> to vector<256x241xbf16>
    %791 = tpu.concatenate %789, %790 in 1 : vector<256x15xbf16>, vector<256x241xbf16> -> vector<256x256xbf16>
    %cst_133 = arith.constant 0.000000e+00 : f32
    %792 = vector.broadcast %cst_133 : f32 to vector<1x256xf32>
    %793 = arith.cmpf one, %788, %792 : vector<1x256xf32>
    %c0_i32_134 = arith.constant 0 : i32
    %794 = arith.sitofp %c0_i32_134 : i32 to bf16
    %795 = vector.shape_cast %793 : vector<1x256xi1> to vector<1x256xi1>
    %796 = vector.broadcast %795 : vector<1x256xi1> to vector<256x256xi1>
    %797 = vector.broadcast %794 : bf16 to vector<256x256xbf16>
    %798 = arith.select %796, %791, %797 : vector<256x256xi1>, vector<256x256xbf16>
    %c2_135 = arith.constant 2 : index
    %c0_136 = arith.constant 0 : index
    %c0_137 = arith.constant 0 : index
    %799 = vector.load %arg11[%c2_135, %c0_136, %c0_137] : memref<9x16x256xf32, #tpu.memory_space<vmem>>, vector<1x16x256xf32>
    %800 = vector.shape_cast %799 : vector<1x16x256xf32> to vector<16x256xf32>
    %801 = arith.truncf %800 : vector<16x256xf32> to vector<16x256xbf16>
    %cst_138 = arith.constant dense<0.000000e+00> : vector<16x256xf32>
    %802 = tpu.matmul %801, %798, %cst_138 {dimension_numbers = #tpu.dot_dimension_numbers<[1], [0], [0], [1], [0, 0, 1, 1], [], []>} : vector<16x256xbf16>, vector<256x256xbf16>, vector<16x256xf32> -> vector<16x256xf32>
    %803 = arith.addf %787, %802 : vector<16x256xf32>
    %c3_139 = arith.constant 3 : index
    %c0_140 = arith.constant 0 : index
    %804 = vector.load %arg4[%c3_139, %c0_140] : memref<9x256xf32, #tpu.memory_space<vmem>>, vector<1x256xf32>
    %805 = vector.extract_strided_slice %754 {offsets = [0, 255], sizes = [256, 1], strides = [1, 1]} : vector<256x256xbf16> to vector<256x1xbf16>
    %806 = vector.extract_strided_slice %754 {offsets = [0, 0], sizes = [256, 255], strides = [1, 1]} : vector<256x256xbf16> to vector<256x255xbf16>
    %807 = tpu.concatenate %805, %806 in 1 : vector<256x1xbf16>, vector<256x255xbf16> -> vector<256x256xbf16>
    %cst_141 = arith.constant 0.000000e+00 : f32
    %808 = vector.broadcast %cst_141 : f32 to vector<1x256xf32>
    %809 = arith.cmpf one, %804, %808 : vector<1x256xf32>
    %c0_i32_142 = arith.constant 0 : i32
    %810 = arith.sitofp %c0_i32_142 : i32 to bf16
    %811 = vector.shape_cast %809 : vector<1x256xi1> to vector<1x256xi1>
    %812 = vector.broadcast %811 : vector<1x256xi1> to vector<256x256xi1>
    %813 = vector.broadcast %810 : bf16 to vector<256x256xbf16>
    %814 = arith.select %812, %807, %813 : vector<256x256xi1>, vector<256x256xbf16>
    %c3_143 = arith.constant 3 : index
    %c0_144 = arith.constant 0 : index
    %c0_145 = arith.constant 0 : index
    %815 = vector.load %arg11[%c3_143, %c0_144, %c0_145] : memref<9x16x256xf32, #tpu.memory_space<vmem>>, vector<1x16x256xf32>
    %816 = vector.shape_cast %815 : vector<1x16x256xf32> to vector<16x256xf32>
    %817 = arith.truncf %816 : vector<16x256xf32> to vector<16x256xbf16>
    %cst_146 = arith.constant dense<0.000000e+00> : vector<16x256xf32>
    %818 = tpu.matmul %817, %814, %cst_146 {dimension_numbers = #tpu.dot_dimension_numbers<[1], [0], [0], [1], [0, 0, 1, 1], [], []>} : vector<16x256xbf16>, vector<256x256xbf16>, vector<16x256xf32> -> vector<16x256xf32>
    %819 = arith.addf %803, %818 : vector<16x256xf32>
    %c4_147 = arith.constant 4 : index
    %c0_148 = arith.constant 0 : index
    %c0_149 = arith.constant 0 : index
    %820 = vector.load %arg11[%c4_147, %c0_148, %c0_149] : memref<9x16x256xf32, #tpu.memory_space<vmem>>, vector<1x16x256xf32>
    %821 = vector.shape_cast %820 : vector<1x16x256xf32> to vector<16x256xf32>
    %822 = arith.truncf %821 : vector<16x256xf32> to vector<16x256xbf16>
    %cst_150 = arith.constant dense<0.000000e+00> : vector<16x256xf32>
    %823 = tpu.matmul %822, %754, %cst_150 {dimension_numbers = #tpu.dot_dimension_numbers<[1], [0], [0], [1], [0, 0, 1, 1], [], []>} : vector<16x256xbf16>, vector<256x256xbf16>, vector<16x256xf32> -> vector<16x256xf32>
    %824 = arith.addf %819, %823 : vector<16x256xf32>
    %c5_151 = arith.constant 5 : index
    %c0_152 = arith.constant 0 : index
    %825 = vector.load %arg4[%c5_151, %c0_152] : memref<9x256xf32, #tpu.memory_space<vmem>>, vector<1x256xf32>
    %826 = vector.extract_strided_slice %754 {offsets = [0, 1], sizes = [256, 255], strides = [1, 1]} : vector<256x256xbf16> to vector<256x255xbf16>
    %827 = vector.extract_strided_slice %754 {offsets = [0, 0], sizes = [256, 1], strides = [1, 1]} : vector<256x256xbf16> to vector<256x1xbf16>
    %828 = tpu.concatenate %826, %827 in 1 : vector<256x255xbf16>, vector<256x1xbf16> -> vector<256x256xbf16>
    %cst_153 = arith.constant 0.000000e+00 : f32
    %829 = vector.broadcast %cst_153 : f32 to vector<1x256xf32>
    %830 = arith.cmpf one, %825, %829 : vector<1x256xf32>
    %c0_i32_154 = arith.constant 0 : i32
    %831 = arith.sitofp %c0_i32_154 : i32 to bf16
    %832 = vector.shape_cast %830 : vector<1x256xi1> to vector<1x256xi1>
    %833 = vector.broadcast %832 : vector<1x256xi1> to vector<256x256xi1>
    %834 = vector.broadcast %831 : bf16 to vector<256x256xbf16>
    %835 = arith.select %833, %828, %834 : vector<256x256xi1>, vector<256x256xbf16>
    %c5_155 = arith.constant 5 : index
    %c0_156 = arith.constant 0 : index
    %c0_157 = arith.constant 0 : index
    %836 = vector.load %arg11[%c5_155, %c0_156, %c0_157] : memref<9x16x256xf32, #tpu.memory_space<vmem>>, vector<1x16x256xf32>
    %837 = vector.shape_cast %836 : vector<1x16x256xf32> to vector<16x256xf32>
    %838 = arith.truncf %837 : vector<16x256xf32> to vector<16x256xbf16>
    %cst_158 = arith.constant dense<0.000000e+00> : vector<16x256xf32>
    %839 = tpu.matmul %838, %835, %cst_158 {dimension_numbers = #tpu.dot_dimension_numbers<[1], [0], [0], [1], [0, 0, 1, 1], [], []>} : vector<16x256xbf16>, vector<256x256xbf16>, vector<16x256xf32> -> vector<16x256xf32>
    %840 = arith.addf %824, %839 : vector<16x256xf32>
    %c6_159 = arith.constant 6 : index
    %c0_160 = arith.constant 0 : index
    %841 = vector.load %arg4[%c6_159, %c0_160] : memref<9x256xf32, #tpu.memory_space<vmem>>, vector<1x256xf32>
    %842 = vector.extract_strided_slice %754 {offsets = [0, 15], sizes = [256, 241], strides = [1, 1]} : vector<256x256xbf16> to vector<256x241xbf16>
    %843 = vector.extract_strided_slice %754 {offsets = [0, 0], sizes = [256, 15], strides = [1, 1]} : vector<256x256xbf16> to vector<256x15xbf16>
    %844 = tpu.concatenate %842, %843 in 1 : vector<256x241xbf16>, vector<256x15xbf16> -> vector<256x256xbf16>
    %cst_161 = arith.constant 0.000000e+00 : f32
    %845 = vector.broadcast %cst_161 : f32 to vector<1x256xf32>
    %846 = arith.cmpf one, %841, %845 : vector<1x256xf32>
    %c0_i32_162 = arith.constant 0 : i32
    %847 = arith.sitofp %c0_i32_162 : i32 to bf16
    %848 = vector.shape_cast %846 : vector<1x256xi1> to vector<1x256xi1>
    %849 = vector.broadcast %848 : vector<1x256xi1> to vector<256x256xi1>
    %850 = vector.broadcast %847 : bf16 to vector<256x256xbf16>
    %851 = arith.select %849, %844, %850 : vector<256x256xi1>, vector<256x256xbf16>
    %c6_163 = arith.constant 6 : index
    %c0_164 = arith.constant 0 : index
    %c0_165 = arith.constant 0 : index
    %852 = vector.load %arg11[%c6_163, %c0_164, %c0_165] : memref<9x16x256xf32, #tpu.memory_space<vmem>>, vector<1x16x256xf32>
    %853 = vector.shape_cast %852 : vector<1x16x256xf32> to vector<16x256xf32>
    %854 = arith.truncf %853 : vector<16x256xf32> to vector<16x256xbf16>
    %cst_166 = arith.constant dense<0.000000e+00> : vector<16x256xf32>
    %855 = tpu.matmul %854, %851, %cst_166 {dimension_numbers = #tpu.dot_dimension_numbers<[1], [0], [0], [1], [0, 0, 1, 1], [], []>} : vector<16x256xbf16>, vector<256x256xbf16>, vector<16x256xf32> -> vector<16x256xf32>
    %856 = arith.addf %840, %855 : vector<16x256xf32>
    %c7_167 = arith.constant 7 : index
    %c0_168 = arith.constant 0 : index
    %857 = vector.load %arg4[%c7_167, %c0_168] : memref<9x256xf32, #tpu.memory_space<vmem>>, vector<1x256xf32>
    %858 = vector.extract_strided_slice %754 {offsets = [0, 16], sizes = [256, 240], strides = [1, 1]} : vector<256x256xbf16> to vector<256x240xbf16>
    %859 = vector.extract_strided_slice %754 {offsets = [0, 0], sizes = [256, 16], strides = [1, 1]} : vector<256x256xbf16> to vector<256x16xbf16>
    %860 = tpu.concatenate %858, %859 in 1 : vector<256x240xbf16>, vector<256x16xbf16> -> vector<256x256xbf16>
    %cst_169 = arith.constant 0.000000e+00 : f32
    %861 = vector.broadcast %cst_169 : f32 to vector<1x256xf32>
    %862 = arith.cmpf one, %857, %861 : vector<1x256xf32>
    %c0_i32_170 = arith.constant 0 : i32
    %863 = arith.sitofp %c0_i32_170 : i32 to bf16
    %864 = vector.shape_cast %862 : vector<1x256xi1> to vector<1x256xi1>
    %865 = vector.broadcast %864 : vector<1x256xi1> to vector<256x256xi1>
    %866 = vector.broadcast %863 : bf16 to vector<256x256xbf16>
    %867 = arith.select %865, %860, %866 : vector<256x256xi1>, vector<256x256xbf16>
    %c7_171 = arith.constant 7 : index
    %c0_172 = arith.constant 0 : index
    %c0_173 = arith.constant 0 : index
    %868 = vector.load %arg11[%c7_171, %c0_172, %c0_173] : memref<9x16x256xf32, #tpu.memory_space<vmem>>, vector<1x16x256xf32>
    %869 = vector.shape_cast %868 : vector<1x16x256xf32> to vector<16x256xf32>
    %870 = arith.truncf %869 : vector<16x256xf32> to vector<16x256xbf16>
    %cst_174 = arith.constant dense<0.000000e+00> : vector<16x256xf32>
    %871 = tpu.matmul %870, %867, %cst_174 {dimension_numbers = #tpu.dot_dimension_numbers<[1], [0], [0], [1], [0, 0, 1, 1], [], []>} : vector<16x256xbf16>, vector<256x256xbf16>, vector<16x256xf32> -> vector<16x256xf32>
    %872 = arith.addf %856, %871 : vector<16x256xf32>
    %c8_175 = arith.constant 8 : index
    %c0_176 = arith.constant 0 : index
    %873 = vector.load %arg4[%c8_175, %c0_176] : memref<9x256xf32, #tpu.memory_space<vmem>>, vector<1x256xf32>
    %874 = vector.extract_strided_slice %754 {offsets = [0, 17], sizes = [256, 239], strides = [1, 1]} : vector<256x256xbf16> to vector<256x239xbf16>
    %875 = vector.extract_strided_slice %754 {offsets = [0, 0], sizes = [256, 17], strides = [1, 1]} : vector<256x256xbf16> to vector<256x17xbf16>
    %876 = tpu.concatenate %874, %875 in 1 : vector<256x239xbf16>, vector<256x17xbf16> -> vector<256x256xbf16>
    %cst_177 = arith.constant 0.000000e+00 : f32
    %877 = vector.broadcast %cst_177 : f32 to vector<1x256xf32>
    %878 = arith.cmpf one, %873, %877 : vector<1x256xf32>
    %c0_i32_178 = arith.constant 0 : i32
    %879 = arith.sitofp %c0_i32_178 : i32 to bf16
    %880 = vector.shape_cast %878 : vector<1x256xi1> to vector<1x256xi1>
    %881 = vector.broadcast %880 : vector<1x256xi1> to vector<256x256xi1>
    %882 = vector.broadcast %879 : bf16 to vector<256x256xbf16>
    %883 = arith.select %881, %876, %882 : vector<256x256xi1>, vector<256x256xbf16>
    %c8_179 = arith.constant 8 : index
    %c0_180 = arith.constant 0 : index
    %c0_181 = arith.constant 0 : index
    %884 = vector.load %arg11[%c8_179, %c0_180, %c0_181] : memref<9x16x256xf32, #tpu.memory_space<vmem>>, vector<1x16x256xf32>
    %885 = vector.shape_cast %884 : vector<1x16x256xf32> to vector<16x256xf32>
    %886 = arith.truncf %885 : vector<16x256xf32> to vector<16x256xbf16>
    %cst_182 = arith.constant dense<0.000000e+00> : vector<16x256xf32>
    %887 = tpu.matmul %886, %883, %cst_182 {dimension_numbers = #tpu.dot_dimension_numbers<[1], [0], [0], [1], [0, 0, 1, 1], [], []>} : vector<16x256xbf16>, vector<256x256xbf16>, vector<16x256xf32> -> vector<16x256xf32>
    %888 = arith.addf %872, %887 : vector<16x256xf32>
    %c0_183 = arith.constant 0 : index
    %c0_184 = arith.constant 0 : index
    %889 = vector.load %arg12[%c0_183, %c0_184] : memref<16x1xf32, #tpu.memory_space<vmem>>, vector<16x1xf32>
    %890 = vector.broadcast %889 : vector<16x1xf32> to vector<16x256xf32>
    %891 = arith.addf %888, %890 : vector<16x256xf32>
    %cst_185 = arith.constant 0.000000e+00 : f32
    %892 = vector.broadcast %cst_185 : f32 to vector<16x256xf32>
    %893 = arith.maximumf %891, %892 : vector<16x256xf32>
    %cst_186 = arith.constant 0.000000e+00 : f32
    %894 = vector.broadcast %cst_186 : f32 to vector<3x256xf32>
    %c0_187 = arith.constant 0 : index
    %c0_188 = arith.constant 0 : index
    %895 = vector.load %arg4[%c0_187, %c0_188] : memref<9x256xf32, #tpu.memory_space<vmem>>, vector<1x256xf32>
    %896 = vector.extract_strided_slice %893 {offsets = [0, 239], sizes = [16, 17], strides = [1, 1]} : vector<16x256xf32> to vector<16x17xf32>
    %897 = vector.extract_strided_slice %893 {offsets = [0, 0], sizes = [16, 239], strides = [1, 1]} : vector<16x256xf32> to vector<16x239xf32>
    %898 = tpu.concatenate %896, %897 in 1 : vector<16x17xf32>, vector<16x239xf32> -> vector<16x256xf32>
    %899 = vector.broadcast %895 : vector<1x256xf32> to vector<16x256xf32>
    %900 = arith.mulf %898, %899 : vector<16x256xf32>
    %c0_189 = arith.constant 0 : index
    %c0_190 = arith.constant 0 : index
    %c0_191 = arith.constant 0 : index
    %901 = vector.load %arg13[%c0_189, %c0_190, %c0_191] : memref<9x3x16xf32, #tpu.memory_space<vmem>>, vector<1x3x16xf32>
    %902 = vector.shape_cast %901 : vector<1x3x16xf32> to vector<3x16xf32>
    %cst_192 = arith.constant dense<0.000000e+00> : vector<3x256xf32>
    %903 = tpu.matmul %902, %900, %cst_192 {dimension_numbers = #tpu.dot_dimension_numbers<[1], [0], [0], [1], [0, 0, 1, 1], [], []>} : vector<3x16xf32>, vector<16x256xf32>, vector<3x256xf32> -> vector<3x256xf32>
    %904 = arith.addf %894, %903 : vector<3x256xf32>
    %c1_193 = arith.constant 1 : index
    %c0_194 = arith.constant 0 : index
    %905 = vector.load %arg4[%c1_193, %c0_194] : memref<9x256xf32, #tpu.memory_space<vmem>>, vector<1x256xf32>
    %906 = vector.extract_strided_slice %893 {offsets = [0, 240], sizes = [16, 16], strides = [1, 1]} : vector<16x256xf32> to vector<16x16xf32>
    %907 = vector.extract_strided_slice %893 {offsets = [0, 0], sizes = [16, 240], strides = [1, 1]} : vector<16x256xf32> to vector<16x240xf32>
    %908 = tpu.concatenate %906, %907 in 1 : vector<16x16xf32>, vector<16x240xf32> -> vector<16x256xf32>
    %909 = vector.broadcast %905 : vector<1x256xf32> to vector<16x256xf32>
    %910 = arith.mulf %908, %909 : vector<16x256xf32>
    %c1_195 = arith.constant 1 : index
    %c0_196 = arith.constant 0 : index
    %c0_197 = arith.constant 0 : index
    %911 = vector.load %arg13[%c1_195, %c0_196, %c0_197] : memref<9x3x16xf32, #tpu.memory_space<vmem>>, vector<1x3x16xf32>
    %912 = vector.shape_cast %911 : vector<1x3x16xf32> to vector<3x16xf32>
    %cst_198 = arith.constant dense<0.000000e+00> : vector<3x256xf32>
    %913 = tpu.matmul %912, %910, %cst_198 {dimension_numbers = #tpu.dot_dimension_numbers<[1], [0], [0], [1], [0, 0, 1, 1], [], []>} : vector<3x16xf32>, vector<16x256xf32>, vector<3x256xf32> -> vector<3x256xf32>
    %914 = arith.addf %904, %913 : vector<3x256xf32>
    %c2_199 = arith.constant 2 : index
    %c0_200 = arith.constant 0 : index
    %915 = vector.load %arg4[%c2_199, %c0_200] : memref<9x256xf32, #tpu.memory_space<vmem>>, vector<1x256xf32>
    %916 = vector.extract_strided_slice %893 {offsets = [0, 241], sizes = [16, 15], strides = [1, 1]} : vector<16x256xf32> to vector<16x15xf32>
    %917 = vector.extract_strided_slice %893 {offsets = [0, 0], sizes = [16, 241], strides = [1, 1]} : vector<16x256xf32> to vector<16x241xf32>
    %918 = tpu.concatenate %916, %917 in 1 : vector<16x15xf32>, vector<16x241xf32> -> vector<16x256xf32>
    %919 = vector.broadcast %915 : vector<1x256xf32> to vector<16x256xf32>
    %920 = arith.mulf %918, %919 : vector<16x256xf32>
    %c2_201 = arith.constant 2 : index
    %c0_202 = arith.constant 0 : index
    %c0_203 = arith.constant 0 : index
    %921 = vector.load %arg13[%c2_201, %c0_202, %c0_203] : memref<9x3x16xf32, #tpu.memory_space<vmem>>, vector<1x3x16xf32>
    %922 = vector.shape_cast %921 : vector<1x3x16xf32> to vector<3x16xf32>
    %cst_204 = arith.constant dense<0.000000e+00> : vector<3x256xf32>
    %923 = tpu.matmul %922, %920, %cst_204 {dimension_numbers = #tpu.dot_dimension_numbers<[1], [0], [0], [1], [0, 0, 1, 1], [], []>} : vector<3x16xf32>, vector<16x256xf32>, vector<3x256xf32> -> vector<3x256xf32>
    %924 = arith.addf %914, %923 : vector<3x256xf32>
    %c3_205 = arith.constant 3 : index
    %c0_206 = arith.constant 0 : index
    %925 = vector.load %arg4[%c3_205, %c0_206] : memref<9x256xf32, #tpu.memory_space<vmem>>, vector<1x256xf32>
    %926 = vector.extract_strided_slice %893 {offsets = [0, 255], sizes = [16, 1], strides = [1, 1]} : vector<16x256xf32> to vector<16x1xf32>
    %927 = vector.extract_strided_slice %893 {offsets = [0, 0], sizes = [16, 255], strides = [1, 1]} : vector<16x256xf32> to vector<16x255xf32>
    %928 = tpu.concatenate %926, %927 in 1 : vector<16x1xf32>, vector<16x255xf32> -> vector<16x256xf32>
    %929 = vector.broadcast %925 : vector<1x256xf32> to vector<16x256xf32>
    %930 = arith.mulf %928, %929 : vector<16x256xf32>
    %c3_207 = arith.constant 3 : index
    %c0_208 = arith.constant 0 : index
    %c0_209 = arith.constant 0 : index
    %931 = vector.load %arg13[%c3_207, %c0_208, %c0_209] : memref<9x3x16xf32, #tpu.memory_space<vmem>>, vector<1x3x16xf32>
    %932 = vector.shape_cast %931 : vector<1x3x16xf32> to vector<3x16xf32>
    %cst_210 = arith.constant dense<0.000000e+00> : vector<3x256xf32>
    %933 = tpu.matmul %932, %930, %cst_210 {dimension_numbers = #tpu.dot_dimension_numbers<[1], [0], [0], [1], [0, 0, 1, 1], [], []>} : vector<3x16xf32>, vector<16x256xf32>, vector<3x256xf32> -> vector<3x256xf32>
    %934 = arith.addf %924, %933 : vector<3x256xf32>
    %c4_211 = arith.constant 4 : index
    %c0_212 = arith.constant 0 : index
    %c0_213 = arith.constant 0 : index
    %935 = vector.load %arg13[%c4_211, %c0_212, %c0_213] : memref<9x3x16xf32, #tpu.memory_space<vmem>>, vector<1x3x16xf32>
    %936 = vector.shape_cast %935 : vector<1x3x16xf32> to vector<3x16xf32>
    %cst_214 = arith.constant dense<0.000000e+00> : vector<3x256xf32>
    %937 = tpu.matmul %936, %893, %cst_214 {dimension_numbers = #tpu.dot_dimension_numbers<[1], [0], [0], [1], [0, 0, 1, 1], [], []>} : vector<3x16xf32>, vector<16x256xf32>, vector<3x256xf32> -> vector<3x256xf32>
    %938 = arith.addf %934, %937 : vector<3x256xf32>
    %c5_215 = arith.constant 5 : index
    %c0_216 = arith.constant 0 : index
    %939 = vector.load %arg4[%c5_215, %c0_216] : memref<9x256xf32, #tpu.memory_space<vmem>>, vector<1x256xf32>
    %940 = vector.extract_strided_slice %893 {offsets = [0, 1], sizes = [16, 255], strides = [1, 1]} : vector<16x256xf32> to vector<16x255xf32>
    %941 = vector.extract_strided_slice %893 {offsets = [0, 0], sizes = [16, 1], strides = [1, 1]} : vector<16x256xf32> to vector<16x1xf32>
    %942 = tpu.concatenate %940, %941 in 1 : vector<16x255xf32>, vector<16x1xf32> -> vector<16x256xf32>
    %943 = vector.broadcast %939 : vector<1x256xf32> to vector<16x256xf32>
    %944 = arith.mulf %942, %943 : vector<16x256xf32>
    %c5_217 = arith.constant 5 : index
    %c0_218 = arith.constant 0 : index
    %c0_219 = arith.constant 0 : index
    %945 = vector.load %arg13[%c5_217, %c0_218, %c0_219] : memref<9x3x16xf32, #tpu.memory_space<vmem>>, vector<1x3x16xf32>
    %946 = vector.shape_cast %945 : vector<1x3x16xf32> to vector<3x16xf32>
    %cst_220 = arith.constant dense<0.000000e+00> : vector<3x256xf32>
    %947 = tpu.matmul %946, %944, %cst_220 {dimension_numbers = #tpu.dot_dimension_numbers<[1], [0], [0], [1], [0, 0, 1, 1], [], []>} : vector<3x16xf32>, vector<16x256xf32>, vector<3x256xf32> -> vector<3x256xf32>
    %948 = arith.addf %938, %947 : vector<3x256xf32>
    %c6_221 = arith.constant 6 : index
    %c0_222 = arith.constant 0 : index
    %949 = vector.load %arg4[%c6_221, %c0_222] : memref<9x256xf32, #tpu.memory_space<vmem>>, vector<1x256xf32>
    %950 = vector.extract_strided_slice %893 {offsets = [0, 15], sizes = [16, 241], strides = [1, 1]} : vector<16x256xf32> to vector<16x241xf32>
    %951 = vector.extract_strided_slice %893 {offsets = [0, 0], sizes = [16, 15], strides = [1, 1]} : vector<16x256xf32> to vector<16x15xf32>
    %952 = tpu.concatenate %950, %951 in 1 : vector<16x241xf32>, vector<16x15xf32> -> vector<16x256xf32>
    %953 = vector.broadcast %949 : vector<1x256xf32> to vector<16x256xf32>
    %954 = arith.mulf %952, %953 : vector<16x256xf32>
    %c6_223 = arith.constant 6 : index
    %c0_224 = arith.constant 0 : index
    %c0_225 = arith.constant 0 : index
    %955 = vector.load %arg13[%c6_223, %c0_224, %c0_225] : memref<9x3x16xf32, #tpu.memory_space<vmem>>, vector<1x3x16xf32>
    %956 = vector.shape_cast %955 : vector<1x3x16xf32> to vector<3x16xf32>
    %cst_226 = arith.constant dense<0.000000e+00> : vector<3x256xf32>
    %957 = tpu.matmul %956, %954, %cst_226 {dimension_numbers = #tpu.dot_dimension_numbers<[1], [0], [0], [1], [0, 0, 1, 1], [], []>} : vector<3x16xf32>, vector<16x256xf32>, vector<3x256xf32> -> vector<3x256xf32>
    %958 = arith.addf %948, %957 : vector<3x256xf32>
    %c7_227 = arith.constant 7 : index
    %c0_228 = arith.constant 0 : index
    %959 = vector.load %arg4[%c7_227, %c0_228] : memref<9x256xf32, #tpu.memory_space<vmem>>, vector<1x256xf32>
    %960 = vector.extract_strided_slice %893 {offsets = [0, 16], sizes = [16, 240], strides = [1, 1]} : vector<16x256xf32> to vector<16x240xf32>
    %961 = vector.extract_strided_slice %893 {offsets = [0, 0], sizes = [16, 16], strides = [1, 1]} : vector<16x256xf32> to vector<16x16xf32>
    %962 = tpu.concatenate %960, %961 in 1 : vector<16x240xf32>, vector<16x16xf32> -> vector<16x256xf32>
    %963 = vector.broadcast %959 : vector<1x256xf32> to vector<16x256xf32>
    %964 = arith.mulf %962, %963 : vector<16x256xf32>
    %c7_229 = arith.constant 7 : index
    %c0_230 = arith.constant 0 : index
    %c0_231 = arith.constant 0 : index
    %965 = vector.load %arg13[%c7_229, %c0_230, %c0_231] : memref<9x3x16xf32, #tpu.memory_space<vmem>>, vector<1x3x16xf32>
    %966 = vector.shape_cast %965 : vector<1x3x16xf32> to vector<3x16xf32>
    %cst_232 = arith.constant dense<0.000000e+00> : vector<3x256xf32>
    %967 = tpu.matmul %966, %964, %cst_232 {dimension_numbers = #tpu.dot_dimension_numbers<[1], [0], [0], [1], [0, 0, 1, 1], [], []>} : vector<3x16xf32>, vector<16x256xf32>, vector<3x256xf32> -> vector<3x256xf32>
    %968 = arith.addf %958, %967 : vector<3x256xf32>
    %c8_233 = arith.constant 8 : index
    %c0_234 = arith.constant 0 : index
    %969 = vector.load %arg4[%c8_233, %c0_234] : memref<9x256xf32, #tpu.memory_space<vmem>>, vector<1x256xf32>
    %970 = vector.extract_strided_slice %893 {offsets = [0, 17], sizes = [16, 239], strides = [1, 1]} : vector<16x256xf32> to vector<16x239xf32>
    %971 = vector.extract_strided_slice %893 {offsets = [0, 0], sizes = [16, 17], strides = [1, 1]} : vector<16x256xf32> to vector<16x17xf32>
    %972 = tpu.concatenate %970, %971 in 1 : vector<16x239xf32>, vector<16x17xf32> -> vector<16x256xf32>
    %973 = vector.broadcast %969 : vector<1x256xf32> to vector<16x256xf32>
    %974 = arith.mulf %972, %973 : vector<16x256xf32>
    %c8_235 = arith.constant 8 : index
    %c0_236 = arith.constant 0 : index
    %c0_237 = arith.constant 0 : index
    %975 = vector.load %arg13[%c8_235, %c0_236, %c0_237] : memref<9x3x16xf32, #tpu.memory_space<vmem>>, vector<1x3x16xf32>
    %976 = vector.shape_cast %975 : vector<1x3x16xf32> to vector<3x16xf32>
    %cst_238 = arith.constant dense<0.000000e+00> : vector<3x256xf32>
    %977 = tpu.matmul %976, %974, %cst_238 {dimension_numbers = #tpu.dot_dimension_numbers<[1], [0], [0], [1], [0, 0, 1, 1], [], []>} : vector<3x16xf32>, vector<16x256xf32>, vector<3x256xf32> -> vector<3x256xf32>
    %978 = arith.addf %968, %977 : vector<3x256xf32>
    %c0_239 = arith.constant 0 : index
    %c0_240 = arith.constant 0 : index
    %979 = vector.load %arg14[%c0_239, %c0_240] : memref<3x1xf32, #tpu.memory_space<vmem>>, vector<3x1xf32>
    %980 = vector.broadcast %979 : vector<3x1xf32> to vector<3x256xf32>
    %981 = arith.addf %978, %980 : vector<3x256xf32>
    %cst_241 = arith.constant 0.000000e+00 : f32
    %982 = vector.broadcast %cst_241 : f32 to vector<1x256xf32>
    %c0_242 = arith.constant 0 : index
    %c0_243 = arith.constant 0 : index
    %983 = vector.load %arg4[%c0_242, %c0_243] : memref<9x256xf32, #tpu.memory_space<vmem>>, vector<1x256xf32>
    %984 = vector.extract_strided_slice %981 {offsets = [0, 239], sizes = [3, 17], strides = [1, 1]} : vector<3x256xf32> to vector<3x17xf32>
    %985 = vector.extract_strided_slice %981 {offsets = [0, 0], sizes = [3, 239], strides = [1, 1]} : vector<3x256xf32> to vector<3x239xf32>
    %986 = tpu.concatenate %984, %985 in 1 : vector<3x17xf32>, vector<3x239xf32> -> vector<3x256xf32>
    %987 = vector.broadcast %983 : vector<1x256xf32> to vector<3x256xf32>
    %988 = arith.mulf %986, %987 : vector<3x256xf32>
    %c0_244 = arith.constant 0 : index
    %c0_245 = arith.constant 0 : index
    %c0_246 = arith.constant 0 : index
    %989 = vector.load %arg15[%c0_244, %c0_245, %c0_246] : memref<9x3x1xf32, #tpu.memory_space<vmem>>, vector<1x3x1xf32>
    %990 = vector.shape_cast %989 : vector<1x3x1xf32> to vector<3x1xf32>
    %991 = vector.broadcast %990 : vector<3x1xf32> to vector<3x256xf32>
    %992 = arith.mulf %991, %988 : vector<3x256xf32>
    %cst_247 = arith.constant dense<0.000000e+00> : vector<256xf32>
    %993 = vector.multi_reduction <add>, %992, %cst_247 [0] : vector<3x256xf32> to vector<256xf32>
    %994 = vector.shape_cast %993 : vector<256xf32> to vector<1x256xf32>
    %995 = arith.addf %982, %994 : vector<1x256xf32>
    %c1_248 = arith.constant 1 : index
    %c0_249 = arith.constant 0 : index
    %996 = vector.load %arg4[%c1_248, %c0_249] : memref<9x256xf32, #tpu.memory_space<vmem>>, vector<1x256xf32>
    %997 = vector.extract_strided_slice %981 {offsets = [0, 240], sizes = [3, 16], strides = [1, 1]} : vector<3x256xf32> to vector<3x16xf32>
    %998 = vector.extract_strided_slice %981 {offsets = [0, 0], sizes = [3, 240], strides = [1, 1]} : vector<3x256xf32> to vector<3x240xf32>
    %999 = tpu.concatenate %997, %998 in 1 : vector<3x16xf32>, vector<3x240xf32> -> vector<3x256xf32>
    %1000 = vector.broadcast %996 : vector<1x256xf32> to vector<3x256xf32>
    %1001 = arith.mulf %999, %1000 : vector<3x256xf32>
    %c1_250 = arith.constant 1 : index
    %c0_251 = arith.constant 0 : index
    %c0_252 = arith.constant 0 : index
    %1002 = vector.load %arg15[%c1_250, %c0_251, %c0_252] : memref<9x3x1xf32, #tpu.memory_space<vmem>>, vector<1x3x1xf32>
    %1003 = vector.shape_cast %1002 : vector<1x3x1xf32> to vector<3x1xf32>
    %1004 = vector.broadcast %1003 : vector<3x1xf32> to vector<3x256xf32>
    %1005 = arith.mulf %1004, %1001 : vector<3x256xf32>
    %cst_253 = arith.constant dense<0.000000e+00> : vector<256xf32>
    %1006 = vector.multi_reduction <add>, %1005, %cst_253 [0] : vector<3x256xf32> to vector<256xf32>
    %1007 = vector.shape_cast %1006 : vector<256xf32> to vector<1x256xf32>
    %1008 = arith.addf %995, %1007 : vector<1x256xf32>
    %c2_254 = arith.constant 2 : index
    %c0_255 = arith.constant 0 : index
    %1009 = vector.load %arg4[%c2_254, %c0_255] : memref<9x256xf32, #tpu.memory_space<vmem>>, vector<1x256xf32>
    %1010 = vector.extract_strided_slice %981 {offsets = [0, 241], sizes = [3, 15], strides = [1, 1]} : vector<3x256xf32> to vector<3x15xf32>
    %1011 = vector.extract_strided_slice %981 {offsets = [0, 0], sizes = [3, 241], strides = [1, 1]} : vector<3x256xf32> to vector<3x241xf32>
    %1012 = tpu.concatenate %1010, %1011 in 1 : vector<3x15xf32>, vector<3x241xf32> -> vector<3x256xf32>
    %1013 = vector.broadcast %1009 : vector<1x256xf32> to vector<3x256xf32>
    %1014 = arith.mulf %1012, %1013 : vector<3x256xf32>
    %c2_256 = arith.constant 2 : index
    %c0_257 = arith.constant 0 : index
    %c0_258 = arith.constant 0 : index
    %1015 = vector.load %arg15[%c2_256, %c0_257, %c0_258] : memref<9x3x1xf32, #tpu.memory_space<vmem>>, vector<1x3x1xf32>
    %1016 = vector.shape_cast %1015 : vector<1x3x1xf32> to vector<3x1xf32>
    %1017 = vector.broadcast %1016 : vector<3x1xf32> to vector<3x256xf32>
    %1018 = arith.mulf %1017, %1014 : vector<3x256xf32>
    %cst_259 = arith.constant dense<0.000000e+00> : vector<256xf32>
    %1019 = vector.multi_reduction <add>, %1018, %cst_259 [0] : vector<3x256xf32> to vector<256xf32>
    %1020 = vector.shape_cast %1019 : vector<256xf32> to vector<1x256xf32>
    %1021 = arith.addf %1008, %1020 : vector<1x256xf32>
    %c3_260 = arith.constant 3 : index
    %c0_261 = arith.constant 0 : index
    %1022 = vector.load %arg4[%c3_260, %c0_261] : memref<9x256xf32, #tpu.memory_space<vmem>>, vector<1x256xf32>
    %1023 = vector.extract_strided_slice %981 {offsets = [0, 255], sizes = [3, 1], strides = [1, 1]} : vector<3x256xf32> to vector<3x1xf32>
    %1024 = vector.extract_strided_slice %981 {offsets = [0, 0], sizes = [3, 255], strides = [1, 1]} : vector<3x256xf32> to vector<3x255xf32>
    %1025 = tpu.concatenate %1023, %1024 in 1 : vector<3x1xf32>, vector<3x255xf32> -> vector<3x256xf32>
    %1026 = vector.broadcast %1022 : vector<1x256xf32> to vector<3x256xf32>
    %1027 = arith.mulf %1025, %1026 : vector<3x256xf32>
    %c3_262 = arith.constant 3 : index
    %c0_263 = arith.constant 0 : index
    %c0_264 = arith.constant 0 : index
    %1028 = vector.load %arg15[%c3_262, %c0_263, %c0_264] : memref<9x3x1xf32, #tpu.memory_space<vmem>>, vector<1x3x1xf32>
    %1029 = vector.shape_cast %1028 : vector<1x3x1xf32> to vector<3x1xf32>
    %1030 = vector.broadcast %1029 : vector<3x1xf32> to vector<3x256xf32>
    %1031 = arith.mulf %1030, %1027 : vector<3x256xf32>
    %cst_265 = arith.constant dense<0.000000e+00> : vector<256xf32>
    %1032 = vector.multi_reduction <add>, %1031, %cst_265 [0] : vector<3x256xf32> to vector<256xf32>
    %1033 = vector.shape_cast %1032 : vector<256xf32> to vector<1x256xf32>
    %1034 = arith.addf %1021, %1033 : vector<1x256xf32>
    %c4_266 = arith.constant 4 : index
    %c0_267 = arith.constant 0 : index
    %c0_268 = arith.constant 0 : index
    %1035 = vector.load %arg15[%c4_266, %c0_267, %c0_268] : memref<9x3x1xf32, #tpu.memory_space<vmem>>, vector<1x3x1xf32>
    %1036 = vector.shape_cast %1035 : vector<1x3x1xf32> to vector<3x1xf32>
    %1037 = vector.broadcast %1036 : vector<3x1xf32> to vector<3x256xf32>
    %1038 = arith.mulf %1037, %981 : vector<3x256xf32>
    %cst_269 = arith.constant dense<0.000000e+00> : vector<256xf32>
    %1039 = vector.multi_reduction <add>, %1038, %cst_269 [0] : vector<3x256xf32> to vector<256xf32>
    %1040 = vector.shape_cast %1039 : vector<256xf32> to vector<1x256xf32>
    %1041 = arith.addf %1034, %1040 : vector<1x256xf32>
    %c5_270 = arith.constant 5 : index
    %c0_271 = arith.constant 0 : index
    %1042 = vector.load %arg4[%c5_270, %c0_271] : memref<9x256xf32, #tpu.memory_space<vmem>>, vector<1x256xf32>
    %1043 = vector.extract_strided_slice %981 {offsets = [0, 1], sizes = [3, 255], strides = [1, 1]} : vector<3x256xf32> to vector<3x255xf32>
    %1044 = vector.extract_strided_slice %981 {offsets = [0, 0], sizes = [3, 1], strides = [1, 1]} : vector<3x256xf32> to vector<3x1xf32>
    %1045 = tpu.concatenate %1043, %1044 in 1 : vector<3x255xf32>, vector<3x1xf32> -> vector<3x256xf32>
    %1046 = vector.broadcast %1042 : vector<1x256xf32> to vector<3x256xf32>
    %1047 = arith.mulf %1045, %1046 : vector<3x256xf32>
    %c5_272 = arith.constant 5 : index
    %c0_273 = arith.constant 0 : index
    %c0_274 = arith.constant 0 : index
    %1048 = vector.load %arg15[%c5_272, %c0_273, %c0_274] : memref<9x3x1xf32, #tpu.memory_space<vmem>>, vector<1x3x1xf32>
    %1049 = vector.shape_cast %1048 : vector<1x3x1xf32> to vector<3x1xf32>
    %1050 = vector.broadcast %1049 : vector<3x1xf32> to vector<3x256xf32>
    %1051 = arith.mulf %1050, %1047 : vector<3x256xf32>
    %cst_275 = arith.constant dense<0.000000e+00> : vector<256xf32>
    %1052 = vector.multi_reduction <add>, %1051, %cst_275 [0] : vector<3x256xf32> to vector<256xf32>
    %1053 = vector.shape_cast %1052 : vector<256xf32> to vector<1x256xf32>
    %1054 = arith.addf %1041, %1053 : vector<1x256xf32>
    %c6_276 = arith.constant 6 : index
    %c0_277 = arith.constant 0 : index
    %1055 = vector.load %arg4[%c6_276, %c0_277] : memref<9x256xf32, #tpu.memory_space<vmem>>, vector<1x256xf32>
    %1056 = vector.extract_strided_slice %981 {offsets = [0, 15], sizes = [3, 241], strides = [1, 1]} : vector<3x256xf32> to vector<3x241xf32>
    %1057 = vector.extract_strided_slice %981 {offsets = [0, 0], sizes = [3, 15], strides = [1, 1]} : vector<3x256xf32> to vector<3x15xf32>
    %1058 = tpu.concatenate %1056, %1057 in 1 : vector<3x241xf32>, vector<3x15xf32> -> vector<3x256xf32>
    %1059 = vector.broadcast %1055 : vector<1x256xf32> to vector<3x256xf32>
    %1060 = arith.mulf %1058, %1059 : vector<3x256xf32>
    %c6_278 = arith.constant 6 : index
    %c0_279 = arith.constant 0 : index
    %c0_280 = arith.constant 0 : index
    %1061 = vector.load %arg15[%c6_278, %c0_279, %c0_280] : memref<9x3x1xf32, #tpu.memory_space<vmem>>, vector<1x3x1xf32>
    %1062 = vector.shape_cast %1061 : vector<1x3x1xf32> to vector<3x1xf32>
    %1063 = vector.broadcast %1062 : vector<3x1xf32> to vector<3x256xf32>
    %1064 = arith.mulf %1063, %1060 : vector<3x256xf32>
    %cst_281 = arith.constant dense<0.000000e+00> : vector<256xf32>
    %1065 = vector.multi_reduction <add>, %1064, %cst_281 [0] : vector<3x256xf32> to vector<256xf32>
    %1066 = vector.shape_cast %1065 : vector<256xf32> to vector<1x256xf32>
    %1067 = arith.addf %1054, %1066 : vector<1x256xf32>
    %c7_282 = arith.constant 7 : index
    %c0_283 = arith.constant 0 : index
    %1068 = vector.load %arg4[%c7_282, %c0_283] : memref<9x256xf32, #tpu.memory_space<vmem>>, vector<1x256xf32>
    %1069 = vector.extract_strided_slice %981 {offsets = [0, 16], sizes = [3, 240], strides = [1, 1]} : vector<3x256xf32> to vector<3x240xf32>
    %1070 = vector.extract_strided_slice %981 {offsets = [0, 0], sizes = [3, 16], strides = [1, 1]} : vector<3x256xf32> to vector<3x16xf32>
    %1071 = tpu.concatenate %1069, %1070 in 1 : vector<3x240xf32>, vector<3x16xf32> -> vector<3x256xf32>
    %1072 = vector.broadcast %1068 : vector<1x256xf32> to vector<3x256xf32>
    %1073 = arith.mulf %1071, %1072 : vector<3x256xf32>
    %c7_284 = arith.constant 7 : index
    %c0_285 = arith.constant 0 : index
    %c0_286 = arith.constant 0 : index
    %1074 = vector.load %arg15[%c7_284, %c0_285, %c0_286] : memref<9x3x1xf32, #tpu.memory_space<vmem>>, vector<1x3x1xf32>
    %1075 = vector.shape_cast %1074 : vector<1x3x1xf32> to vector<3x1xf32>
    %1076 = vector.broadcast %1075 : vector<3x1xf32> to vector<3x256xf32>
    %1077 = arith.mulf %1076, %1073 : vector<3x256xf32>
    %cst_287 = arith.constant dense<0.000000e+00> : vector<256xf32>
    %1078 = vector.multi_reduction <add>, %1077, %cst_287 [0] : vector<3x256xf32> to vector<256xf32>
    %1079 = vector.shape_cast %1078 : vector<256xf32> to vector<1x256xf32>
    %1080 = arith.addf %1067, %1079 : vector<1x256xf32>
    %c8_288 = arith.constant 8 : index
    %c0_289 = arith.constant 0 : index
    %1081 = vector.load %arg4[%c8_288, %c0_289] : memref<9x256xf32, #tpu.memory_space<vmem>>, vector<1x256xf32>
    %1082 = vector.extract_strided_slice %981 {offsets = [0, 17], sizes = [3, 239], strides = [1, 1]} : vector<3x256xf32> to vector<3x239xf32>
    %1083 = vector.extract_strided_slice %981 {offsets = [0, 0], sizes = [3, 17], strides = [1, 1]} : vector<3x256xf32> to vector<3x17xf32>
    %1084 = tpu.concatenate %1082, %1083 in 1 : vector<3x239xf32>, vector<3x17xf32> -> vector<3x256xf32>
    %1085 = vector.broadcast %1081 : vector<1x256xf32> to vector<3x256xf32>
    %1086 = arith.mulf %1084, %1085 : vector<3x256xf32>
    %c8_290 = arith.constant 8 : index
    %c0_291 = arith.constant 0 : index
    %c0_292 = arith.constant 0 : index
    %1087 = vector.load %arg15[%c8_290, %c0_291, %c0_292] : memref<9x3x1xf32, #tpu.memory_space<vmem>>, vector<1x3x1xf32>
    %1088 = vector.shape_cast %1087 : vector<1x3x1xf32> to vector<3x1xf32>
    %1089 = vector.broadcast %1088 : vector<3x1xf32> to vector<3x256xf32>
    %1090 = arith.mulf %1089, %1086 : vector<3x256xf32>
    %cst_293 = arith.constant dense<0.000000e+00> : vector<256xf32>
    %1091 = vector.multi_reduction <add>, %1090, %cst_293 [0] : vector<3x256xf32> to vector<256xf32>
    %1092 = vector.shape_cast %1091 : vector<256xf32> to vector<1x256xf32>
    %1093 = arith.addf %1080, %1092 : vector<1x256xf32>
    %c0_294 = arith.constant 0 : index
    %c0_295 = arith.constant 0 : index
    %1094 = vector.load %arg16[%c0_294, %c0_295] : memref<1x1xf32, #tpu.memory_space<vmem>>, vector<1x1xf32>
    %1095 = vector.broadcast %1094 : vector<1x1xf32> to vector<1x256xf32>
    %1096 = arith.addf %1093, %1095 : vector<1x256xf32>
    %1097 = vector.broadcast %1096 : vector<1x256xf32> to vector<4x256xf32>
    %1098 = arith.mulf %1097, %745 : vector<4x256xf32>
    %1099 = arith.addf %1, %1098 : vector<4x256xf32>
    %c0_296 = arith.constant 0 : index
    %c0_297 = arith.constant 0 : index
    %c0_298 = arith.constant 0 : index
    %1100 = vector.load %arg17[%c0_296, %c0_297, %c0_298] : memref<1x4x256xf32, #tpu.memory_space<vmem>>, vector<1x4x256xf32>
    %1101 = vector.shape_cast %1100 : vector<1x4x256xf32> to vector<4x256xf32>
    %1102 = vector.shape_cast %1099 : vector<4x256xf32> to vector<1x4x256xf32>
    tpu.vector_store %arg17[%c0_296, %c0_297, %c0_298], %1102 {strides = array<i32>} : memref<1x4x256xf32, #tpu.memory_space<vmem>>, vector<1x4x256xf32>,
    return
  }
  func.func @transform_0(%arg0: i32) -> (i32, i32, i32) {
    %c0_i32 = arith.constant 0 : i32
    %c0_i32_0 = arith.constant 0 : i32
    %c0_i32_1 = arith.constant 0 : i32
    return %arg0, %c0_i32, %c0_i32_0 : i32, i32, i32
  }
  func.func @transform_1(%arg0: i32) -> (i32, i32, i32) {
    %c0_i32 = arith.constant 0 : i32
    %c0_i32_0 = arith.constant 0 : i32
    %c0_i32_1 = arith.constant 0 : i32
    return %arg0, %c0_i32, %c0_i32_0 : i32, i32, i32
  }
  func.func @transform_2(%arg0: i32) -> (i32, i32) {
    %c0_i32 = arith.constant 0 : i32
    %c0_i32_0 = arith.constant 0 : i32
    %c0_i32_1 = arith.constant 0 : i32
    return %c0_i32, %c0_i32_0 : i32, i32
  }
  func.func @transform_3(%arg0: i32) -> (i32, i32) {
    %c0_i32 = arith.constant 0 : i32
    %c0_i32_0 = arith.constant 0 : i32
    %c0_i32_1 = arith.constant 0 : i32
    return %c0_i32, %c0_i32_0 : i32, i32
  }
  func.func @transform_4(%arg0: i32) -> (i32, i32, i32) {
    %c0_i32 = arith.constant 0 : i32
    %c0_i32_0 = arith.constant 0 : i32
    %c0_i32_1 = arith.constant 0 : i32
    %c0_i32_2 = arith.constant 0 : i32
    return %c0_i32, %c0_i32_0, %c0_i32_1 : i32, i32, i32
  }
  func.func @transform_5(%arg0: i32) -> (i32, i32, i32) {
    %c0_i32 = arith.constant 0 : i32
    %c0_i32_0 = arith.constant 0 : i32
    %c0_i32_1 = arith.constant 0 : i32
    %c0_i32_2 = arith.constant 0 : i32
    return %c0_i32, %c0_i32_0, %c0_i32_1 : i32, i32, i32
  }
  func.func @transform_6(%arg0: i32) -> (i32, i32) {
    %c0_i32 = arith.constant 0 : i32
    %c0_i32_0 = arith.constant 0 : i32
    %c0_i32_1 = arith.constant 0 : i32
    return %c0_i32, %c0_i32_0 : i32, i32
  }
  func.func @transform_7(%arg0: i32) -> (i32, i32) {
    %c0_i32 = arith.constant 0 : i32
    %c0_i32_0 = arith.constant 0 : i32
    %c0_i32_1 = arith.constant 0 : i32
    return %c0_i32, %c0_i32_0 : i32, i32
  }
  func.func @transform_8(%arg0: i32) -> (i32, i32) {
    %c0_i32 = arith.constant 0 : i32
    %c0_i32_0 = arith.constant 0 : i32
    %c0_i32_1 = arith.constant 0 : i32
    return %c0_i32, %c0_i32_0 : i32, i32
  }
  func.func @transform_9(%arg0: i32) -> (i32, i32) {
    %c0_i32 = arith.constant 0 : i32
    %c0_i32_0 = arith.constant 0 : i32
    %c0_i32_1 = arith.constant 0 : i32
    return %c0_i32, %c0_i32_0 : i32, i32
  }
  func.func @transform_10(%arg0: i32) -> (i32, i32, i32) {
    %c0_i32 = arith.constant 0 : i32
    %c0_i32_0 = arith.constant 0 : i32
    %c0_i32_1 = arith.constant 0 : i32
    %c0_i32_2 = arith.constant 0 : i32
    return %c0_i32, %c0_i32_0, %c0_i32_1 : i32, i32, i32
  }
  func.func @transform_11(%arg0: i32) -> (i32, i32) {
    %c0_i32 = arith.constant 0 : i32
    %c0_i32_0 = arith.constant 0 : i32
    %c0_i32_1 = arith.constant 0 : i32
    return %c0_i32, %c0_i32_0 : i32, i32
  }
  func.func @transform_12(%arg0: i32) -> (i32, i32, i32) {
    %c0_i32 = arith.constant 0 : i32
    %c0_i32_0 = arith.constant 0 : i32
    %c0_i32_1 = arith.constant 0 : i32
    %c0_i32_2 = arith.constant 0 : i32
    return %c0_i32, %c0_i32_0, %c0_i32_1 : i32, i32, i32
  }
  func.func @transform_13(%arg0: i32) -> (i32, i32) {
    %c0_i32 = arith.constant 0 : i32
    %c0_i32_0 = arith.constant 0 : i32
    %c0_i32_1 = arith.constant 0 : i32
    return %c0_i32, %c0_i32_0 : i32, i32
  }
  func.func @transform_14(%arg0: i32) -> (i32, i32, i32) {
    %c0_i32 = arith.constant 0 : i32
    %c0_i32_0 = arith.constant 0 : i32
    %c0_i32_1 = arith.constant 0 : i32
    %c0_i32_2 = arith.constant 0 : i32
    return %c0_i32, %c0_i32_0, %c0_i32_1 : i32, i32, i32
  }
  func.func @transform_15(%arg0: i32) -> (i32, i32) {
    %c0_i32 = arith.constant 0 : i32
    %c0_i32_0 = arith.constant 0 : i32
    %c0_i32_1 = arith.constant 0 : i32
    return %c0_i32, %c0_i32_0 : i32, i32
  }
  func.func @transform_16(%arg0: i32) -> (i32, i32, i32) {
    %c0_i32 = arith.constant 0 : i32
    %c0_i32_0 = arith.constant 0 : i32
    %c0_i32_1 = arith.constant 0 : i32
    return %arg0, %c0_i32, %c0_i32_0 : i32, i32, i32
  }
}

</mosaic_0001>

<bundles_post_ra>
// kernel: ca_forward.1
= control target key start
LH: loop header
LB: loop body
LE: loop exit
PB: predicated region body
PF: predicated region fallthrough
CT: control target
= control target key end

     0   :  { %s8702_s23 = smov 0   ;;  %s13882_s0 = inlined_call_operand.vmem [shape: f32[2,4,256], index: 0, kind: input, shape index: {}]   ;;  %s13883_s1 = inlined_call_operand.vmem [shape: f32[2,4,256], index: 1, kind: input, shape index: {}]   ;;  %s13884_s2 = inlined_call_operand.vmem [shape: f32[25,256], index: 2, kind: input, shape index: {}]   ;;  %s13885_s3 = inlined_call_operand.vmem [shape: f32[9,256], index: 3, kind: input, shape index: {}]   ;;  %s13886_s4 = inlined_call_operand.vmem [shape: f32[3,2,4], index: 4, kind: input, shape index: {}]   ;;  %s13887_s5 = inlined_call_operand.vmem [shape: f32[3,2,1], index: 5, kind: input, shape index: {}]   ;;  %s13888_s6 = inlined_call_operand.vmem [shape: f32[4,2], index: 6, kind: input, shape index: {}]   ;;  %s13889_s7 = inlined_call_operand.vmem [shape: f32[4,1], index: 7, kind: input, shape index: {}]   ;;  %s13890_s8 = inlined_call_operand.vmem [shape: f32[256,8], index: 8, kind: input, shape index: {}]   ;;  %s13891_s9 = inlined_call_operand.vmem [shape: f32[256,1], index: 9, kind: input, shape index: {}]   ;;  %s13892_s10 = inlined_call_operand.vmem [shape: f32[9,16,256], index: 10, kind: input, shape index: {}]   ;;  %s13893_s11 = inlined_call_operand.vmem [shape: f32[16,1], index: 11, kind: input, shape index: {}]   ;;  %s13894_s12 = inlined_call_operand.vmem [shape: f32[9,3,16], index: 12, kind: input, shape index: {}]   ;;  %s13895_s13 = inlined_call_operand.vmem [shape: f32[3,1], index: 13, kind: input, shape index: {}]   ;;  %s13896_s14 = inlined_call_operand.vmem [shape: f32[9,3,1], index: 14, kind: input, shape index: {}]   ;;  %s13897_s15 = inlined_call_operand.<no memory space> [shape: f32[1,1], index: 15, kind: input, shape index: {}]   ;;  %s13898_s16 = inlined_call_operand.vmem [shape: f32[2,4,256], index: 16, kind: output, shape index: {}]  }
   0x1   :  { %14167 = sst [smem:[#allocation74_spill]] %s13882_s0  ;;  %v21_v0 = vstv %s13897_s15 }
   0x2   :  { %14168 = sst [smem:[#allocation75_spill]] %s13883_s1  ;;  %22 = vst [vmem:[#allocation2] sm:$0x1] %v21_v0 }
   0x3   :  { %14169 = sst [smem:[#allocation76_spill]] %s13884_s2 }
   0x4   :  { %14170 = sst [smem:[#allocation77_spill]] %s13886_s4 }
   0x5   :  { %14171 = sst [smem:[#allocation78_spill]] %s13887_s5 }
   0x6 LB: > { %s8061_s24 = sadd.s32 4294967295, %s8586_s23   ;;  %p8065_p0 = scmp.ge.s32.totalorder %s8586_s23, 1  ;;  %s8586_s23 = sphi %s8702_s23, %s28_s23  }
   0x7   : > { %p474_p1 = scmp.lt.s32.totalorder %s8586_s23, 3 }
   0x9   : > { %p475_p2 = pnand %p8065_p0, %p474_p1 }
   0xb   : > { %478 = sbr.rel (%p475_p2) target bundleno = 2329 (0x919), region = 84 }
  0x10   : > { %s14172_s5 = sld [smem:[#allocation78_spill]]  ;;  %v551_v2 = vlaneseq  ;;  %v13921_v3 = vmov 0   ;;  %p529_p3 = scmp.lt.s32.totalorder %s8061_s24, 1  ;;  %vm13958_vm0 = vcmask 1043456   ;;  %vm741_vm1 = vcmask 1041409  }
  0x11   : > { %8362 = vset.pattern.permute.xlu1 %v13921_v3  ;;  %8363 = vset.pattern.permute.xlu0 %v13921_v3  ;;  %s14174_s4 = sld [smem:[#allocation77_spill]]  ;;  %s8589_s29 = smov 33   ;;  %vm792_vm2 = vcmask 1041408   ;;  %vm752_vm3 = vcmask 277504   ;;  %vm873_vm4 = vcmask 269312   ;;  %vm987_vm5 = vcmask 261120  }
  0x12   : > { %v8715_v4 = vshrl.u32 %v551_v2, 7  ;;  %s14767_s24 = smov (!%p529_p3, %s8061_s24), 1  ;;  %s14176_s1 = sld [smem:[#allocation75_spill]]  ;;  %vm1101_vm6 = vcmask 252928   ;;  %vm1215_vm7 = vcmask 244736   ;;  %vm1329_vm8 = vcmask 146432  }
  0x13   : > { %s8748_s21 = sshll.u32 %s14767_s24, 3  ;;  %s14177_s27 = sld [smem:[#allocation74_spill]]  ;;  %vm14027_vm9 = vcmask 138240   ;;  %vm14030_vm10 = vcmask 130048   ;;  %vm14034_vm11 = vcmask 121856   ;;  %vm1785_vm12 = vcmask 113664  }
  0x14   : > { %14173 = vst [vmem:[#allocation3_spill] sm:$0xff] %v8715_v4  ;;  %v8724_v7 = vsub.s32 1, %v8715_v4  ;;  %v8727_v8 = vsub.s32 0, %v8715_v4  ;;  %s8590_s30 = smov 34   ;;  %s8591_s0 = smov 32   ;;  %vm1899_vm13 = vcmask 15360  }
  0x15   : > { %s8592_s17 = smov 31   ;;  %s8593_s18 = smov 30   ;;  %vm2013_vm14 = vcmask 7168   ;;  %vm2198_vm15 = vcmask 1039360  }
  0x16   : > { %v8073_v1 = vld [vmem:[%s14172_s5 + $0x2] sm:$0x3]  ;;  %v8075_v5 = vld [vmem:[%s14172_s5 + $0x4] sm:$0x3]  ;;  %14175 = vst [vmem:[#allocation4_spill] sm:$0xff] %v8724_v7  ;;  %s8594_s19 = smov 18  }
  0x17   : > { %667 = vperm.xlu1 %8362, %v8073_v1   ;;  %v8072_v6 = vld [vmem:[%s14174_s4 + $0x2] sm:$0x3]  ;;  %v8074_v9 = vld [vmem:[%s14174_s4 + $0x4] sm:$0x3]  ;;  %v549_v13 = vld [vmem:[%s14174_s4] sm:$0x3] }
  0x18   : > { %v626_v10 = vrot.slane %v8072_v6, %v8724_v7  ;;  %v690_v11 = vrot.slane %v8074_v9, %v8724_v7  ;;  %v619_v12 = vrot.slane %v8072_v6, %v8727_v8  ;;  %v554_v14 = vrot.slane %v549_v13, %v8727_v8  ;;  %v550_v17 = vld [vmem:[%s14172_s5] sm:$0x3]  ;;  %s538_s26 = scalar_lea.vmem %s14176_s1, %s8748_s21  ;;  %s13911_s20 = smov 17  }
  0x19   : > { %v683_v15 = vrot.slane %v8074_v9, %v8727_v8  ;;  %v561_v16 = vrot.slane %v549_v13, %v8724_v7  ;;  %v8754_v18 = vld [vmem:[%s538_s26] sm:$0xff]  ;;  %s8774_s28 = scalar_lea.vmem %s14177_s27, %s8748_s21  ;;  %s13915_s22 = smov 16  }
  0x1a   : > { %628 = vbcast.lane.b32.xlu0 %v626_v10, 256  ;;  %v8758_v19 = vcombine.high %v8754_v18, %v8754_v18  ;;  %v547_v50 = vld [vmem:[%s8774_s28] sm:$0xff]  ;;  %s13899_s25 = smov 15   ;;  %s8598_s26 = smov 14  }
  0x1b   : > { %728 = vperm.xlu1 %8362, %v8075_v5   ;;  %v8783_v58 = vcombine.high %v547_v50, %v547_v50  ;;  %s13901_s24 = smov 2   ;;  %s13917_s15 = smov 1  }
  0x1c   : > { %s13903_s27 = smov 127   ;;  %s14181_s2 = sld [smem:[#allocation76_spill]] }
  0x1d   : > { %14178 = vst [vmem:[#allocation5_spill] sm:$0xff] %v8783_v58  ;;  %s14544_s1 = smov 112  }
  0x1e   : > { %621 = vbcast.lane.b32.xlu0 %v619_v12, 256 }
  0x1f   : > { %692 = vbcast.lane.b32.xlu1 %v690_v11, 256 }
  0x22   : > { %685 = vbcast.lane.b32.xlu0 %v683_v15, 256 }
  0x23   : > { %556 = vbcast.lane.b32.xlu1 %v554_v14, 256 }
  0x26   : > { %563 = vbcast.lane.b32.xlu0 %v561_v16, 256 }
  0x2a   : > { %603 = vperm.xlu0 %8363, %v550_v17  }
  0x8c   : > { %v629_v20 = vpop.permute.xlu0 %628 }
  0x8d   : > { %v635_v21 = vmul.f32 %v629_v20, %v8754_v18  ;;  %v636_v22 = vmul.f32 %v8758_v19, %v629_v20 }
  0x8f   : > { %v651_v23 = vsel %vm13958_vm0, %v635_v21, 0.0  ;;  %v658_v24 = vsel %vm13958_vm0, %v636_v22, 0.0 }
  0x90   : > { %v652_v26 = vrot.slane %v651_v23, 4  ;;  %v659_v27 = vrot.slane %v658_v24, 4  ;;  %v622_v28 = vpop.permute.xlu0 %621 }
  0x91   : > { %v633_v29 = vmul.f32 %v622_v28, %v8754_v18  ;;  %v634_v30 = vmul.f32 %v8758_v19, %v622_v28 }
  0x92   : > { %v668_v25 = vpop.permute.xlu1 %667  ;;  %v653_v31 = vadd.f32 %v652_v26, %v651_v23  ;;  %v660_v32 = vadd.f32 %v659_v27, %v658_v24 }
  0x93   : > { %v637_v33 = vsel %vm13958_vm0, %v633_v29, 0.0  ;;  %v644_v34 = vsel %vm13958_vm0, %v634_v30, 0.0  ;;  %v669_v46 = vrot.slane %v668_v25, 1 }
  0x94   : > { %v654_v35 = vrot.slane %v653_v31, 2  ;;  %v661_v36 = vrot.slane %v660_v32, 2  ;;  %v638_v37 = vrot.slane %v637_v33, 4  ;;  %v645_v38 = vrot.slane %v644_v34, 4  ;;  %v8776_v44 = vpop.permute.xlu0 %685 }
  0x96   : > { %v8768_v39 = vpop.permute.xlu1 %728  ;;  %v655_v40 = vadd.f32 %v654_v35, %v653_v31  ;;  %v662_v41 = vadd.f32 %v661_v36, %v660_v32  ;;  %v639_v42 = vadd.f32 %v638_v37, %v637_v33  ;;  %v646_v43 = vadd.f32 %v645_v38, %v644_v34 }
  0x98   : > { %v663_v45 = vrot.slane %v662_v41, 1  ;;  %v640_v47 = vrot.slane %v639_v42, 2  ;;  %v647_v48 = vrot.slane %v646_v43, 2  ;;  %v656_v49 = vrot.slane %v655_v40, 1  ;;  %v564_v60 = vpop.permute.xlu0 %563 }
  0x99   : > { %v570_v1 = vmul.f32 %v564_v60, %v547_v50  ;;  %v571_v2 = vmul.f32 %v8783_v58, %v564_v60 }
  0x9a   : > { %v664_v51 = vadd.f32 %v663_v45, %v662_v41  ;;  %v641_v52 = vadd.f32 %v640_v47, %v639_v42  ;;  %v648_v53 = vadd.f32 %v647_v48, %v646_v43  ;;  %v8779_v54 = vpop.permute.xlu1 %692  ;;  %v657_v59 = vadd.f32 %v656_v49, %v655_v40 }
  0x9b   : > { %v587_v10 = vsel %vm13958_vm0, %v570_v1, 0.0  ;;  %v594_v11 = vsel %vm13958_vm0, %v571_v2, 0.0  ;;  %v697_v45 = vmul.f32 %v8779_v54, %v8758_v19 }
  0x9c   : > { %v8781_v55 = vadd.f32 %v669_v46, %v664_v51  ;;  %v642_v56 = vrot.slane %v641_v52, 1  ;;  %v649_v57 = vrot.slane %v648_v53, 1  ;;  %v674_v5 = vadd.f32 %v669_v46, %v657_v59 }
  0x9d   : > { %v588_v13 = vrot.slane %v587_v10, 4  ;;  %v595_v14 = vrot.slane %v594_v11, 4 }
  0x9e   : > { %v650_v61 = vadd.f32 %v649_v57, %v648_v53  ;;  %v643_v62 = vadd.f32 %v642_v56, %v641_v52  ;;  %v740_v63 = vrot.slane %v8781_v55, 7  ;;  %v557_v6 = vpop.permute.xlu1 %556  ;;  %v748_v17 = vrot.slane %v674_v5, 7 }
  0x9f   : > { %v568_v15 = vmul.f32 %v557_v6, %v547_v50  ;;  %v569_v16 = vmul.f32 %v8783_v58, %v557_v6  ;;  %v589_v20 = vadd.f32 %v588_v13, %v587_v10  ;;  %v596_v21 = vadd.f32 %v595_v14, %v594_v11 }
  0xa0   : > { %v8786_v0 = vadd.f32 %v668_v25, %v650_v61  ;;  %v672_v12 = vadd.f32 %v668_v25, %v643_v62  ;;  %v719_v53 = vsel %vm13958_vm0, %v697_v45, 0.0  ;;  %v695_v61 = vmul.f32 %v8776_v44, %v8758_v19 }
  0xa1   : > { %v573_v22 = vsel %vm13958_vm0, %v568_v15, 0.0  ;;  %v580_v23 = vsel %vm13958_vm0, %v569_v16, 0.0  ;;  %v590_v27 = vrot.slane %v589_v20, 2  ;;  %v597_v28 = vrot.slane %v596_v21, 2 }
  0xa2   : > { %v8791_v9 = vsel %vm741_vm1, %v740_v63, %v8786_v0  ;;  %v8803_v24 = vsel %vm741_vm1, %v748_v17, %v672_v12  ;;  %v574_v25 = vrot.slane %v573_v22, 4  ;;  %v581_v26 = vrot.slane %v580_v23, 4 }
  0xa3   : > { %868 = vrot.lane.b32.xlu0 %v8791_v9, %s8589_s29  ;;  %743 = vrot.lane.b32.xlu1 %v8791_v9, %s8590_s30  ;;  %v591_v32 = vadd.f32 %v590_v27, %v589_v20  ;;  %v598_v33 = vadd.f32 %v597_v28, %v596_v21  ;;  %v720_v2 = vrot.slane %v719_v53, 4  ;;  %v696_v19 = vmul.f32 %v8779_v54, %v8754_v18 }
  0xa4   : > { %v575_v29 = vadd.f32 %v574_v25, %v573_v22  ;;  %v582_v30 = vadd.f32 %v581_v26, %v580_v23  ;;  %v730_v27 = vrot.slane %v8768_v39, 1 }
  0xa5   : > { %v604_v31 = vpop.permute.xlu0 %603  ;;  %v592_v36 = vrot.slane %v591_v32, 1  ;;  %v599_v37 = vrot.slane %v598_v33, 1  ;;  %v721_v6 = vadd.f32 %v720_v2, %v719_v53  ;;  %v712_v11 = vsel %vm13958_vm0, %v696_v19, 0.0  ;;  %v737_v53 = vld [vmem:[%s14181_s2] ss:$8 sm:$0x3] }
  0xa6   : > { %v576_v34 = vrot.slane %v575_v29, 2  ;;  %v583_v35 = vrot.slane %v582_v30, 2  ;;  %v605_v38 = vrot.slane %v604_v31, 1  ;;  %v713_v13 = vrot.slane %v712_v11, 4 }
  0xa7   : > { %982 = vrot.lane.b32.xlu0 %v8791_v9, %s8591_s0  ;;  %750 = vrot.lane.b32.xlu1 %v8803_v24, %s8590_s30  ;;  %v593_v42 = vadd.f32 %v592_v36, %v591_v32  ;;  %v600_v43 = vadd.f32 %v599_v37, %v598_v33  ;;  %v722_v54 = vrot.slane %v721_v6, 2  ;;  %v8077_v2 = vld [vmem:[%s14181_s2 + $0x2] ss:$8 sm:$0x3] }
  0xa8   : > { %v577_v40 = vadd.f32 %v576_v34, %v575_v29  ;;  %v584_v41 = vadd.f32 %v583_v35, %v582_v30  ;;  %v714_v17 = vadd.f32 %v713_v13, %v712_v11 }
  0xa9   : > { %v8817_v48 = vadd.f32 %v605_v38, %v593_v42  ;;  %v8819_v49 = vadd.f32 %v605_v38, %v600_v43  ;;  %v723_v16 = vadd.f32 %v722_v54, %v721_v6  ;;  %v8078_v6 = vld [vmem:[%s14181_s2 + $0x3] ss:$8 sm:$0x3]  ;;  %v8079_v54 = vld [vmem:[%s14181_s2 + $0x4] ss:$8 sm:$0x3] }
  0xaa   : > { %v578_v46 = vrot.slane %v577_v40, 1  ;;  %v585_v47 = vrot.slane %v584_v41, 1  ;;  %v715_v21 = vrot.slane %v714_v17, 2 }
  0xab   : > { %1096 = vrot.lane.b32.xlu0 %v8791_v9, %s8592_s17  ;;  %871 = vrot.lane.b32.xlu1 %v8803_v24, %s8589_s29  ;;  %v2122_v52 = vmul.f32 %v674_v5, %v8817_v48  ;;  %v2123_v59 = vmul.f32 %v8781_v55, %v8819_v49 }
  0xac   : > { %v579_v50 = vadd.f32 %v578_v46, %v577_v40  ;;  %v586_v51 = vadd.f32 %v585_v47, %v584_v41  ;;  %v716_v26 = vadd.f32 %v715_v21, %v714_v17  ;;  %v9005_v17 = vrot.slane %v8077_v2, %v8724_v7 }
  0xad   : > { %v2128_v60 = vrot.slane %v2122_v52, 7  ;;  %v2130_v1 = vrot.slane %v2123_v59, 7 }
  0xae   : > { %v8825_v56 = vadd.f32 %v604_v31, %v579_v50  ;;  %v8827_v57 = vadd.f32 %v604_v31, %v586_v51  ;;  %v717_v31 = vrot.slane %v716_v26, 1  ;;  %14184 = vst [vmem:[#allocation9_spill] sm:$0xff] %v9005_v17 }
  0xaf   : > { %1210 = vrot.lane.b32.xlu0 %v8791_v9, %s8593_s18  ;;  %985 = vrot.lane.b32.xlu1 %v8803_v24, %s8591_s0 }
  0xb0   : > { %v2120_v62 = vmul.f32 %v672_v12, %v8825_v56  ;;  %v2121_v63 = vmul.f32 %v8786_v0, %v8827_v57  ;;  %v705_v0 = vsel %vm13958_vm0, %v695_v61, 0.0  ;;  %v694_v12 = vmul.f32 %v8776_v44, %v8754_v18 }
  0xb1   : > { %v706_v10 = vrot.slane %v705_v0, 4  ;;  %v724_v44 = vrot.slane %v723_v16, 1  ;;  %v718_v35 = vadd.f32 %v717_v31, %v716_v26 }
  0xb2   : > { %v8843_v55 = vsel %vm741_vm1, %v2128_v60, %v2120_v62  ;;  %v8846_v5 = vsel %vm741_vm1, %v2130_v1, %v2121_v63  ;;  %v698_v15 = vsel %vm13958_vm0, %v694_v12, 0.0  ;;  %v8076_v62 = vld [vmem:[%s14181_s2 + $0x1] ss:$8 sm:$0x3]  ;;  %v8973_v63 = vrot.slane %v737_v53, %v8727_v8 }
  0xb3   : > { %1324 = vrot.lane.b32.xlu0 %v8791_v9, %s8594_s19  ;;  %1099 = vrot.lane.b32.xlu1 %v8803_v24, %s8592_s17  ;;  %v707_v14 = vadd.f32 %v706_v10, %v705_v0  ;;  %v699_v18 = vrot.slane %v698_v15, 4  ;;  %v725_v25 = vadd.f32 %v724_v44, %v723_v16  ;;  %v735_v40 = vadd.f32 %v730_v27, %v718_v35 }
  0xb4   : > { %v2141_v46 = vsel %vm792_vm2, %v8846_v5, 0.0  ;;  %v8976_v1 = vrot.slane %v737_v53, %v8724_v7  ;;  %v8982_v0 = vrot.slane %v8076_v62, %v8727_v8  ;;  %v8992_v12 = vrot.slane %v8076_v62, %v8724_v7 }
  0xb5   : > { %v708_v20 = vrot.slane %v707_v14, 2  ;;  %v700_v23 = vadd.f32 %v699_v18, %v698_v15  ;;  %v736_v30 = vadd.f32 %v730_v27, %v725_v25  ;;  %v830_v42 = vrot.slane %v735_v40, 7 }
  0xb6   : > { %v2142_v50 = vrot.slane %v2141_v46, 4  ;;  %v9002_v16 = vrot.slane %v8077_v2, %v8727_v8  ;;  %v9011_v18 = vrot.slane %v8078_v6, %v8727_v8  ;;  %v9014_v44 = vrot.slane %v8078_v6, %v8724_v7 }
  0xb7   : > { %1438 = vrot.lane.b32.xlu0 %v8791_v9, %s13911_s20  ;;  %1213 = vrot.lane.b32.xlu1 %v8803_v24, %s8593_s18  ;;  %v709_v22 = vadd.f32 %v708_v20, %v707_v14  ;;  %v701_v29 = vrot.slane %v700_v23, 2  ;;  %v823_v34 = vrot.slane %v736_v30, 7  ;;  %v8080_v20 = vld [vmem:[%s14181_s2 + $0x5] ss:$8 sm:$0x3]  ;;  %v9017_v27 = vrot.slane %v8079_v54, %v8727_v8 }
  0xb8   : > { %v2143_v52 = vadd.f32 %v2142_v50, %v2141_v46  ;;  %14183 = vst [vmem:[#allocation8_spill] sm:$0xff] %v9002_v16  ;;  %14185 = vst [vmem:[#allocation10_spill] sm:$0xff] %v9011_v18  ;;  %v9027_v31 = vrot.slane %v8080_v20, %v8727_v8  ;;  %vm2312_vm0 = vcmask 1031168  }
  0xb9   : > { %v710_v28 = vrot.slane %v709_v22, 1  ;;  %v702_v33 = vadd.f32 %v701_v29, %v700_v23  ;;  %14186 = vst [vmem:[#allocation11_spill] sm:$0xff] %v9014_v44  ;;  %14187 = vst [vmem:[#allocation12_spill] sm:$0xff] %v9017_v27 }
  0xba   : > { %v2144_v60 = vrot.slane %v2143_v52, 2  ;;  %14189 = vst [vmem:[#allocation14_spill] sm:$0xff] %v9027_v31 }
  0xbb   : > { %1552 = vrot.lane.b32.xlu0 %v8791_v9, %s13915_s22  ;;  %1327 = vrot.lane.b32.xlu1 %v8803_v24, %s8594_s19  ;;  %v711_v32 = vadd.f32 %v710_v28, %v709_v22  ;;  %v703_v37 = vrot.slane %v702_v33, 1  ;;  %v9020_v28 = vrot.slane %v8079_v54, %v8724_v7 }
  0xbc   : > { %v2145_v5 = vadd.f32 %v2144_v60, %v2143_v52 }
  0xbd   : > { %v734_v36 = vadd.f32 %v8768_v39, %v711_v32  ;;  %v704_v41 = vadd.f32 %v703_v37, %v702_v33  ;;  %14188 = vst [vmem:[#allocation13_spill] sm:$0xff] %v9020_v28  ;;  %v9030_v32 = vrot.slane %v8080_v20, %v8724_v7 }
  0xbe   : > { %v2146_v22 = vrot.slane %v2145_v5, 1 }
  0xbf   : > { %1666 = vrot.lane.b32.xlu0 %v8791_v9, %s13899_s25  ;;  %1441 = vrot.lane.b32.xlu1 %v8803_v24, %s13911_s20  ;;  %v8888_v38 = vsel %vm741_vm1, %v823_v34, %v734_v36  ;;  %v733_v43 = vadd.f32 %v8768_v39, %v704_v41  ;;  %v2134_v39 = vsel %vm792_vm2, %v8843_v55, 0.0  ;;  %14190 = vst [vmem:[#allocation15_spill] sm:$0xff] %v9030_v32 }
  0xc0   : > { %14179 = vst [vmem:[#allocation6_spill] sm:$0xff] %v8888_v38  ;;  %v2135_v47 = vrot.slane %v2134_v39, 4 }
  0xc1   : > { %v8900_v45 = vsel %vm741_vm1, %v830_v42, %v733_v43  ;;  %v9042_v42 = vadd.f32 %v2146_v22, %v2145_v5 }
  0xc2   : > { %14180 = vst [vmem:[#allocation7_spill] sm:$0xff] %v8900_v45  ;;  %v2136_v51 = vadd.f32 %v2135_v47, %v2134_v39 }
  0xc3   : > { %1780 = vrot.lane.b32.xlu0 %v8791_v9, %s8598_s26  ;;  %1555 = vrot.lane.b32.xlu1 %v8803_v24, %s13915_s22 }
  0xc4   : > { %v2137_v59 = vrot.slane %v2136_v51, 2 }
  0xc6   : > { %v2138_v55 = vadd.f32 %v2137_v59, %v2136_v51 }
  0xc7   : > { %1894 = vrot.lane.b32.xlu0 %v8791_v9, %s13901_s24  ;;  %1669 = vrot.lane.b32.xlu1 %v8803_v24, %s13899_s25  ;;  %s13905_s25 = smov 126  }
  0xc8   : > { %v2139_v21 = vrot.slane %v2138_v55, 1 }
  0xca   : > { %v9040_v41 = vadd.f32 %v2139_v21, %v2138_v55 }
  0xcb   : > { %2008 = vrot.lane.b32.xlu0 %v8791_v9, %s13917_s15  ;;  %1783 = vrot.lane.b32.xlu1 %v8803_v24, %s8598_s26 }
  0xcf   : > { %2194 = vrot.lane.b32.xlu0 %v8803_v24, %s13903_s27  ;;  %1897 = vrot.lane.b32.xlu1 %v8803_v24, %s13901_s24  ;;  %s8603_s24 = smov 114  }
  0xd3   : > { %2308 = vrot.lane.b32.xlu0 %v8803_v24, %s13905_s25  ;;  %2011 = vrot.lane.b32.xlu1 %v8803_v24, %s13917_s15 }
  0xd7   : > { %825 = vrot.lane.b32.xlu0 %v8888_v38, %s8590_s30  ;;  %2196 = vrot.lane.b32.xlu1 %v8791_v9, %s13903_s27  ;;  %s14165_s27 = smov 113  }
  0xdb   : > { %2422 = vrot.lane.b32.xlu0 %v8803_v24, %s8603_s24  ;;  %2310 = vrot.lane.b32.xlu1 %v8791_v9, %s13905_s25  ;;  %s14133_s25 = smov 112  }
  0xdf   : > { %943 = vrot.lane.b32.xlu0 %v8888_v38, %s8589_s29  ;;  %832 = vrot.lane.b32.xlu1 %v8900_v45, %s8590_s30  ;;  %s13913_s30 = smov 111  }
  0xe3   : > { %2536 = vrot.lane.b32.xlu0 %v8803_v24, %s14165_s27  ;;  %2424 = vrot.lane.b32.xlu1 %v8791_v9, %s8603_s24 }
  0xe7   : > { %1057 = vrot.lane.b32.xlu0 %v8888_v38, %s8591_s0  ;;  %946 = vrot.lane.b32.xlu1 %v8900_v45, %s8589_s29  ;;  %s13907_s29 = smov 110  }
  0xeb   : > { %2650 = vrot.lane.b32.xlu0 %v8803_v24, %s14133_s25  ;;  %2538 = vrot.lane.b32.xlu1 %v8791_v9, %s14165_s27 }
  0xef   : > { %1171 = vrot.lane.b32.xlu0 %v8888_v38, %s8592_s17  ;;  %1060 = vrot.lane.b32.xlu1 %v8900_v45, %s8591_s0  ;;  %s13909_s0 = smov 98  }
  0xf3   : > { %2764 = vrot.lane.b32.xlu0 %v8803_v24, %s13913_s30  ;;  %2652 = vrot.lane.b32.xlu1 %v8791_v9, %s14133_s25 }
  0xf7   : > { %1285 = vrot.lane.b32.xlu0 %v8888_v38, %s8593_s18  ;;  %1174 = vrot.lane.b32.xlu1 %v8900_v45, %s8592_s17  ;;  %s8609_s17 = smov 97  }
  0xfb   : > { %2878 = vrot.lane.b32.xlu0 %v8803_v24, %s13907_s29  ;;  %2766 = vrot.lane.b32.xlu1 %v8791_v9, %s13913_s30  ;;  %s14192_s30 = smov 127  }
  0xff   : > { %1399 = vrot.lane.b32.xlu0 %v8888_v38, %s8594_s19  ;;  %1288 = vrot.lane.b32.xlu1 %v8900_v45, %s8593_s18  ;;  %s8610_s18 = smov 96  }
 0x103   : > { %2992 = vrot.lane.b32.xlu0 %v8803_v24, %s13909_s0  ;;  %2880 = vrot.lane.b32.xlu1 %v8791_v9, %s13907_s29  ;;  %s13919_s29 = smov 94  }
 0x107   : > { %1513 = vrot.lane.b32.xlu0 %v8888_v38, %s13911_s20  ;;  %1402 = vrot.lane.b32.xlu1 %v8900_v45, %s8594_s19  ;;  %s14191_s19 = smov 2  }
 0x10b   : > { %3106 = vrot.lane.b32.xlu0 %v8803_v24, %s8609_s17  ;;  %2994 = vrot.lane.b32.xlu1 %v8791_v9, %s13909_s0  ;;  %s14182_s0 = smov 15  }
 0x10f   : > { %1627 = vrot.lane.b32.xlu0 %v8888_v38, %s13915_s22  ;;  %1516 = vrot.lane.b32.xlu1 %v8900_v45, %s13911_s20 }
 0x113   : > { %3220 = vrot.lane.b32.xlu0 %v8803_v24, %s8610_s18  ;;  %3108 = vrot.lane.b32.xlu1 %v8791_v9, %s8609_s17 }
 0x115   : > { %v744_v61 = vpop.permute.xlu1 %743  ;;  %v869_v13 = vpop.permute.xlu0 %868 }
 0x117   : > { %1741 = vrot.lane.b32.xlu0 %v8888_v38, %s14182_s0  ;;  %1630 = vrot.lane.b32.xlu1 %v8900_v45, %s13915_s22  ;;  %s8611_s22 = smov 95  }
 0x119   : > { %v751_v19 = vpop.permute.xlu1 %750  ;;  %v983_v43 = vpop.permute.xlu0 %982 }
 0x11a   : > { %v753_v10 = vsel %vm752_vm3, %v751_v19, %v744_v61  ;;  %v756_v11 = vsel %vm752_vm3, %v744_v61, %v751_v19 }
 0x11b   : > { %3334 = vrot.lane.b32.xlu0 %v8803_v24, %s8611_s22  ;;  %v768_v14 = vmul.f32 %v8973_v63, %v756_v11  ;;  %v769_v15 = vmul.f32 %v8976_v1, %v753_v10  ;;  %3222 = vrot.lane.b32.xlu1 %v8791_v9, %s8610_s18 }
 0x11d   : > { %v772_v23 = vrot.slane %v768_v14, 1  ;;  %v773_v25 = vrot.slane %v769_v15, 1  ;;  %v872_v26 = vpop.permute.xlu1 %871  ;;  %v778_v37 = vmul.f32 %v768_v14, %v8825_v56  ;;  %v779_v40 = vmul.f32 %v769_v15, %v8827_v57 }
 0x11e   : > { %v874_v29 = vsel %vm873_vm4, %v872_v26, %v869_v13  ;;  %v877_v30 = vsel %vm873_vm4, %v869_v13, %v872_v26 }
 0x11f   : > { %1855 = vrot.lane.b32.xlu0 %v8888_v38, %s8598_s26  ;;  %v780_v33 = vmul.f32 %v772_v23, %v8817_v48  ;;  %v781_v34 = vmul.f32 %v773_v25, %v8819_v49  ;;  %v889_v35 = vmul.f32 %v8982_v0, %v877_v30  ;;  %v890_v36 = vmul.f32 %v8992_v12, %v874_v29 }
 0x120   : > { %1744 = vrot.lane.b32.xlu1 %v8900_v45, %s14182_s0 }
 0x121   : > { %v786_v39 = vrot.slane %v780_v33, 7  ;;  %v788_v46 = vrot.slane %v781_v34, 7  ;;  %v893_v47 = vrot.slane %v889_v35, 1  ;;  %v894_v50 = vrot.slane %v890_v36, 1  ;;  %v986_v51 = vpop.permute.xlu1 %985 }
 0x122   : > { %v899_v52 = vmul.f32 %v889_v35, %v8825_v56  ;;  %v900_v53 = vmul.f32 %v890_v36, %v8827_v57  ;;  %v988_v59 = vsel %vm987_vm5, %v986_v51, %v983_v43  ;;  %v991_v60 = vsel %vm987_vm5, %v983_v43, %v986_v51 }
 0x123   : > { %3448 = vrot.lane.b32.xlu0 %v8803_v24, %s13919_s29  ;;  %v787_v61 = vsel %vm741_vm1, %v786_v39, %v778_v37  ;;  %v789_v62 = vsel %vm741_vm1, %v788_v46, %v779_v40  ;;  %v901_v2 = vmul.f32 %v893_v47, %v8817_v48  ;;  %v902_v55 = vmul.f32 %v894_v50, %v8819_v49  ;;  %v1097_v40 = vpop.permute.xlu0 %1096 }
 0x124   : > { %3336 = vrot.lane.b32.xlu1 %v8791_v9, %s8611_s22  ;;  %v793_v5 = vsel %vm792_vm2, %v787_v61, 0.0  ;;  %v800_v19 = vsel %vm792_vm2, %v789_v62, 0.0  ;;  %v1003_v6 = vmul.f32 %v9002_v16, %v991_v60  ;;  %v1004_v10 = vmul.f32 %v9005_v17, %v988_v59 }
 0x125   : > { %v794_v24 = vrot.slane %v793_v5, 4  ;;  %v801_v11 = vrot.slane %v800_v19, 4  ;;  %v907_v54 = vrot.slane %v901_v2, 7  ;;  %v909_v13 = vrot.slane %v902_v55, 7  ;;  %v1100_v29 = vpop.permute.xlu1 %1099 }
 0x126   : > { %v1007_v14 = vrot.slane %v1003_v6, 1  ;;  %v1008_v15 = vrot.slane %v1004_v10, 1  ;;  %v1013_v20 = vmul.f32 %v1003_v6, %v8825_v56  ;;  %v1014_v21 = vmul.f32 %v1004_v10, %v8827_v57 }
 0x127   : > { %1969 = vrot.lane.b32.xlu0 %v8888_v38, %s14191_s19  ;;  %v795_v22 = vadd.f32 %v794_v24, %v793_v5  ;;  %v802_v23 = vadd.f32 %v801_v11, %v800_v19  ;;  %v908_v25 = vsel %vm741_vm1, %v907_v54, %v899_v52  ;;  %v910_v26 = vsel %vm741_vm1, %v909_v13, %v900_v53  ;;  %v8081_v5 = vld [vmem:[%s14181_s2 + $0x6] ss:$8 sm:$0x3] }
 0x128   : > { %1858 = vrot.lane.b32.xlu1 %v8900_v45, %s8598_s26  ;;  %v913_v30 = vsel %vm792_vm2, %v908_v25, 0.0  ;;  %v920_v33 = vsel %vm792_vm2, %v910_v26, 0.0  ;;  %v1015_v34 = vmul.f32 %v1007_v14, %v8817_v48  ;;  %v1016_v35 = vmul.f32 %v1008_v15, %v8819_v49  ;;  %s14212_s26 = smov 98  }
 0x129   : > { %v796_v36 = vrot.slane %v795_v22, 2  ;;  %v803_v37 = vrot.slane %v802_v23, 2  ;;  %v914_v43 = vrot.slane %v913_v30, 4  ;;  %v921_v39 = vrot.slane %v920_v33, 4 }
 0x12a   : > { %v1021_v46 = vrot.slane %v1015_v34, 7  ;;  %v1023_v47 = vrot.slane %v1016_v35, 7  ;;  %v1102_v50 = vsel %vm1101_vm6, %v1100_v29, %v1097_v40  ;;  %v1105_v51 = vsel %vm1101_vm6, %v1097_v40, %v1100_v29 }
 0x12b   : > { %2083 = vrot.lane.b32.xlu0 %v8888_v38, %s13917_s15  ;;  %v797_v52 = vadd.f32 %v796_v36, %v795_v22  ;;  %v804_v53 = vadd.f32 %v803_v37, %v802_v23  ;;  %v915_v59 = vadd.f32 %v914_v43, %v913_v30  ;;  %v922_v60 = vadd.f32 %v921_v39, %v920_v33 }
 0x12c   : > { %3450 = vrot.lane.b32.xlu1 %v8791_v9, %s13919_s29  ;;  %v1022_v61 = vsel %vm741_vm1, %v1021_v46, %v1013_v20  ;;  %v1024_v62 = vsel %vm741_vm1, %v1023_v47, %v1014_v21  ;;  %v1117_v2 = vmul.f32 %v9011_v18, %v1105_v51  ;;  %v1118_v55 = vmul.f32 %v9014_v44, %v1102_v50  ;;  %s14384_s29 = smov 1  }
 0x12d   : > { %v798_v19 = vrot.slane %v797_v52, 1  ;;  %v805_v6 = vrot.slane %v804_v53, 1  ;;  %v916_v10 = vrot.slane %v915_v59, 2  ;;  %v923_v24 = vrot.slane %v922_v60, 2 }
 0x12e   : > { %v1027_v11 = vsel %vm792_vm2, %v1022_v61, 0.0  ;;  %v1034_v9 = vsel %vm792_vm2, %v1024_v62, 0.0  ;;  %v1121_v54 = vrot.slane %v1117_v2, 1  ;;  %v1122_v13 = vrot.slane %v1118_v55, 1 }
 0x12f   : > { %2269 = vrot.lane.b32.xlu0 %v8900_v45, %s14192_s30  ;;  %v917_v14 = vadd.f32 %v916_v10, %v915_v59  ;;  %v924_v15 = vadd.f32 %v923_v24, %v922_v60  ;;  %v9092_v20 = vmul.f32 32.0, %v9040_v41  ;;  %v9095_v21 = vmul.f32 32.0, %v9042_v42  ;;  %v8082_v42 = vld [vmem:[%s14181_s2 + $0x7] ss:$8 sm:$0x3] }
 0x130   : > { %1972 = vrot.lane.b32.xlu1 %v8900_v45, %s14191_s19  ;;  %v1028_v22 = vrot.slane %v1027_v11, 4  ;;  %v1035_v23 = vrot.slane %v1034_v9, 4  ;;  %v9098_v25 = vrot.slane %v8081_v5, %v8727_v8  ;;  %v9101_v26 = vrot.slane %v8081_v5, %v8724_v7  ;;  %s14197_s19 = smov 126  }
 0x131   : > { %14193 = vst [vmem:[#allocation16_spill] sm:$0xff] %v9092_v20  ;;  %14194 = vst [vmem:[#allocation17_spill] sm:$0xff] %v9095_v21  ;;  %v799_v29 = vadd.f32 %v798_v19, %v797_v52  ;;  %v806_v30 = vadd.f32 %v805_v6, %v804_v53  ;;  %v918_v33 = vrot.slane %v917_v14, 1  ;;  %v925_v34 = vrot.slane %v924_v15, 1  ;;  %v1214_v19 = vpop.permute.xlu1 %1213 }
 0x132   : > { %14195 = vst [vmem:[#allocation18_spill] sm:$0xff] %v9098_v25  ;;  %14196 = vst [vmem:[#allocation19_spill] sm:$0xff] %v9101_v26  ;;  %v1029_v35 = vadd.f32 %v1028_v22, %v1027_v11  ;;  %v1036_v36 = vadd.f32 %v1035_v23, %v1034_v9  ;;  %v1129_v41 = vmul.f32 %v1121_v54, %v8817_v48  ;;  %v8083_v6 = vld [vmem:[%s14181_s2 + $0x10] ss:$8 sm:$0x3] }
 0x133   : > { %v1130_v37 = vmul.f32 %v1122_v13, %v8819_v49  ;;  %2383 = vrot.lane.b32.xlu0 %v8900_v45, %s14197_s19  ;;  %v919_v40 = vadd.f32 %v918_v33, %v917_v14  ;;  %v926_v43 = vadd.f32 %v925_v34, %v924_v15  ;;  %v1127_v39 = vmul.f32 %v1117_v2, %v8825_v56  ;;  %v1211_v13 = vpop.permute.xlu0 %1210  ;;  %v8084_v23 = vld [vmem:[%s14181_s2 + $0x11] ss:$8 sm:$0x3] }
 0x134   : > { %v1128_v46 = vmul.f32 %v1118_v55, %v8827_v57  ;;  %2086 = vrot.lane.b32.xlu1 %v8900_v45, %s13917_s15  ;;  %v1030_v47 = vrot.slane %v1029_v35, 2  ;;  %v1037_v50 = vrot.slane %v1036_v36, 2  ;;  %v1135_v51 = vrot.slane %v1129_v41, 7 }
 0x135   : > { %v1137_v52 = vrot.slane %v1130_v37, 7  ;;  %v9114_v53 = vmul.f32 32.0, %v799_v29  ;;  %v927_v59 = vmul.f32 32.0, %v919_v40  ;;  %v9116_v60 = vmul.f32 32.0, %v926_v43 }
 0x136   : > { %v9119_v61 = vrot.slane %v8082_v42, %v8727_v8  ;;  %v1031_v62 = vadd.f32 %v1030_v47, %v1029_v35  ;;  %v1038_v2 = vadd.f32 %v1037_v50, %v1036_v36  ;;  %v1136_v55 = vsel %vm741_vm1, %v1135_v51, %v1127_v39  ;;  %v8086_v47 = vld [vmem:[%s14181_s2 + $0x13] ss:$8 sm:$0x3] }
 0x137   : > { %v1138_v5 = vsel %vm741_vm1, %v1137_v52, %v1128_v46  ;;  %2497 = vrot.lane.b32.xlu0 %v8900_v45, %s8603_s24  ;;  %v9128_v10 = vmul.f32 32.0, %v806_v30  ;;  %v1141_v24 = vsel %vm792_vm2, %v1136_v55, 0.0  ;;  %v9133_v9 = vrot.slane %v8082_v42, %v8724_v7  ;;  %v8085_v42 = vld [vmem:[%s14181_s2 + $0x12] ss:$8 sm:$0x3] }
 0x138   : > { %14198 = vst [vmem:[#allocation20_spill] sm:$0xff] %v9119_v61  ;;  %v1148_v11 = vsel %vm792_vm2, %v1138_v5, 0.0  ;;  %2271 = vrot.lane.b32.xlu1 %v8888_v38, %s14192_s30  ;;  %v9138_v54 = vmax.f32 %v9114_v53, %v927_v59  ;;  %v1032_v14 = vrot.slane %v1031_v62, 1  ;;  %v1142_v15 = vrot.slane %v1141_v24, 4 }
 0x139   : > { %14199 = vst [vmem:[#allocation21_spill] sm:$0xff] %v9133_v9  ;;  %v1149_v22 = vrot.slane %v1148_v11, 4  ;;  %v9145_v29 = vmax.f32 %v9128_v10, %v9116_v60  ;;  %v1216_v30 = vsel %vm1215_vm7, %v1214_v19, %v1211_v13  ;;  %v1219_v33 = vsel %vm1215_vm7, %v1211_v13, %v1214_v19  ;;  %v1328_v19 = vpop.permute.xlu1 %1327 }
 0x13a   : > { %v9150_v34 = vrot.slane %v8083_v6, %v8727_v8  ;;  %v1033_v35 = vadd.f32 %v1032_v14, %v1031_v62  ;;  %v1039_v36 = vrot.slane %v1038_v2, 1  ;;  %v1143_v41 = vadd.f32 %v1142_v15, %v1141_v24  ;;  %v1325_v15 = vpop.permute.xlu0 %1324 }
 0x13b   : > { %v1150_v37 = vadd.f32 %v1149_v22, %v1148_v11  ;;  %2611 = vrot.lane.b32.xlu0 %v8900_v45, %s14165_s27  ;;  %v1231_v40 = vmul.f32 %v9017_v27, %v1219_v33  ;;  %v1232_v43 = vmul.f32 %v9020_v28, %v1216_v30  ;;  %v9160_v39 = vrot.slane %v8083_v6, %v8724_v7 }
 0x13c   : > { %14200 = vst [vmem:[#allocation22_spill] sm:$0xff] %v9150_v34  ;;  %2385 = vrot.lane.b32.xlu1 %v8888_v38, %s14197_s19  ;;  %v9165_v46 = vrot.slane %v8084_v23, %v8727_v8  ;;  %v937_v50 = vsub.f32 %v927_v59, %v9138_v54  ;;  %v1144_v51 = vrot.slane %v1143_v41, 2  ;;  %v9172_v62 = vrot.slane %v8084_v23, %v8724_v7  ;;  %s14211_s19 = smov 110  }
 0x13d   : > { %14201 = vst [vmem:[#allocation23_spill] sm:$0xff] %v9160_v39  ;;  %v1151_v52 = vrot.slane %v1150_v37, 2  ;;  %v1235_v55 = vrot.slane %v1231_v40, 1  ;;  %v1236_v5 = vrot.slane %v1232_v43, 1  ;;  %v9175_v6 = vrot.slane %v8085_v42, %v8727_v8 }
 0x13e   : > { %14202 = vst [vmem:[#allocation24_spill] sm:$0xff] %v9165_v46  ;;  %14203 = vst [vmem:[#allocation25_spill] sm:$0xff] %v9172_v62  ;;  %v9178_v24 = vrot.slane %v8085_v42, %v8724_v7  ;;  %v938_v11 = vsub.f32 %v9116_v60, %v9145_v29  ;;  %v1040_v13 = vadd.f32 %v1039_v36, %v1038_v2  ;;  %v9182_v59 = vmul.f32 32.0, %v1033_v35 }
 0x13f   : > { %14204 = vst [vmem:[#allocation26_spill] sm:$0xff] %v9175_v6  ;;  %2725 = vrot.lane.b32.xlu0 %v8900_v45, %s14133_s25  ;;  %v9187_v14 = vrot.slane %v8086_v47, %v8727_v8  ;;  %v1145_v22 = vadd.f32 %v1144_v51, %v1143_v41  ;;  %v1243_v23 = vmul.f32 %v1235_v55, %v8817_v48  ;;  %v939_v2 = vmul.f32 1.442695, %v937_v50  ;;  %v8087_v55 = vld [vmem:[%s14181_s2 + $0x15] ss:$8 sm:$0x3] }
 0x140   : > { %14205 = vst [vmem:[#allocation27_spill] sm:$0xff] %v9178_v24  ;;  %v1244_v30 = vmul.f32 %v1236_v5, %v8819_v49  ;;  %2499 = vrot.lane.b32.xlu1 %v8888_v38, %s8603_s24  ;;  %v9194_v60 = vrot.slane %v8086_v47, %v8724_v7  ;;  %v1152_v33 = vadd.f32 %v1151_v52, %v1150_v37  ;;  %v941_v5 = vmul.f32 1.442695, %v938_v11  ;;  %s14208_s24 = smov 111  }
 0x141   : > { %14206 = vst [vmem:[#allocation28_spill] sm:$0xff] %v9187_v14  ;;  %v1241_v35 = vmul.f32 %v1231_v40, %v8825_v56  ;;  %v1330_v36 = vsel %vm1329_vm8, %v1328_v19, %v1325_v15  ;;  %v1242_v42 = vmul.f32 %v1232_v43, %v8827_v57  ;;  %v1249_v3 = vrot.slane %v1243_v23, 7 }
 0x142   : > { %14207 = vst [vmem:[#allocation29_spill] sm:$0xff] %v9194_v60  ;;  %v1251_v41 = vrot.slane %v1244_v30, 7  ;;  %v1333_v51 = vsel %vm1329_vm8, %v1325_v15, %v1328_v19  ;;  %v9203_v58 = vmul.f32 32.0, %v1040_v13  ;;  %v9207_v37 = vmax.f32 %v9138_v54, %v9182_v59 }
 0x143   : > { %v1345_v40 = vmul.f32 %v9027_v31, %v1333_v51  ;;  %2839 = vrot.lane.b32.xlu0 %v8900_v45, %s14208_s24  ;;  %v1146_v43 = vrot.slane %v1145_v22, 1  ;;  %v1250_v47 = vsel %vm741_vm1, %v1249_v3, %v1241_v35  ;;  %v1346_v52 = vmul.f32 %v9030_v32, %v1330_v36  ;;  %v1442_v51 = vpop.permute.xlu1 %1441 }
 0x144   : > { %v1252_v50 = vsel %vm741_vm1, %v1251_v41, %v1242_v42  ;;  %2613 = vrot.lane.b32.xlu1 %v8888_v38, %s14165_s27  ;;  %v1153_v19 = vrot.slane %v1152_v33, 1  ;;  %v1255_v11 = vsel %vm792_vm2, %v1250_v47, 0.0  ;;  %v9220_v15 = vrot.slane %v8087_v55, %v8727_v8  ;;  %v1439_v47 = vpop.permute.xlu0 %1438 }
 0x145   : > { %v1262_v13 = vsel %vm792_vm2, %v1252_v50, 0.0  ;;  %8366 = vpow2.f32 %v939_v2  ;;  %v1256_v23 = vrot.slane %v1255_v11, 4  ;;  %v9223_v3 = vrot.slane %v8087_v55, %v8724_v7 }
 0x146   : > { %14209 = vst [vmem:[#allocation30_spill] sm:$0xff] %v9220_v15  ;;  %v1263_v30 = vrot.slane %v1262_v13, 4  ;;  %8368 = vpow2.f32 %v941_v5  ;;  %v9227_v35 = vmax.f32 %v9145_v29, %v9203_v58  ;;  %v1349_v36 = vrot.slane %v1345_v40, 1 }
 0x147   : > { %14210 = vst [vmem:[#allocation31_spill] sm:$0xff] %v9223_v3  ;;  %v1350_v42 = vrot.slane %v1346_v52, 1  ;;  %2953 = vrot.lane.b32.xlu0 %v8900_v45, %s14211_s19  ;;  %v1051_v2 = vsub.f32 %v9182_v59, %v9207_v37  ;;  %v1147_v41 = vadd.f32 %v1146_v43, %v1145_v22  ;;  %v1257_v50 = vadd.f32 %v1256_v23, %v1255_v11 }
 0x148   : > { %v1264_v31 = vadd.f32 %v1263_v30, %v1262_v13  ;;  %2727 = vrot.lane.b32.xlu1 %v8888_v38, %s14133_s25  ;;  %v1154_v55 = vadd.f32 %v1153_v19, %v1152_v33  ;;  %v1357_v5 = vmul.f32 %v1349_v36, %v8817_v48  ;;  %v1444_v28 = vsel %vm14027_vm9, %v1442_v51, %v1439_v47 }
 0x149   : > { %v1358_v32 = vmul.f32 %v1350_v42, %v8819_v49  ;;  %v1258_v27 = vrot.slane %v1257_v50, 2  ;;  %v1355_v18 = vmul.f32 %v1345_v40, %v8825_v56  ;;  %v1447_v59 = vsel %vm14027_vm9, %v1439_v47, %v1442_v51 }
 0x14a   : > { %v1265_v44 = vrot.slane %v1264_v31, 2  ;;  %v1356_v22 = vmul.f32 %v1346_v52, %v8827_v57  ;;  %v1363_v43 = vrot.slane %v1357_v5, 7  ;;  %v1459_v13 = vmul.f32 %v9098_v25, %v1447_v59 }
 0x14b   : > { %v1365_v11 = vrot.slane %v1358_v32, 7  ;;  %3067 = vrot.lane.b32.xlu0 %v8900_v45, %s14212_s26  ;;  %v9244_v33 = vmul.f32 32.0, %v1147_v41  ;;  %v1259_v19 = vadd.f32 %v1258_v27, %v1257_v50  ;;  %v1460_v30 = vmul.f32 %v9101_v26, %v1444_v28  ;;  %v1556_v27 = vpop.permute.xlu1 %1555 }
 0x14c   : > { %v1266_v23 = vadd.f32 %v1265_v44, %v1264_v31  ;;  %2841 = vrot.lane.b32.xlu1 %v8888_v38, %s14208_s24  ;;  %v1052_v40 = vsub.f32 %v9203_v58, %v9227_v35  ;;  %v1364_v52 = vsel %vm741_vm1, %v1363_v43, %v1355_v18  ;;  %v1463_v51 = vrot.slane %v1459_v13, 1 }
 0x14d   : > { %v1366_v32 = vsel %vm741_vm1, %v1365_v11, %v1356_v22  ;;  %v1053_v36 = vmul.f32 1.442695, %v1051_v2  ;;  %v1260_v42 = vrot.slane %v1259_v19, 1  ;;  %v1369_v41 = vsel %vm792_vm2, %v1364_v52, 0.0  ;;  %v1553_v2 = vpop.permute.xlu0 %1552 }
 0x14e   : > { %v1267_v47 = vrot.slane %v1266_v23, 1  ;;  %v9254_v44 = vmul.f32 32.0, %v1154_v55  ;;  %v1370_v28 = vrot.slane %v1369_v41, 4  ;;  %v1376_v31 = vsel %vm792_vm2, %v1366_v32, 0.0 }
 0x14f   : > { %v1464_v50 = vrot.slane %v1460_v30, 1  ;;  %3181 = vrot.lane.b32.xlu0 %v8900_v45, %s8609_s17  ;;  %v9261_v58 = vmax.f32 %v9207_v37, %v9244_v33  ;;  %v1261_v18 = vadd.f32 %v1260_v42, %v1259_v19  ;;  %v1377_v5 = vrot.slane %v1376_v31, 4 }
 0x150   : > { %v1469_v59 = vmul.f32 %v1459_v13, %v8825_v56  ;;  %2955 = vrot.lane.b32.xlu1 %v8888_v38, %s14211_s19  ;;  %v1371_v55 = vadd.f32 %v1370_v28, %v1369_v41  ;;  %v1471_v22 = vmul.f32 %v1463_v51, %v8817_v48  ;;  %v1558_v11 = vsel %vm14030_vm10, %v1556_v27, %v1553_v2 }
 0x151   : > { %v1472_v43 = vmul.f32 %v1464_v50, %v8819_v49  ;;  %v1268_v52 = vadd.f32 %v1267_v47, %v1266_v23  ;;  %v1378_v32 = vadd.f32 %v1377_v5, %v1376_v31  ;;  %v1470_v26 = vmul.f32 %v1460_v30, %v8827_v57 }
 0x152   : > { %v1561_v19 = vsel %vm14030_vm10, %v1553_v2, %v1556_v27  ;;  %v9271_v42 = vpop.eup %8366  ;;  %v1372_v13 = vrot.slane %v1371_v55, 2  ;;  %v1477_v25 = vrot.slane %v1471_v22, 7  ;;  %v1055_v28 = vmul.f32 1.442695, %v1052_v40 }
 0x153   : > { %v1479_v17 = vrot.slane %v1472_v43, 7  ;;  %v1573_v41 = vmul.f32 %v9119_v61, %v1561_v19  ;;  %3295 = vrot.lane.b32.xlu0 %v8900_v45, %s8610_s18  ;;  %v9276_v51 = vpop.eup %8368  ;;  %v9280_v23 = vmax.f32 %v9227_v35, %v9254_v44  ;;  %v1379_v30 = vrot.slane %v1378_v32, 2  ;;  %v8088_v40 = vld [vmem:[%s14181_s2 + $0x16] ss:$8 sm:$0x3] }
 0x154   : > { %14213 = vst [vmem:[#allocation32_spill] sm:$0xff] %v9276_v51  ;;  %v1574_v47 = vmul.f32 %v9133_v9, %v1558_v11  ;;  %3069 = vrot.lane.b32.xlu1 %v8888_v38, %s14212_s26  ;;  %v1165_v27 = vsub.f32 %v9244_v33, %v9261_v58  ;;  %v1373_v31 = vadd.f32 %v1372_v13, %v1371_v55  ;;  %v9292_v5 = vmul.f32 32.0, %v1261_v18 }
 0x155   : > { %v1478_v50 = vsel %vm741_vm1, %v1477_v25, %v1469_v59  ;;  %v1480_v2 = vsel %vm741_vm1, %v1479_v17, %v1470_v26  ;;  %v1380_v22 = vadd.f32 %v1379_v30, %v1378_v32  ;;  %v1577_v11 = vrot.slane %v1573_v41, 1  ;;  %v1670_v30 = vpop.permute.xlu1 %1669 }
 0x156   : > { %v1483_v43 = vsel %vm792_vm2, %v1478_v50, 0.0  ;;  %v1270_v19 = vmul.f32 32.0, %v1268_v52  ;;  %v1490_v61 = vsel %vm792_vm2, %v1480_v2, 0.0  ;;  %v1578_v33 = vrot.slane %v1574_v47, 1 }
 0x157   : > { %v1484_v9 = vrot.slane %v1483_v43, 4  ;;  %3409 = vrot.lane.b32.xlu0 %v8900_v45, %s8611_s22  ;;  %8370 = vpow2.f32 %v1053_v36  ;;  %v1374_v17 = vrot.slane %v1373_v31, 1  ;;  %v1491_v25 = vrot.slane %v1490_v61, 4 }
 0x158   : > { %v9299_v26 = vrot.slane %v8088_v40, %v8727_v8  ;;  %3183 = vrot.lane.b32.xlu1 %v8888_v38, %s8609_s17  ;;  %8372 = vpow2.f32 %v1055_v28  ;;  %v1381_v18 = vrot.slane %v1380_v22, 1  ;;  %v9304_v55 = vrot.slane %v8088_v40, %v8724_v7  ;;  %s14218_s17 = smov 94  }
 0x159   : > { %v1485_v59 = vadd.f32 %v1484_v9, %v1483_v43  ;;  %v1166_v52 = vsub.f32 %v9254_v44, %v9280_v23  ;;  %v1167_v32 = vmul.f32 1.442695, %v1165_v27  ;;  %v1492_v13 = vadd.f32 %v1491_v25, %v1490_v61  ;;  %v1667_v27 = vpop.permute.xlu0 %1666 }
 0x15a   : > { %14214 = vst [vmem:[#allocation33_spill] sm:$0xff] %v9299_v26  ;;  %14215 = vst [vmem:[#allocation34_spill] sm:$0xff] %v9304_v55  ;;  %v1585_v36 = vmul.f32 %v1577_v11, %v8817_v48  ;;  %v9311_v50 = vmax.f32 %v9261_v58, %v9292_v5  ;;  %v9314_v2 = vmax.f32 %v9280_v23, %v1270_v19 }
 0x15b   : > { %v1486_v28 = vrot.slane %v1485_v59, 2  ;;  %v1586_v9 = vmul.f32 %v1578_v33, %v8819_v49  ;;  %3523 = vrot.lane.b32.xlu0 %v8900_v45, %s14218_s17  ;;  %v1375_v44 = vadd.f32 %v1374_v17, %v1373_v31  ;;  %v1583_v61 = vmul.f32 %v1573_v41, %v8825_v56 }
 0x15c   : > { %14216 = vst [vmem:[#allocation35_spill] sm:$0xff] %v9311_v50  ;;  %14217 = vst [vmem:[#allocation36_spill] sm:$0xff] %v9314_v2  ;;  %v1584_v40 = vmul.f32 %v1574_v47, %v8827_v57  ;;  %v1591_v43 = vrot.slane %v1585_v36, 7  ;;  %3297 = vrot.lane.b32.xlu1 %v8888_v38, %s8610_s18  ;;  %v1382_v11 = vadd.f32 %v1381_v18, %v1380_v22  ;;  %v1493_v25 = vrot.slane %v1492_v13, 2  ;;  %s14383_s18 = smov 17  }
 0x15d   : > { %v1593_v16 = vrot.slane %v1586_v9, 7  ;;  %v1675_v4 = vsel %vm14034_vm11, %v1667_v27, %v1670_v30  ;;  %v1487_v33 = vadd.f32 %v1486_v28, %v1485_v59  ;;  %v1672_v45 = vsel %vm14034_vm11, %v1670_v30, %v1667_v27 }
 0x15e   : > { %v1592_v51 = vsel %vm741_vm1, %v1591_v43, %v1583_v61  ;;  %v1687_v31 = vmul.f32 %v9150_v34, %v1675_v4  ;;  %v1169_v17 = vmul.f32 1.442695, %v1166_v52  ;;  %v1279_v41 = vsub.f32 %v9292_v5, %v9311_v50  ;;  %v1784_v61 = vpop.permute.xlu1 %1783 }
 0x15f   : > { %v1594_v47 = vsel %vm741_vm1, %v1593_v16, %v1584_v40  ;;  %v1597_v36 = vsel %vm792_vm2, %v1592_v51, 0.0  ;;  %v1280_v22 = vsub.f32 %v1270_v19, %v9314_v2  ;;  %v1383_v18 = vmul.f32 32.0, %v1375_v44 }
 0x160   : > { %v1598_v9 = vrot.slane %v1597_v36, 4  ;;  %v1604_v59 = vsel %vm792_vm2, %v1594_v47, 0.0  ;;  %3411 = vrot.lane.b32.xlu1 %v8888_v38, %s8611_s22  ;;  %v1384_v30 = vmul.f32 32.0, %v1382_v11  ;;  %v1494_v28 = vadd.f32 %v1493_v25, %v1492_v13  ;;  %v1781_v25 = vpop.permute.xlu0 %1780  ;;  %s14382_s22 = smov 16  }
 0x161   : > { %v1605_v4 = vrot.slane %v1604_v59, 4  ;;  %v1688_v52 = vmul.f32 %v9160_v39, %v1672_v45  ;;  %8374 = vpow2.f32 %v1167_v32  ;;  %v1488_v5 = vrot.slane %v1487_v33, 1 }
 0x162   : > { %v1599_v27 = vadd.f32 %v1598_v9, %v1597_v36  ;;  %v1691_v16 = vrot.slane %v1687_v31, 1  ;;  %8376 = vpow2.f32 %v1169_v17  ;;  %v1281_v40 = vmul.f32 1.442695, %v1279_v41 }
 0x163   : > { %v1606_v19 = vadd.f32 %v1605_v4, %v1604_v59  ;;  %v1692_v44 = vrot.slane %v1688_v52, 1  ;;  %v1283_v43 = vmul.f32 1.442695, %v1280_v22  ;;  %v9338_v47 = vmax.f32 %v9311_v50, %v1383_v18 }
 0x164   : > { %v1600_v11 = vrot.slane %v1599_v27, 2  ;;  %3525 = vrot.lane.b32.xlu1 %v8888_v38, %s14218_s17  ;;  %v9342_v45 = vpop.eup %8370  ;;  %v9345_v32 = vmax.f32 %v9314_v2, %v1384_v30  ;;  %v1495_v13 = vrot.slane %v1494_v28, 1  ;;  %v1699_v36 = vmul.f32 %v1691_v16, %v8817_v48  ;;  %s14757_s17 = smov 113  }
 0x165   : > { %14219 = vst [vmem:[#allocation37_spill] sm:$0xff] %v9342_v45  ;;  %v1607_v17 = vrot.slane %v1606_v19, 2  ;;  %v9348_v41 = vpop.eup %8372  ;;  %v1489_v22 = vadd.f32 %v1488_v5, %v1487_v33  ;;  %v1700_v59 = vmul.f32 %v1692_v44, %v8819_v49  ;;  %v1786_v4 = vsel %vm1785_vm12, %v1784_v61, %v1781_v25 }
 0x166   : > { %14220 = vst [vmem:[#allocation38_spill] sm:$0xff] %v9345_v32  ;;  %v1601_v9 = vadd.f32 %v1600_v11, %v1599_v27  ;;  %v1697_v38 = vmul.f32 %v1687_v31, %v8825_v56  ;;  %v1705_v39 = vrot.slane %v1699_v36, 7  ;;  %v1789_v34 = vsel %vm1785_vm12, %v1781_v25, %v1784_v61 }
 0x167   : > { %v1608_v51 = vadd.f32 %v1607_v17, %v1606_v19  ;;  %v1393_v2 = vsub.f32 %v1383_v18, %v9338_v47  ;;  %v1698_v50 = vmul.f32 %v1688_v52, %v8827_v57  ;;  %v1707_v45 = vrot.slane %v1700_v59, 7 }
 0x168   : > { %v1801_v16 = vmul.f32 %v9165_v46, %v1789_v34  ;;  %v1394_v33 = vsub.f32 %v1384_v30, %v9345_v32  ;;  %v1496_v5 = vadd.f32 %v1495_v13, %v1494_v28  ;;  %v1706_v27 = vsel %vm741_vm1, %v1705_v39, %v1697_v38  ;;  %v1898_v28 = vpop.permute.xlu1 %1897 }
 0x169   : > { %v1802_v44 = vmul.f32 %v9172_v62, %v1786_v4  ;;  %v1497_v19 = vmul.f32 32.0, %v1489_v22  ;;  %v1602_v11 = vrot.slane %v1601_v9, 1  ;;  %v1708_v31 = vsel %vm741_vm1, %v1707_v45, %v1698_v50 }
 0x16a   : > { %v1711_v61 = vsel %vm792_vm2, %v1706_v27, 0.0  ;;  %8378 = vpow2.f32 %v1281_v40  ;;  %v1609_v18 = vrot.slane %v1608_v51, 1  ;;  %v1718_v52 = vsel %vm792_vm2, %v1708_v31, 0.0  ;;  %v1895_v40 = vpop.permute.xlu0 %1894 }
 0x16b   : > { %v1712_v25 = vrot.slane %v1711_v61, 4  ;;  %8380 = vpow2.f32 %v1283_v43  ;;  %v1395_v34 = vmul.f32 1.442695, %v1393_v2  ;;  %v1719_v17 = vrot.slane %v1718_v52, 4 }
 0x16c   : > { %v1805_v30 = vrot.slane %v1801_v16, 1  ;;  %v1397_v13 = vmul.f32 1.442695, %v1394_v33  ;;  %v9363_v38 = vmul.f32 32.0, %v1496_v5  ;;  %v1806_v36 = vrot.slane %v1802_v44, 1  ;;  %v2012_v46 = vpop.permute.xlu1 %2011 }
 0x16d   : > { %v1713_v39 = vadd.f32 %v1712_v25, %v1711_v61  ;;  %v9366_v50 = vmax.f32 %v9338_v47, %v1497_v19  ;;  %v1603_v45 = vadd.f32 %v1602_v11, %v1601_v9  ;;  %v1720_v22 = vadd.f32 %v1719_v17, %v1718_v52 }
 0x16e   : > { %v1813_v59 = vmul.f32 %v1805_v30, %v8817_v48  ;;  %v9369_v4 = vpop.eup %8374  ;;  %v1610_v2 = vadd.f32 %v1609_v18, %v1608_v51  ;;  %v1814_v27 = vmul.f32 %v1806_v36, %v8819_v49  ;;  %v1900_v33 = vsel %vm1899_vm13, %v1898_v28, %v1895_v40 }
 0x16f   : > { %14221 = vst [vmem:[#allocation39_spill] sm:$0xff] %v9366_v50  ;;  %v1714_v43 = vrot.slane %v1713_v39, 2  ;;  %v9373_v5 = vpop.eup %8376  ;;  %v1721_v31 = vrot.slane %v1720_v22, 2  ;;  %v1811_v61 = vmul.f32 %v1801_v16, %v8825_v56  ;;  %v1903_v9 = vsel %vm1899_vm13, %v1895_v40, %v1898_v28 }
 0x170   : > { %v1819_v25 = vrot.slane %v1813_v59, 7  ;;  %v1812_v52 = vmul.f32 %v1802_v44, %v8827_v57  ;;  %v1821_v17 = vrot.slane %v1814_v27, 7  ;;  %v1915_v30 = vmul.f32 %v9175_v6, %v1903_v9 }
 0x171   : > { %v1715_v11 = vadd.f32 %v1714_v43, %v1713_v39  ;;  %v9381_v51 = vmax.f32 %v9345_v32, %v9363_v38  ;;  %v1507_v18 = vsub.f32 %v1497_v19, %v9366_v50  ;;  %v1916_v62 = vmul.f32 %v9178_v24, %v1900_v33 }
 0x172   : > { %v1820_v36 = vsel %vm741_vm1, %v1819_v25, %v1811_v61  ;;  %v1611_v16 = vmul.f32 32.0, %v1603_v45  ;;  %v1612_v59 = vmul.f32 32.0, %v1610_v2  ;;  %v1822_v28 = vsel %vm741_vm1, %v1821_v17, %v1812_v52 }
 0x173   : > { %14222 = vst [vmem:[#allocation40_spill] sm:$0xff] %v9381_v51  ;;  %v1825_v39 = vsel %vm792_vm2, %v1820_v36, 0.0  ;;  %v1716_v44 = vrot.slane %v1715_v11, 1  ;;  %v1722_v40 = vadd.f32 %v1721_v31, %v1720_v22  ;;  %v1832_v27 = vsel %vm792_vm2, %v1822_v28, 0.0  ;;  %v2009_v31 = vpop.permute.xlu0 %2008 }
 0x174   : > { %v1826_v43 = vrot.slane %v1825_v39, 4  ;;  %8382 = vpow2.f32 %v1395_v34  ;;  %v1833_v6 = vrot.slane %v1832_v27, 4  ;;  %v1919_v19 = vrot.slane %v1915_v30, 1 }
 0x175   : > { %8384 = vpow2.f32 %v1397_v13  ;;  %v1508_v45 = vsub.f32 %v9363_v38, %v9381_v51  ;;  %v1920_v33 = vrot.slane %v1916_v62, 1  ;;  %v1509_v61 = vmul.f32 1.442695, %v1507_v18 }
 0x176   : > { %v1827_v2 = vadd.f32 %v1826_v43, %v1825_v39  ;;  %v9393_v25 = vmax.f32 %v9366_v50, %v1611_v16  ;;  %v9396_v22 = vmax.f32 %v9381_v51, %v1612_v59  ;;  %v1927_v52 = vmul.f32 %v1919_v19, %v8817_v48 }
 0x177   : > { %v9399_v34 = vpop.eup %8378  ;;  %v1717_v17 = vadd.f32 %v1716_v44, %v1715_v11  ;;  %v1723_v13 = vrot.slane %v1722_v40, 1  ;;  %v1928_v36 = vmul.f32 %v1920_v33, %v8819_v49  ;;  %v2014_v38 = vsel %vm2013_vm14, %v2012_v46, %v2009_v31 }
 0x178   : > { %14223 = vst [vmem:[#allocation41_spill] sm:$0xff] %v9393_v25  ;;  %14224 = vst [vmem:[#allocation42_spill] sm:$0xff] %v9396_v22  ;;  %v9403_v28 = vpop.eup %8380  ;;  %v1834_v18 = vadd.f32 %v1833_v6, %v1832_v27  ;;  %v1925_v39 = vmul.f32 %v1915_v30, %v8825_v56  ;;  %v1933_v43 = vrot.slane %v1927_v52, 7  ;;  %v2017_v9 = vsel %vm2013_vm14, %v2009_v31, %v2012_v46 }
 0x179   : > { %v1828_v24 = vrot.slane %v1827_v2, 2  ;;  %v1926_v19 = vmul.f32 %v1916_v62, %v8827_v57  ;;  %v1935_v51 = vrot.slane %v1928_v36, 7  ;;  %v2029_v50 = vmul.f32 %v9187_v14, %v2017_v9 }
 0x17a   : > { %v1511_v11 = vmul.f32 1.442695, %v1508_v45  ;;  %v1621_v44 = vsub.f32 %v1611_v16, %v9393_v25  ;;  %v1934_v33 = vsel %vm741_vm1, %v1933_v43, %v1925_v39  ;;  %v2030_v32 = vmul.f32 %v9194_v60, %v2014_v38 }
 0x17b   : > { %v1622_v6 = vsub.f32 %v1612_v59, %v9396_v22  ;;  %v1724_v27 = vadd.f32 %v1723_v13, %v1722_v40  ;;  %v1936_v30 = vsel %vm741_vm1, %v1935_v51, %v1926_v19  ;;  %v1939_v46 = vsel %vm792_vm2, %v1934_v33, 0.0  ;;  %v2197_v13 = vpop.permute.xlu1 %2196 }
 0x17c   : > { %v1725_v31 = vmul.f32 32.0, %v1717_v17  ;;  %v1835_v52 = vrot.slane %v1834_v18, 2  ;;  %v1940_v62 = vrot.slane %v1939_v46, 4  ;;  %v1946_v36 = vsel %vm792_vm2, %v1936_v30, 0.0 }
 0x17d   : > { %8386 = vpow2.f32 %v1509_v61  ;;  %v1829_v9 = vadd.f32 %v1828_v24, %v1827_v2  ;;  %v1947_v45 = vrot.slane %v1946_v36, 4  ;;  %v2033_v16 = vrot.slane %v2029_v50, 1  ;;  %v2195_v24 = vpop.permute.xlu0 %2194 }
 0x17e   : > { %v14225_v39 = vsub.f32 -inf, %v9114_v53  ;;  %8388 = vpow2.f32 %v1511_v11  ;;  %v1941_v59 = vadd.f32 %v1940_v62, %v1939_v46  ;;  %v2034_v40 = vrot.slane %v2030_v32, 1 }
 0x17f   : > { %v1623_v51 = vmul.f32 1.442695, %v1621_v44  ;;  %v1625_v38 = vmul.f32 1.442695, %v1622_v6  ;;  %v9420_v19 = vmul.f32 32.0, %v1724_v27  ;;  %v1948_v17 = vadd.f32 %v1947_v45, %v1946_v36 }
 0x180   : > { %v9418_v43 = vmul.f32 1.442695, %v14225_v39  ;;  %v9423_v33 = vmax.f32 %v9393_v25, %v1725_v31  ;;  %v1836_v61 = vadd.f32 %v1835_v52, %v1834_v18  ;;  %v1942_v2 = vrot.slane %v1941_v59, 2 }
 0x181   : > { %v2041_v30 = vmul.f32 %v2033_v16, %v8817_v48  ;;  %v9426_v39 = vpop.eup %8382  ;;  %v1830_v11 = vrot.slane %v1829_v9, 1  ;;  %v1949_v46 = vrot.slane %v1948_v17, 2  ;;  %v2042_v62 = vmul.f32 %v2034_v40, %v8819_v49 }
 0x182   : > { %14226 = vst [vmem:[#allocation43_spill] sm:$0xff] %v9426_v39  ;;  %v2199_v44 = vsel %vm2198_vm15, %v2195_v24, %v2197_v13  ;;  %v9430_v6 = vpop.eup %8384  ;;  %v1943_v27 = vadd.f32 %v1942_v2, %v1941_v59  ;;  %v2039_v36 = vmul.f32 %v2029_v50, %v8825_v56  ;;  %v2203_v18 = vsel %vm2198_vm15, %v2197_v13, %v2195_v24 }
 0x183   : > { %14227 = vst [vmem:[#allocation44_spill] sm:$0xff] %v9430_v6  ;;  %v2047_v45 = vrot.slane %v2041_v30, 7  ;;  %v9436_v52 = vmax.f32 %v9396_v22, %v9420_v19  ;;  %v2040_v16 = vmul.f32 %v2030_v32, %v8827_v57  ;;  %v2049_v60 = vrot.slane %v2042_v62, 7 }
 0x184   : > { %v2215_v14 = vmul.f32 %v9220_v15, %v2199_v44  ;;  %v1735_v40 = vsub.f32 %v1725_v31, %v9423_v33  ;;  %v1837_v25 = vrot.slane %v1836_v61, 1  ;;  %v2216_v59 = vmul.f32 %v9223_v3, %v2203_v18 }
 0x185   : > { %v2048_v6 = vsel %vm741_vm1, %v2047_v45, %v2039_v36  ;;  %v1831_v50 = vadd.f32 %v1830_v11, %v1829_v9  ;;  %v1950_v2 = vadd.f32 %v1949_v46, %v1948_v17  ;;  %v2050_v13 = vsel %vm741_vm1, %v2049_v60, %v2040_v16  ;;  %v2311_v46 = vpop.permute.xlu1 %2310 }
 0x186   : > { %v2053_v24 = vsel %vm792_vm2, %v2048_v6, 0.0  ;;  %8390 = vpow2.f32 %v1623_v51  ;;  %v1944_v30 = vrot.slane %v1943_v27, 1  ;;  %v2060_v32 = vsel %vm792_vm2, %v2050_v13, 0.0 }
 0x187   : > { %v2054_v22 = vrot.slane %v2053_v24, 4  ;;  %v14228_v62 = vsub.f32 -inf, %v9128_v10  ;;  %8392 = vpow2.f32 %v1625_v38  ;;  %v2061_v31 = vrot.slane %v2060_v32, 4 }
 0x188   : > { %v2219_v36 = vrot.slane %v2215_v14, 1  ;;  %v1736_v9 = vsub.f32 %v9420_v19, %v9436_v52  ;;  %v1737_v17 = vmul.f32 1.442695, %v1735_v40  ;;  %v2220_v60 = vrot.slane %v2216_v59, 1 }
 0x189   : > { %v9448_v44 = vmul.f32 1.442695, %v14228_v62  ;;  %v2055_v11 = vadd.f32 %v2054_v22, %v2053_v24  ;;  %v1838_v6 = vadd.f32 %v1837_v25, %v1836_v61  ;;  %v9452_v51 = vmul.f32 32.0, %v1831_v50  ;;  %v2309_v62 = vpop.permute.xlu0 %2308 }
 0x18a   : > { %v1951_v45 = vrot.slane %v1950_v2, 1  ;;  %v2062_v18 = vadd.f32 %v2061_v31, %v2060_v32  ;;  %v9454_v16 = vpop.eup %8386  ;;  %v1945_v13 = vadd.f32 %v1944_v30, %v1943_v27  ;;  %v2227_v38 = vmul.f32 %v2219_v36, %v8817_v48 }
 0x18b   : > { %14229 = vst [vmem:[#allocation45_spill] sm:$0xff] %v9454_v16  ;;  %v2056_v3 = vrot.slane %v2055_v11, 2  ;;  %v2228_v15 = vmul.f32 %v2220_v60, %v8819_v49  ;;  %v9458_v39 = vpop.eup %8388  ;;  %v2225_v22 = vmul.f32 %v2215_v14, %v8825_v56  ;;  %v2313_v25 = vsel %vm2312_vm0, %v2309_v62, %v2311_v46 }
 0x18c   : > { %14230 = vst [vmem:[#allocation46_spill] sm:$0xff] %v9458_v39  ;;  %v2063_v19 = vrot.slane %v2062_v18, 2  ;;  %v2317_v61 = vsel %vm2312_vm0, %v2311_v46, %v2309_v62  ;;  %v2226_v50 = vmul.f32 %v2216_v59, %v8827_v57  ;;  %v2233_v24 = vrot.slane %v2227_v38, 7 }
 0x18d   : > { %v2057_v40 = vadd.f32 %v2056_v3, %v2055_v11  ;;  %v2235_v27 = vrot.slane %v2228_v15, 7  ;;  %v1840_v30 = vmul.f32 32.0, %v1838_v6  ;;  %v2329_v31 = vmul.f32 %v9299_v26, %v2313_v25 }
 0x18e   : > { %v2064_v32 = vadd.f32 %v2063_v19, %v2062_v18  ;;  %v2330_v36 = vmul.f32 %v9304_v55, %v2317_v61  ;;  %v1952_v60 = vadd.f32 %v1951_v45, %v1950_v2  ;;  %v2234_v16 = vsel %vm741_vm1, %v2233_v24, %v2225_v22 }
 0x18f   : > { %v2058_v39 = vrot.slane %v2057_v40, 1  ;;  %v2236_v14 = vsel %vm741_vm1, %v2235_v27, %v2226_v50  ;;  %v9470_v46 = vmax.f32 %v9423_v33, %v9452_v51  ;;  %v2239_v59 = vsel %vm792_vm2, %v2234_v16, 0.0 }
 0x190   : > { %v2065_v3 = vrot.slane %v2064_v32, 1  ;;  %v2246_v15 = vsel %vm792_vm2, %v2236_v14, 0.0  ;;  %v1953_v11 = vmul.f32 32.0, %v1945_v13  ;;  %v2240_v18 = vrot.slane %v2239_v59, 4 }
 0x191   : > { %v2059_v6 = vadd.f32 %v2058_v39, %v2057_v40  ;;  %v2247_v62 = vrot.slane %v2246_v15, 4  ;;  %v1739_v38 = vmul.f32 1.442695, %v1736_v9  ;;  %v2333_v45 = vrot.slane %v2329_v31, 1 }
 0x192   : > { %v2066_v2 = vadd.f32 %v2065_v3, %v2064_v32  ;;  %v2334_v19 = vrot.slane %v2330_v36, 1  ;;  %v9475_v22 = vmax.f32 %v9436_v52, %v1840_v30  ;;  %v1954_v25 = vmul.f32 32.0, %v1952_v60 }
 0x193   : > { %v2241_v61 = vadd.f32 %v2240_v18, %v2239_v59  ;;  %v2248_v50 = vadd.f32 %v2247_v62, %v2246_v15  ;;  %v9477_v24 = vpop.eup %8390  ;;  %v1849_v16 = vsub.f32 %v9452_v51, %v9470_v46  ;;  %v2067_v27 = vmul.f32 32.0, %v2059_v6 }
 0x194   : > { %v2341_v39 = vmul.f32 %v2333_v45, %v8817_v48  ;;  %v2342_v13 = vmul.f32 %v2334_v19, %v8819_v49  ;;  %v9483_v9 = vpop.eup %8392  ;;  %v9486_v40 = vmax.f32 %v9470_v46, %v1953_v11  ;;  %v2068_v32 = vmul.f32 32.0, %v2066_v2 }
 0x195   : > { %v2242_v14 = vrot.slane %v2241_v61, 2  ;;  %v2249_v60 = vrot.slane %v2248_v50, 2  ;;  %v2339_v3 = vmul.f32 %v2329_v31, %v8825_v56  ;;  %v2340_v59 = vmul.f32 %v2330_v36, %v8827_v57 }
 0x196   : > { %v2347_v15 = vrot.slane %v2341_v39, 7  ;;  %v2349_v18 = vrot.slane %v2342_v13, 7  ;;  %8394 = vpow2.f32 %v1737_v17  ;;  %v9491_v51 = vmax.f32 %v9475_v22, %v1954_v25 }
 0x197   : > { %v2243_v6 = vadd.f32 %v2242_v14, %v2241_v61  ;;  %v2250_v62 = vadd.f32 %v2249_v60, %v2248_v50  ;;  %v1850_v45 = vsub.f32 %v1840_v30, %v9475_v22  ;;  %v9495_v19 = vmax.f32 %v9486_v40, %v2067_v27 }
 0x198   : > { %v2348_v2 = vsel %vm741_vm1, %v2347_v15, %v2339_v3  ;;  %v2350_v55 = vsel %vm741_vm1, %v2349_v18, %v2340_v59  ;;  %v9500_v31 = vmax.f32 %v9491_v51, %v2068_v32  ;;  %v1851_v13 = vmul.f32 1.442695, %v1849_v16 }
 0x199   : > { %14231 = vst [vmem:[#allocation47_spill] sm:$0xff] %v9495_v19  ;;  %v2244_v36 = vrot.slane %v2243_v6, 1  ;;  %v2251_v39 = vrot.slane %v2250_v62, 1  ;;  %v2353_v17 = vsel %vm792_vm2, %v2348_v2, 0.0  ;;  %v1963_v61 = vsub.f32 %v1953_v11, %v9486_v40 }
 0x19a   : > { %14232 = vst [vmem:[#allocation48_spill] sm:$0xff] %v9500_v31  ;;  %v2354_v50 = vrot.slane %v2353_v17, 4  ;;  %v2360_v30 = vsel %vm792_vm2, %v2350_v55, 0.0  ;;  %8396 = vpow2.f32 %v9418_v43  ;;  %v1853_v3 = vmul.f32 1.442695, %v1850_v45 }
 0x19b   : > { %v2245_v14 = vadd.f32 %v2244_v36, %v2243_v6  ;;  %v2252_v60 = vadd.f32 %v2251_v39, %v2250_v62  ;;  %v2361_v26 = vrot.slane %v2360_v30, 4  ;;  %v1964_v59 = vsub.f32 %v1954_v25, %v9491_v51  ;;  %v833_v39 = vpop.permute.xlu1 %832 }
 0x19c   : > { %v2355_v15 = vadd.f32 %v2354_v50, %v2353_v17  ;;  %8398 = vpow2.f32 %v9448_v44  ;;  %v2077_v18 = vsub.f32 %v2067_v27, %v9495_v19  ;;  %v9511_v16 = vmax.f32 %v9495_v19, %v9092_v20 }
 0x19d   : > { %v9515_v55 = vmax.f32 %v9500_v31, %v9095_v21  ;;  %v2362_v11 = vadd.f32 %v2361_v26, %v2360_v30  ;;  %v2253_v6 = vmul.f32 32.0, %v2245_v14  ;;  %v2254_v62 = vmul.f32 32.0, %v2252_v60  ;;  %v826_v30 = vpop.permute.xlu0 %825 }
 0x19e   : > { %14233 = vst [vmem:[#allocation49_spill] sm:$0xff] %v9511_v16  ;;  %v2356_v43 = vrot.slane %v2355_v15, 2  ;;  %v815_v25 = vsub.f32 %v9114_v53, %v9114_v53  ;;  %8400 = vpow2.f32 %v1739_v38  ;;  %v1965_v45 = vmul.f32 1.442695, %v1963_v61 }
 0x19f   : > { %14234 = vst [vmem:[#allocation50_spill] sm:$0xff] %v9515_v55  ;;  %v2078_v44 = vsub.f32 %v2068_v32, %v9500_v31  ;;  %v2363_v27 = vrot.slane %v2362_v11, 2  ;;  %8402 = vpow2.f32 %v1851_v13  ;;  %v1967_v2 = vmul.f32 1.442695, %v1964_v59 }
 0x1a0   : > { %v2357_v36 = vadd.f32 %v2356_v43, %v2355_v15  ;;  %v816_v17 = vsub.f32 %v9128_v10, %v9128_v10  ;;  %8404 = vpow2.f32 %v1853_v3  ;;  %v2079_v26 = vmul.f32 1.442695, %v2077_v18 }
 0x1a1   : > { %v2364_v50 = vadd.f32 %v2363_v27, %v2362_v11  ;;  %v9523_v14 = vmax.f32 %v9511_v16, %v2253_v6  ;;  %v9526_v38 = vmax.f32 %v9515_v55, %v2254_v62  ;;  %v817_v32 = vmul.f32 1.442695, %v815_v25 }
 0x1a2   : > { %v2358_v61 = vrot.slane %v2357_v36, 1  ;;  %8406 = vpow2.f32 %v1965_v45  ;;  %v2081_v13 = vmul.f32 1.442695, %v2078_v44  ;;  %v819_v15 = vmul.f32 1.442695, %v816_v17  ;;  %v2425_v44 = vpop.permute.xlu1 %2424 }
 0x1a3   : > { %14235 = vst [vmem:[#allocation51_spill] sm:$0xff] %v9523_v14  ;;  %14236 = vst [vmem:[#allocation52_spill] sm:$0xff] %v9526_v38  ;;  %v9528_v60 = vpop.eup %8394  ;;  %8408 = vpow2.f32 %v1967_v2  ;;  %v2365_v59 = vrot.slane %v2364_v50, 1  ;;  %v837_v3 = vsel %vm752_vm3, %v826_v30, %v833_v39  ;;  %v834_v18 = vsel %vm752_vm3, %v833_v39, %v826_v30  ;;  %v8089_v45 = vld [vmem:[%s14181_s2 + $0x17] ss:$8 sm:$0x3] }
 0x1a4   : > { %8410 = vpow2.f32 %v2079_v26  ;;  %v931_v11 = vsub.f32 %v9114_v53, %v9138_v54  ;;  %v2263_v43 = vsub.f32 %v2253_v6, %v9523_v14  ;;  %v2264_v27 = vsub.f32 %v2254_v62, %v9526_v38  ;;  %v2423_v53 = vpop.permute.xlu0 %2422 }
 0x1a5   : > { %v2359_v25 = vadd.f32 %v2358_v61, %v2357_v36  ;;  %8412 = vpow2.f32 %v817_v32  ;;  %v9540_v2 = vmul.f32 %v837_v3, %v8973_v63  ;;  %v932_v39 = vsub.f32 %v9128_v10, %v9145_v29 }
 0x1a6   : > { %8414 = vpow2.f32 %v2081_v13  ;;  %v2366_v26 = vadd.f32 %v2365_v59, %v2364_v50  ;;  %v9545_v6 = vmul.f32 %v834_v18, %v8976_v1  ;;  %vm13979_vm3 = vcmask 932864  }
 0x1a7   : > { %v8397_v17 = vpop.eup %8396  ;;  %8416 = vpow2.f32 %v819_v15  ;;  %v933_v36 = vmul.f32 1.442695, %v931_v11  ;;  %v1045_v30 = vsub.f32 %v9138_v54, %v9207_v37  ;;  %v1046_v63 = vsub.f32 %v9145_v29, %v9227_v35 }
 0x1a8   : > { %v9552_v61 = vrot.slane %v8089_v45, %v8727_v8  ;;  %v2265_v10 = vmul.f32 1.442695, %v2263_v43  ;;  %v2267_v32 = vmul.f32 1.442695, %v2264_v27  ;;  %v2367_v13 = vmul.f32 32.0, %v2359_v25  ;;  %v9565_v27 = vpop.permute.xlu1 %946 }
 0x1a9   : > { %v8399_v62 = vpop.eup %8398  ;;  %v9555_v50 = vrot.slane %v8089_v45, %v8724_v7  ;;  %v840_v1 = vmul.f32 0.0, %v8397_v17  ;;  %v935_v59 = vmul.f32 1.442695, %v932_v39  ;;  %v2427_v15 = vsel %vm13979_vm3, %v2423_v53, %v2425_v44 }
 0x1aa   : > { %14237 = vst [vmem:[#allocation53_spill] sm:$0xff] %v9552_v61  ;;  %v2431_v3 = vsel %vm13979_vm3, %v2425_v44, %v2423_v53  ;;  %v2368_v54 = vmul.f32 32.0, %v2366_v26  ;;  %v847_v29 = vrot.slane %v8397_v17, %v8727_v8  ;;  %v851_v11 = vrot.slane %v8399_v62, %v8727_v8  ;;  %v944_v26 = vpop.permute.xlu0 %943 }
 0x1ab   : > { %14238 = vst [vmem:[#allocation54_spill] sm:$0xff] %v9555_v50  ;;  %v9559_v18 = vpop.eup %8400  ;;  %v1159_v43 = vsub.f32 %v9207_v37, %v9261_v58  ;;  %8418 = vpow2.f32 %v933_v36  ;;  %v1047_v45 = vmul.f32 1.442695, %v1045_v30  ;;  %v2443_v39 = vmul.f32 %v9552_v61, %v2427_v15 }
 0x1ac   : > { %v9567_v25 = vpop.eup %8402  ;;  %v2444_v44 = vmul.f32 %v9555_v50, %v2431_v3  ;;  %8420 = vpow2.f32 %v2265_v10  ;;  %v9574_v17 = vmax.f32 %v9523_v14, %v2367_v13  ;;  %v1049_v21 = vmul.f32 1.442695, %v1046_v63 }
 0x1ad   : > { %v9571_v53 = vpop.eup %8404  ;;  %v1160_v37 = vsub.f32 %v9227_v35, %v9280_v23  ;;  %v841_v20 = vmul.f32 0.0, %v8399_v62  ;;  %8422 = vpow2.f32 %v935_v59  ;;  %v2447_v55 = vrot.slane %v2443_v39, 1  ;;  %v8090_v62 = vld [vmem:[%s14181_s2 + $0x20] ss:$8 sm:$0x3] }
 0x1ae   : > { %14239 = vst [vmem:[#allocation55_spill] sm:$0xff] %v9571_v53  ;;  %14240 = vst [vmem:[#allocation56_spill] sm:$0xff] %v9574_v17  ;;  %v2448_v36 = vrot.slane %v2444_v44, 1  ;;  %8424 = vpow2.f32 %v2267_v32  ;;  %v9581_v15 = vmax.f32 %v9526_v38, %v2368_v54  ;;  %v852_v3 = vmul.f32 0.0, %v847_v29 }
 0x1af   : > { %v9578_v30 = vpop.eup %8406  ;;  %v1161_v10 = vmul.f32 1.442695, %v1159_v43  ;;  %v9585_v61 = vmul.f32 0.0, %v851_v11  ;;  %8426 = vpow2.f32 %v1047_v45  ;;  %v2455_v63 = vmul.f32 %v2447_v55, %v8817_v48  ;;  %v2539_v43 = vpop.permute.xlu1 %2538 }
 0x1b0   : > { %14241 = vst [vmem:[#allocation57_spill] sm:$0xff] %v9578_v30  ;;  %14242 = vst [vmem:[#allocation58_spill] sm:$0xff] %v9581_v15  ;;  %v9583_v50 = vpop.eup %8408  ;;  %v2456_v35 = vmul.f32 %v2448_v36, %v8819_v49  ;;  %v2377_v32 = vsub.f32 %v2367_v13, %v9574_v17  ;;  %8428 = vpow2.f32 %v1049_v21  ;;  %v1163_v29 = vmul.f32 1.442695, %v1160_v37  ;;  %v2537_v30 = vpop.permute.xlu0 %2536 }
 0x1b1   : > { %14243 = vst [vmem:[#allocation59_spill] sm:$0xff] %v9583_v50  ;;  %v9592_v59 = vpop.eup %8410  ;;  %vm2540_vm3 = vcmask 924672   ;;  %v2453_v11 = vmul.f32 %v2443_v39, %v8825_v56  ;;  %v2454_v45 = vmul.f32 %v2444_v44, %v8827_v57  ;;  %v2461_v55 = vrot.slane %v2455_v63, 7 }
 0x1b2   : > { %14244 = vst [vmem:[#allocation60_spill] sm:$0xff] %v9592_v59  ;;  %v8413_v38 = vpop.eup %8412  ;;  %v2463_v14 = vrot.slane %v2456_v35, 7  ;;  %v2378_v50 = vsub.f32 %v2368_v54, %v9581_v15  ;;  %8430 = vpow2.f32 %v1161_v10  ;;  %v9601_v59 = vrot.slane %v8090_v62, %v8727_v8 }
 0x1b3   : > { %v9597_v36 = vpop.eup %8414  ;;  %v9604_v21 = vrot.slane %v8090_v62, %v8724_v7  ;;  %v2462_v37 = vsel %vm741_vm1, %v2461_v55, %v2453_v11  ;;  %v2541_v44 = vsel %vm2540_vm3, %v2537_v30, %v2539_v43  ;;  %v2545_v63 = vsel %vm2540_vm3, %v2539_v43, %v2537_v30 }
 0x1b4   : > { %14245 = vst [vmem:[#allocation61_spill] sm:$0xff] %v9597_v36  ;;  %14246 = vst [vmem:[#allocation62_spill] sm:$0xff] %v9601_v59  ;;  %v8417_v13 = vpop.eup %8416  ;;  %v2464_v39 = vsel %vm741_vm1, %v2463_v14, %v2454_v45  ;;  %v2379_v35 = vmul.f32 1.442695, %v2377_v32  ;;  %v857_v54 = vrot.slane %v8413_v38, %v8727_v8  ;;  %v2467_v10 = vsel %vm792_vm2, %v2462_v37, 0.0 }
 0x1b5   : > { %14247 = vst [vmem:[#allocation63_spill] sm:$0xff] %v9604_v21  ;;  %v2474_v36 = vsel %vm792_vm2, %v2464_v39, 0.0  ;;  %v842_v16 = vadd.f32 %v8413_v38, %v840_v1  ;;  %8432 = vpow2.f32 %v1163_v29  ;;  %v2468_v62 = vrot.slane %v2467_v10, 4 }
 0x1b6   : > { %v2475_v31 = vrot.slane %v2474_v36, 4  ;;  %v9613_v19 = vmul.f32 1.442695, %v2378_v50  ;;  %v862_v11 = vmul.f32 %v857_v54, %v9540_v2  ;;  %v2557_v14 = vmul.f32 %v9601_v59, %v2541_v44  ;;  %v9626_v2 = vld [vmem:[%s13888_s6] sm:$0xf] }
 0x1b7   : > { %v2558_v45 = vmul.f32 %v9604_v21, %v2545_v63  ;;  %v861_v30 = vrot.slane %v8417_v13, %v8727_v8  ;;  %v2469_v32 = vadd.f32 %v2468_v62, %v2467_v10  ;;  %v951_v55 = vsel %vm873_vm4, %v944_v26, %v9565_v27 }
 0x1b8   : > { %v2476_v43 = vadd.f32 %v2475_v31, %v2474_v36  ;;  %v8419_v37 = vpop.eup %8418  ;;  %8434 = vpow2.f32 %v2379_v35  ;;  %v948_v38 = vsel %vm873_vm4, %v9565_v27, %v944_v26  ;;  %v2561_v50 = vrot.slane %v2557_v14, 1 }
 0x1b9   : > { %v2562_v1 = vrot.slane %v2558_v45, 1  ;;  %v9628_v29 = vpop.eup %8420  ;;  %v843_v39 = vadd.f32 %v8417_v13, %v841_v20  ;;  %v863_v31 = vmul.f32 %v861_v30, %v9545_v6  ;;  %v2470_v36 = vrot.slane %v2469_v32, 2 }
 0x1ba   : > { %14248 = vst [vmem:[#allocation64_spill] sm:$0xff] %v9628_v29  ;;  %v2477_v44 = vrot.slane %v2476_v43, 2  ;;  %v8423_v63 = vpop.eup %8422  ;;  %v864_v54 = vadd.f32 %v862_v11, %v852_v3  ;;  %v952_v35 = vmul.f32 %v951_v55, %v8982_v0  ;;  %v2569_v27 = vmul.f32 %v2561_v50, %v8817_v48 }
 0x1bb   : > { %v2570_v26 = vmul.f32 %v2562_v1, %v8819_v49  ;;  %v9634_v10 = vpop.eup %8424  ;;  %v954_v62 = vmul.f32 %v8419_v37, %v842_v16  ;;  %v2471_v21 = vadd.f32 %v2470_v36, %v2469_v32  ;;  %v3579_v20 = vrot.slane %v9626_v2, %v8727_v8 }
 0x1bc   : > { %14249 = vst [vmem:[#allocation65_spill] sm:$0xff] %v9634_v10  ;;  %v2478_v59 = vadd.f32 %v2477_v44, %v2476_v43  ;;  %v9638_v13 = vpop.eup %8426  ;;  %v2567_v6 = vmul.f32 %v2557_v14, %v8825_v56  ;;  %v2568_v3 = vmul.f32 %v2558_v45, %v8827_v57  ;;  %v2575_v11 = vrot.slane %v2569_v27, 7  ;;  %v1061_v45 = vpop.permute.xlu1 %1060 }
 0x1bd   : > { %v2577_v0 = vrot.slane %v2570_v26, 7  ;;  %v9642_v30 = vpop.eup %8428  ;;  %v955_v55 = vmul.f32 %v8423_v63, %v843_v39  ;;  %v2472_v50 = vrot.slane %v2471_v21, 1  ;;  %v971_v16 = vrot.slane %v9271_v42, %v8727_v8  ;;  %3581 = vbcast.lane.b32.xlu0 %v3579_v20, 256  ;;  %v1058_v20 = vpop.permute.xlu0 %1057 }
 0x1be   : > { %v2479_v1 = vrot.slane %v2478_v59, 1  ;;  %v865_v32 = vadd.f32 %v863_v31, %v9585_v61  ;;  %v953_v43 = vmul.f32 %v948_v38, %v8992_v12  ;;  %v2576_v36 = vsel %vm741_vm1, %v2575_v11, %v2567_v6  ;;  %v14250_v38 = vld [vmem:[#allocation32_spill] sm:$0xff] }
 0x1bf   : > { %v2578_v14 = vsel %vm741_vm1, %v2577_v0, %v2568_v3  ;;  %v9650_v44 = vpop.eup %8430  ;;  %v2473_v27 = vadd.f32 %v2472_v50, %v2471_v21  ;;  %v976_v26 = vmul.f32 %v971_v16, %v952_v35  ;;  %v2581_v39 = vsel %vm792_vm2, %v2576_v36, 0.0  ;;  %v14251_v36 = vld [vmem:[#allocation3_spill] sm:$0xff] }
 0x1c0   : > { %v2588_v10 = vsel %vm792_vm2, %v2578_v14, 0.0  ;;  %v956_v29 = vadd.f32 %v9271_v42, %v954_v62  ;;  %v961_v61 = vrot.slane %v8419_v37, %v8727_v8  ;;  %v2582_v31 = vrot.slane %v2581_v39, 4 }
 0x1c1   : > { %v2589_v12 = vrot.slane %v2588_v10, 4  ;;  %v957_v6 = vadd.f32 %v14250_v38, %v955_v55  ;;  %v2480_v11 = vadd.f32 %v2479_v1, %v2478_v59  ;;  %v965_v3 = vrot.slane %v8423_v63, %v8727_v8  ;;  %v8091_v59 = vld [vmem:[%s14181_s2 + $0x21] ss:$8 sm:$0x3] }
 0x1c2   : > { %v975_v21 = vrot.slane %v14250_v38, %v8727_v8  ;;  %v9660_v35 = vpop.eup %8432  ;;  %v2481_v0 = vmul.f32 32.0, %v2473_v27  ;;  %v966_v50 = vmul.f32 %v961_v61, %v864_v54  ;;  %v2583_v16 = vadd.f32 %v2582_v31, %v2581_v39  ;;  %v2653_v27 = vpop.permute.xlu1 %2652 }
 0x1c3   : > { %v3592_v42 = vsub.s32 2, %v14251_v36  ;;  %8436 = vpow2.f32 %v9613_v19  ;;  %v967_v37 = vmul.f32 %v965_v3, %v865_v32  ;;  %v2590_v14 = vadd.f32 %v2589_v12, %v2588_v10 }
 0x1c4   : > { %v977_v62 = vmul.f32 %v975_v21, %v953_v43  ;;  %v1068_v63 = vmul.f32 %v9638_v13, %v956_v29  ;;  %v978_v55 = vadd.f32 %v976_v26, %v966_v50  ;;  %vm2654_vm4 = vcmask 916480   ;;  %v2651_v43 = vpop.permute.xlu0 %2650  ;;  %v14256_v21 = vld [vmem:[#allocation9_spill] sm:$0xff] }
 0x1c5   : > { %v3593_v1 = vrot.slane %v9626_v2, %v3592_v42  ;;  %v9669_v54 = vpop.eup %8434  ;;  %v1069_v39 = vmul.f32 %v9642_v30, %v957_v6  ;;  %v2482_v61 = vmul.f32 32.0, %v2480_v11  ;;  %v1062_v19 = vsel %vm987_vm5, %v1061_v45, %v1058_v20 }
 0x1c6   : > { %14252 = vst [vmem:[#allocation32_spill] sm:$0xff] %v9669_v54  ;;  %v1065_v10 = vsel %vm987_vm5, %v1058_v20, %v1061_v45  ;;  %v9675_v32 = vmax.f32 %v9574_v17, %v2481_v0  ;;  %v2584_v31 = vrot.slane %v2583_v16, 2  ;;  %v9678_v29 = vrot.slane %v8091_v59, %v8727_v8  ;;  %v3575_v45 = vld [vmem:[%s13889_s7] sm:$0xf]  ;;  %v14255_v20 = vld [vmem:[#allocation8_spill] sm:$0xff] }
 0x1c7   : > { %3595 = vbcast.lane.b32.xlu0 %v3593_v1, 256  ;;  %v9681_v26 = vrot.slane %v8091_v59, %v8724_v7  ;;  %v979_v12 = vadd.f32 %v977_v62, %v967_v37  ;;  %v2591_v38 = vrot.slane %v2590_v14, 2  ;;  %v2655_v6 = vsel %vm2654_vm4, %v2651_v43, %v2653_v27  ;;  %v14257_v59 = vld [vmem:[#allocation37_spill] sm:$0xff] }
 0x1c8   : > { %14253 = vst [vmem:[#allocation66_spill] sm:$0xff] %v9678_v29  ;;  %v2659_v11 = vsel %vm2654_vm4, %v2653_v27, %v2651_v43  ;;  %v1066_v3 = vmul.f32 %v1065_v10, %v14255_v20  ;;  %v1067_v50 = vmul.f32 %v1062_v19, %v14256_v21  ;;  %v2671_v42 = vmul.f32 %v9678_v29, %v2655_v6 }
 0x1c9   : > { %14254 = vst [vmem:[#allocation67_spill] sm:$0xff] %v9681_v26  ;;  %v2672_v1 = vmul.f32 %v9681_v26, %v2659_v11  ;;  %v1070_v54 = vadd.f32 %v14257_v59, %v1068_v63  ;;  %v9694_v37 = vmax.f32 %v9581_v15, %v2482_v61  ;;  %v1085_v62 = vrot.slane %v14257_v59, %v8727_v8  ;;  %v3763_v59 = vld [vmem:[%s13891_s9 + $0x78] sm:$0xff] }
 0x1ca   : > { %v3586_v27 = vrot.slane %v9626_v2, %v8724_v7  ;;  %v2491_v43 = vsub.f32 %v2481_v0, %v9675_v32  ;;  %v2585_v10 = vadd.f32 %v2584_v31, %v2583_v16  ;;  %v1089_v19 = vrot.slane %v9348_v41, %v8727_v8 }
 0x1cb   : > { %v2675_v6 = vrot.slane %v2671_v42, 1  ;;  %3670 = vperm.xlu0 %8363, %v3575_v45   ;;  %v2592_v11 = vadd.f32 %v2591_v38, %v2590_v14  ;;  %v1075_v63 = vrot.slane %v9638_v13, %v8727_v8  ;;  %v1079_v20 = vrot.slane %v9642_v30, %v8727_v8  ;;  %v1175_v45 = vpop.permute.xlu1 %1174 }
 0x1cc   : > { %v2676_v21 = vrot.slane %v2672_v1, 1  ;;  %3588 = vbcast.lane.b32.xlu1 %v3586_v27, 256  ;;  %v1071_v0 = vadd.f32 %v9348_v41, %v1069_v39  ;;  %v1090_v16 = vmul.f32 %v1085_v62, %v1066_v3  ;;  %v1091_v31 = vmul.f32 %v1089_v19, %v1067_v50  ;;  %v1172_v27 = vpop.permute.xlu0 %1171 }
 0x1cd   : > { %v2683_v26 = vmul.f32 %v2675_v6, %v8817_v48  ;;  %v2492_v14 = vsub.f32 %v2482_v61, %v9694_v37  ;;  %v1080_v38 = vmul.f32 %v1075_v63, %v978_v55  ;;  %v1081_v13 = vmul.f32 %v1079_v20, %v979_v12  ;;  %v3761_v55 = vld [vmem:[%s13891_s9 + $0x68] sm:$0xff] }
 0x1ce   : > { %v2684_v29 = vmul.f32 %v2676_v21, %v8819_v49  ;;  %v2493_v30 = vmul.f32 1.442695, %v2491_v43  ;;  %v2586_v15 = vrot.slane %v2585_v10, 1  ;;  %v2681_v17 = vmul.f32 %v2671_v42, %v8825_v56  ;;  %v8092_v42 = vld [vmem:[%s14181_s2 + $0x22] ss:$8 sm:$0x3] }
 0x1cf   : > { %v2689_v53 = vrot.slane %v2683_v26, 7  ;;  %3857 = vperm.xlu0 %8363, %v3763_v59   ;;  %v9716_v41 = vmul.f32 %v9650_v44, %v1070_v54  ;;  %v2593_v39 = vrot.slane %v2592_v11, 1  ;;  %v2682_v3 = vmul.f32 %v2672_v1, %v8827_v57  ;;  %v2767_v21 = vpop.permute.xlu1 %2766 }
 0x1d0   : > { %v2691_v50 = vrot.slane %v2684_v29, 7  ;;  %v9722_v61 = vpop.eup %8436  ;;  %v9725_v12 = vmul.f32 %v9660_v35, %v1071_v0  ;;  %v9727_v62 = vadd.f32 %v1090_v16, %v1080_v38  ;;  %v9729_v26 = vadd.f32 %v1091_v31, %v1081_v13  ;;  %v3759_v0 = vld [vmem:[%s13891_s9 + $0x58] sm:$0xff]  ;;  %v2765_v16 = vpop.permute.xlu0 %2764 }
 0x1d1   : > { %v2690_v54 = vsel %vm741_vm1, %v2689_v53, %v2681_v17  ;;  %v2495_v29 = vmul.f32 1.442695, %v2492_v14  ;;  %v3599_v19 = vsub.s32 3, %v14251_v36  ;;  %8438 = vpow2.f32 %v2493_v30 }
 0x1d2   : > { %v2692_v1 = vsel %vm741_vm1, %v2691_v50, %v2682_v3  ;;  %v2695_v43 = vsel %vm792_vm2, %v2690_v54, 0.0  ;;  %v2587_v6 = vadd.f32 %v2586_v15, %v2585_v10  ;;  %v2594_v59 = vadd.f32 %v2593_v39, %v2592_v11  ;;  %v3762_v50 = vld [vmem:[%s13891_s9 + $0x70] sm:$0xff] }
 0x1d3   : > { %v2696_v63 = vrot.slane %v2695_v43, 4  ;;  %v2702_v20 = vsel %vm792_vm2, %v2692_v1, 0.0  ;;  %3847 = vperm.xlu0 %8363, %v3761_v55   ;;  %v3600_v17 = vrot.slane %v9626_v2, %v3599_v19  ;;  %vm2768_vm5 = vcmask 908288  }
 0x1d4   : > { %v2703_v53 = vrot.slane %v2702_v20, 4  ;;  %v1179_v14 = vsel %vm1101_vm6, %v1172_v27, %v1175_v45  ;;  %v9745_v15 = vrot.slane %v8092_v42, %v8727_v8  ;;  %v9748_v10 = vrot.slane %v8092_v42, %v8724_v7 }
 0x1d5   : > { %v2697_v31 = vadd.f32 %v2696_v63, %v2695_v43  ;;  %v1176_v11 = vsel %vm1101_vm6, %v1175_v45, %v1172_v27  ;;  %3602 = vbcast.lane.b32.xlu1 %v3600_v17, 256  ;;  %v2769_v2 = vsel %vm2768_vm5, %v2765_v16, %v2767_v21  ;;  %v2773_v13 = vsel %vm2768_vm5, %v2767_v21, %v2765_v16  ;;  %v14260_v27 = vld [vmem:[#allocation10_spill] sm:$0xff]  ;;  %v14261_v43 = vld [vmem:[#allocation11_spill] sm:$0xff]  ;;  %v9771_v21 = vpop.permute.xlu1 %1288  ;;  %v9779_v16 = vpop.permute.xlu0 %1285 }
 0x1d6   : > { %14258 = vst [vmem:[#allocation8_spill] sm:$0xff] %v9745_v15  ;;  %14259 = vst [vmem:[#allocation9_spill] sm:$0xff] %v9748_v10  ;;  %v2704_v38 = vadd.f32 %v2703_v53, %v2702_v20  ;;  %8440 = vpow2.f32 %v2495_v29  ;;  %v2785_v39 = vmul.f32 %v9745_v15, %v2769_v2  ;;  %v2786_v3 = vmul.f32 %v9748_v10, %v2773_v13  ;;  %v3757_v29 = vld [vmem:[%s13891_s9 + $0x48] sm:$0xff] }
 0x1d7   : > { %v2698_v30 = vrot.slane %v2697_v31, 2  ;;  %3837 = vperm.xlu0 %8363, %v3759_v0   ;;  %v9758_v55 = vmul.f32 32.0, %v2587_v6  ;;  %v9760_v54 = vmul.f32 32.0, %v2594_v59  ;;  %v9763_v42 = vmul.f32 %v1179_v14, %v14260_v27  ;;  %v3755_v27 = vld [vmem:[%s13891_s9 + $0x38] sm:$0xff] }
 0x1d8   : > { %v2705_v45 = vrot.slane %v2704_v38, 2  ;;  %v9769_v19 = vmul.f32 %v1176_v11, %v14261_v43  ;;  %v2789_v63 = vrot.slane %v2785_v39, 1  ;;  %v2790_v20 = vrot.slane %v2786_v3, 1  ;;  %v14262_v11 = vld [vmem:[#allocation35_spill] sm:$0xff] }
 0x1d9   : > { %v2699_v1 = vadd.f32 %v2698_v30, %v2697_v31  ;;  %v1189_v59 = vrot.slane %v9650_v44, %v8727_v8  ;;  %3852 = vperm.xlu1 %8362, %v3762_v50   ;;  %v3760_v44 = vld [vmem:[%s13891_s9 + $0x60] sm:$0xff]  ;;  %v9790_v2 = vmax.f32 %v9675_v32, %v9758_v55  ;;  %v2795_v30 = vmul.f32 %v2785_v39, %v8825_v56  ;;  %v14263_v50 = vld [vmem:[#allocation36_spill] sm:$0xff] }
 0x1da   : > { %v2706_v6 = vadd.f32 %v2705_v45, %v2704_v38  ;;  %v2797_v31 = vmul.f32 %v2789_v63, %v8817_v48  ;;  %v2798_v14 = vmul.f32 %v2790_v20, %v8819_v49  ;;  %v1273_v38 = vsub.f32 %v9261_v58, %v14262_v11  ;;  %v8093_v39 = vld [vmem:[%s14181_s2 + $0x23] ss:$8 sm:$0x3] }
 0x1db   : > { %v2700_v0 = vrot.slane %v2699_v1, 1  ;;  %3827 = vperm.xlu0 %8363, %v3757_v29   ;;  %v1274_v45 = vsub.f32 %v9280_v23, %v14263_v50  ;;  %v2796_v43 = vmul.f32 %v2786_v3, %v8827_v57  ;;  %v9801_v29 = vmax.f32 %v9694_v37, %v9760_v54 }
 0x1dc   : > { %v2707_v13 = vrot.slane %v2706_v6, 1  ;;  %v2803_v63 = vrot.slane %v2797_v31, 7  ;;  %v2805_v20 = vrot.slane %v2798_v14, 7  ;;  %v9804_v53 = vmul.f32 %v1189_v59, %v9727_v62  ;;  %v2881_v31 = vpop.permute.xlu1 %2880  ;;  %v3758_v62 = vld [vmem:[%s13891_s9 + $0x50] sm:$0xff] }
 0x1dd   : > { %v2701_v58 = vadd.f32 %v2700_v0, %v2699_v1  ;;  %v1203_v23 = vrot.slane %v9373_v5, %v8727_v8  ;;  %3842 = vperm.xlu1 %8362, %v3760_v44   ;;  %v1275_v0 = vmul.f32 1.442695, %v1273_v38  ;;  %vm2882_vm6 = vcmask 900096  }
 0x1de   : > { %v2708_v17 = vadd.f32 %v2707_v13, %v2706_v6  ;;  %v2804_v3 = vsel %vm741_vm1, %v2803_v63, %v2795_v30  ;;  %v2806_v1 = vsel %vm741_vm1, %v2805_v20, %v2796_v43  ;;  %v9816_v6 = vpop.eup %8438  ;;  %v1277_v13 = vmul.f32 1.442695, %v1274_v45  ;;  %v3753_v30 = vld [vmem:[%s13891_s9 + $0x28] sm:$0xff]  ;;  %v2879_v63 = vpop.permute.xlu0 %2878 }
 0x1df   : > { %3817 = vperm.xlu0 %8363, %v3755_v27   ;;  %14264 = vst [vmem:[#allocation37_spill] sm:$0xff] %v9816_v6  ;;  %v2709_v59 = vmul.f32 32.0, %v2701_v58  ;;  %v2809_v14 = vsel %vm792_vm2, %v2804_v3, 0.0  ;;  %v2816_v44 = vsel %vm792_vm2, %v2806_v1, 0.0  ;;  %v2605_v38 = vsub.f32 %v9758_v55, %v9790_v2 }
 0x1e0   : > { %v2710_v43 = vmul.f32 32.0, %v2708_v17  ;;  %v2810_v20 = vrot.slane %v2809_v14, 4  ;;  %v2817_v36 = vrot.slane %v2816_v44, 4  ;;  %v2606_v27 = vsub.f32 %v9760_v54, %v9801_v29  ;;  %v3756_v17 = vld [vmem:[%s13891_s9 + $0x40] sm:$0xff] }
 0x1e1   : > { %v9828_v58 = vrot.slane %v8093_v39, %v8727_v8  ;;  %v9831_v3 = vrot.slane %v8093_v39, %v8724_v7  ;;  %v2883_v45 = vsel %vm2882_vm6, %v2879_v63, %v2881_v31  ;;  %3832 = vperm.xlu1 %8362, %v3758_v62   ;;  %8442 = vpow2.f32 %v1275_v0 }
 0x1e2   : > { %v2811_v1 = vadd.f32 %v2810_v20, %v2809_v14  ;;  %v2818_v10 = vadd.f32 %v2817_v36, %v2816_v44  ;;  %v2887_v55 = vsel %vm2882_vm6, %v2881_v31, %v2879_v63  ;;  %v9841_v15 = vmax.f32 %v9790_v2, %v2709_v59  ;;  %v3751_v36 = vld [vmem:[%s13891_s9 + $0x18] sm:$0xff] }
 0x1e3   : > { %14265 = vst [vmem:[#allocation10_spill] sm:$0xff] %v9828_v58  ;;  %14266 = vst [vmem:[#allocation11_spill] sm:$0xff] %v9831_v3  ;;  %3807 = vperm.xlu0 %8363, %v3753_v30   ;;  %v9838_v54 = vpop.eup %8440  ;;  %8444 = vpow2.f32 %v1277_v13  ;;  %v2899_v39 = vmul.f32 %v9828_v58, %v2883_v45  ;;  %v2900_v62 = vmul.f32 %v9831_v3, %v2887_v55  ;;  %v2607_v0 = vmul.f32 1.442695, %v2605_v38 }
 0x1e4   : > { %14267 = vst [vmem:[#allocation35_spill] sm:$0xff] %v9838_v54  ;;  %v9849_v31 = vmax.f32 %v9801_v29, %v2710_v43  ;;  %v2812_v14 = vrot.slane %v2811_v1, 2  ;;  %v2819_v44 = vrot.slane %v2818_v10, 2  ;;  %v14269_v30 = vrot.slane %v9660_v35, %v8727_v8  ;;  %v3754_v35 = vld [vmem:[%s13891_s9 + $0x30] sm:$0xff] }
 0x1e5   : > { %v14270_v13 = vrot.slane %v9369_v4, %v8727_v8  ;;  %v2903_v45 = vrot.slane %v2899_v39, 1  ;;  %v2904_v55 = vrot.slane %v2900_v62, 1  ;;  %3822 = vperm.xlu1 %8362, %v3756_v17   ;;  %v2609_v3 = vmul.f32 1.442695, %v2606_v27 }
 0x1e6   : > { %14268 = vst [vmem:[#allocation36_spill] sm:$0xff] %v9849_v31  ;;  %v1195_v63 = vmul.f32 %v14269_v30, %v9729_v26  ;;  %v1205_v38 = vmul.f32 %v1203_v23, %v9769_v19  ;;  %v2813_v58 = vadd.f32 %v2812_v14, %v2811_v1  ;;  %v1293_v54 = vsel %vm1215_vm7, %v9779_v16, %v9771_v21  ;;  %v3749_v19 = vld [vmem:[%s13891_s9 + $0x8] sm:$0xff] }
 0x1e7   : > { %v1204_v20 = vmul.f32 %v14270_v13, %v9763_v42  ;;  %3797 = vperm.xlu0 %8363, %v3751_v36   ;;  %v2719_v26 = vsub.f32 %v2709_v59, %v9841_v15  ;;  %v2820_v30 = vadd.f32 %v2819_v44, %v2818_v10  ;;  %v2911_v42 = vmul.f32 %v2903_v45, %v8817_v48 }
 0x1e8   : > { %v2912_v17 = vmul.f32 %v2904_v55, %v8819_v49  ;;  %8446 = vpow2.f32 %v2607_v0  ;;  %v2720_v23 = vsub.f32 %v2710_v43, %v9849_v31  ;;  %v1290_v27 = vsel %vm1215_vm7, %v9771_v21, %v9779_v16  ;;  %v14271_v0 = vld [vmem:[#allocation12_spill] sm:$0xff]  ;;  %v3752_v21 = vld [vmem:[%s13891_s9 + $0x20] sm:$0xff]  ;;  %v9889_v55 = vpop.permute.xlu1 %1402 }
 0x1e9   : > { %v2909_v1 = vmul.f32 %v2899_v39, %v8825_v56  ;;  %v2814_v36 = vrot.slane %v2813_v58, 1  ;;  %v2910_v10 = vmul.f32 %v2900_v62, %v8827_v57  ;;  %v2917_v59 = vrot.slane %v2911_v42, 7  ;;  %3812 = vperm.xlu1 %8362, %v3754_v35  }
 0x1ea   : > { %v2919_v14 = vrot.slane %v2912_v17, 7  ;;  %8448 = vpow2.f32 %v2609_v3  ;;  %v9879_v44 = vadd.f32 %v1204_v20, %v9804_v53  ;;  %v9881_v13 = vadd.f32 %v1205_v38, %v1195_v63  ;;  %v3779_v53 = vld [vmem:[%s13891_s9 + $0xf8] sm:$0xff] }
 0x1eb   : > { %v1294_v43 = vmul.f32 %v1293_v54, %v14271_v0  ;;  %3787 = vperm.xlu0 %8363, %v3749_v19   ;;  %v2721_v16 = vmul.f32 1.442695, %v2719_v26  ;;  %v2821_v39 = vrot.slane %v2820_v30, 1  ;;  %v2918_v62 = vsel %vm741_vm1, %v2917_v59, %v2909_v1  ;;  %v14272_v63 = vld [vmem:[#allocation13_spill] sm:$0xff]  ;;  %v9899_v26 = vpop.permute.xlu0 %1399  ;;  %v14273_v19 = vld [vmem:[#allocation38_spill] sm:$0xff] }
 0x1ec   : > { %v2920_v45 = vsel %vm741_vm1, %v2919_v14, %v2910_v10  ;;  %v2723_v3 = vmul.f32 1.442695, %v2720_v23  ;;  %v1295_v54 = vmul.f32 %v1290_v27, %v14272_v63  ;;  %v1313_v20 = vrot.slane %v9399_v34, %v8727_v8 }
 0x1ed   : > { %v1387_v38 = vsub.f32 %v14262_v11, %v9338_v47  ;;  %v2815_v35 = vadd.f32 %v2814_v36, %v2813_v58  ;;  %v2923_v42 = vsel %vm792_vm2, %v2918_v62, 0.0  ;;  %v2930_v17 = vsel %vm792_vm2, %v2920_v45, 0.0  ;;  %3802 = vperm.xlu1 %8362, %v3752_v21   ;;  %v3750_v36 = vld [vmem:[%s13891_s9 + $0x10] sm:$0xff] }
 0x1ee   : > { %v1388_v1 = vsub.f32 %v14263_v50, %v14273_v19  ;;  %v1184_v23 = vadd.f32 %v9369_v4, %v9716_v41  ;;  %v1185_v27 = vadd.f32 %v9373_v5, %v9725_v12  ;;  %v1317_v11 = vrot.slane %v9403_v28, %v8727_v8  ;;  %v8443_v10 = vpop.eup %8442  ;;  %v8094_v4 = vld [vmem:[%s14181_s2 + $0x24] ss:$8 sm:$0x3] }
 0x1ef   : > { %v2924_v58 = vrot.slane %v2923_v42, 4  ;;  %3937 = vperm.xlu0 %8363, %v3779_v53   ;;  %8450 = vpow2.f32 %v2721_v16  ;;  %v2822_v59 = vadd.f32 %v2821_v39, %v2820_v30  ;;  %v1318_v50 = vmul.f32 %v1313_v20, %v1294_v43  ;;  %v3777_v5 = vld [vmem:[%s13891_s9 + $0xe8] sm:$0xff]  ;;  %v2995_v43 = vpop.permute.xlu1 %2994 }
 0x1f0   : > { %v2931_v14 = vrot.slane %v2930_v17, 4  ;;  %v8445_v41 = vpop.eup %8444  ;;  %8452 = vpow2.f32 %v2723_v3  ;;  %v9920_v12 = vmul.f32 %v1317_v11, %v1295_v54  ;;  %v1389_v21 = vmul.f32 1.442695, %v1387_v38  ;;  %v3748_v3 = vld [vmem:[%s13891_s9] sm:$0xff]  ;;  %v2993_v38 = vpop.permute.xlu0 %2992 }
 0x1f1   : > { %v2925_v0 = vadd.f32 %v2924_v58, %v2923_v42  ;;  %v9922_v62 = vmul.f32 32.0, %v2815_v35  ;;  %v1391_v30 = vmul.f32 1.442695, %v1388_v1  ;;  %vm2996_vm7 = vcmask 801792   ;;  %3792 = vperm.xlu1 %8362, %v3750_v36  }
 0x1f2   : > { %v2932_v16 = vadd.f32 %v2931_v14, %v2930_v17  ;;  %v1296_v39 = vmul.f32 %v8443_v10, %v1184_v23  ;;  %v1404_v53 = vsel %vm1329_vm8, %v9889_v55, %v9899_v26  ;;  %v9928_v63 = vrot.slane %v8094_v4, %v8727_v8  ;;  %v3775_v17 = vld [vmem:[%s13891_s9 + $0xd8] sm:$0xff] }
 0x1f3   : > { %v2926_v45 = vrot.slane %v2925_v0, 2  ;;  %3927 = vperm.xlu0 %8363, %v3777_v5   ;;  %v9933_v54 = vmul.f32 32.0, %v2822_v59  ;;  %v1297_v20 = vmul.f32 %v8445_v41, %v1185_v27  ;;  %v9936_v42 = vrot.slane %v8094_v4, %v8724_v7 }
 0x1f4   : > { %14274 = vst [vmem:[#allocation12_spill] sm:$0xff] %v9928_v63  ;;  %v2933_v35 = vrot.slane %v2932_v16, 2  ;;  %8454 = vpow2.f32 %v1389_v21  ;;  %v2997_v23 = vsel %vm2996_vm7, %v2993_v38, %v2995_v43  ;;  %v3001_v11 = vsel %vm2996_vm7, %v2995_v43, %v2993_v38  ;;  %v3778_v21 = vld [vmem:[%s13891_s9 + $0xf0] sm:$0xff] }
 0x1f5   : > { %14275 = vst [vmem:[#allocation13_spill] sm:$0xff] %v9936_v42  ;;  %v2927_v1 = vadd.f32 %v2926_v45, %v2925_v0  ;;  %v9943_v58 = vpop.eup %8446  ;;  %v9947_v27 = vmax.f32 %v9841_v15, %v9922_v62  ;;  %v3013_v59 = vmul.f32 %v9928_v63, %v2997_v23  ;;  %v3014_v14 = vmul.f32 %v9936_v42, %v3001_v11 }
 0x1f6   : > { %14276 = vst [vmem:[#allocation38_spill] sm:$0xff] %v9943_v58  ;;  %v2934_v36 = vadd.f32 %v2933_v35, %v2932_v16  ;;  %3782 = vperm.xlu1 %8362, %v3748_v3   ;;  %v1303_v4 = vrot.slane %v8443_v10, %v8727_v8  ;;  %v1307_v5 = vrot.slane %v8445_v41, %v8727_v8  ;;  %8456 = vpow2.f32 %v1391_v30  ;;  %v3773_v10 = vld [vmem:[%s13891_s9 + $0xc8] sm:$0xff] }
 0x1f7   : > { %14277 = vst [vmem:[#allocation68_spill] sm:$0xff] %v9947_v27  ;;  %v2928_v0 = vrot.slane %v2927_v1, 1  ;;  %3917 = vperm.xlu0 %8363, %v3775_v17   ;;  %v9956_v43 = vpop.eup %8448  ;;  %v9960_v16 = vmax.f32 %v9849_v31, %v9933_v54  ;;  %v3017_v38 = vrot.slane %v3013_v59, 1  ;;  %v3018_v3 = vrot.slane %v3014_v14, 1 }
 0x1f8   : > { %14278 = vst [vmem:[#allocation69_spill] sm:$0xff] %v9956_v43  ;;  %v2935_v45 = vrot.slane %v2934_v36, 1  ;;  %v9966_v41 = vadd.f32 %v9399_v34, %v1296_v39  ;;  %v9969_v30 = vadd.f32 %v9403_v28, %v1297_v20  ;;  %v1308_v35 = vmul.f32 %v1303_v4, %v9879_v44  ;;  %v14280_v39 = vld [vmem:[#allocation15_spill] sm:$0xff] }
 0x1f9   : > { %14279 = vst [vmem:[#allocation70_spill] sm:$0xff] %v9960_v16  ;;  %v1309_v17 = vmul.f32 %v1307_v5, %v9881_v13  ;;  %v2833_v23 = vsub.f32 %v9922_v62, %v9947_v27  ;;  %v1407_v11 = vsel %vm1329_vm8, %v9899_v26, %v9889_v55  ;;  %v3025_v42 = vmul.f32 %v3017_v38, %v8817_v48  ;;  %v14281_v44 = vld [vmem:[#allocation39_spill] sm:$0xff]  ;;  %v1517_v5 = vpop.permute.xlu1 %1516 }
 0x1fa   : > { %v3026_v63 = vmul.f32 %v3018_v3, %v8819_v49  ;;  %3932 = vperm.xlu1 %8362, %v3778_v21   ;;  %v9980_v34 = vadd.f32 %v1318_v50, %v1308_v35  ;;  %v2929_v28 = vadd.f32 %v2928_v0, %v2927_v1  ;;  %v1409_v20 = vmul.f32 %v1404_v53, %v14280_v39  ;;  %v3776_v62 = vld [vmem:[%s13891_s9 + $0xe0] sm:$0xff]  ;;  %v14282_v21 = vld [vmem:[#allocation40_spill] sm:$0xff]  ;;  %v3771_v53 = vld [vmem:[%s13891_s9 + $0xb8] sm:$0xff] }
 0x1fb   : > { %v1501_v13 = vsub.f32 %v9338_v47, %v14281_v44  ;;  %3907 = vperm.xlu0 %8363, %v3773_v10   ;;  %v2834_v55 = vsub.f32 %v9933_v54, %v9960_v16  ;;  %v2936_v26 = vadd.f32 %v2935_v45, %v2934_v36  ;;  %v3031_v4 = vrot.slane %v3025_v42, 7  ;;  %v14284_v47 = vld [vmem:[#allocation14_spill] sm:$0xff]  ;;  %v14286_v45 = vld [vmem:[#allocation43_spill] sm:$0xff]  ;;  %v14287_v39 = vld [vmem:[#allocation44_spill] sm:$0xff] }
 0x1fc   : > { %v1502_v50 = vsub.f32 %v14273_v19, %v14282_v21  ;;  %v9995_v1 = vpop.eup %8450  ;;  %v1408_v0 = vmul.f32 %v1407_v11, %v14284_v47  ;;  %v3023_v38 = vmul.f32 %v3013_v59, %v8825_v56  ;;  %v3024_v3 = vmul.f32 %v3014_v14, %v8827_v57  ;;  %v1514_v19 = vpop.permute.xlu0 %1513 }
 0x1fd   : > { %14283 = vst [vmem:[#allocation15_spill] sm:$0xff] %v9995_v1  ;;  %v3033_v10 = vrot.slane %v3026_v63, 7  ;;  %v10000_v54 = vpop.eup %8452  ;;  %v2835_v42 = vmul.f32 1.442695, %v2833_v23  ;;  %v10003_v36 = vadd.f32 %v9920_v12, %v1309_v17  ;;  %v1427_v35 = vrot.slane %v14286_v45, %v8727_v8  ;;  %v3774_v12 = vld [vmem:[%s13891_s9 + $0xd0] sm:$0xff]  ;;  %v3769_v17 = vld [vmem:[%s13891_s9 + $0xa8] sm:$0xff] }
 0x1fe   : > { %14285 = vst [vmem:[#allocation39_spill] sm:$0xff] %v10000_v54  ;;  %v1431_v1 = vrot.slane %v14287_v39, %v8727_v8  ;;  %3922 = vperm.xlu1 %8362, %v3776_v62   ;;  %v10009_v11 = vmul.f32 32.0, %v2929_v28  ;;  %v3032_v59 = vsel %vm741_vm1, %v3031_v4, %v3023_v38  ;;  %v1503_v14 = vmul.f32 1.442695, %v1501_v13 }
 0x1ff   : > { %v3034_v63 = vsel %vm741_vm1, %v3033_v10, %v3024_v3  ;;  %3897 = vperm.xlu0 %8363, %v3771_v53   ;;  %v2837_v23 = vmul.f32 1.442695, %v2834_v55  ;;  %v10019_v47 = vmul.f32 32.0, %v2936_v26  ;;  %v3037_v28 = vsel %vm792_vm2, %v3032_v59, 0.0  ;;  %v3109_v59 = vpop.permute.xlu1 %3108 }
 0x200   : > { %v1505_v62 = vmul.f32 1.442695, %v1502_v50  ;;  %v10022_v54 = vmul.f32 %v1427_v35, %v1408_v0  ;;  %v10024_v4 = vmul.f32 %v1431_v1, %v1409_v20  ;;  %v3038_v13 = vrot.slane %v3037_v28, 4  ;;  %v8095_v53 = vld [vmem:[%s14181_s2 + $0x25] ss:$8 sm:$0x3] }
 0x201   : > { %v3044_v38 = vsel %vm792_vm2, %v3034_v63, 0.0  ;;  %v8455_v3 = vpop.eup %8454  ;;  %8458 = vpow2.f32 %v2835_v42  ;;  %v1518_v55 = vsel %vm14027_vm9, %v1517_v5, %v1514_v19  ;;  %v1521_v26 = vsel %vm14027_vm9, %v1514_v19, %v1517_v5  ;;  %v3772_v1 = vld [vmem:[%s13891_s9 + $0xc0] sm:$0xff]  ;;  %v3107_v5 = vpop.permute.xlu0 %3106  ;;  %v3767_v63 = vld [vmem:[%s13891_s9 + $0x98] sm:$0xff] }
 0x202   : > { %v3045_v10 = vrot.slane %v3044_v38, 4  ;;  %3912 = vperm.xlu1 %8362, %v3774_v12   ;;  %v10034_v20 = vmax.f32 %v9947_v27, %v10009_v11  ;;  %v3039_v50 = vadd.f32 %v3038_v13, %v3037_v28  ;;  %8460 = vpow2.f32 %v1503_v14 }
 0x203   : > { %vm3110_vm8 = vcmask 793600   ;;  %3887 = vperm.xlu0 %8363, %v3769_v17   ;;  %v8457_v0 = vpop.eup %8456  ;;  %v10041_v42 = vmax.f32 %v9960_v16, %v10019_v47  ;;  %8462 = vpow2.f32 %v1505_v62  ;;  %v10044_v35 = vrot.slane %v8095_v53, %v8727_v8  ;;  %v3770_v16 = vld [vmem:[%s13891_s9 + $0xb0] sm:$0xff] }
 0x204   : > { %v3046_v19 = vadd.f32 %v3045_v10, %v3044_v38  ;;  %v3040_v14 = vrot.slane %v3039_v50, 2  ;;  %v10050_v12 = vrot.slane %v8095_v53, %v8724_v7  ;;  %v3111_v17 = vsel %vm3110_vm8, %v3107_v5, %v3109_v59 }
 0x205   : > { %14288 = vst [vmem:[#allocation40_spill] sm:$0xff] %v10044_v35  ;;  %v3115_v28 = vsel %vm3110_vm8, %v3109_v59, %v3107_v5  ;;  %8464 = vpow2.f32 %v2837_v23  ;;  %v1410_v13 = vmul.f32 %v8455_v3, %v9966_v41  ;;  %v3127_v62 = vmul.f32 %v10044_v35, %v3111_v17  ;;  %v14290_v59 = vld [vmem:[#allocation18_spill] sm:$0xff]  ;;  %v14291_v5 = vld [vmem:[#allocation19_spill] sm:$0xff] }
 0x206   : > { %14289 = vst [vmem:[#allocation14_spill] sm:$0xff] %v10050_v12  ;;  %v3047_v38 = vrot.slane %v3046_v19, 2  ;;  %3902 = vperm.xlu1 %8362, %v3772_v1   ;;  %v2947_v10 = vsub.f32 %v10009_v11, %v10034_v20  ;;  %v1411_v43 = vmul.f32 %v8457_v0, %v9969_v30  ;;  %v3041_v58 = vadd.f32 %v3040_v14, %v3039_v50  ;;  %v3765_v11 = vld [vmem:[%s13891_s9 + $0x88] sm:$0xff]  ;;  %v14292_v14 = vld [vmem:[#allocation41_spill] sm:$0xff] }
 0x207   : > { %v3128_v53 = vmul.f32 %v10050_v12, %v3115_v28  ;;  %3877 = vperm.xlu0 %8363, %v3767_v63   ;;  %v1522_v41 = vmul.f32 %v1521_v26, %v14290_v59  ;;  %v1523_v27 = vmul.f32 %v1518_v55, %v14291_v5  ;;  %v3131_v17 = vrot.slane %v3127_v62, 1  ;;  %v14293_v26 = vld [vmem:[#allocation45_spill] sm:$0xff] }
 0x208   : > { %v3048_v23 = vadd.f32 %v3047_v38, %v3046_v19  ;;  %v2948_v30 = vsub.f32 %v10019_v47, %v10041_v42  ;;  %v1417_v50 = vrot.slane %v8455_v3, %v8727_v8  ;;  %v1615_v28 = vsub.f32 %v14281_v44, %v14292_v14  ;;  %v3768_v44 = vld [vmem:[%s13891_s9 + $0xa0] sm:$0xff] }
 0x209   : > { %v3132_v1 = vrot.slane %v3128_v53, 1  ;;  %v1412_v19 = vadd.f32 %v14286_v45, %v1410_v13  ;;  %v3042_v63 = vrot.slane %v3041_v58, 1  ;;  %v1541_v55 = vrot.slane %v14293_v26, %v8727_v8 }
 0x20a   : > { %v3139_v38 = vmul.f32 %v3131_v17, %v8817_v48  ;;  %3892 = vperm.xlu1 %8362, %v3770_v16   ;;  %v2949_v59 = vmul.f32 1.442695, %v2947_v10  ;;  %v1413_v5 = vadd.f32 %v14287_v39, %v1411_v43  ;;  %v1421_v47 = vrot.slane %v8457_v0, %v8727_v8  ;;  %v1631_v17 = vpop.permute.xlu1 %1630 }
 0x20b   : > { %v1422_v3 = vmul.f32 %v1417_v50, %v9980_v34  ;;  %3867 = vperm.xlu0 %8363, %v3765_v11   ;;  %v3049_v45 = vrot.slane %v3048_v23, 1  ;;  %v3137_v13 = vmul.f32 %v3127_v62, %v8825_v56  ;;  %v3140_v12 = vmul.f32 %v3132_v1, %v8819_v49  ;;  %v1628_v34 = vpop.permute.xlu0 %1627 }
 0x20c   : > { %v3145_v35 = vrot.slane %v3139_v38, 7  ;;  %v2951_v16 = vmul.f32 1.442695, %v2948_v30  ;;  %v1423_v10 = vmul.f32 %v1421_v47, %v10003_v36  ;;  %v1617_v39 = vmul.f32 1.442695, %v1615_v28  ;;  %v14294_v30 = vld [vmem:[#allocation46_spill] sm:$0xff] }
 0x20d   : > { %v1434_v43 = vadd.f32 %v10022_v54, %v1422_v3  ;;  %v3043_v0 = vadd.f32 %v3042_v63, %v3041_v58  ;;  %v3138_v50 = vmul.f32 %v3128_v53, %v8827_v57  ;;  %v3147_v11 = vrot.slane %v3140_v12, 7  ;;  %v3766_v58 = vld [vmem:[%s13891_s9 + $0x90] sm:$0xff]  ;;  %v14295_v28 = vld [vmem:[#allocation42_spill] sm:$0xff] }
 0x20e   : > { %v3146_v6 = vsel %vm741_vm1, %v3145_v35, %v3137_v13  ;;  %3882 = vperm.xlu1 %8362, %v3768_v44   ;;  %v10089_v31 = vpop.eup %8458  ;;  %8466 = vpow2.f32 %v2949_v59  ;;  %v1435_v62 = vadd.f32 %v10024_v4, %v1423_v10  ;;  %v1545_v1 = vrot.slane %v14294_v30, %v8727_v8  ;;  %v8096_v4 = vld [vmem:[%s14181_s2 + $0x26] ss:$8 sm:$0x3] }
 0x20f   : > { %v3151_v36 = vsel %vm792_vm2, %v3146_v6, 0.0  ;;  %v8461_v54 = vpop.eup %8460  ;;  %v3050_v53 = vadd.f32 %v3049_v45, %v3048_v23  ;;  %v3148_v35 = vsel %vm741_vm1, %v3147_v11, %v3138_v50  ;;  %v1616_v63 = vsub.f32 %v14282_v21, %v14295_v28  ;;  %v3223_v23 = vpop.permute.xlu1 %3222 }
 0x210   : > { %v3152_v12 = vrot.slane %v3151_v36, 4  ;;  %v8463_v38 = vpop.eup %8462  ;;  %8468 = vpow2.f32 %v2951_v16  ;;  %v1546_v59 = vmul.f32 %v1541_v55, %v1522_v41  ;;  %v1547_v6 = vmul.f32 %v1545_v1, %v1523_v27  ;;  %v3764_v27 = vld [vmem:[%s13891_s9 + $0x80] sm:$0xff]  ;;  %v3221_v55 = vpop.permute.xlu0 %3220 }
 0x211   : > { %v3158_v47 = vsel %vm792_vm2, %v3148_v35, 0.0  ;;  %v3051_v3 = vmul.f32 32.0, %v3043_v0  ;;  %8470 = vpow2.f32 %v1617_v39  ;;  %v1524_v10 = vmul.f32 %v8461_v54, %v1412_v19 }
 0x212   : > { %v3153_v44 = vadd.f32 %v3152_v12, %v3151_v36  ;;  %v3159_v13 = vrot.slane %v3158_v47, 4  ;;  %3872 = vperm.xlu1 %8362, %v3766_v58   ;;  %v10105_v45 = vpop.eup %8464  ;;  %v1632_v21 = vsel %vm14030_vm10, %v1631_v17, %v1628_v34  ;;  %vm3224_vm9 = vcmask 785408  }
 0x213   : > { %14296 = vst [vmem:[#allocation43_spill] sm:$0xff] %v10105_v45  ;;  %v10109_v50 = vrot.slane %v8096_v4, %v8727_v8  ;;  %v3052_v41 = vmul.f32 32.0, %v3050_v53  ;;  %v1619_v39 = vmul.f32 1.442695, %v1616_v63  ;;  %v1525_v11 = vmul.f32 %v8463_v38, %v1413_v5 }
 0x214   : > { %v3154_v16 = vrot.slane %v3153_v44, 2  ;;  %v3160_v0 = vadd.f32 %v3159_v13, %v3158_v47  ;;  %v10115_v1 = vrot.slane %v8096_v4, %v8724_v7  ;;  %v3225_v19 = vsel %vm3224_vm9, %v3221_v55, %v3223_v23 }
 0x215   : > { %14297 = vst [vmem:[#allocation44_spill] sm:$0xff] %v10109_v50  ;;  %v3229_v36 = vsel %vm3224_vm9, %v3223_v23, %v3221_v55  ;;  %v10120_v58 = vmax.f32 %v10034_v20, %v3051_v3  ;;  %v3241_v45 = vmul.f32 %v10109_v50, %v3225_v19  ;;  %v1531_v53 = vrot.slane %v8461_v54, %v8727_v8 }
 0x216   : > { %14298 = vst [vmem:[#allocation18_spill] sm:$0xff] %v10115_v1  ;;  %v3155_v35 = vadd.f32 %v3154_v16, %v3153_v44  ;;  %v3161_v12 = vrot.slane %v3160_v0, 2  ;;  %3862 = vperm.xlu1 %8362, %v3764_v27   ;;  %v1535_v63 = vrot.slane %v8463_v38, %v8727_v8  ;;  %v1635_v5 = vsel %vm14030_vm10, %v1628_v34, %v1631_v17 }
 0x217   : > { %v3242_v4 = vmul.f32 %v10115_v1, %v3229_v36  ;;  %v10128_v47 = vmax.f32 %v10041_v42, %v3052_v41  ;;  %8472 = vpow2.f32 %v1619_v39  ;;  %v1526_v44 = vadd.f32 %v14293_v26, %v1524_v10  ;;  %v14299_v10 = vld [vmem:[#allocation20_spill] sm:$0xff] }
 0x218   : > { %v3156_v13 = vrot.slane %v3155_v35, 1  ;;  %v3162_v23 = vadd.f32 %v3161_v12, %v3160_v0  ;;  %v1536_v55 = vmul.f32 %v1531_v53, %v1434_v43  ;;  %v3245_v16 = vrot.slane %v3241_v45, 1  ;;  %v1745_v53 = vpop.permute.xlu1 %1744 }
 0x219   : > { %v3246_v19 = vrot.slane %v3242_v4, 1  ;;  %v3061_v27 = vsub.f32 %v3051_v3, %v10120_v58  ;;  %v10133_v54 = vadd.f32 %v14294_v30, %v1525_v11  ;;  %v1537_v38 = vmul.f32 %v1535_v63, %v1435_v62 }
 0x21a   : > { %v3163_v17 = vrot.slane %v3162_v23, 1  ;;  %v1548_v34 = vadd.f32 %v1546_v59, %v1536_v55  ;;  %v3253_v36 = vmul.f32 %v3245_v16, %v8817_v48  ;;  %v1729_v0 = vsub.f32 %v14292_v14, %v9423_v33  ;;  %v14300_v14 = vld [vmem:[#allocation21_spill] sm:$0xff] }
 0x21b   : > { %v3254_v1 = vmul.f32 %v3246_v19, %v8819_v49  ;;  %v10139_v39 = vpop.eup %8466  ;;  %v3062_v26 = vsub.f32 %v3052_v41, %v10128_v47  ;;  %v3157_v43 = vadd.f32 %v3156_v13, %v3155_v35  ;;  %v1636_v3 = vmul.f32 %v1635_v5, %v14299_v10  ;;  %v1742_v5 = vpop.permute.xlu0 %1741 }
 0x21c   : > { %v3251_v30 = vmul.f32 %v3241_v45, %v8825_v56  ;;  %v3164_v11 = vadd.f32 %v3163_v17, %v3162_v23  ;;  %v3252_v62 = vmul.f32 %v3242_v4, %v8827_v57  ;;  %v3259_v59 = vrot.slane %v3253_v36, 7 }
 0x21d   : > { %v3261_v12 = vrot.slane %v3254_v1, 7  ;;  %v10145_v63 = vpop.eup %8468  ;;  %v3063_v55 = vmul.f32 1.442695, %v3061_v27  ;;  %v10147_v16 = vadd.f32 %v1547_v6, %v1537_v38  ;;  %v1637_v19 = vmul.f32 %v1632_v21, %v14300_v14  ;;  %v8097_v14 = vld [vmem:[%s14181_s2 + $0x27] ss:$8 sm:$0x3] }
 0x21e   : > { %v1655_v41 = vrot.slane %v9477_v24, %v8727_v8  ;;  %v8471_v35 = vpop.eup %8470  ;;  %v1659_v45 = vrot.slane %v9483_v9, %v8727_v8  ;;  %v3260_v4 = vsel %vm741_vm1, %v3259_v59, %v3251_v30  ;;  %v1731_v13 = vmul.f32 1.442695, %v1729_v0 }
 0x21f   : > { %v3262_v1 = vsel %vm741_vm1, %v3261_v12, %v3252_v62  ;;  %v3065_v23 = vmul.f32 1.442695, %v3062_v26  ;;  %v3165_v17 = vmul.f32 32.0, %v3157_v43  ;;  %v3265_v6 = vsel %vm792_vm2, %v3260_v4, 0.0  ;;  %v3337_v62 = vpop.permute.xlu1 %3336 }
 0x220   : > { %v3272_v27 = vsel %vm792_vm2, %v3262_v1, 0.0  ;;  %v3166_v21 = vmul.f32 32.0, %v3164_v11  ;;  %v1660_v38 = vmul.f32 %v1655_v41, %v1636_v3  ;;  %v3266_v36 = vrot.slane %v3265_v6, 4 }
 0x221   : > { %v3273_v10 = vrot.slane %v3272_v27, 4  ;;  %8474 = vpow2.f32 %v3063_v55  ;;  %v1645_v30 = vrot.slane %v8471_v35, %v8727_v8  ;;  %v1661_v59 = vmul.f32 %v1659_v45, %v1637_v19  ;;  %v3335_v45 = vpop.permute.xlu0 %3334 }
 0x222   : > { %v1730_v0 = vsub.f32 %v14295_v28, %v9436_v52  ;;  %v3267_v26 = vadd.f32 %v3266_v36, %v3265_v6  ;;  %8476 = vpow2.f32 %v1731_v13  ;;  %vm3338_vm10 = vcmask 777216  }
 0x223   : > { %v3274_v43 = vadd.f32 %v3273_v10, %v3272_v27  ;;  %8478 = vpow2.f32 %v3065_v23  ;;  %v10165_v3 = vmax.f32 %v10120_v58, %v3165_v17  ;;  %v1638_v11 = vmul.f32 %v8471_v35, %v1526_v44 }
 0x224   : > { %v10168_v12 = vrot.slane %v8097_v14, %v8727_v8  ;;  %v8473_v55 = vpop.eup %8472  ;;  %v10171_v41 = vmax.f32 %v10128_v47, %v3166_v21  ;;  %v1650_v19 = vmul.f32 %v1645_v30, %v1548_v34  ;;  %v3268_v28 = vrot.slane %v3267_v26, 2 }
 0x225   : > { %v10174_v4 = vrot.slane %v8097_v14, %v8724_v7  ;;  %v3275_v1 = vrot.slane %v3274_v43, 2  ;;  %v1733_v13 = vmul.f32 1.442695, %v1730_v0  ;;  %v3339_v23 = vsel %vm3338_vm10, %v3335_v45, %v3337_v62 }
 0x226   : > { %14301 = vst [vmem:[#allocation19_spill] sm:$0xff] %v10168_v12  ;;  %v3343_v6 = vsel %vm3338_vm10, %v3337_v62, %v3335_v45  ;;  %v3269_v44 = vadd.f32 %v3268_v28, %v3267_v26  ;;  %v1746_v35 = vsel %vm14034_vm11, %v1745_v53, %v1742_v5  ;;  %v3355_v27 = vmul.f32 %v10168_v12, %v3339_v23 }
 0x227   : > { %14302 = vst [vmem:[#allocation41_spill] sm:$0xff] %v10174_v4  ;;  %v3356_v36 = vmul.f32 %v10174_v4, %v3343_v6  ;;  %v3175_v34 = vsub.f32 %v3165_v17, %v10165_v3  ;;  %v1639_v10 = vmul.f32 %v8473_v55, %v10133_v54  ;;  %v1640_v14 = vadd.f32 %v9477_v24, %v1638_v11  ;;  %v14303_v11 = vld [vmem:[#allocation22_spill] sm:$0xff]  ;;  %v1856_v4 = vpop.permute.xlu0 %1855 }
 0x228   : > { %v10184_v30 = vadd.f32 %v1660_v38, %v1650_v19  ;;  %v3176_v0 = vsub.f32 %v3166_v21, %v10171_v41  ;;  %v1749_v50 = vsel %vm14034_vm11, %v1742_v5, %v1745_v53  ;;  %v3359_v62 = vrot.slane %v3355_v27, 1 }
 0x229   : > { %v3360_v26 = vrot.slane %v3356_v36, 1  ;;  %v1649_v45 = vrot.slane %v8473_v55, %v8727_v8  ;;  %v3276_v28 = vadd.f32 %v3275_v1, %v3274_v43  ;;  %8480 = vpow2.f32 %v1733_v13  ;;  %v1859_v55 = vpop.permute.xlu1 %1858  ;;  %v14304_v1 = vld [vmem:[#allocation23_spill] sm:$0xff] }
 0x22a   : > { %v1843_v23 = vsub.f32 %v9423_v33, %v9470_v46  ;;  %v3270_v17 = vrot.slane %v3269_v44, 1  ;;  %v3367_v54 = vmul.f32 %v3359_v62, %v8817_v48  ;;  %v1844_v38 = vsub.f32 %v9436_v52, %v9475_v22 }
 0x22b   : > { %v3368_v24 = vmul.f32 %v3360_v26, %v8819_v49  ;;  %v3177_v21 = vmul.f32 1.442695, %v3175_v34  ;;  %v10196_v53 = vadd.f32 %v9483_v9, %v1639_v10  ;;  %v1651_v5 = vmul.f32 %v1649_v45, %v10147_v16 }
 0x22c   : > { %v1750_v43 = vmul.f32 %v1749_v50, %v14303_v11  ;;  %v3179_v19 = vmul.f32 1.442695, %v3176_v0  ;;  %v1751_v33 = vmul.f32 %v1746_v35, %v14304_v1  ;;  %v3373_v13 = vrot.slane %v3367_v54, 7  ;;  %v8098_v54 = vld [vmem:[%s14181_s2 + $0x30] ss:$8 sm:$0x3] }
 0x22d   : > { %v3375_v6 = vrot.slane %v3368_v24, 7  ;;  %v3277_v62 = vrot.slane %v3276_v28, 1  ;;  %v3365_v26 = vmul.f32 %v3355_v27, %v8825_v56  ;;  %v3366_v52 = vmul.f32 %v3356_v36, %v8827_v57 }
 0x22e   : > { %v1845_v34 = vmul.f32 1.442695, %v1843_v23  ;;  %v10203_v12 = vpop.eup %8474  ;;  %v3271_v9 = vadd.f32 %v3270_v17, %v3269_v44  ;;  %v1769_v16 = vrot.slane %v9528_v60, %v8727_v8  ;;  %v1773_v50 = vrot.slane %v9559_v18, %v8727_v8 }
 0x22f   : > { %v1847_v10 = vmul.f32 1.442695, %v1844_v38  ;;  %v8477_v35 = vpop.eup %8476  ;;  %8482 = vpow2.f32 %v3177_v21  ;;  %v10209_v0 = vadd.f32 %v1661_v59, %v1651_v5  ;;  %v3374_v45 = vsel %vm741_vm1, %v3373_v13, %v3365_v26  ;;  %v3451_v21 = vpop.permute.xlu1 %3450 }
 0x230   : > { %v3376_v27 = vsel %vm741_vm1, %v3375_v6, %v3366_v52  ;;  %v10213_v36 = vpop.eup %8478  ;;  %8484 = vpow2.f32 %v3179_v19  ;;  %v10215_v23 = vmul.f32 %v1769_v16, %v1750_v43  ;;  %v10217_v44 = vmul.f32 %v1773_v50, %v1751_v33  ;;  %v3449_v43 = vpop.permute.xlu0 %3448 }
 0x231   : > { %v1863_v17 = vsel %vm1785_vm12, %v1856_v4, %v1859_v55  ;;  %v3278_v24 = vadd.f32 %v3277_v62, %v3276_v28  ;;  %v3379_v59 = vsel %vm792_vm2, %v3374_v45, 0.0  ;;  %v3386_v38 = vsel %vm792_vm2, %v3376_v27, 0.0  ;;  %v14307_v27 = vld [vmem:[#allocation24_spill] sm:$0xff] }
 0x232   : > { %8486 = vpow2.f32 %v1845_v34  ;;  %v3279_v5 = vmul.f32 32.0, %v3271_v9  ;;  %v1752_v11 = vmul.f32 %v8477_v35, %v1640_v14  ;;  %v3380_v19 = vrot.slane %v3379_v59, 4 }
 0x233   : > { %8488 = vpow2.f32 %v1847_v10  ;;  %v3387_v1 = vrot.slane %v3386_v38, 4  ;;  %vm3452_vm11 = vcmask 769024   ;;  %v10226_v33 = vrot.slane %v8098_v54, %v8727_v8 }
 0x234   : > { %v10229_v13 = vrot.slane %v8098_v54, %v8724_v7  ;;  %v3381_v28 = vadd.f32 %v3380_v19, %v3379_v59  ;;  %v1860_v6 = vsel %vm1785_vm12, %v1859_v55, %v1856_v4  ;;  %v3453_v62 = vsel %vm3452_vm11, %v3449_v43, %v3451_v21  ;;  %v14308_v19 = vld [vmem:[#allocation25_spill] sm:$0xff] }
 0x235   : > { %14305 = vst [vmem:[#allocation45_spill] sm:$0xff] %v10226_v33  ;;  %v3457_v26 = vsel %vm3452_vm11, %v3451_v21, %v3449_v43  ;;  %v3280_v52 = vmul.f32 32.0, %v3278_v24  ;;  %v3388_v14 = vadd.f32 %v3387_v1, %v3386_v38  ;;  %v3469_v34 = vmul.f32 %v10226_v33, %v3453_v62 }
 0x236   : > { %14306 = vst [vmem:[#allocation46_spill] sm:$0xff] %v10229_v13  ;;  %v3470_v9 = vmul.f32 %v10229_v13, %v3457_v26  ;;  %v8481_v16 = vpop.eup %8480  ;;  %v1754_v50 = vadd.f32 %v9528_v60, %v1752_v11  ;;  %v1759_v10 = vrot.slane %v8477_v35, %v8727_v8  ;;  %v3382_v45 = vrot.slane %v3381_v28, 2 }
 0x237   : > { %v1864_v54 = vmul.f32 %v1863_v17, %v14307_v27  ;;  %v10240_v4 = vmax.f32 %v10165_v3, %v3279_v5  ;;  %v3389_v55 = vrot.slane %v3388_v14, 2  ;;  %v3473_v59 = vrot.slane %v3469_v34, 1 }
 0x238   : > { %v1957_v24 = vsub.f32 %v9470_v46, %v9486_v40  ;;  %v1764_v38 = vmul.f32 %v1759_v10, %v10184_v30  ;;  %v3383_v21 = vadd.f32 %v3382_v45, %v3381_v28  ;;  %v1865_v43 = vmul.f32 %v1860_v6, %v14308_v19 }
 0x239   : > { %v3474_v1 = vrot.slane %v3470_v9, 1  ;;  %v10247_v60 = vmax.f32 %v10171_v41, %v3280_v52  ;;  %v3390_v35 = vadd.f32 %v3389_v55, %v3388_v14  ;;  %v1883_v17 = vrot.slane %v9567_v25, %v8727_v8 }
 0x23a   : > { %v1958_v11 = vsub.f32 %v9475_v22, %v9491_v51  ;;  %v1753_v62 = vmul.f32 %v8481_v16, %v10196_v53  ;;  %v3384_v26 = vrot.slane %v3383_v21, 1  ;;  %v3481_v46 = vmul.f32 %v3473_v59, %v8817_v48 }
 0x23b   : > { %v3482_v30 = vmul.f32 %v3474_v1, %v8819_v49  ;;  %v3289_v28 = vsub.f32 %v3279_v5, %v10240_v4  ;;  %v3391_v6 = vrot.slane %v3390_v35, 1  ;;  %v3479_v10 = vmul.f32 %v3469_v34, %v8825_v56  ;;  %v14309_v1 = vld [vmem:[#allocation55_spill] sm:$0xff] }
 0x23c   : > { %v1959_v45 = vmul.f32 1.442695, %v1957_v24  ;;  %v10258_v14 = vpop.eup %8482  ;;  %v3385_v27 = vadd.f32 %v3384_v26, %v3383_v21  ;;  %v3480_v55 = vmul.f32 %v3470_v9, %v8827_v57  ;;  %v3487_v19 = vrot.slane %v3481_v46, 7 }
 0x23d   : > { %v3489_v22 = vrot.slane %v3482_v30, 7  ;;  %v10261_v7 = vpop.eup %8484  ;;  %v3290_v53 = vsub.f32 %v3280_v52, %v10247_v60  ;;  %v1763_v48 = vrot.slane %v8481_v16, %v8727_v8  ;;  %v3392_v49 = vadd.f32 %v3391_v6, %v3390_v35 }
 0x23e   : > { %v1961_v59 = vmul.f32 1.442695, %v1958_v11  ;;  %v1887_v56 = vrot.slane %v14309_v1, %v8727_v8  ;;  %v3488_v34 = vsel %vm741_vm1, %v3487_v19, %v3479_v10  ;;  %8490 = vpow2.f32 %v1959_v45 }
 0x23f   : > { %v8487_v5 = vpop.eup %8486  ;;  %v3490_v24 = vsel %vm741_vm1, %v3489_v22, %v3480_v55  ;;  %v1755_v9 = vadd.f32 %v9559_v18, %v1753_v62  ;;  %v1765_v21 = vmul.f32 %v1763_v48, %v10209_v0  ;;  %v3493_v52 = vsel %vm792_vm2, %v3488_v34, 0.0  ;;  %v14310_v18 = vld [vmem:[#allocation47_spill] sm:$0xff] }
 0x240   : > { %v8489_v57 = vpop.eup %8488  ;;  %8492 = vpow2.f32 %v1961_v59  ;;  %v3291_v16 = vmul.f32 1.442695, %v3289_v28  ;;  %v3393_v35 = vmul.f32 32.0, %v3385_v27  ;;  %v3494_v11 = vrot.slane %v3493_v52, 4  ;;  %v1973_v28 = vpop.permute.xlu1 %1972  ;;  %v14311_v27 = vld [vmem:[#allocation48_spill] sm:$0xff] }
 0x241   : > { %v3500_v26 = vsel %vm792_vm2, %v3490_v24, 0.0  ;;  %v3293_v46 = vmul.f32 1.442695, %v3290_v53  ;;  %v1776_v30 = vadd.f32 %v10215_v23, %v1764_v38  ;;  %v3394_v6 = vmul.f32 32.0, %v3392_v49 }
 0x242   : > { %v1888_v10 = vmul.f32 %v1883_v17, %v1864_v54  ;;  %v1777_v45 = vadd.f32 %v10217_v44, %v1765_v21  ;;  %v1866_v55 = vmul.f32 %v8487_v5, %v1754_v50  ;;  %v1889_v19 = vmul.f32 %v1887_v56, %v1865_v43  ;;  %v1970_v50 = vpop.permute.xlu0 %1969 }
 0x243   : > { %v2071_v0 = vsub.f32 %v9486_v40, %v14310_v18  ;;  %v1867_v62 = vmul.f32 %v8489_v57, %v1755_v9  ;;  %v3495_v22 = vadd.f32 %v3494_v11, %v3493_v52  ;;  %v3501_v48 = vrot.slane %v3500_v26, 4  ;;  %v14312_v52 = vld [vmem:[#allocation49_spill] sm:$0xff] }
 0x244   : > { %v2072_v59 = vsub.f32 %v9491_v51, %v14311_v27  ;;  %8494 = vpow2.f32 %v3291_v16  ;;  %v10280_v53 = vmax.f32 %v10240_v4, %v3393_v35  ;;  %v1873_v23 = vrot.slane %v8487_v5, %v8727_v8 }
 0x245   : > { %v2073_v54 = vmul.f32 1.442695, %v2071_v0  ;;  %8496 = vpow2.f32 %v3293_v46  ;;  %v10284_v44 = vmax.f32 %v10247_v60, %v3394_v6  ;;  %v1877_v40 = vrot.slane %v8489_v57, %v8727_v8  ;;  %v14314_v46 = vld [vmem:[#allocation50_spill] sm:$0xff] }
 0x246   : > { %v2075_v38 = vmul.f32 1.442695, %v2072_v59  ;;  %v1868_v43 = vadd.f32 %v9567_v25, %v1866_v55  ;;  %v1878_v17 = vmul.f32 %v1873_v23, %v1776_v30  ;;  %v1974_v51 = vsel %vm1899_vm13, %v1973_v28, %v1970_v50  ;;  %v14313_v25 = vld [vmem:[#allocation26_spill] sm:$0xff] }
 0x247   : > { %v1977_v49 = vsel %vm1899_vm13, %v1970_v50, %v1973_v28  ;;  %v1869_v56 = vadd.f32 %v14309_v1, %v1867_v62  ;;  %v1879_v34 = vmul.f32 %v1877_v40, %v1777_v45  ;;  %v3496_v5 = vrot.slane %v3495_v22, 2  ;;  %v14315_v1 = vld [vmem:[#allocation57_spill] sm:$0xff]  ;;  %v2084_v50 = vpop.permute.xlu0 %2083  ;;  %v14319_v40 = vld [vmem:[#allocation59_spill] sm:$0xff] }
 0x248   : > { %v3502_v24 = vadd.f32 %v3501_v48, %v3500_v26  ;;  %v3403_v9 = vsub.f32 %v3393_v35, %v10280_v53  ;;  %v1890_v21 = vadd.f32 %v1888_v10, %v1878_v17  ;;  %8498 = vpow2.f32 %v2073_v54  ;;  %v2087_v26 = vpop.permute.xlu1 %2086  ;;  %v14316_v35 = vld [vmem:[#allocation16_spill] sm:$0xff] }
 0x249   : > { %v2152_v57 = vsub.f32 %v14310_v18, %v14312_v52  ;;  %v3404_v16 = vsub.f32 %v3394_v6, %v10284_v44  ;;  %v1978_v11 = vmul.f32 %v1977_v49, %v14313_v25  ;;  %8500 = vpow2.f32 %v2075_v38  ;;  %v14317_v6 = vld [vmem:[#allocation17_spill] sm:$0xff] }
 0x24a   : > { %v2153_v30 = vsub.f32 %v14311_v27, %v14314_v46  ;;  %v1891_v55 = vadd.f32 %v1889_v19, %v1879_v34  ;;  %v1997_v45 = vrot.slane %v14315_v1, %v8727_v8  ;;  %v2158_v10 = vsub.f32 %v14316_v35, %v14312_v52  ;;  %v14318_v27 = vld [vmem:[#allocation27_spill] sm:$0xff] }
 0x24b   : > { %v2154_v0 = vmul.f32 1.442695, %v2152_v57  ;;  %v8491_v62 = vpop.eup %8490  ;;  %v3497_v48 = vadd.f32 %v3496_v5, %v3495_v22  ;;  %v3503_v18 = vrot.slane %v3502_v24, 2  ;;  %v2159_v59 = vsub.f32 %v14317_v6, %v14314_v46 }
 0x24c   : > { %v2156_v28 = vmul.f32 1.442695, %v2153_v30  ;;  %v3405_v54 = vmul.f32 1.442695, %v3403_v9  ;;  %v1979_v19 = vmul.f32 %v1974_v51, %v14318_v27  ;;  %v2001_v38 = vrot.slane %v14319_v40, %v8727_v8  ;;  %v14320_v27 = vld [vmem:[#allocation28_spill] sm:$0xff] }
 0x24d   : > { %v8493_v23 = vpop.eup %8492  ;;  %v2160_v17 = vmul.f32 1.442695, %v2158_v10  ;;  %v3407_v49 = vmul.f32 1.442695, %v3404_v16  ;;  %v2002_v34 = vmul.f32 %v1997_v45, %v1978_v11  ;;  %v2091_v57 = vsel %vm2013_vm14, %v2084_v50, %v2087_v26 }
 0x24e   : > { %8502 = vpow2.f32 %v2154_v0  ;;  %v1980_v22 = vmul.f32 %v8491_v62, %v1868_v43  ;;  %v2088_v5 = vsel %vm2013_vm14, %v2087_v26, %v2084_v50  ;;  %v2162_v25 = vmul.f32 1.442695, %v2159_v59  ;;  %v14321_v43 = vld [vmem:[#allocation51_spill] sm:$0xff]  ;;  %v14322_v26 = vld [vmem:[#allocation52_spill] sm:$0xff] }
 0x24f   : > { %8504 = vpow2.f32 %v2156_v28  ;;  %v3498_v30 = vrot.slane %v3497_v48, 1  ;;  %v3504_v35 = vadd.f32 %v3503_v18, %v3502_v24  ;;  %v1981_v9 = vmul.f32 %v8493_v23, %v1869_v56  ;;  %v14324_v18 = vld [vmem:[#allocation29_spill] sm:$0xff] }
 0x250   : > { %8506 = vpow2.f32 %v2160_v17  ;;  %v1987_v51 = vrot.slane %v8491_v62, %v8727_v8  ;;  %v2003_v6 = vmul.f32 %v2001_v38, %v1979_v19  ;;  %v2092_v10 = vmul.f32 %v2091_v57, %v14320_v27  ;;  %v14325_v38 = vld [vmem:[#allocation60_spill] sm:$0xff]  ;;  %v14326_v17 = vld [vmem:[#allocation61_spill] sm:$0xff]  ;;  %v2272_v57 = vpop.permute.xlu1 %2271 }
 0x251   : > { %8508 = vpow2.f32 %v3405_v54  ;;  %v10311_v16 = vpop.eup %8494  ;;  %v1991_v11 = vrot.slane %v8493_v23, %v8727_v8  ;;  %v2257_v45 = vsub.f32 %v14312_v52, %v14321_v43  ;;  %v2258_v0 = vsub.f32 %v14314_v46, %v14322_v26 }
 0x252   : > { %8510 = vpow2.f32 %v2162_v25  ;;  %v10318_v24 = vpop.eup %8496  ;;  %v1982_v56 = vadd.f32 %v14315_v1, %v1980_v22  ;;  %v1992_v62 = vmul.f32 %v1987_v51, %v1890_v21  ;;  %v2093_v28 = vmul.f32 %v2088_v5, %v14324_v18  ;;  %v14327_v21 = vld [vmem:[#allocation56_spill] sm:$0xff] }
 0x253   : > { %14323 = vst [vmem:[#allocation42_spill] sm:$0xff] %v10318_v24  ;;  %8512 = vpow2.f32 %v3407_v49  ;;  %v3499_v59 = vadd.f32 %v3498_v30, %v3497_v48  ;;  %v3505_v54 = vrot.slane %v3504_v35, 1  ;;  %v1983_v50 = vadd.f32 %v14319_v40, %v1981_v9  ;;  %v14328_v48 = vld [vmem:[#allocation58_spill] sm:$0xff] }
 0x254   : > { %v1993_v23 = vmul.f32 %v1991_v11, %v1891_v55  ;;  %v2004_v19 = vadd.f32 %v2002_v34, %v1992_v62  ;;  %v2111_v52 = vrot.slane %v14325_v38, %v8727_v8  ;;  %v2115_v46 = vrot.slane %v14326_v17, %v8727_v8  ;;  %v2270_v55 = vpop.permute.xlu0 %2269 }
 0x255   : > { %v2259_v25 = vmul.f32 1.442695, %v2257_v45  ;;  %v8499_v49 = vpop.eup %8498  ;;  %v2261_v1 = vmul.f32 1.442695, %v2258_v0  ;;  %v2371_v22 = vsub.f32 %v14321_v43, %v14327_v21  ;;  %v2372_v5 = vsub.f32 %v14322_v26, %v14328_v48 }
 0x256   : > { %v2005_v27 = vadd.f32 %v2003_v6, %v1993_v23  ;;  %v8501_v40 = vpop.eup %8500  ;;  %v2094_v34 = vmul.f32 %v8499_v49, %v1982_v56  ;;  %v2101_v30 = vrot.slane %v8499_v49, %v8727_v8  ;;  %v2116_v9 = vmul.f32 %v2111_v52, %v2092_v10 }
 0x257   : > { %v2117_v51 = vmul.f32 %v2115_v46, %v2093_v28  ;;  %v3506_v11 = vadd.f32 %v3505_v54, %v3504_v35  ;;  %v10332_v62 = vmul.f32 32.0, %v3499_v59  ;;  %v2095_v45 = vmul.f32 %v8501_v40, %v1983_v50  ;;  %v2386_v28 = vpop.permute.xlu1 %2385  ;;  %v14329_v46 = vld [vmem:[#allocation30_spill] sm:$0xff] }
 0x258   : > { %v2105_v6 = vrot.slane %v8501_v40, %v8727_v8  ;;  %v2106_v0 = vmul.f32 %v2101_v30, %v2004_v19  ;;  %8514 = vpow2.f32 %v2259_v25  ;;  %v2273_v43 = vsel %vm2198_vm15, %v2270_v55, %v2272_v57  ;;  %v2384_v19 = vpop.permute.xlu0 %2383 }
 0x259   : > { %v2373_v18 = vmul.f32 1.442695, %v2371_v22  ;;  %v2096_v26 = vadd.f32 %v14325_v38, %v2094_v34  ;;  %8516 = vpow2.f32 %v2261_v1  ;;  %v2375_v56 = vmul.f32 1.442695, %v2372_v5 }
 0x25a   : > { %v2107_v23 = vmul.f32 %v2105_v6, %v2005_v27  ;;  %v2097_v10 = vadd.f32 %v14326_v17, %v2095_v45  ;;  %v10338_v59 = vmul.f32 32.0, %v3506_v11  ;;  %v10342_v50 = vmax.f32 %v10280_v53, %v10332_v62  ;;  %v14332_v11 = vld [vmem:[#allocation31_spill] sm:$0xff]  ;;  %v14333_v45 = vld [vmem:[#allocation64_spill] sm:$0xff] }
 0x25b   : > { %v8503_v13 = vpop.eup %8502  ;;  %8518 = vpow2.f32 %v2373_v18  ;;  %v2118_v52 = vadd.f32 %v2116_v9, %v2106_v0  ;;  %v2277_v38 = vsel %vm2198_vm15, %v2272_v57, %v2270_v55  ;;  %v2278_v25 = vmul.f32 %v2273_v43, %v14329_v46  ;;  %v14334_v43 = vld [vmem:[#allocation65_spill] sm:$0xff]  ;;  %v2500_v24 = vpop.permute.xlu1 %2499 }
 0x25c   : > { %v8505_v35 = vpop.eup %8504  ;;  %8520 = vpow2.f32 %v2375_v56  ;;  %v2119_v17 = vadd.f32 %v2117_v51, %v2107_v23  ;;  %v2164_v27 = vmul.f32 %v8503_v13, %v2096_v26  ;;  %v2171_v1 = vrot.slane %v8503_v13, %v8727_v8 }
 0x25d   : > { %v8507_v54 = vpop.eup %8506  ;;  %v2387_v22 = vsel %vm2312_vm0, %v2384_v19, %v2386_v28  ;;  %v2165_v40 = vmul.f32 %v8505_v35, %v2097_v10  ;;  %v2485_v30 = vsub.f32 %v14327_v21, %v9675_v32  ;;  %v2486_v57 = vsub.f32 %v14328_v48, %v9694_v37  ;;  %v14335_v10 = vld [vmem:[#allocation33_spill] sm:$0xff] }
 0x25e   : > { %v10346_v49 = vpop.eup %8508  ;;  %v2181_v34 = vrot.slane %v8507_v54, %v8727_v8  ;;  %v2175_v9 = vrot.slane %v8505_v35, %v8727_v8  ;;  %v2279_v13 = vmul.f32 %v2277_v38, %v14332_v11  ;;  %v2297_v6 = vrot.slane %v14333_v45, %v8727_v8  ;;  %v14337_v38 = vld [vmem:[#allocation6_spill] sm:$0xff] }
 0x25f   : > { %14330 = vst [vmem:[#allocation20_spill] sm:$0xff] %v10346_v49  ;;  %v8511_v5 = vpop.eup %8510  ;;  %v2176_v0 = vmul.f32 %v2171_v1, %v2118_v52  ;;  %v2301_v18 = vrot.slane %v14334_v43, %v8727_v8  ;;  %v2487_v26 = vmul.f32 1.442695, %v2485_v30  ;;  %v2489_v21 = vmul.f32 1.442695, %v2486_v57 }
 0x260   : > { %v10355_v55 = vpop.eup %8512  ;;  %v2185_v51 = vrot.slane %v8511_v5, %v8727_v8  ;;  %v2177_v23 = vmul.f32 %v2175_v9, %v2119_v17  ;;  %v2302_v56 = vmul.f32 %v2297_v6, %v2278_v25  ;;  %v2391_v48 = vsel %vm2312_vm0, %v2386_v28, %v2384_v19  ;;  %v14338_v28 = vld [vmem:[#allocation34_spill] sm:$0xff] }
 0x261   : > { %14331 = vst [vmem:[#allocation21_spill] sm:$0xff] %v10355_v55  ;;  %v2392_v46 = vmul.f32 %v2387_v22, %v14335_v10  ;;  %v2166_v35 = vadd.f32 %v8507_v54, %v2164_v27  ;;  %v2167_v33 = vadd.f32 %v8511_v5, %v2165_v40  ;;  %v14336_v55 = vld [vmem:[#allocation7_spill] sm:$0xff]  ;;  %8522 = vpow2.f32 %v2487_v26  ;;  %v14339_v54 = vld [vmem:[#allocation32_spill] sm:$0xff]  ;;  %v2498_v5 = vpop.permute.xlu0 %2497 }
 0x262   : > { %v2188_v49 = vmul.f32 %v2181_v34, %v14336_v55  ;;  %v2189_v11 = vmul.f32 %v2185_v51, %v14337_v38  ;;  %8524 = vpow2.f32 %v2489_v21  ;;  %v2599_v52 = vsub.f32 %v9675_v32, %v9790_v2 }
 0x263   : > { %v2600_v17 = vsub.f32 %v9694_v37, %v9801_v29  ;;  %v2303_v1 = vmul.f32 %v2301_v18, %v2279_v13  ;;  %v2393_v19 = vmul.f32 %v2391_v48, %v14338_v28  ;;  %v2411_v27 = vrot.slane %v14339_v54, %v8727_v8 }
 0x264   : > { %v2190_v25 = vadd.f32 %v2188_v49, %v2176_v0  ;;  %v2191_v40 = vadd.f32 %v2189_v11, %v2177_v23  ;;  %v2415_v34 = vrot.slane %v9722_v61, %v8727_v8  ;;  %v2601_v30 = vmul.f32 1.442695, %v2599_v52 }
 0x265   : > { %v8515_v22 = vpop.eup %8514  ;;  %v2603_v57 = vmul.f32 1.442695, %v2600_v17  ;;  %v2416_v37 = vmul.f32 %v2411_v27, %v2392_v46  ;;  %vm14340_vm0 = vcmask 932864   ;;  %v2713_v0 = vsub.f32 %v9790_v2, %v9841_v15  ;;  %v14343_v17 = vld [vmem:[#allocation36_spill] sm:$0xff] }
 0x266   : > { %v8517_v55 = vpop.eup %8516  ;;  %v2280_v32 = vmul.f32 %v8515_v22, %v2166_v35  ;;  %v2287_v9 = vrot.slane %v8515_v22, %v8727_v8  ;;  %v2501_v49 = vsel %vm14340_vm0, %v2498_v5, %v2500_v24  ;;  %8526 = vpow2.f32 %v2601_v30  ;;  %vm14341_vm12 = vmmov %vm14340_vm0  ;;  %v14342_v35 = vld [vmem:[#allocation53_spill] sm:$0xff] }
 0x267   : > { %v2281_v13 = vmul.f32 %v8517_v55, %v2167_v33  ;;  %v2291_v6 = vrot.slane %v8517_v55, %v8727_v8  ;;  %v2417_v23 = vmul.f32 %v2415_v34, %v2393_v19  ;;  %8528 = vpow2.f32 %v2603_v57  ;;  %v2612_v34 = vpop.permute.xlu0 %2611  ;;  %v14345_v57 = vld [vmem:[#allocation37_spill] sm:$0xff] }
 0x268   : > { %v8519_v51 = vpop.eup %8518  ;;  %v2282_v26 = vadd.f32 %v14333_v45, %v2280_v32  ;;  %v2292_v21 = vmul.f32 %v2287_v9, %v2190_v25  ;;  %v2505_v46 = vsel %vm14341_vm12, %v2500_v24, %v2498_v5  ;;  %v2506_v38 = vmul.f32 %v2501_v49, %v14342_v35  ;;  %v2614_v25 = vpop.permute.xlu1 %2613 }
 0x269   : > { %v8521_v18 = vpop.eup %8520  ;;  %v2283_v48 = vadd.f32 %v14334_v43, %v2281_v13  ;;  %v2293_v10 = vmul.f32 %v2291_v6, %v2191_v40  ;;  %v2401_v52 = vrot.slane %v8519_v51, %v8727_v8  ;;  %v2714_v2 = vsub.f32 %v9801_v29, %v14343_v17  ;;  %v14344_v40 = vld [vmem:[#allocation54_spill] sm:$0xff]  ;;  %v14347_v13 = vld [vmem:[#allocation68_spill] sm:$0xff] }
 0x26a   : > { %v2304_v33 = vadd.f32 %v2302_v56, %v2292_v21  ;;  %v2394_v11 = vmul.f32 %v8519_v51, %v2282_v26  ;;  %v2405_v45 = vrot.slane %v8521_v18, %v8727_v8  ;;  %v2715_v19 = vmul.f32 1.442695, %v2713_v0 }
 0x26b   : > { %v2305_v28 = vadd.f32 %v2303_v1, %v2293_v10  ;;  %v2395_v27 = vmul.f32 %v8521_v18, %v2283_v48  ;;  %v2507_v24 = vmul.f32 %v2505_v46, %v14344_v40  ;;  %v2717_v5 = vmul.f32 1.442695, %v2714_v2  ;;  %v14346_v1 = vld [vmem:[#allocation35_spill] sm:$0xff] }
 0x26c   : > { %v2396_v43 = vadd.f32 %v14339_v54, %v2394_v11  ;;  %v2406_v22 = vmul.f32 %v2401_v52, %v2304_v33  ;;  %v2525_v55 = vrot.slane %v14345_v57, %v8727_v8  ;;  %8530 = vpow2.f32 %v2715_v19  ;;  %v14349_v11 = vld [vmem:[#allocation62_spill] sm:$0xff]  ;;  %v14350_v52 = vld [vmem:[#allocation63_spill] sm:$0xff]  ;;  %v14352_v19 = vld [vmem:[#allocation69_spill] sm:$0xff] }
 0x26d   : > { %v2397_v56 = vadd.f32 %v9722_v61, %v2395_v27  ;;  %v2407_v30 = vmul.f32 %v2405_v45, %v2305_v28  ;;  %v2529_v32 = vrot.slane %v14346_v1, %v8727_v8  ;;  %v2615_v9 = vsel %vm2540_vm3, %v2612_v34, %v2614_v25  ;;  %v14348_v61 = vld [vmem:[#allocation70_spill] sm:$0xff] }
 0x26e   : > { %v2418_v29 = vadd.f32 %v2416_v37, %v2406_v22  ;;  %8532 = vpow2.f32 %v2717_v5  ;;  %v8523_v54 = vpop.eup %8522  ;;  %v2619_v51 = vsel %vm2540_vm3, %v2614_v25, %v2612_v34  ;;  %v2827_v6 = vsub.f32 %v9841_v15, %v14347_v13  ;;  %v14351_v45 = vld [vmem:[#allocation38_spill] sm:$0xff]  ;;  %v2726_v22 = vpop.permute.xlu0 %2725 }
 0x26f   : > { %v2419_v49 = vadd.f32 %v2417_v23, %v2407_v30  ;;  %v2828_v0 = vsub.f32 %v14343_v17, %v14348_v61  ;;  %v8525_v18 = vpop.eup %8524  ;;  %v10405_v37 = vmax.f32 %v10284_v44, %v10338_v59  ;;  %v2508_v26 = vmul.f32 %v8523_v54, %v2396_v43  ;;  %v2728_v17 = vpop.permute.xlu1 %2727 }
 0x270   : > { %v2515_v21 = vrot.slane %v8523_v54, %v8727_v8  ;;  %v2530_v48 = vmul.f32 %v2525_v55, %v2506_v38  ;;  %v2509_v10 = vmul.f32 %v8525_v18, %v2397_v56  ;;  %v2519_v23 = vrot.slane %v8525_v18, %v8727_v8  ;;  %v14353_v18 = vld [vmem:[#allocation66_spill] sm:$0xff] }
 0x271   : > { %v2531_v46 = vmul.f32 %v2529_v32, %v2507_v24  ;;  %v2829_v35 = vmul.f32 1.442695, %v2827_v6  ;;  %v2620_v15 = vmul.f32 %v2615_v9, %v14349_v11  ;;  %v2621_v2 = vmul.f32 %v2619_v51, %v14350_v52  ;;  %v14356_v11 = vld [vmem:[#allocation39_spill] sm:$0xff] }
 0x272   : > { %v2520_v33 = vmul.f32 %v2515_v21, %v2418_v29  ;;  %v2831_v28 = vmul.f32 1.442695, %v2828_v0  ;;  %v2521_v27 = vmul.f32 %v2519_v23, %v2419_v49  ;;  %v2639_v25 = vrot.slane %v14351_v45, %v8727_v8  ;;  %v14354_v21 = vld [vmem:[#allocation67_spill] sm:$0xff] }
 0x273   : > { %v2643_v43 = vrot.slane %v14352_v19, %v8727_v8  ;;  %8534 = vpow2.f32 %v2829_v35  ;;  %v8527_v38 = vpop.eup %8526  ;;  %v2510_v40 = vadd.f32 %v14345_v57, %v2508_v26  ;;  %v2511_v24 = vadd.f32 %v14346_v1, %v2509_v10  ;;  %v2842_v10 = vpop.permute.xlu1 %2841  ;;  %v14355_v35 = vld [vmem:[#allocation15_spill] sm:$0xff] }
 0x274   : > { %v2532_v5 = vadd.f32 %v2530_v48, %v2520_v33  ;;  %8536 = vpow2.f32 %v2831_v28  ;;  %v8529_v34 = vpop.eup %8528  ;;  %v2533_v56 = vadd.f32 %v2531_v46, %v2521_v27  ;;  %v2629_v30 = vrot.slane %v8527_v38, %v8727_v8 }
 0x275   : > { %v2729_v55 = vsel %vm2654_vm4, %v2726_v22, %v2728_v17  ;;  %v2733_v29 = vsel %vm2654_vm4, %v2728_v17, %v2726_v22  ;;  %v2622_v32 = vmul.f32 %v8527_v38, %v2510_v40  ;;  %v2623_v9 = vmul.f32 %v8529_v34, %v2511_v24 }
 0x276   : > { %v2633_v54 = vrot.slane %v8529_v34, %v8727_v8  ;;  %v2941_v49 = vsub.f32 %v14347_v13, %v10034_v20  ;;  %v2634_v57 = vmul.f32 %v2629_v30, %v2532_v5  ;;  %v2644_v51 = vmul.f32 %v2639_v25, %v2620_v15 }
 0x277   : > { %v2645_v1 = vmul.f32 %v2643_v43, %v2621_v2  ;;  %v2942_v6 = vsub.f32 %v14348_v61, %v10041_v42  ;;  %v2734_v26 = vmul.f32 %v2729_v55, %v14353_v18  ;;  %v2735_v48 = vmul.f32 %v2733_v29, %v14354_v21  ;;  %v2840_v2 = vpop.permute.xlu0 %2839  ;;  %v14357_v29 = vld [vmem:[#allocation8_spill] sm:$0xff] }
 0x278   : > { %v2635_v0 = vmul.f32 %v2633_v54, %v2533_v56  ;;  %v2943_v23 = vmul.f32 1.442695, %v2941_v49  ;;  %v2646_v46 = vadd.f32 %v2644_v51, %v2634_v57  ;;  %v2753_v33 = vrot.slane %v14355_v35, %v8727_v8  ;;  %v14358_v57 = vld [vmem:[#allocation9_spill] sm:$0xff] }
 0x279   : > { %v2757_v13 = vrot.slane %v14356_v11, %v8727_v8  ;;  %v2945_v52 = vmul.f32 1.442695, %v2942_v6  ;;  %v8531_v15 = vpop.eup %8530  ;;  %v2624_v17 = vadd.f32 %v14351_v45, %v2622_v32  ;;  %v2625_v61 = vadd.f32 %v14352_v19, %v2623_v9  ;;  %v2956_v9 = vpop.permute.xlu1 %2955 }
 0x27a   : > { %v2647_v28 = vadd.f32 %v2645_v1, %v2635_v0  ;;  %8538 = vpow2.f32 %v2943_v23  ;;  %v2743_v25 = vrot.slane %v8531_v15, %v8727_v8  ;;  %v2843_v43 = vsel %vm2768_vm5, %v2840_v2, %v2842_v10 }
 0x27b   : > { %v8533_v27 = vpop.eup %8532  ;;  %v2847_v38 = vsel %vm2768_vm5, %v2842_v10, %v2840_v2  ;;  %8540 = vpow2.f32 %v2945_v52  ;;  %v2736_v22 = vmul.f32 %v8531_v15, %v2624_v17  ;;  %v3055_v5 = vsub.f32 %v10034_v20, %v10120_v58  ;;  %v2954_v0 = vpop.permute.xlu0 %2953  ;;  %v14359_v15 = vld [vmem:[#allocation43_spill] sm:$0xff] }
 0x27c   : > { %v2737_v40 = vmul.f32 %v8533_v27, %v2625_v61  ;;  %v2747_v24 = vrot.slane %v8533_v27, %v8727_v8  ;;  %v3511_v45 = vsub.f32 %v10280_v53, %v10342_v50  ;;  %v2748_v19 = vmul.f32 %v2743_v25, %v2646_v46 }
 0x27d   : > { %v2758_v34 = vmul.f32 %v2753_v33, %v2734_v26  ;;  %v3056_v56 = vsub.f32 %v10041_v42, %v10128_v47  ;;  %v2759_v55 = vmul.f32 %v2757_v13, %v2735_v48  ;;  %v2848_v32 = vmul.f32 %v2843_v43, %v14357_v29 }
 0x27e   : > { %v2749_v30 = vmul.f32 %v2747_v24, %v2647_v28  ;;  %v3057_v54 = vmul.f32 1.442695, %v3055_v5  ;;  %v2849_v51 = vmul.f32 %v2847_v38, %v14358_v57  ;;  %v2867_v20 = vrot.slane %v10089_v31, %v8727_v8  ;;  %v14360_v38 = vld [vmem:[#allocation10_spill] sm:$0xff] }
 0x27f   : > { %v2760_v49 = vadd.f32 %v2758_v34, %v2748_v19  ;;  %v3059_v1 = vmul.f32 1.442695, %v3056_v56  ;;  %v2738_v18 = vadd.f32 %v14355_v35, %v2736_v22  ;;  %v2739_v26 = vadd.f32 %v14356_v11, %v2737_v40  ;;  %v3070_v56 = vpop.permute.xlu1 %3069 }
 0x280   : > { %v8535_v6 = vpop.eup %8534  ;;  %v2761_v42 = vadd.f32 %v2759_v55, %v2749_v30  ;;  %8542 = vpow2.f32 %v3057_v54  ;;  %v2957_v10 = vsel %vm2882_vm6, %v2954_v0, %v2956_v9  ;;  %v2961_v23 = vsel %vm2882_vm6, %v2956_v9, %v2954_v0 }
 0x281   : > { %v8537_v21 = vpop.eup %8536  ;;  %v2857_v48 = vrot.slane %v8535_v6, %v8727_v8  ;;  %8544 = vpow2.f32 %v3059_v1  ;;  %v2850_v46 = vmul.f32 %v8535_v6, %v2738_v18  ;;  %v3169_v52 = vsub.f32 %v10120_v58, %v10165_v3  ;;  %v14361_v58 = vld [vmem:[#allocation11_spill] sm:$0xff] }
 0x282   : > { %v2851_v33 = vmul.f32 %v8537_v21, %v2739_v26  ;;  %v2861_v13 = vrot.slane %v8537_v21, %v8727_v8  ;;  %v3512_v35 = vsub.f32 %v10284_v44, %v10405_v37  ;;  %v2871_v2 = vrot.slane %v14359_v15, %v8727_v8 }
 0x283   : > { %v2862_v11 = vmul.f32 %v2857_v48, %v2760_v49  ;;  %v3170_v17 = vsub.f32 %v10128_v47, %v10171_v41  ;;  %v3517_v61 = vsub.f32 %v10332_v62, %v10342_v50  ;;  %v2872_v27 = vmul.f32 %v2867_v20, %v2848_v32  ;;  %v3068_v32 = vpop.permute.xlu0 %3067 }
 0x284   : > { %v2863_v28 = vmul.f32 %v2861_v13, %v2761_v42  ;;  %v3171_v25 = vmul.f32 1.442695, %v3169_v52  ;;  %v2873_v43 = vmul.f32 %v2871_v2, %v2849_v51  ;;  %v2962_v22 = vmul.f32 %v2957_v10, %v14360_v38  ;;  %v14362_v10 = vld [vmem:[#allocation12_spill] sm:$0xff] }
 0x285   : > { %v2963_v40 = vmul.f32 %v2961_v23, %v14361_v58  ;;  %v3173_v24 = vmul.f32 1.442695, %v3170_v17  ;;  %v2852_v5 = vadd.f32 %v10089_v31, %v2850_v46  ;;  %v2853_v19 = vadd.f32 %v14359_v15, %v2851_v33 }
 0x286   : > { %v2874_v34 = vadd.f32 %v2872_v27, %v2862_v11  ;;  %8546 = vpow2.f32 %v3171_v25  ;;  %v2875_v30 = vadd.f32 %v2873_v43, %v2863_v28  ;;  %v3283_v62 = vsub.f32 %v10165_v3, %v10240_v4 }
 0x287   : > { %v8539_v47 = vpop.eup %8538  ;;  %8548 = vpow2.f32 %v3173_v24  ;;  %v3284_v55 = vsub.f32 %v10171_v41, %v10247_v60  ;;  %v2981_v31 = vrot.slane %v10139_v39, %v8727_v8  ;;  %v2985_v49 = vrot.slane %v10145_v63, %v8727_v8 }
 0x288   : > { %v8541_v29 = vpop.eup %8540  ;;  %v2964_v9 = vmul.f32 %v8539_v47, %v2852_v5  ;;  %v2971_v54 = vrot.slane %v8539_v47, %v8727_v8  ;;  %v3071_v20 = vsel %vm2996_vm7, %v3068_v32, %v3070_v56  ;;  %v3285_v3 = vmul.f32 1.442695, %v3283_v62  ;;  %v14364_v62 = vld [vmem:[#allocation40_spill] sm:$0xff] }
 0x289   : > { %v2965_v57 = vmul.f32 %v8541_v29, %v2853_v19  ;;  %v2975_v51 = vrot.slane %v8541_v29, %v8727_v8  ;;  %v3518_v41 = vsub.f32 %v10338_v59, %v10405_v37  ;;  %v2986_v6 = vmul.f32 %v2981_v31, %v2962_v22 }
 0x28a   : > { %v2976_v1 = vmul.f32 %v2971_v54, %v2874_v34  ;;  %v3287_v0 = vmul.f32 1.442695, %v3284_v55  ;;  %v2987_v26 = vmul.f32 %v2985_v49, %v2963_v40  ;;  %v3075_v42 = vsel %vm2996_vm7, %v3070_v56, %v3068_v32  ;;  %v14365_v32 = vld [vmem:[#allocation14_spill] sm:$0xff] }
 0x28b   : > { %v2977_v18 = vmul.f32 %v2975_v51, %v2875_v30  ;;  %8550 = vpow2.f32 %v3285_v3  ;;  %v2966_v21 = vadd.f32 %v10139_v39, %v2964_v9  ;;  %v3076_v23 = vmul.f32 %v3071_v20, %v14362_v10  ;;  %v14363_v39 = vld [vmem:[#allocation13_spill] sm:$0xff] }
 0x28c   : > { %v2988_v48 = vadd.f32 %v2986_v6, %v2976_v1  ;;  %8552 = vpow2.f32 %v3287_v0  ;;  %v2967_v33 = vadd.f32 %v10145_v63, %v2965_v57  ;;  %v3397_v59 = vsub.f32 %v10240_v4, %v10280_v53  ;;  %v3184_v4 = vpop.permute.xlu1 %3183 }
 0x28d   : > { %v8543_v46 = vpop.eup %8542  ;;  %v2989_v13 = vadd.f32 %v2987_v26, %v2977_v18  ;;  %v3398_v37 = vsub.f32 %v10247_v60, %v10284_v44  ;;  %v3513_v11 = vmul.f32 1.442695, %v3511_v45  ;;  %v3077_v15 = vmul.f32 %v3075_v42, %v14363_v39  ;;  %v3182_v45 = vpop.permute.xlu0 %3181 }
 0x28e   : > { %v8545_v52 = vpop.eup %8544  ;;  %v3078_v2 = vmul.f32 %v8543_v46, %v2966_v21  ;;  %v3085_v17 = vrot.slane %v8543_v46, %v8727_v8  ;;  %v3095_v27 = vrot.slane %v10203_v12, %v8727_v8  ;;  %v3399_v25 = vmul.f32 1.442695, %v3397_v59 }
 0x28f   : > { %v3079_v28 = vmul.f32 %v8545_v52, %v2967_v33  ;;  %v3089_v63 = vrot.slane %v8545_v52, %v8727_v8  ;;  %v3515_v43 = vmul.f32 1.442695, %v3512_v35  ;;  %v3099_v44 = vrot.slane %v10213_v36, %v8727_v8 }
 0x290   : > { %v3090_v60 = vmul.f32 %v3085_v17, %v2988_v48  ;;  %v3401_v53 = vmul.f32 1.442695, %v3398_v37  ;;  %v3519_v50 = vmul.f32 1.442695, %v3517_v61  ;;  %v3100_v22 = vmul.f32 %v3095_v27, %v3076_v23  ;;  %v3298_v49 = vpop.permute.xlu1 %3297  ;;  %v14366_v23 = vld [vmem:[#allocation44_spill] sm:$0xff] }
 0x291   : > { %v3091_v38 = vmul.f32 %v3089_v63, %v2989_v13  ;;  %8554 = vpow2.f32 %v3399_v25  ;;  %v3080_v58 = vadd.f32 %v10203_v12, %v3078_v2  ;;  %v3101_v40 = vmul.f32 %v3099_v44, %v3077_v15  ;;  %v3296_v6 = vpop.permute.xlu0 %3295 }
 0x292   : > { %v3185_v24 = vsel %vm3110_vm8, %v3182_v45, %v3184_v4  ;;  %8556 = vpow2.f32 %v3401_v53  ;;  %v3081_v35 = vadd.f32 %v10213_v36, %v3079_v28  ;;  %v3102_v19 = vadd.f32 %v3100_v22, %v3090_v60 }
 0x293   : > { %v8547_v5 = vpop.eup %8546  ;;  %8558 = vpow2.f32 %v3513_v11  ;;  %v3189_v34 = vsel %vm3110_vm8, %v3184_v4, %v3182_v45  ;;  %v3521_v61 = vmul.f32 1.442695, %v3518_v41  ;;  %v3103_v47 = vadd.f32 %v3101_v40, %v3091_v38  ;;  %v14368_v11 = vld [vmem:[#allocation42_spill] sm:$0xff]  ;;  %v14369_v45 = vld [vmem:[#allocation20_spill] sm:$0xff]  ;;  %v14370_v40 = vld [vmem:[#allocation21_spill] sm:$0xff] }
 0x294   : > { %v8549_v56 = vpop.eup %8548  ;;  %8560 = vpow2.f32 %v3515_v43  ;;  %v3192_v30 = vmul.f32 %v8547_v5, %v3080_v58  ;;  %v3190_v55 = vmul.f32 %v3185_v24, %v14364_v62  ;;  %v3199_v12 = vrot.slane %v8547_v5, %v8727_v8  ;;  %v3412_v27 = vpop.permute.xlu1 %3411 }
 0x295   : > { %v3193_v29 = vmul.f32 %v8549_v56, %v3081_v35  ;;  %v3191_v9 = vmul.f32 %v3189_v34, %v14365_v32  ;;  %v3203_v54 = vrot.slane %v8549_v56, %v8727_v8  ;;  %8562 = vpow2.f32 %v3519_v50  ;;  %v3410_v17 = vpop.permute.xlu0 %3409 }
 0x296   : > { %v3204_v31 = vmul.f32 %v3199_v12, %v3102_v19  ;;  %v3209_v36 = vrot.slane %v10258_v14, %v8727_v8  ;;  %v3194_v57 = vadd.f32 %v10258_v14, %v3192_v30  ;;  %8564 = vpow2.f32 %v3521_v61  ;;  %v14371_v30 = vld [vmem:[#allocation19_spill] sm:$0xff]  ;;  %v14372_v12 = vld [vmem:[#allocation41_spill] sm:$0xff] }
 0x297   : > { %v3205_v20 = vmul.f32 %v3203_v54, %v3103_v47  ;;  %v3213_v3 = vrot.slane %v10261_v7, %v8727_v8  ;;  %v3195_v41 = vadd.f32 %v10261_v7, %v3193_v29  ;;  %v3299_v42 = vsel %vm3224_vm9, %v3296_v6, %v3298_v49  ;;  %v14367_v7 = vld [vmem:[#allocation18_spill] sm:$0xff] }
 0x298   : > { %v8551_v51 = vpop.eup %8550  ;;  %v3214_v0 = vmul.f32 %v3209_v36, %v3190_v55  ;;  %v3303_v10 = vsel %vm3224_vm9, %v3298_v49, %v3296_v6  ;;  %v3304_v46 = vmul.f32 %v3299_v42, %v14366_v23  ;;  %v14042_v15 = vmov 0.0   ;;  %v3526_v49 = vpop.permute.xlu1 %3525 }
 0x299   : > { %v8553_v1 = vpop.eup %8552  ;;  %v3306_v18 = vmul.f32 %v8551_v51, %v3194_v57  ;;  %v3215_v26 = vmul.f32 %v3213_v3, %v3191_v9  ;;  %v3313_v33 = vrot.slane %v8551_v51, %v8727_v8  ;;  %v3305_v37 = vmul.f32 %v3303_v10, %v14367_v7  ;;  %4101 = vmatprep.mubr.f32.mxu0 %v14042_v15  ;;  %v3524_v47 = vpop.permute.xlu0 %3523 }
 0x29a   : > { %v3307_v21 = vmul.f32 %v8553_v1, %v3195_v41  ;;  %v3216_v48 = vadd.f32 %v3214_v0, %v3204_v31  ;;  %v3317_v52 = vrot.slane %v8553_v1, %v8727_v8  ;;  %v3323_v63 = vrot.slane %v10311_v16, %v8727_v8 }
 0x29b   : > { %v3217_v14 = vadd.f32 %v3215_v26, %v3205_v20  ;;  %v3308_v13 = vadd.f32 %v10311_v16, %v3306_v18  ;;  %v3327_v60 = vrot.slane %v14368_v11, %v8727_v8  ;;  %v3413_v58 = vsel %vm3338_vm10, %v3410_v17, %v3412_v27  ;;  %v14373_v26 = vld [vmem:[#allocation45_spill] sm:$0xff] }
 0x29c   : > { %v3309_v39 = vadd.f32 %v14368_v11, %v3307_v21  ;;  %v3318_v28 = vmul.f32 %v3313_v33, %v3216_v48  ;;  %v3328_v50 = vmul.f32 %v3323_v63, %v3304_v46  ;;  %v3417_v16 = vsel %vm3338_vm10, %v3412_v27, %v3410_v17  ;;  %v14374_v48 = vld [vmem:[#allocation46_spill] sm:$0xff]  ;;  %v3589_v7 = vpop.permute.xlu1 %3588 }
 0x29d   : > { %v3319_v43 = vmul.f32 %v3317_v52, %v3217_v14  ;;  %v3329_v22 = vmul.f32 %v3327_v60, %v3305_v37  ;;  %v3418_v62 = vmul.f32 %v3413_v58, %v14371_v30  ;;  %v3419_v32 = vmul.f32 %v3417_v16, %v14372_v12  ;;  %v3582_v3 = vpop.permute.xlu0 %3581 }
 0x29e   : > { %v8555_v59 = vpop.eup %8554  ;;  %v3330_v5 = vadd.f32 %v3328_v50, %v3318_v28  ;;  %v3437_v36 = vrot.slane %v14369_v45, %v8727_v8  ;;  %v3441_v51 = vrot.slane %v14370_v40, %v8727_v8  ;;  %v3527_v1 = vsel %vm3452_vm11, %v3524_v47, %v3526_v49 }
 0x29f   : > { %v8557_v2 = vpop.eup %8556  ;;  %v3420_v4 = vmul.f32 %v8555_v59, %v3308_v13  ;;  %v3331_v34 = vadd.f32 %v3329_v22, %v3319_v43  ;;  %v3427_v55 = vrot.slane %v8555_v59, %v8727_v8  ;;  %v3531_v0 = vsel %vm3452_vm11, %v3526_v49, %v3524_v47 }
 0x2a0   : > { %v8559_v25 = vpop.eup %8558  ;;  %v3421_v44 = vmul.f32 %v8557_v2, %v3309_v39  ;;  %v3431_v9 = vrot.slane %v8557_v2, %v8727_v8  ;;  %v3442_v20 = vmul.f32 %v3437_v36, %v3418_v62  ;;  %v3443_v41 = vmul.f32 %v3441_v51, %v3419_v32 }
 0x2a1   : > { %v8561_v53 = vpop.eup %8560  ;;  %v3422_v38 = vadd.f32 %v14369_v45, %v3420_v4  ;;  %v3432_v31 = vmul.f32 %v3427_v55, %v3330_v5  ;;  %v3532_v42 = vmul.f32 %v3527_v1, %v14373_v26  ;;  %v3541_v21 = vrot.slane %v8559_v25, %v8727_v8  ;;  %v3596_v33 = vpop.permute.xlu0 %3595 }
 0x2a2   : > { %v3423_v24 = vadd.f32 %v14370_v40, %v3421_v44  ;;  %v8563_v19 = vpop.eup %8562  ;;  %v3433_v57 = vmul.f32 %v3431_v9, %v3331_v34  ;;  %v3533_v10 = vmul.f32 %v3531_v0, %v14374_v48  ;;  %v3545_v14 = vrot.slane %v8561_v53, %v8727_v8  ;;  %v3603_v4 = vpop.permute.xlu1 %3602 }
 0x2a3   : > { %v3534_v35 = vmul.f32 %v8559_v25, %v3422_v38  ;;  %v8565_v61 = vpop.eup %8564  ;;  %v3444_v6 = vadd.f32 %v3442_v20, %v3432_v31  ;;  %v3551_v46 = vrot.slane %v8563_v19, %v8727_v8  ;;  %vm3697_vm9 = vcmask 1045509  }
 0x2a4   : > { %v3535_v56 = vmul.f32 %v8561_v53, %v3423_v24  ;;  %v3445_v18 = vadd.f32 %v3443_v41, %v3433_v57  ;;  %v3555_v59 = vrot.slane %v8565_v61, %v8727_v8  ;;  %vm3703_vm10 = vcmask 1047559  }
 0x2a5   : > { %v3536_v29 = vadd.f32 %v8563_v19, %v3534_v35  ;;  %v3546_v23 = vmul.f32 %v3541_v21, %v3444_v6  ;;  %v3556_v37 = vmul.f32 %v3551_v46, %v3532_v42  ;;  %v10546_v63 = vpop.permute.xlu0 %3670  ;;  %vm7973_vm11 = vcmask 1042434  }
 0x2a6   : > { %v3537_v54 = vadd.f32 %v8565_v61, %v3535_v56  ;;  %v3547_v13 = vmul.f32 %v3545_v14, %v3445_v18  ;;  %v3557_v52 = vmul.f32 %v3555_v59, %v3533_v10  ;;  %v3672_v60 = vrot.slane %v10546_v63, 1 }
 0x2a7   : > { %8566 = vrcp.f32 %v3536_v29  ;;  %v3558_v11 = vadd.f32 %v3556_v37, %v3546_v23  ;;  %v3673_v44 = vrot.slane %v10546_v63, 2  ;;  %v3674_v53 = vrot.slane %v10546_v63, 3 }
 0x2a8   : > { %8568 = vrcp.f32 %v3537_v54  ;;  %v3559_v2 = vadd.f32 %v3557_v52, %v3547_v13  ;;  %vm7976_vm13 = vcmask 1043459   ;;  %vm14377_vm6 = vcmask 1043456  }
 0x2a9   : > { %vm14378_vm7 = vmmov %vm14377_vm6 }
 0x2b4   : > { %v8567_v39 = vpop.eup %8566 }
 0x2b5   : > { %v8569_v17 = vpop.eup %8568  ;;  %v3567_v28 = vrot.slane %v8567_v39, %v8727_v8 }
 0x2b6   : > { %v3571_v27 = vrot.slane %v8569_v17, %v8727_v8 }
 0x2b7   : > { %v3572_v25 = vmul.f32 %v3567_v28, %v3558_v11 }
 0x2b8   : > { %v3573_v43 = vmul.f32 %v3571_v27, %v3559_v2 }
 0x2b9   : > { %v3604_v50 = vmul.f32 %v3582_v3, %v3572_v25  ;;  %v3608_v45 = vmul.f32 %v3596_v33, %v3572_v25  ;;  %v3606_v38 = vmul.f32 %v3589_v7, %v3572_v25  ;;  %v3610_v22 = vmul.f32 %v3603_v4, %v3572_v25 }
 0x2ba   : > { %v3605_v58 = vmul.f32 %v3582_v3, %v3573_v43  ;;  %v3609_v40 = vmul.f32 %v3596_v33, %v3573_v43  ;;  %v3607_v24 = vmul.f32 %v3589_v7, %v3573_v43  ;;  %v3611_v5 = vmul.f32 %v3603_v4, %v3573_v43 }
 0x2bb   : > { %v3612_v16 = vsel %vm792_vm2, %v3604_v50, 0.0  ;;  %v3640_v35 = vsel %vm792_vm2, %v3608_v45, 0.0  ;;  %v3626_v19 = vsel %vm792_vm2, %v3606_v38, 0.0  ;;  %v3654_v34 = vsel %vm792_vm2, %v3610_v22, 0.0 }
 0x2bc   : > { %v3613_v56 = vrot.slane %v3612_v16, 4  ;;  %v3619_v61 = vsel %vm792_vm2, %v3605_v58, 0.0  ;;  %v3641_v47 = vrot.slane %v3640_v35, 4  ;;  %v3647_v30 = vsel %vm792_vm2, %v3609_v40, 0.0 }
 0x2bd   : > { %v3620_v62 = vrot.slane %v3619_v61, 4  ;;  %v3648_v55 = vrot.slane %v3647_v30, 4  ;;  %v3627_v29 = vrot.slane %v3626_v19, 4  ;;  %v3633_v12 = vsel %vm792_vm2, %v3607_v24, 0.0 }
 0x2be   : > { %v3614_v32 = vadd.f32 %v3613_v56, %v3612_v16  ;;  %v3642_v9 = vadd.f32 %v3641_v47, %v3640_v35  ;;  %v3634_v54 = vrot.slane %v3633_v12, 4  ;;  %v3655_v31 = vrot.slane %v3654_v34, 4 }
 0x2bf   : > { %v3621_v36 = vadd.f32 %v3620_v62, %v3619_v61  ;;  %v3649_v49 = vadd.f32 %v3648_v55, %v3647_v30  ;;  %v3628_v57 = vadd.f32 %v3627_v29, %v3626_v19  ;;  %v3661_v51 = vsel %vm792_vm2, %v3611_v5, 0.0 }
 0x2c0   : > { %v3615_v20 = vrot.slane %v3614_v32, 2  ;;  %v3643_v3 = vrot.slane %v3642_v9, 2  ;;  %v3635_v41 = vadd.f32 %v3634_v54, %v3633_v12  ;;  %v3656_v1 = vadd.f32 %v3655_v31, %v3654_v34 }
 0x2c1   : > { %v3622_v6 = vrot.slane %v3621_v36, 2  ;;  %v3650_v0 = vrot.slane %v3649_v49, 2  ;;  %v3629_v18 = vrot.slane %v3628_v57, 2  ;;  %v3662_v26 = vrot.slane %v3661_v51, 4 }
 0x2c2   : > { %v3616_v42 = vadd.f32 %v3615_v20, %v3614_v32  ;;  %v3644_v21 = vadd.f32 %v3643_v3, %v3642_v9  ;;  %v3636_v48 = vrot.slane %v3635_v41, 2  ;;  %v3657_v10 = vrot.slane %v3656_v1, 2 }
 0x2c3   : > { %v3623_v14 = vadd.f32 %v3622_v6, %v3621_v36  ;;  %v3651_v23 = vadd.f32 %v3650_v0, %v3649_v49  ;;  %v3630_v46 = vadd.f32 %v3629_v18, %v3628_v57  ;;  %v3663_v33 = vadd.f32 %v3662_v26, %v3661_v51  ;;  %v14376_v26 = vld [vmem:[#allocation5_spill] sm:$0xff] }
 0x2c4   : > { %v3617_v13 = vrot.slane %v3616_v42, 1  ;;  %v3645_v59 = vrot.slane %v3644_v21, 1  ;;  %v3637_v7 = vadd.f32 %v3636_v48, %v3635_v41  ;;  %v3658_v37 = vadd.f32 %v3657_v10, %v3656_v1 }
 0x2c5   : > { %vm3700_vm2 = vcmask 1046534   ;;  %v3624_v52 = vrot.slane %v3623_v14, 1  ;;  %v3652_v11 = vrot.slane %v3651_v23, 1  ;;  %v3631_v39 = vrot.slane %v3630_v46, 1 }
 0x2c6   : > { %v3664_v2 = vrot.slane %v3663_v33, 2  ;;  %v3618_v17 = vadd.f32 %v3617_v13, %v3616_v42  ;;  %v3646_v28 = vadd.f32 %v3645_v59, %v3644_v21  ;;  %v3638_v27 = vrot.slane %v3637_v7, 1  ;;  %v8570_v21 = vld [vmem:[%s8774_s28] sm:$0xff]  ;;  %v3721_v59 = vld [vmem:[%s13890_s8 + $0x28] sm:$0xff] }
 0x2c7   : > { %v3659_v4 = vrot.slane %v3658_v37, 1  ;;  %v3625_v25 = vadd.f32 %v3624_v52, %v3623_v14  ;;  %v3653_v43 = vadd.f32 %v3652_v11, %v3651_v23  ;;  %v3632_v50 = vadd.f32 %v3631_v39, %v3630_v46  ;;  %v3716_v14 = vld [vmem:[%s13890_s8] sm:$0xff]  ;;  %v3717_v23 = vld [vmem:[%s13890_s8 + $0x8] sm:$0xff]  ;;  %v3718_v46 = vld [vmem:[%s13890_s8 + $0x10] sm:$0xff] }
 0x2c8   : > { %v3665_v45 = vadd.f32 %v3664_v2, %v3663_v33  ;;  %v3639_v38 = vadd.f32 %v3638_v27, %v3637_v7  ;;  %v3679_v22 = vadd.f32 %v10546_v63, %v3618_v17  ;;  %v3683_v40 = vadd.f32 %v3673_v44, %v3646_v28  ;;  %v3719_v33 = vld [vmem:[%s13890_s8 + $0x18] sm:$0xff]  ;;  %v3720_v13 = vld [vmem:[%s13890_s8 + $0x20] sm:$0xff]  ;;  %v3722_v7 = vld [vmem:[%s13890_s8 + $0x30] sm:$0xff] }
 0x2c9   : > { %v3660_v58 = vadd.f32 %v3659_v4, %v3658_v37  ;;  %v3680_v24 = vadd.f32 %v10546_v63, %v3625_v25  ;;  %v3684_v16 = vadd.f32 %v3673_v44, %v3653_v43  ;;  %v3681_v35 = vadd.f32 %v3672_v60, %v3632_v50  ;;  %v3723_v37 = vld [vmem:[%s13890_s8 + $0x38] sm:$0xff]  ;;  %v3724_v52 = vld [vmem:[%s13890_s8 + $0x40] sm:$0xff]  ;;  %v3725_v11 = vld [vmem:[%s13890_s8 + $0x48] sm:$0xff] }
 0x2ca   : > { %v3666_v5 = vrot.slane %v3665_v45, 1  ;;  %v3682_v19 = vadd.f32 %v3672_v60, %v3639_v38  ;;  %v3695_v56 = vrot.slane %v3679_v22, 4  ;;  %v3699_v32 = vrot.slane %v3683_v40, 2  ;;  %v3726_v39 = vld [vmem:[%s13890_s8 + $0x50] sm:$0xff]  ;;  %v3727_v2 = vld [vmem:[%s13890_s8 + $0x58] sm:$0xff]  ;;  %v3728_v17 = vld [vmem:[%s13890_s8 + $0x60] sm:$0xff] }
 0x2cb   : > { %v3685_v34 = vadd.f32 %v3674_v53, %v3660_v58  ;;  %v3705_v47 = vrot.slane %v3680_v24, 4  ;;  %v3708_v30 = vrot.slane %v3684_v16, 2  ;;  %v7980_v62 = vrot.slane %v3684_v16, 6  ;;  %v3729_v28 = vld [vmem:[%s13890_s8 + $0x68] sm:$0xff]  ;;  %v3730_v27 = vld [vmem:[%s13890_s8 + $0x70] sm:$0xff]  ;;  %v3731_v4 = vld [vmem:[%s13890_s8 + $0x78] sm:$0xff] }
 0x2cc   : > { %v3667_v61 = vadd.f32 %v3666_v5, %v3665_v45  ;;  %v3706_v55 = vrot.slane %v3682_v19, 3  ;;  %v7978_v29 = vrot.slane %v3682_v19, 7  ;;  %v3696_v12 = vrot.slane %v3681_v35, 3  ;;  %v3732_v25 = vld [vmem:[%s13890_s8 + $0x80] sm:$0xff]  ;;  %v3733_v43 = vld [vmem:[%s13890_s8 + $0x88] sm:$0xff]  ;;  %v3734_v50 = vld [vmem:[%s13890_s8 + $0x90] sm:$0xff] }
 0x2cd   : > { %v7970_v9 = vrot.slane %v3681_v35, 7  ;;  %v7972_v54 = vrot.slane %v3683_v40, 6  ;;  %v3702_v49 = vrot.slane %v3685_v34, 1  ;;  %v7975_v41 = vrot.slane %v3685_v34, 5  ;;  %v3735_v45 = vld [vmem:[%s13890_s8 + $0x98] sm:$0xff]  ;;  %v3736_v38 = vld [vmem:[%s13890_s8 + $0xa0] sm:$0xff] }
 0x2ce   : > { %v3686_v44 = vadd.f32 %v3674_v53, %v3667_v61  ;;  %v3707_v60 = vsel %vm3697_vm9, %v3706_v55, %v3705_v47  ;;  %v7979_v31 = vsel %vm741_vm1, %v7978_v29, %v3680_v24  ;;  %v3698_v36 = vsel %vm3697_vm9, %v3696_v12, %v3695_v56  ;;  %v3738_v58 = vld [vmem:[%s13890_s8 + $0xb0] sm:$0xff]  ;;  %v3739_v40 = vld [vmem:[%s13890_s8 + $0xb8] sm:$0xff]  ;;  %v3740_v24 = vld [vmem:[%s13890_s8 + $0xc0] sm:$0xff]  ;;  %v10753_v47 = vpop.permute.xlu1 %3852 }
 0x2cf   : > { %v3709_v57 = vsel %vm3700_vm2, %v3708_v30, %v3707_v60  ;;  %v7981_v20 = vsel %vm7973_vm11, %v7980_v62, %v7979_v31  ;;  %v3701_v63 = vsel %vm3700_vm2, %v3699_v32, %v3698_v36  ;;  %v7971_v53 = vsel %vm741_vm1, %v7970_v9, %v3679_v22  ;;  %v3737_v22 = vld [vmem:[%s13890_s8 + $0xa8] sm:$0xff]  ;;  %v3742_v16 = vld [vmem:[%s13890_s8 + $0xd0] sm:$0xff]  ;;  %v3743_v35 = vld [vmem:[%s13890_s8 + $0xd8] sm:$0xff]  ;;  %v10755_v30 = vpop.permute.xlu0 %3857 }
 0x2d0   : > { %v3710_v51 = vrot.slane %v3686_v44, 1  ;;  %v7982_v3 = vrot.slane %v3686_v44, 5  ;;  %v3704_v0 = vsel %vm3703_vm10, %v3702_v49, %v3701_v63  ;;  %v7974_v18 = vsel %vm7973_vm11, %v7972_v54, %v7971_v53  ;;  %v3741_v5 = vld [vmem:[%s13890_s8 + $0xc8] sm:$0xff]  ;;  %v3744_v19 = vld [vmem:[%s13890_s8 + $0xe0] sm:$0xff]  ;;  %v3746_v56 = vld [vmem:[%s13890_s8 + $0xf0] sm:$0xff] }
 0x2d1   : > { %v3714_v48 = vsel %vm14378_vm7, %v8570_v21, %v3704_v0  ;;  %v10592_v10 = vsel %vm7976_vm13, %v7975_v41, %v7974_v18  ;;  %vm3940_vm1 = vcmask 64512   ;;  %v3745_v34 = vld [vmem:[%s13890_s8 + $0xe8] sm:$0xff]  ;;  %v3747_v61 = vld [vmem:[%s13890_s8 + $0xf8] sm:$0xff]  ;;  %vm14439_vm7 = vcmask 130048  }
 0x2d2   : > { %v3711_v1 = vsel %vm3703_vm10, %v3710_v51, %v3709_v57  ;;  %v10583_v6 = vsel %vm7976_vm13, %v7982_v3, %v7981_v20  ;;  %14379 = vst [vmem:[#allocation23_spill] sm:$0xff] %v10592_v10  ;;  %v10757_v62 = vpop.permute.xlu1 %3842 }
 0x2d3   : > { %14375 = vst [vmem:[#allocation22_spill] sm:$0xff] %v10583_v6  ;;  %v3715_v42 = vsel %vm14377_vm6, %v14376_v26, %v3711_v1  ;;  %v10759_v55 = vpop.permute.xlu0 %3847 }
 0x2d4   : > { %4067 = vmatprep.subr.mxu0 %v3715_v42 }
 0x2d5   : > { %4068 = vmatpush1.msra.mxu0 %v3714_v48 }
 0x2d6   : > { %8099 = vmatmul.mubr.msk.f32.vlgmr.msra.gmra.mxu0 %vm3940_vm1, %v3716_v14  ;;  %v10761_v29 = vpop.permute.xlu1 %3832 }
 0x2d7   : > { %4107 = vmatprep.mubr.f32.mxu0 %v14042_v15  ;;  %v10763_v12 = vpop.permute.xlu0 %3837 }
 0x2da   : > { %8100 = vmatmul.mubr.msk.f32.gmra.mxu0 %vm3940_vm1, %v3717_v23  ;;  %v10765_v32 = vpop.permute.xlu1 %3822 }
 0x2db   : > { %4113 = vmatprep.mubr.f32.mxu0 %v14042_v15  ;;  %v10767_v44 = vpop.permute.xlu0 %3827 }
 0x2de   : > { %8101 = vmatmul.mubr.msk.f32.gmra.mxu0 %vm3940_vm1, %v3718_v46  ;;  %v10769_v9 = vpop.permute.xlu1 %3812 }
 0x2df   : > { %4119 = vmatprep.mubr.f32.mxu0 %v14042_v15  ;;  %v10771_v54 = vpop.permute.xlu0 %3817 }
 0x2e2   : > { %8102 = vmatmul.mubr.msk.f32.gmra.mxu0 %vm3940_vm1, %v3719_v33  ;;  %v3803_v60 = vpop.permute.xlu1 %3802 }
 0x2e3   : > { %4125 = vmatprep.mubr.f32.mxu0 %v14042_v15  ;;  %v3808_v31 = vpop.permute.xlu0 %3807 }
 0x2e6   : > { %8103 = vmatmul.mubr.msk.f32.gmra.mxu0 %vm3940_vm1, %v3720_v13  ;;  %v3793_v36 = vpop.permute.xlu1 %3792 }
 0x2e7   : > { %4131 = vmatprep.mubr.f32.mxu0 %v14042_v15  ;;  %v3798_v49 = vpop.permute.xlu0 %3797 }
 0x2ea   : > { %8104 = vmatmul.mubr.msk.f32.gmra.mxu0 %vm3940_vm1, %v3721_v59  ;;  %v3783_v51 = vpop.permute.xlu1 %3782 }
 0x2eb   : > { %4137 = vmatprep.mubr.f32.mxu0 %v14042_v15  ;;  %v3788_v63 = vpop.permute.xlu0 %3787 }
 0x2ee   : > { %8105 = vmatmul.mubr.msk.f32.gmra.mxu0 %vm3940_vm1, %v3722_v7 }
 0x2ef   : > { %4143 = vmatprep.mubr.f32.mxu0 %v14042_v15 }
 0x2f2   : > { %8106 = vmatmul.mubr.msk.f32.gmra.mxu0 %vm3940_vm1, %v3723_v37 }
 0x2f3   : > { %4149 = vmatprep.mubr.f32.mxu0 %v14042_v15 }
 0x2f6   : > { %8107 = vmatmul.mubr.msk.f32.gmra.mxu0 %vm3940_vm1, %v3724_v52 }
 0x2f7   : > { %4155 = vmatprep.mubr.f32.mxu0 %v14042_v15 }
 0x2fa   : > { %8108 = vmatmul.mubr.msk.f32.gmra.mxu0 %vm3940_vm1, %v3725_v11 }
 0x2fb   : > { %4161 = vmatprep.mubr.f32.mxu0 %v14042_v15 }
 0x2fe   : > { %8109 = vmatmul.mubr.msk.f32.gmra.mxu0 %vm3940_vm1, %v3726_v39 }
 0x2ff   : > { %4167 = vmatprep.mubr.f32.mxu0 %v14042_v15 }
 0x302   : > { %8110 = vmatmul.mubr.msk.f32.gmra.mxu0 %vm3940_vm1, %v3727_v2 }
 0x303   : > { %4173 = vmatprep.mubr.f32.mxu0 %v14042_v15 }
 0x306   : > { %8111 = vmatmul.mubr.msk.f32.gmra.mxu0 %vm3940_vm1, %v3728_v17 }
 0x307   : > { %4179 = vmatprep.mubr.f32.mxu0 %v14042_v15 }
 0x30a   : > { %8112 = vmatmul.mubr.msk.f32.gmra.mxu0 %vm3940_vm1, %v3729_v28 }
 0x30b   : > { %4185 = vmatprep.mubr.f32.mxu0 %v14042_v15 }
 0x30e   : > { %8113 = vmatmul.mubr.msk.f32.gmra.mxu0 %vm3940_vm1, %v3730_v27 }
 0x30f   : > { %4191 = vmatprep.mubr.f32.mxu0 %v14042_v15 }
 0x312   : > { %8114 = vmatmul.mubr.msk.f32.gmra.mxu0 %vm3940_vm1, %v3731_v4 }
 0x313   : > { %4197 = vmatprep.mubr.f32.mxu0 %v14042_v15 }
 0x316   : > { %8115 = vmatmul.mubr.msk.f32.gmra.mxu0 %vm3940_vm1, %v3732_v25 }
 0x317   : > { %4203 = vmatprep.mubr.f32.mxu0 %v14042_v15 }
 0x31a   : > { %8116 = vmatmul.mubr.msk.f32.gmra.mxu0 %vm3940_vm1, %v3733_v43 }
 0x31b   : > { %4209 = vmatprep.mubr.f32.mxu0 %v14042_v15 }
 0x31e   : > { %8117 = vmatmul.mubr.msk.f32.gmra.mxu0 %vm3940_vm1, %v3734_v50 }
 0x31f   : > { %4215 = vmatprep.mubr.f32.mxu0 %v14042_v15 }
 0x322   : > { %8118 = vmatmul.mubr.msk.f32.gmra.mxu0 %vm3940_vm1, %v3735_v45 }
 0x323   : > { %4221 = vmatprep.mubr.f32.mxu0 %v14042_v15 }
 0x326   : > { %8119 = vmatmul.mubr.msk.f32.gmra.mxu0 %vm3940_vm1, %v3736_v38 }
 0x327   : > { %4227 = vmatprep.mubr.f32.mxu0 %v14042_v15 }
 0x32a   : > { %8120 = vmatmul.mubr.msk.f32.gmra.mxu0 %vm3940_vm1, %v3737_v22 }
 0x32b   : > { %4233 = vmatprep.mubr.f32.mxu0 %v14042_v15 }
 0x32e   : > { %8121 = vmatmul.mubr.msk.f32.gmra.mxu0 %vm3940_vm1, %v3738_v58 }
 0x32f   : > { %4239 = vmatprep.mubr.f32.mxu0 %v14042_v15 }
 0x332   : > { %8122 = vmatmul.mubr.msk.f32.gmra.mxu0 %vm3940_vm1, %v3739_v40 }
 0x333   : > { %4245 = vmatprep.mubr.f32.mxu0 %v14042_v15 }
 0x336   : > { %8123 = vmatmul.mubr.msk.f32.gmra.mxu0 %vm3940_vm1, %v3740_v24 }
 0x337   : > { %4251 = vmatprep.mubr.f32.mxu0 %v14042_v15 }
 0x33a   : > { %8124 = vmatmul.mubr.msk.f32.gmra.mxu0 %vm3940_vm1, %v3741_v5 }
 0x33b   : > { %4257 = vmatprep.mubr.f32.mxu0 %v14042_v15 }
 0x33e   : > { %8125 = vmatmul.mubr.msk.f32.gmra.mxu0 %vm3940_vm1, %v3742_v16 }
 0x33f   : > { %4263 = vmatprep.mubr.f32.mxu0 %v14042_v15 }
 0x342   : > { %8126 = vmatmul.mubr.msk.f32.gmra.mxu0 %vm3940_vm1, %v3743_v35 }
 0x343   : > { %4269 = vmatprep.mubr.f32.mxu0 %v14042_v15 }
 0x346   : > { %8127 = vmatmul.mubr.msk.f32.gmra.mxu0 %vm3940_vm1, %v3744_v19 }
 0x347   : > { %4275 = vmatprep.mubr.f32.mxu0 %v14042_v15 }
 0x34a   : > { %8128 = vmatmul.mubr.msk.f32.gmra.mxu0 %vm3940_vm1, %v3745_v34 }
 0x34b   : > { %4281 = vmatprep.mubr.f32.mxu0 %v14042_v15 }
 0x34e   : > { %8129 = vmatmul.mubr.msk.f32.gmra.mxu0 %vm3940_vm1, %v3746_v56 }
 0x34f   : > { %4287 = vmatprep.mubr.f32.mxu0 %v14042_v15 }
 0x352   : > { %8130 = vmatmul.mubr.msk.f32.gmra.mxu0 %vm3940_vm1, %v3747_v61  ;;  %vm14440_vm1 = vmmov %vm14439_vm7 }
 0x396   : > { %v4103_v57 = vpop.f32.mrf.mxu0 }
 0x397   : > { %v4104_v3 = vadd.f32 %v4103_v57, %v3783_v51 }
 0x398   : > { %v4105_v20 = vpop.f32.mrf.mxu0 }
 0x399   : > { %v4106_v41 = vadd.f32 %v4105_v20, %v3783_v51  ;;  %v4294_v18 = vmax.f32 %v4104_v3, 0.0 }
 0x39a   : > { %v4109_v53 = vpop.f32.mrf.mxu0 }
 0x39b   : > { %v4110_v1 = vadd.f32 %v4109_v53, %v3788_v63  ;;  %v4295_v48 = vmax.f32 %v4106_v41, 0.0 }
 0x39c   : > { %v4111_v0 = vpop.f32.mrf.mxu0 }
 0x39d   : > { %v4296_v26 = vmax.f32 %v4110_v1, 0.0  ;;  %v4112_v42 = vadd.f32 %v4111_v0, %v3788_v63 }
 0x39e   : > { %v4115_v21 = vpop.f32.mrf.mxu0 }
 0x39f   : > { %v10773_v14 = vpack.c.bf16 %v4296_v26, %v4294_v18  ;;  %v4297_v23 = vmax.f32 %v4112_v42, 0.0  ;;  %v4116_v11 = vadd.f32 %v4115_v21, %v3793_v36 }
 0x3a0   : > { %v4117_v46 = vpop.f32.mrf.mxu0 }
 0x3a1   : > { %14380 = vst [vmem:[#allocation24_spill] sm:$0xff] %v10773_v14  ;;  %v10775_v33 = vpack.c.bf16 %v4297_v23, %v4295_v48  ;;  %4680 = vrot.lane.b32.xlu0 %v10773_v14, %s14382_s22  ;;  %v4118_v17 = vadd.f32 %v4117_v46, %v3793_v36  ;;  %v4298_v4 = vmax.f32 %v4116_v11, 0.0 }
 0x3a2   : > { %v4121_v13 = vpop.f32.mrf.mxu0 }
 0x3a3   : > { %14381 = vst [vmem:[#allocation25_spill] sm:$0xff] %v10775_v33  ;;  %4648 = vrot.lane.b32.xlu1 %v10775_v33, %s14382_s22  ;;  %v4122_v37 = vadd.f32 %v4121_v13, %v3798_v49  ;;  %v4299_v50 = vmax.f32 %v4118_v17, 0.0 }
 0x3a4   : > { %v4123_v59 = vpop.f32.mrf.mxu0 }
 0x3a5   : > { %4455 = vrot.lane.b32.xlu0 %v10773_v14, %s14383_s18  ;;  %v4124_v39 = vadd.f32 %v4123_v59, %v3798_v49  ;;  %v4300_v28 = vmax.f32 %v4122_v37, 0.0 }
 0x3a6   : > { %v4127_v7 = vpop.f32.mrf.mxu0 }
 0x3a7   : > { %4407 = vrot.lane.b32.xlu1 %v10775_v33, %s14383_s18  ;;  %v4301_v25 = vmax.f32 %v4124_v39, 0.0  ;;  %v10791_v45 = vpack.c.bf16 %v4300_v28, %v4298_v4  ;;  %v4128_v16 = vadd.f32 %v4127_v7, %v3803_v60 }
 0x3a8   : > { %v4129_v52 = vpop.f32.mrf.mxu0 }
 0x3a9   : > { %4992 = vrot.lane.b32.xlu0 %v10773_v14, %s14182_s0  ;;  %14385 = vst [vmem:[#allocation55_spill] sm:$0xff] %v10791_v45  ;;  %v10795_v22 = vpack.c.bf16 %v4301_v25, %v4299_v50  ;;  %v4130_v34 = vadd.f32 %v4129_v52, %v3803_v60  ;;  %v4302_v61 = vmax.f32 %v4128_v16, 0.0  ;;  %v10873_v25 = vpop.permute.xlu1 %3932 }
 0x3aa   : > { %v4133_v2 = vpop.f32.mrf.mxu0 }
 0x3ab   : > { %4960 = vrot.lane.b32.xlu1 %v10775_v33, %s14182_s0  ;;  %14386 = vst [vmem:[#allocation47_spill] sm:$0xff] %v10795_v22  ;;  %v4134_v5 = vadd.f32 %v4133_v2, %v3808_v31  ;;  %v4303_v57 = vmax.f32 %v4130_v34, 0.0 }
 0x3ac   : > { %v4135_v27 = vpop.f32.mrf.mxu0 }
 0x3ad   : > { %5265 = vrot.lane.b32.xlu0 %v10773_v14, %s14384_s29  ;;  %v4136_v35 = vadd.f32 %v4135_v27, %v3808_v31  ;;  %v4304_v56 = vmax.f32 %v4134_v5, 0.0  ;;  %v10869_v27 = vpop.permute.xlu0 %3937  ;;  %v10887_v16 = vpop.permute.xlu1 %3922 }
 0x3ae   : > { %v4139_v43 = vpop.f32.mrf.mxu0 }
 0x3af   : > { %5233 = vrot.lane.b32.xlu1 %v10775_v33, %s14384_s29  ;;  %v4305_v36 = vmax.f32 %v4136_v35, 0.0  ;;  %v10811_v51 = vpack.c.bf16 %v4304_v56, %v4302_v61  ;;  %v4140_v63 = vadd.f32 %v4139_v43, %v10769_v9 }
 0x3b0   : > { %v4141_v38 = vpop.f32.mrf.mxu0 }
 0x3b1   : > { %4682 = vrot.lane.b32.xlu0 %v10791_v45, %s14382_s22  ;;  %14387 = vst [vmem:[#allocation48_spill] sm:$0xff] %v10811_v51  ;;  %v10815_v31 = vpack.c.bf16 %v4305_v36, %v4303_v57  ;;  %v4142_v1 = vadd.f32 %v4141_v38, %v10769_v9  ;;  %v4306_v18 = vmax.f32 %v4140_v63, 0.0 }
 0x3b2   : > { %v4145_v58 = vpop.f32.mrf.mxu0 }
 0x3b3   : > { %4650 = vrot.lane.b32.xlu1 %v10795_v22, %s14382_s22  ;;  %14388 = vst [vmem:[#allocation49_spill] sm:$0xff] %v10815_v31  ;;  %v4146_v3 = vadd.f32 %v4145_v58, %v10771_v54  ;;  %v4307_v21 = vmax.f32 %v4142_v1, 0.0 }
 0x3b4   : > { %v4147_v40 = vpop.f32.mrf.mxu0 }
 0x3b5   : > { %4457 = vrot.lane.b32.xlu0 %v10791_v45, %s14383_s18  ;;  %v4148_v53 = vadd.f32 %v4147_v40, %v10771_v54  ;;  %v4308_v0 = vmax.f32 %v4146_v3, 0.0  ;;  %v10882_v40 = vpop.permute.xlu0 %3927 }
 0x3b6   : > { %v4151_v24 = vpop.f32.mrf.mxu0 }
 0x3b7   : > { %4409 = vrot.lane.b32.xlu1 %v10795_v22, %s14383_s18  ;;  %v4309_v26 = vmax.f32 %v4148_v53, 0.0  ;;  %v10835_v48 = vpack.c.bf16 %v4308_v0, %v4306_v18  ;;  %v4152_v13 = vadd.f32 %v4151_v24, %v10765_v32 }
 0x3b8   : > { %v4153_v19 = vpop.f32.mrf.mxu0 }
 0x3b9   : > { %4994 = vrot.lane.b32.xlu0 %v10791_v45, %s14182_s0  ;;  %14389 = vst [vmem:[#allocation26_spill] sm:$0xff] %v10835_v48  ;;  %v10839_v54 = vpack.c.bf16 %v4309_v26, %v4307_v21  ;;  %v4154_v37 = vadd.f32 %v4153_v19, %v10765_v32  ;;  %v4310_v11 = vmax.f32 %v4152_v13, 0.0  ;;  %v10895_v61 = vpop.permute.xlu0 %3917 }
 0x3ba   : > { %v4157_v49 = vpop.f32.mrf.mxu0 }
 0x3bb   : > { %4962 = vrot.lane.b32.xlu1 %v10795_v22, %s14182_s0  ;;  %14390 = vst [vmem:[#allocation50_spill] sm:$0xff] %v10839_v54  ;;  %v4158_v46 = vadd.f32 %v4157_v49, %v10767_v44  ;;  %v4311_v17 = vmax.f32 %v4154_v37, 0.0  ;;  %v10901_v49 = vpop.permute.xlu1 %3912 }
 0x3bc   : > { %v4159_v60 = vpop.f32.mrf.mxu0 }
 0x3bd   : > { %5267 = vrot.lane.b32.xlu0 %v10791_v45, %s14384_s29  ;;  %v4160_v59 = vadd.f32 %v4159_v60, %v10767_v44  ;;  %v4312_v52 = vmax.f32 %v4158_v46, 0.0  ;;  %v10907_v60 = vpop.permute.xlu0 %3907 }
 0x3be   : > { %v4163_v20 = vpop.f32.mrf.mxu0 }
 0x3bf   : > { %5235 = vrot.lane.b32.xlu1 %v10795_v22, %s14384_s29  ;;  %v4313_v39 = vmax.f32 %v4160_v59, 0.0  ;;  %v10859_v28 = vpack.c.bf16 %v4312_v52, %v4310_v11  ;;  %v4164_v50 = vadd.f32 %v4163_v20, %v10761_v29  ;;  %v10912_v3 = vpop.permute.xlu1 %3902 }
 0x3c0   : > { %v4165_v41 = vpop.f32.mrf.mxu0 }
 0x3c1   : > { %4684 = vrot.lane.b32.xlu0 %v10811_v51, %s14382_s22  ;;  %v10863_v44 = vpack.c.bf16 %v4313_v39, %v4311_v17  ;;  %v4166_v24 = vadd.f32 %v4165_v41, %v10761_v29  ;;  %v4314_v35 = vmax.f32 %v4164_v50, 0.0  ;;  %v10921_v18 = vpop.permute.xlu0 %3897 }
 0x3c2   : > { %v4169_v42 = vpop.f32.mrf.mxu0 }
 0x3c3   : > { %4652 = vrot.lane.b32.xlu1 %v10815_v31, %s14382_s22  ;;  %14391 = vst [vmem:[#allocation57_spill] sm:$0xff] %v10863_v44  ;;  %v4170_v43 = vadd.f32 %v4169_v42, %v10763_v12  ;;  %v4315_v34 = vmax.f32 %v4166_v24, 0.0 }
 0x3c4   : > { %v4171_v9 = vpop.f32.mrf.mxu0 }
 0x3c5   : > { %4459 = vrot.lane.b32.xlu0 %v10811_v51, %s14383_s18  ;;  %v4172_v38 = vadd.f32 %v4171_v9, %v10763_v12  ;;  %v4316_v5 = vmax.f32 %v4170_v43, 0.0  ;;  %v10925_v9 = vpop.permute.xlu1 %3892  ;;  %v10935_v13 = vpop.permute.xlu0 %3887 }
 0x3c6   : > { %v4175_v23 = vpop.f32.mrf.mxu0 }
 0x3c7   : > { %4411 = vrot.lane.b32.xlu1 %v10815_v31, %s14383_s18  ;;  %v4317_v19 = vmax.f32 %v4172_v38, 0.0  ;;  %v10891_v56 = vpack.c.bf16 %v4316_v5, %v4314_v35  ;;  %v4176_v63 = vadd.f32 %v4175_v23, %v10757_v62 }
 0x3c8   : > { %v4177_v7 = vpop.f32.mrf.mxu0 }
 0x3c9   : > { %4996 = vrot.lane.b32.xlu0 %v10811_v51, %s14182_s0  ;;  %v10897_v29 = vpack.c.bf16 %v4317_v19, %v4315_v34  ;;  %v4178_v1 = vadd.f32 %v4177_v7, %v10757_v62  ;;  %v4318_v26 = vmax.f32 %v4176_v63, 0.0  ;;  %v10939_v59 = vpop.permute.xlu1 %3882  ;;  %v3878_v52 = vpop.permute.xlu0 %3877 }
 0x3ca   : > { %v4181_v2 = vpop.f32.mrf.mxu0 }
 0x3cb   : > { %4964 = vrot.lane.b32.xlu1 %v10815_v31, %s14182_s0  ;;  %v4182_v20 = vadd.f32 %v4181_v2, %v10759_v55 }
 0x3cc   : > { %v4183_v32 = vpop.f32.mrf.mxu0 }
 0x3cd   : > { %5269 = vrot.lane.b32.xlu0 %v10811_v51, %s14384_s29  ;;  %v4184_v53 = vadd.f32 %v4183_v32, %v10759_v55  ;;  %v4320_v0 = vmax.f32 %v4182_v20, 0.0  ;;  %v4319_v55 = vmax.f32 %v4178_v1, 0.0  ;;  %v3873_v17 = vpop.permute.xlu1 %3872 }
 0x3ce   : > { %v4187_v4 = vpop.f32.mrf.mxu0 }
 0x3cf   : > { %5237 = vrot.lane.b32.xlu1 %v10815_v31, %s14384_s29  ;;  %v4321_v42 = vmax.f32 %v4184_v53, 0.0  ;;  %v10927_v23 = vpack.c.bf16 %v4320_v0, %v4318_v26  ;;  %v4188_v11 = vadd.f32 %v4187_v4, %v10753_v47  ;;  %v3868_v4 = vpop.permute.xlu0 %3867  ;;  %v14422_v31 = vld [vmem:[#allocation4_spill] sm:$0xff] }
 0x3d0   : > { %v4189_v58 = vpop.f32.mrf.mxu0 }
 0x3d1   : > { %4686 = vrot.lane.b32.xlu0 %v10835_v48, %s14382_s22  ;;  %v10931_v62 = vpack.c.bf16 %v4321_v42, %v4319_v55  ;;  %v4190_v32 = vadd.f32 %v4189_v58, %v10753_v47  ;;  %v4322_v50 = vmax.f32 %v4188_v11, 0.0  ;;  %v3863_v35 = vpop.permute.xlu1 %3862 }
 0x3d2   : > { %v4193_v12 = vpop.f32.mrf.mxu0 }
 0x3d3   : > { %4654 = vrot.lane.b32.xlu1 %v10839_v54, %s14382_s22  ;;  %v4194_v37 = vadd.f32 %v4193_v12, %v10755_v30  ;;  %v4323_v5 = vmax.f32 %v4190_v32, 0.0 }
 0x3d4   : > { %v4195_v36 = vpop.f32.mrf.mxu0 }
 0x3d5   : > { %4461 = vrot.lane.b32.xlu0 %v10835_v48, %s14383_s18  ;;  %v4196_v39 = vadd.f32 %v4195_v36, %v10755_v30  ;;  %v4324_v43 = vmax.f32 %v4194_v37, 0.0 }
 0x3d6   : > { %v4199_v57 = vpop.f32.mrf.mxu0 }
 0x3d7   : > { %4413 = vrot.lane.b32.xlu1 %v10839_v54, %s14383_s18  ;;  %v4325_v38 = vmax.f32 %v4196_v39, 0.0  ;;  %v10955_v30 = vpack.c.bf16 %v4324_v43, %v4322_v50  ;;  %v4200_v63 = vadd.f32 %v4199_v57, %v3863_v35 }
 0x3d8   : > { %v4201_v41 = vpop.f32.mrf.mxu0 }
 0x3d9   : > { %4998 = vrot.lane.b32.xlu0 %v10835_v48, %s14182_s0  ;;  %v10959_v19 = vpack.c.bf16 %v4325_v38, %v4323_v5  ;;  %v4202_v26 = vadd.f32 %v4201_v41, %v3863_v35 }
 0x3da   : > { %v4205_v21 = vpop.f32.mrf.mxu0 }
 0x3db   : > { %4966 = vrot.lane.b32.xlu1 %v10839_v54, %s14182_s0  ;;  %v4206_v36 = vadd.f32 %v4205_v21, %v3868_v4  ;;  %v4326_v21 = vmax.f32 %v4200_v63, 0.0 }
 0x3dc   : > { %v4207_v46 = vpop.f32.mrf.mxu0 }
 0x3dd   : > { %5271 = vrot.lane.b32.xlu0 %v10835_v48, %s14384_s29  ;;  %v4208_v53 = vadd.f32 %v4207_v46, %v3868_v4  ;;  %v4328_v42 = vmax.f32 %v4206_v36, 0.0  ;;  %v4327_v46 = vmax.f32 %v4202_v26, 0.0 }
 0x3de   : > { %v4211_v7 = vpop.f32.mrf.mxu0 }
 0x3df   : > { %5239 = vrot.lane.b32.xlu1 %v10839_v54, %s14384_s29  ;;  %v4329_v37 = vmax.f32 %v4208_v53, 0.0  ;;  %v10987_v39 = vpack.c.bf16 %v4328_v42, %v4326_v21  ;;  %v4212_v5 = vadd.f32 %v4211_v7, %v3873_v17 }
 0x3e0   : > { %v4213_v2 = vpop.f32.mrf.mxu0 }
 0x3e1   : > { %4688 = vrot.lane.b32.xlu0 %v10859_v28, %s14382_s22  ;;  %v10993_v32 = vpack.c.bf16 %v4329_v37, %v4327_v46  ;;  %v4214_v53 = vadd.f32 %v4213_v2, %v3873_v17 }
 0x3e2   : > { %v4217_v24 = vpop.f32.mrf.mxu0 }
 0x3e3   : > { %4656 = vrot.lane.b32.xlu1 %v10863_v44, %s14382_s22  ;;  %v4218_v38 = vadd.f32 %v4217_v24, %v3878_v52  ;;  %v4330_v24 = vmax.f32 %v4212_v5, 0.0 }
 0x3e4   : > { %v4219_v47 = vpop.f32.mrf.mxu0 }
 0x3e5   : > { %4463 = vrot.lane.b32.xlu0 %v10859_v28, %s14383_s18  ;;  %v4220_v35 = vadd.f32 %v4219_v47, %v3878_v52  ;;  %v4332_v26 = vmax.f32 %v4218_v38, 0.0  ;;  %v4331_v52 = vmax.f32 %v4214_v53, 0.0 }
 0x3e6   : > { %v4223_v34 = vpop.f32.mrf.mxu0 }
 0x3e7   : > { %4415 = vrot.lane.b32.xlu1 %v10863_v44, %s14383_s18  ;;  %v4333_v21 = vmax.f32 %v4220_v35, 0.0  ;;  %v11015_v47 = vpack.c.bf16 %v4332_v26, %v4330_v24  ;;  %v4224_v53 = vadd.f32 %v4223_v34, %v10939_v59 }
 0x3e8   : > { %v4225_v0 = vpop.f32.mrf.mxu0 }
 0x3e9   : > { %5000 = vrot.lane.b32.xlu0 %v10859_v28, %s14182_s0  ;;  %v11021_v17 = vpack.c.bf16 %v4333_v21, %v4331_v52  ;;  %v4226_v52 = vadd.f32 %v4225_v0, %v10939_v59  ;;  %v4334_v6 = vmax.f32 %v4224_v53, 0.0 }
 0x3ea   : > { %v4229_v57 = vpop.f32.mrf.mxu0 }
 0x3eb   : > { %4968 = vrot.lane.b32.xlu1 %v10863_v44, %s14182_s0  ;;  %14398 = vst [vmem:[#allocation52_spill] sm:$0xff] %v11021_v17  ;;  %v4230_v5 = vadd.f32 %v4229_v57, %v10935_v13  ;;  %v4335_v34 = vmax.f32 %v4226_v52, 0.0 }
 0x3ec   : > { %v4231_v50 = vpop.f32.mrf.mxu0 }
 0x3ed   : > { %5273 = vrot.lane.b32.xlu0 %v10859_v28, %s14384_s29  ;;  %v4232_v26 = vadd.f32 %v4231_v50, %v10935_v13  ;;  %v4336_v15 = vmax.f32 %v4230_v5, 0.0 }
 0x3ee   : > { %v4235_v63 = vpop.f32.mrf.mxu0 }
 0x3ef   : > { %5241 = vrot.lane.b32.xlu1 %v10863_v44, %s14384_s29  ;;  %v4337_v10 = vmax.f32 %v4232_v26, 0.0  ;;  %v11047_v50 = vpack.c.bf16 %v4336_v15, %v4334_v6  ;;  %v4236_v6 = vadd.f32 %v4235_v63, %v10925_v9 }
 0x3f0   : > { %v4237_v7 = vpop.f32.mrf.mxu0 }
 0x3f1   : > { %4690 = vrot.lane.b32.xlu0 %v10891_v56, %s14382_s22  ;;  %v11053_v0 = vpack.c.bf16 %v4337_v10, %v4335_v34  ;;  %v4238_v34 = vadd.f32 %v4237_v7, %v10925_v9 }
 0x3f2   : > { %v4241_v38 = vpop.f32.mrf.mxu0 }
 0x3f3   : > { %4658 = vrot.lane.b32.xlu1 %v10897_v29, %s14382_s22  ;;  %v4242_v26 = vadd.f32 %v4241_v38, %v10921_v18  ;;  %v4339_v63 = vmax.f32 %v4238_v34, 0.0 }
 0x3f4   : > { %v4243_v21 = vpop.f32.mrf.mxu0 }
 0x3f5   : > { %4465 = vrot.lane.b32.xlu0 %v10891_v56, %s14383_s18  ;;  %v4244_v52 = vadd.f32 %v4243_v21, %v10921_v18 }
 0x3f6   : > { %v4247_v13 = vpop.f32.mrf.mxu0 }
 0x3f7   : > { %4417 = vrot.lane.b32.xlu1 %v10897_v29, %s14383_s18 }
 0x3f8   : > { %v4249_v53 = vpop.f32.mrf.mxu0 }
 0x3f9   : > { %5002 = vrot.lane.b32.xlu0 %v10891_v56, %s14182_s0 }
 0x3fa   : > { %v4253_v10 = vpop.f32.mrf.mxu0 }
 0x3fb   : > { %4970 = vrot.lane.b32.xlu1 %v10897_v29, %s14182_s0 }
 0x3fc   : > { %v4255_v18 = vpop.f32.mrf.mxu0 }
 0x3fd   : > { %5275 = vrot.lane.b32.xlu0 %v10891_v56, %s14384_s29  ;;  %v4256_v34 = vadd.f32 %v4255_v18, %v10907_v60 }
 0x3ff   : > { %5243 = vrot.lane.b32.xlu1 %v10897_v29, %s14384_s29 }
 0x401   : > { %4692 = vrot.lane.b32.xlu0 %v10927_v23, %s14382_s22 }
 0x403   : > { %4660 = vrot.lane.b32.xlu1 %v10931_v62, %s14382_s22 }
 0x405   : > { %4467 = vrot.lane.b32.xlu0 %v10927_v23, %s14383_s18 }
 0x407   : > { %4419 = vrot.lane.b32.xlu1 %v10931_v62, %s14383_s18 }
 0x409   : > { %5004 = vrot.lane.b32.xlu0 %v10927_v23, %s14182_s0 }
 0x40b   : > { %4972 = vrot.lane.b32.xlu1 %v10931_v62, %s14182_s0 }
 0x40d   : > { %5277 = vrot.lane.b32.xlu0 %v10927_v23, %s14384_s29 }
 0x40f   : > { %5245 = vrot.lane.b32.xlu1 %v10931_v62, %s14384_s29 }
 0x411   : > { %4694 = vrot.lane.b32.xlu0 %v10955_v30, %s14382_s22 }
 0x413   : > { %4662 = vrot.lane.b32.xlu1 %v10959_v19, %s14382_s22  ;;  %v10965_v58 = vpop.permute.xlu0 %4680 }
 0x415   : > { %v10967_v12 = vpop.permute.xlu1 %4648  ;;  %4469 = vrot.lane.b32.xlu0 %v10955_v30, %s14383_s18 }
 0x417   : > { %4421 = vrot.lane.b32.xlu1 %v10959_v19, %s14383_s18  ;;  %v10973_v20 = vpop.permute.xlu0 %4455 }
 0x418   : > { %14392 = vst [vmem:[#allocation16_spill] sm:$0xff] %v10973_v20 }
 0x419   : > { %v10975_v1 = vpop.permute.xlu1 %4407  ;;  %5006 = vrot.lane.b32.xlu0 %v10955_v30, %s14182_s0 }
 0x41a   : > { %14393 = vst [vmem:[#allocation17_spill] sm:$0xff] %v10975_v1  ;;  %v4341_v1 = vmax.f32 %v4244_v52, 0.0  ;;  %v4254_v52 = vadd.f32 %v4253_v10, %v10907_v60 }
 0x41b   : > { %4974 = vrot.lane.b32.xlu1 %v10959_v19, %s14182_s0  ;;  %v10981_v55 = vpop.permute.xlu0 %4992 }
 0x41c   : > { %v11085_v7 = vpack.c.bf16 %v4341_v1, %v4339_v63  ;;  %v4250_v63 = vadd.f32 %v4249_v53, %v10912_v3 }
 0x41d   : > { %v10983_v11 = vpop.permute.xlu1 %4960  ;;  %5279 = vrot.lane.b32.xlu0 %v10955_v30, %s14384_s29 }
 0x41f   : > { %5247 = vrot.lane.b32.xlu1 %v10959_v19, %s14384_s29  ;;  %v10991_v41 = vpop.permute.xlu0 %5265 }
 0x420   : > { %14394 = vst [vmem:[#allocation27_spill] sm:$0xff] %v10991_v41 }
 0x421   : > { %v10995_v43 = vpop.permute.xlu1 %5233  ;;  %4696 = vrot.lane.b32.xlu0 %v10987_v39, %s14382_s22 }
 0x422   : > { %14395 = vst [vmem:[#allocation59_spill] sm:$0xff] %v10995_v43 }
 0x423   : > { %4664 = vrot.lane.b32.xlu1 %v10993_v32, %s14382_s22  ;;  %v11001_v4 = vpop.permute.xlu0 %4682 }
 0x425   : > { %v11003_v36 = vpop.permute.xlu1 %4650  ;;  %4471 = vrot.lane.b32.xlu0 %v10987_v39, %s14383_s18 }
 0x427   : > { %4423 = vrot.lane.b32.xlu1 %v10993_v32, %s14383_s18  ;;  %v11009_v42 = vpop.permute.xlu0 %4457 }
 0x428   : > { %14396 = vst [vmem:[#allocation28_spill] sm:$0xff] %v11009_v42  ;;  %v4345_v42 = vmax.f32 %v4256_v34, 0.0 }
 0x429   : > { %v11011_v37 = vpop.permute.xlu1 %4409  ;;  %5008 = vrot.lane.b32.xlu0 %v10987_v39, %s14182_s0 }
 0x42a   : > { %14397 = vst [vmem:[#allocation51_spill] sm:$0xff] %v11011_v37 }
 0x42b   : > { %4976 = vrot.lane.b32.xlu1 %v10993_v32, %s14182_s0  ;;  %v11019_v2 = vpop.permute.xlu0 %4994 }
 0x42d   : > { %v11023_v46 = vpop.permute.xlu1 %4962  ;;  %4698 = vrot.lane.b32.xlu0 %v11015_v47, %s14382_s22 }
 0x42f   : > { %4666 = vrot.lane.b32.xlu1 %v11021_v17, %s14382_s22  ;;  %v11030_v35 = vpop.permute.xlu0 %5267 }
 0x430   : > { %14399 = vst [vmem:[#allocation29_spill] sm:$0xff] %v11030_v35  ;;  %v4338_v35 = vmax.f32 %v4236_v6, 0.0  ;;  %v4259_v6 = vpop.f32.mrf.mxu0 }
 0x431   : > { %v11034_v24 = vpop.permute.xlu1 %5235  ;;  %4473 = vrot.lane.b32.xlu0 %v11015_v47, %s14383_s18 }
 0x432   : > { %14400 = vst [vmem:[#allocation60_spill] sm:$0xff] %v11034_v24  ;;  %v4340_v24 = vmax.f32 %v4242_v26, 0.0  ;;  %v4261_v1 = vpop.f32.mrf.mxu0 }
 0x433   : > { %4425 = vrot.lane.b32.xlu1 %v11021_v17, %s14383_s18  ;;  %v11041_v57 = vpop.permute.xlu0 %4684 }
 0x434   : > { %v11079_v21 = vpack.c.bf16 %v4340_v24, %v4338_v35  ;;  %v4248_v24 = vadd.f32 %v4247_v13, %v10912_v3  ;;  %v4265_v60 = vpop.f32.mrf.mxu0  ;;  %v4343_v13 = vmax.f32 %v4250_v63, 0.0 }
 0x435   : > { %v11043_v43 = vpop.permute.xlu1 %4652  ;;  %5010 = vrot.lane.b32.xlu0 %v11015_v47, %s14182_s0  ;;  %v4266_v34 = vadd.f32 %v4265_v60, %v10895_v61 }
 0x436   : > { %v4342_v37 = vmax.f32 %v4248_v24, 0.0  ;;  %v11117_v53 = vpack.c.bf16 %v4345_v42, %v4343_v13  ;;  %v4267_v24 = vpop.f32.mrf.mxu0  ;;  %v4262_v13 = vadd.f32 %v4261_v1, %v10901_v49 }
 0x437   : > { %4978 = vrot.lane.b32.xlu1 %v11021_v17, %s14182_s0  ;;  %v11051_v59 = vpop.permute.xlu0 %4459  ;;  %v4268_v63 = vadd.f32 %v4267_v24, %v10895_v61 }
 0x438   : > { %14401 = vst [vmem:[#allocation61_spill] sm:$0xff] %v11051_v59  ;;  %v4271_v42 = vpop.f32.mrf.mxu0 }
 0x439   : > { %v11055_v5 = vpop.permute.xlu1 %4411  ;;  %4700 = vrot.lane.b32.xlu0 %v11047_v50, %s14382_s22 }
 0x43a   : > { %14402 = vst [vmem:[#allocation56_spill] sm:$0xff] %v11055_v5  ;;  %v4273_v61 = vpop.f32.mrf.mxu0 }
 0x43b   : > { %4668 = vrot.lane.b32.xlu1 %v11053_v0, %s14382_s22  ;;  %v11062_v15 = vpop.permute.xlu0 %4996 }
 0x43d   : > { %v11066_v41 = vpop.permute.xlu1 %4964  ;;  %4475 = vrot.lane.b32.xlu0 %v11047_v50, %s14383_s18 }
 0x43f   : > { %4427 = vrot.lane.b32.xlu1 %v11053_v0, %s14383_s18  ;;  %v11073_v38 = vpop.permute.xlu0 %5269 }
 0x440   : > { %14403 = vst [vmem:[#allocation58_spill] sm:$0xff] %v11073_v38  ;;  %v4344_v38 = vmax.f32 %v4254_v52, 0.0 }
 0x441   : > { %v11075_v20 = vpop.permute.xlu1 %5237  ;;  %5012 = vrot.lane.b32.xlu0 %v11047_v50, %s14182_s0 }
 0x442   : > { %14404 = vst [vmem:[#allocation30_spill] sm:$0xff] %v11075_v20  ;;  %v11111_v18 = vpack.c.bf16 %v4344_v38, %v4342_v37  ;;  %v4260_v38 = vadd.f32 %v4259_v6, %v10901_v49  ;;  %v4347_v6 = vmax.f32 %v4262_v13, 0.0 }
 0x443   : > { %4980 = vrot.lane.b32.xlu1 %v11053_v0, %s14182_s0  ;;  %v11083_v9 = vpop.permute.xlu0 %4686 }
 0x444   : > { %v4346_v59 = vmax.f32 %v4260_v38, 0.0  ;;  %v4277_v38 = vpop.f32.mrf.mxu0 }
 0x445   : > { %v11087_v26 = vpop.permute.xlu1 %4654  ;;  %4702 = vrot.lane.b32.xlu0 %v11079_v21, %s14382_s22 }
 0x447   : > { %4670 = vrot.lane.b32.xlu1 %v11085_v7, %s14382_s22  ;;  %v11094_v35 = vpop.permute.xlu0 %4461 }
 0x448   : > { %14405 = vst [vmem:[#allocation31_spill] sm:$0xff] %v11094_v35 }
 0x449   : > { %v11098_v20 = vpop.permute.xlu1 %4413  ;;  %4477 = vrot.lane.b32.xlu0 %v11079_v21, %s14383_s18 }
 0x44a   : > { %14406 = vst [vmem:[#allocation64_spill] sm:$0xff] %v11098_v20  ;;  %v4349_v20 = vmax.f32 %v4268_v63, 0.0 }
 0x44b   : > { %4429 = vrot.lane.b32.xlu1 %v11085_v7, %s14383_s18  ;;  %v11105_v10 = vpop.permute.xlu0 %4998 }
 0x44c   : > { %v11149_v1 = vpack.c.bf16 %v4349_v20, %v4347_v6  ;;  %v4278_v20 = vadd.f32 %v4277_v38, %v10882_v40  ;;  %v4272_v6 = vadd.f32 %v4271_v42, %v10887_v16 }
 0x44d   : > { %v11107_v5 = vpop.permute.xlu1 %4966  ;;  %5014 = vrot.lane.b32.xlu0 %v11079_v21, %s14182_s0 }
 0x44e   : > { %14412 = vst [vmem:[#allocation32_spill] sm:$0xff] %v11149_v1  ;;  %v4352_v33 = vmax.f32 %v4278_v20, 0.0  ;;  %v4350_v14 = vmax.f32 %v4272_v6, 0.0 }
 0x44f   : > { %4982 = vrot.lane.b32.xlu1 %v11085_v7, %s14182_s0  ;;  %v11115_v3 = vpop.permute.xlu0 %5271 }
 0x450   : > { %14407 = vst [vmem:[#allocation65_spill] sm:$0xff] %v11115_v3 }
 0x451   : > { %v11119_v52 = vpop.permute.xlu1 %5239  ;;  %4704 = vrot.lane.b32.xlu0 %v11111_v18, %s14382_s22 }
 0x452   : > { %14408 = vst [vmem:[#allocation33_spill] sm:$0xff] %v11119_v52  ;;  %v4348_v52 = vmax.f32 %v4266_v34, 0.0 }
 0x453   : > { %4672 = vrot.lane.b32.xlu1 %v11117_v53, %s14382_s22  ;;  %v11126_v37 = vpop.permute.xlu0 %4688 }
 0x454   : > { %v11143_v24 = vpack.c.bf16 %v4348_v52, %v4346_v59  ;;  %v4279_v52 = vpop.f32.mrf.mxu0 }
 0x455   : > { %v11130_v3 = vpop.permute.xlu1 %4656  ;;  %4479 = vrot.lane.b32.xlu0 %v11111_v18, %s14383_s18 }
 0x456   : > { %14411 = vst [vmem:[#allocation34_spill] sm:$0xff] %v11143_v24 }
 0x457   : > { %4431 = vrot.lane.b32.xlu1 %v11117_v53, %s14383_s18  ;;  %v11137_v60 = vpop.permute.xlu0 %4463 }
 0x458   : > { %14409 = vst [vmem:[#allocation7_spill] sm:$0xff] %v11137_v60 }
 0x459   : > { %v11139_v35 = vpop.permute.xlu1 %4415  ;;  %5016 = vrot.lane.b32.xlu0 %v11111_v18, %s14182_s0 }
 0x45a   : > { %14410 = vst [vmem:[#allocation6_spill] sm:$0xff] %v11139_v35  ;;  %v4280_v35 = vadd.f32 %v4279_v52, %v10882_v40  ;;  %v11183_v52 = vpack.c.bf16 %v4352_v33, %v4350_v14 }
 0x45b   : > { %4984 = vrot.lane.b32.xlu1 %v11117_v53, %s14182_s0  ;;  %v11147_v49 = vpop.permute.xlu0 %5000 }
 0x45c   : > { %v4353_v22 = vmax.f32 %v4280_v35, 0.0  ;;  %14417 = vst [vmem:[#allocation35_spill] sm:$0xff] %v11183_v52 }
 0x45d   : > { %v11151_v34 = vpop.permute.xlu1 %4968  ;;  %4706 = vrot.lane.b32.xlu0 %v11143_v24, %s14382_s22 }
 0x45f   : > { %4674 = vrot.lane.b32.xlu1 %v11149_v1, %s14382_s22  ;;  %v11157_v63 = vpop.permute.xlu0 %5273 }
 0x460   : > { %14413 = vst [vmem:[#allocation53_spill] sm:$0xff] %v11157_v63  ;;  %v4274_v63 = vadd.f32 %v4273_v61, %v10887_v16  ;;  %v8131_v61 = vld [vmem:[%s13885_s3 + $0x1] ss:$8 sm:$0x3] }
 0x461   : > { %v11159_v59 = vpop.permute.xlu1 %5241  ;;  %4481 = vrot.lane.b32.xlu0 %v11143_v24, %s14383_s18  ;;  %vm4809_vm8 = vcmp.ne.f32.partialorder %v8131_v61, 0.0 }
 0x462   : > { %14414 = vst [vmem:[#allocation36_spill] sm:$0xff] %v11159_v59  ;;  %v4283_v59 = vpop.f32.mrf.mxu0  ;;  %v4351_v42 = vmax.f32 %v4274_v63, 0.0 }
 0x463   : > { %4433 = vrot.lane.b32.xlu1 %v11149_v1, %s14383_s18  ;;  %v11166_v13 = vpop.permute.xlu0 %4690  ;;  %v4284_v61 = vadd.f32 %v4283_v59, %v10873_v25 }
 0x464   : > { %v4285_v40 = vpop.f32.mrf.mxu0  ;;  %v11192_v20 = vpack.c.bf16 %v4353_v22, %v4351_v42  ;;  %v14421_v22 = vmov 0  }
 0x465   : > { %v11170_v60 = vpop.permute.xlu1 %4658  ;;  %5018 = vrot.lane.b32.xlu0 %v11143_v24, %s14182_s0  ;;  %v4810_v42 = vsel %vm4809_vm8, 1, %v14421_v22  ;;  %v4286_v51 = vadd.f32 %v4285_v40, %v10873_v25  ;;  %v4354_v59 = vmax.f32 %v4284_v61, 0.0 }
 0x466   : > { %14418 = vst [vmem:[#allocation68_spill] sm:$0xff] %v11192_v20  ;;  %v4289_v6 = vpop.f32.mrf.mxu0 }
 0x467   : > { %4986 = vrot.lane.b32.xlu1 %v11149_v1, %s14182_s0  ;;  %v11177_v38 = vpop.permute.xlu0 %4465  ;;  %v4355_v40 = vmax.f32 %v4286_v51, 0.0 }
 0x468   : > { %14415 = vst [vmem:[#allocation54_spill] sm:$0xff] %v11177_v38  ;;  %v4291_v63 = vpop.f32.mrf.mxu0 }
 0x469   : > { %v11179_v45 = vpop.permute.xlu1 %4417  ;;  %5291 = vrot.lane.b32.xlu0 %v11143_v24, %s14384_s29  ;;  %v8168_v24 = vld [vmem:[%s13885_s3 + $0x2] ss:$8 sm:$0x3] }
 0x46a   : > { %14416 = vst [vmem:[#allocation37_spill] sm:$0xff] %v11179_v45  ;;  %v4290_v45 = vadd.f32 %v4289_v6, %v10869_v27  ;;  %v4818_v6 = vrot.slane %v4810_v42, %v14422_v31  ;;  %vm5121_vm0 = vcmp.ne.f32.partialorder %v8168_v24, 0.0 }
 0x46b   : > { %5259 = vrot.lane.b32.xlu1 %v11149_v1, %s14384_s29  ;;  %v11187_v16 = vpop.permute.xlu0 %5002  ;;  %v4814_v1 = vrot.slane %v4810_v42, %v8727_v8 }
 0x46c   : > { %v4356_v54 = vmax.f32 %v4290_v45, 0.0  ;;  %vm11232_vm9 = vcmp.eq.s32.totalorder %v4818_v6, 1  ;;  %v5122_v45 = vsel %vm5121_vm0, 1, %v14421_v22  ;;  %vm14443_vm0 = vmmov %vm14440_vm1 }
 0x46d   : > { %v11194_v35 = vpop.permute.xlu1 %4970  ;;  %4708 = vrot.lane.b32.xlu0 %v11183_v52, %s14382_s22  ;;  %vm11228_vm12 = vcmp.eq.s32.totalorder %v4814_v1, 1  ;;  %v5126_v51 = vrot.slane %v5122_v45, %v8727_v8 }
 0x46e   : > { %v11237_v42 = vpack.c.bf16 %v4356_v54, %v4354_v59  ;;  %vm4821_vm2 = vmpackc.low %vm11232_vm9, %vm11228_vm12  ;;  %v5130_v54 = vrot.slane %v5122_v45, %v14422_v31 }
 0x46f   : > { %4676 = vrot.lane.b32.xlu1 %v11192_v20, %s14382_s22  ;;  %v11200_v14 = vpop.permute.xlu0 %5275  ;;  %vm11266_vm10 = vcmp.eq.s32.totalorder %v5126_v51, 1  ;;  %vm14444_vm12 = vmmov %vm14443_vm0 }
 0x470   : > { %14419 = vst [vmem:[#allocation70_spill] sm:$0xff] %v11200_v14  ;;  %14429 = vst [vmem:[#allocation69_spill] sm:$0xff] %v11237_v42  ;;  %vm11270_vm11 = vcmp.eq.s32.totalorder %v5130_v54, 1 }
 0x471   : > { %v11202_v33 = vpop.permute.xlu1 %5243  ;;  %4483 = vrot.lane.b32.xlu0 %v11183_v52, %s14383_s18  ;;  %vm5133_vm6 = vmpackc.low %vm11270_vm11, %vm11266_vm10  ;;  %vm14449_vm11 = vcmask 121856  }
 0x472   : > { %14420 = vst [vmem:[#allocation62_spill] sm:$0xff] %v11202_v33  ;;  %v4292_v33 = vadd.f32 %v4291_v63, %v10869_v27  ;;  %v4822_v63 = vsel %vm4821_vm2, 65537, %v14421_v22  ;;  %v5134_v45 = vsel %vm5133_vm6, 65537, %v14421_v22  ;;  %vm14445_vm9 = vmmov %vm14443_vm0 }
 0x473   : > { %4435 = vrot.lane.b32.xlu1 %v11192_v20, %s14383_s18  ;;  %v4693_v38 = vpop.permute.xlu0 %4692  ;;  %vm14448_vm10 = vmmov %vm14443_vm0 }
 0x474   : > { %v4357_v48 = vmax.f32 %v4292_v33, 0.0  ;;  %v14430_v33 = vld [vmem:[#allocation3_spill] sm:$0xff]  ;;  %vm14450_vm6 = vmmov %vm14449_vm11 }
 0x475   : > { %v4661_v14 = vpop.permute.xlu1 %4660  ;;  %5020 = vrot.lane.b32.xlu0 %v11183_v52, %s14182_s0  ;;  %v11244_v61 = vsub.s32 4, %v14430_v33 }
 0x476   : > { %v11250_v1 = vpack.c.bf16 %v4357_v48, %v4355_v40  ;;  %v4826_v40 = vrot.slane %v4822_v63, %v8727_v8 }
 0x477   : > { %4988 = vrot.lane.b32.xlu1 %v11192_v20, %s14182_s0  ;;  %v11222_v44 = vpop.permute.xlu0 %4467  ;;  %v4830_v25 = vrot.slane %v4822_v63, %v11244_v61 }
 0x478   : > { %14423 = vst [vmem:[#allocation63_spill] sm:$0xff] %v11222_v44  ;;  %vm11289_vm8 = vcmp.ne.s16.totalorder %v4826_v40, 0  ;;  %v4771_v40 = vsel %vm14444_vm12, %v4661_v14, %v4693_v38  ;;  %vm14455_vm12 = vmmov %vm14443_vm0 }
 0x479   : > { %v11224_v27 = vpop.permute.xlu1 %4419  ;;  %5293 = vrot.lane.b32.xlu0 %v11183_v52, %s14384_s29  ;;  %vm11277_vm13 = vcmp.ne.s16.totalorder %v4830_v25, 0 }
 0x47a   : > { %14424 = vst [vmem:[#allocation38_spill] sm:$0xff] %v11224_v27 }
 0x47b   : > { %5261 = vrot.lane.b32.xlu1 %v11192_v20, %s14384_s29  ;;  %v11241_v24 = vpop.permute.xlu0 %5004 }
 0x47d   : > { %v4973_v6 = vpop.permute.xlu1 %4972  ;;  %4710 = vrot.lane.b32.xlu0 %v11237_v42, %s14382_s22 }
 0x47f   : > { %4678 = vrot.lane.b32.xlu1 %v11250_v1, %s14382_s22  ;;  %v11258_v59 = vpop.permute.xlu0 %5277 }
 0x480   : > { %14431 = vst [vmem:[#allocation66_spill] sm:$0xff] %v11258_v59 }
 0x481   : > { %v11262_v33 = vpop.permute.xlu1 %5245  ;;  %4485 = vrot.lane.b32.xlu0 %v11237_v42, %s14383_s18 }
 0x482   : > { %14432 = vst [vmem:[#allocation67_spill] sm:$0xff] %v11262_v33 }
 0x483   : > { %5257 = vrot.lane.b32.xlu1 %v11117_v53, %s14384_s29  ;;  %v4695_v59 = vpop.permute.xlu0 %4694 }
 0x485   : > { %v4663_v51 = vpop.permute.xlu1 %4662  ;;  %5022 = vrot.lane.b32.xlu0 %v11237_v42, %s14182_s0 }
 0x486   : > { %v4720_v54 = vsel %vm14439_vm7, %v4695_v59, %v4663_v51  ;;  %v4775_v63 = vsel %vm14440_vm1, %v4663_v51, %v4695_v59  ;;  %v4719_v59 = vsel %vm14443_vm0, %v4693_v38, %v4661_v14  ;;  %v5142_v51 = vrot.slane %v5134_v45, %v11244_v61  ;;  %vm14454_vm1 = vmmov %vm14450_vm6 }
 0x487   : > { %5255 = vrot.lane.b32.xlu1 %v11085_v7, %s14384_s29  ;;  %8136 = vmatprep.subr.msk.bf16.mxu1 %vm11277_vm13, %v4720_v54  ;;  %v11297_v25 = vpop.permute.xlu0 %4469  ;;  %v4847_v48 = vsel %vm11289_vm8, %v4775_v63, 0  ;;  %v5138_v54 = vrot.slane %v5134_v45, %v8727_v8  ;;  %v4718_v38 = vsel %vm14445_vm9, %v11166_v13, %v11170_v60  ;;  %v4767_v45 = vsel %vm14448_vm10, %v11170_v60, %v11166_v13  ;;  %vm14457_vm9 = vmmov %vm14454_vm1 }
 0x488   : > { %4873 = vmatpush1.bf16.msra.mxu1 %v4847_v48  ;;  %v4845_v48 = vsel %vm11289_vm8, %v4771_v40, 0  ;;  %vm11319_vm2 = vcmp.ne.s16.totalorder %v5142_v51, 0  ;;  %v4843_v13 = vsel %vm11289_vm8, %v4767_v45, 0  ;;  %v5031_v45 = vsel %vm14457_vm9, %v11241_v24, %v4973_v6  ;;  %vm14458_vm10 = vmmov %vm14454_vm1 }
 0x489   : > { %v11305_v44 = vpop.permute.xlu1 %4421  ;;  %5295 = vrot.lane.b32.xlu0 %v11237_v42, %s14384_s29  ;;  %8137 = vmatprep.subr.msk.bf16.mxu1 %vm11277_vm13, %v4719_v59  ;;  %vm11332_vm7 = vcmp.ne.s16.totalorder %v5138_v54, 0  ;;  %v5083_v54 = vsel %vm14454_vm1, %v4973_v6, %v11241_v24 }
 0x48a   : > { %v5157_v6 = vsel %vm11332_vm7, %v5083_v54, 0  ;;  %v5030_v54 = vsel %vm14454_vm1, %v11187_v16, %v11194_v35 }
 0x48b   : > { %5253 = vrot.lane.b32.xlu1 %v11053_v0, %s14384_s29  ;;  %v5007_v63 = vpop.permute.xlu0 %5006 }
 0x48c   : > { %4875 = vmatpush1.bf16.msra.mxu1 %v4845_v48 }
 0x48d   : > { %v4975_v59 = vpop.permute.xlu1 %4974  ;;  %5289 = vrot.lane.b32.xlu0 %v11111_v18, %s14384_s29  ;;  %8138 = vmatprep.subr.msk.bf16.mxu1 %vm11277_vm13, %v4718_v38 }
 0x48e   : > { %v5087_v40 = vsel %vm14449_vm11, %v4975_v59, %v5007_v63  ;;  %v5032_v48 = vsel %vm14450_vm6, %v5007_v63, %v4975_v59  ;;  %v4717_v63 = vsel %vm14443_vm0, %v11126_v37, %v11130_v3  ;;  %v4763_v59 = vsel %vm14455_vm12, %v11130_v3, %v11126_v37  ;;  %vm14459_vm11 = vmmov %vm14443_vm0 }
 0x48f   : > { %5251 = vrot.lane.b32.xlu1 %v11021_v17, %s14384_s29  ;;  %8173 = vmatprep.subr.msk.bf16.mxu0 %vm11319_vm2, %v5032_v48  ;;  %v11340_v60 = vpop.permute.xlu0 %5279  ;;  %v5159_v38 = vsel %vm11332_vm7, %v5087_v40, 0  ;;  %v8133_v40 = vld [vmem:[%s13892_s10 + $0x28] sm:$0xff]  ;;  %v4841_v24 = vsel %vm11289_vm8, %v4763_v59, 0  ;;  %vm14460_vm6 = vmmov %vm14443_vm0 }
 0x490   : > { %14453 = vst [vmem:[#allocation15_spill] sm:$0xff] %v11340_v60  ;;  %4877 = vmatpush1.bf16.msra.mxu1 %v4843_v13  ;;  %5185 = vmatpush1.bf16.msra.mxu0 %v5159_v38  ;;  %v8135_v13 = vld [vmem:[%s13892_s10 + $0x38] sm:$0xff]  ;;  %v5079_v38 = vsel %vm14458_vm10, %v11194_v35, %v11187_v16  ;;  %vm14462_vm0 = vmmov %vm14454_vm1 }
 0x491   : > { %v11354_v48 = vpop.permute.xlu1 %5247  ;;  %5287 = vrot.lane.b32.xlu0 %v11079_v21, %s14384_s29  ;;  %8139 = vmatprep.subr.msk.bf16.mxu1 %vm11277_vm13, %v4717_v63  ;;  %v4871_v3 = vpack.c.bf16 %v8135_v13, %v8133_v40  ;;  %v4716_v63 = vsel %vm14459_vm11, %v11083_v9, %v11087_v26  ;;  %v5155_v59 = vsel %vm11332_vm7, %v5079_v38, 0  ;;  %v5075_v13 = vsel %vm14462_vm0, %v11151_v34, %v11147_v49  ;;  %vm14463_vm12 = vmmov %vm14460_vm6 }
 0x492   : > { %14456 = vst [vmem:[#allocation39_spill] sm:$0xff] %v11354_v48  ;;  %8174 = vmatprep.subr.msk.bf16.mxu0 %vm11319_vm2, %v5031_v45  ;;  %v4759_v45 = vsel %vm14460_vm6, %v11087_v26, %v11083_v9  ;;  %v4715_v16 = vsel %vm14463_vm12, %v11041_v57, %v11043_v43  ;;  %vm14464_vm9 = vmmov %vm14460_vm6 }
 0x493   : > { %5249 = vrot.lane.b32.xlu1 %v10993_v32, %s14384_s29  ;;  %v11372_v37 = vpop.permute.xlu0 %4696  ;;  %4904 = vmatprep.mubr.bf16.mxu1 %v4871_v3  ;;  %v4839_v26 = vsel %vm11289_vm8, %v4759_v45, 0  ;;  %v4755_v35 = vsel %vm14464_vm9, %v11043_v43, %v11041_v57  ;;  %vm14466_vm10 = vmmov %vm14462_vm0  ;;  %v5153_v57 = vsel %vm11332_vm7, %v5075_v13, 0  ;;  %v5028_v45 = vsel %vm14462_vm0, %v11105_v10, %v11107_v5 }
 0x494   : > { %4879 = vmatpush1.bf16.msra.mxu1 %v4841_v24  ;;  %5187 = vmatpush1.bf16.msra.mxu0 %v5157_v6  ;;  %v5029_v24 = vsel %vm14466_vm10, %v11147_v49, %v11151_v34  ;;  %v4837_v43 = vsel %vm11289_vm8, %v4755_v35, 0  ;;  %vm14468_vm11 = vmmov %vm14462_vm0  ;;  %v4714_v49 = vsel %vm14460_vm6, %v11001_v4, %v11003_v36 }
 0x495   : > { %v11387_v40 = vpop.permute.xlu1 %4664  ;;  %5285 = vrot.lane.b32.xlu0 %v11047_v50, %s14384_s29  ;;  %8140 = vmatprep.subr.msk.bf16.mxu1 %vm11277_vm13, %v4716_v63  ;;  %v5071_v38 = vsel %vm14468_vm11, %v11107_v5, %v11105_v10  ;;  %vm14469_vm1 = vmmov %vm14460_vm6 }
 0x496   : > { %8175 = vmatprep.subr.msk.bf16.mxu0 %vm11319_vm2, %v5030_v54  ;;  %v4751_v34 = vsel %vm14469_vm1, %v11003_v36, %v11001_v4  ;;  %v5151_v36 = vsel %vm11332_vm7, %v5071_v38, 0  ;;  %vm14471_vm12 = vmmov %vm14462_vm0 }
 0x497   : > { %5588 = vrot.lane.b32.xlu1 %v10955_v30, %s14192_s30  ;;  %v11400_v9 = vpop.permute.xlu0 %4471  ;;  %v4835_v4 = vsel %vm11289_vm8, %v4751_v34, 0  ;;  %vm14472_vm9 = vmmov %vm14469_vm1 }
 0x498   : > { %14461 = vst [vmem:[#allocation8_spill] sm:$0xff] %v11400_v9  ;;  %4881 = vmatpush1.bf16.msra.mxu1 %v4839_v26  ;;  %5189 = vmatpush1.bf16.msra.mxu0 %v5155_v59  ;;  %v5067_v26 = vsel %vm14471_vm12, %v11066_v41, %v11062_v15  ;;  %v4713_v5 = vsel %vm14472_vm9, %v10965_v58, %v10967_v12  ;;  %vm14473_vm10 = vmmov %vm14469_vm1  ;;  %v14498_v9 = vld [vmem:[#allocation47_spill] sm:$0xff] }
 0x499   : > { %v11415_v3 = vpop.permute.xlu1 %4423  ;;  %5283 = vrot.lane.b32.xlu0 %v11015_v47, %s14384_s29  ;;  %8141 = vmatprep.subr.msk.bf16.mxu1 %vm11277_vm13, %v4715_v16  ;;  %v4747_v10 = vsel %vm14473_vm10, %v10967_v12, %v10965_v58  ;;  %vm14474_vm11 = vmmov %vm14462_vm0  ;;  %v5149_v12 = vsel %vm11332_vm7, %v5067_v26, 0 }
 0x49a   : > { %14465 = vst [vmem:[#allocation9_spill] sm:$0xff] %v11415_v3  ;;  %8176 = vmatprep.subr.msk.bf16.mxu0 %vm11319_vm2, %v5029_v24  ;;  %v5027_v13 = vsel %vm14474_vm11, %v11062_v15, %v11066_v41  ;;  %v4833_v58 = vsel %vm11289_vm8, %v4747_v10, 0  ;;  %vm14476_vm6 = vmmov %vm14462_vm0  ;;  %v14487_v10 = vld [vmem:[#allocation57_spill] sm:$0xff] }
 0x49b   : > { %5861 = vrot.lane.b32.xlu1 %v10955_v30, %s14165_s27  ;;  %v11428_v6 = vpop.permute.xlu0 %5008  ;;  %v5063_v35 = vsel %vm14476_vm6, %v11023_v46, %v11019_v2  ;;  %vm14477_vm1 = vmmov %vm14462_vm0 }
 0x49c   : > { %14467 = vst [vmem:[#allocation43_spill] sm:$0xff] %v11428_v6  ;;  %4883 = vmatpush1.bf16.msra.mxu1 %v4837_v43  ;;  %5191 = vmatpush1.bf16.msra.mxu0 %v5153_v57  ;;  %v5026_v41 = vsel %vm14477_vm1, %v11019_v2, %v11023_v46  ;;  %v5147_v43 = vsel %vm11332_vm7, %v5063_v35, 0  ;;  %v5059_v2 = vsel %vm14462_vm0, %v10983_v11, %v10981_v55  ;;  %vm14480_vm12 = vmmov %vm14462_vm0  ;;  %v14494_v6 = vld [vmem:[#allocation49_spill] sm:$0xff] }
 0x49d   : > { %v11443_v63 = vpop.permute.xlu1 %4976  ;;  %5281 = vrot.lane.b32.xlu0 %v10987_v39, %s14384_s29  ;;  %8142 = vmatprep.subr.msk.bf16.mxu1 %vm11277_vm13, %v4714_v49  ;;  %v5025_v46 = vsel %vm14480_vm12, %v10981_v55, %v10983_v11  ;;  %v5145_v49 = vsel %vm11332_vm7, %v5059_v2, 0  ;;  %vm14507_vm10 = vmmov %vm14472_vm9 }
 0x49e   : > { %14470 = vst [vmem:[#allocation10_spill] sm:$0xff] %v11443_v63  ;;  %8177 = vmatprep.subr.msk.bf16.mxu0 %vm11319_vm2, %v5028_v45  ;;  %vm14508_vm11 = vmmov %vm14472_vm9 }
 0x49f   : > { %5584 = vrot.lane.b32.xlu1 %v10927_v23, %s14192_s30  ;;  %v11456_v54 = vpop.permute.xlu0 %4698  ;;  %vm14509_vm6 = vmmov %vm14472_vm9 }
 0x4a0   : > { %4885 = vmatpush1.bf16.msra.mxu1 %v4835_v4  ;;  %5193 = vmatpush1.bf16.msra.mxu0 %v5151_v36  ;;  %v14486_v36 = vld [vmem:[#allocation26_spill] sm:$0xff]  ;;  %vm14510_vm1 = vmmov %vm14509_vm6 }
 0x4a1   : > { %v11471_v59 = vpop.permute.xlu1 %4666  ;;  %5590 = vrot.lane.b32.xlu0 %v10959_v19, %s14192_s30  ;;  %8143 = vmatprep.subr.msk.bf16.mxu1 %vm11277_vm13, %v4713_v5  ;;  %vm14511_vm0 = vmmov %vm14510_vm1 }
 0x4a2   : > { %8178 = vmatprep.subr.msk.bf16.mxu0 %vm11319_vm2, %v5027_v13 }
 0x4a3   : > { %5857 = vrot.lane.b32.xlu1 %v10927_v23, %s14165_s27  ;;  %v11484_v16 = vpop.permute.xlu0 %4473 }
 0x4a4   : > { %14475 = vst [vmem:[#allocation11_spill] sm:$0xff] %v11484_v16  ;;  %4887 = vmatpush1.bf16.msra.mxu1 %v4833_v58  ;;  %5195 = vmatpush1.bf16.msra.mxu0 %v5149_v12 }
 0x4a5   : > { %v11496_v15 = vpop.permute.xlu1 %4425  ;;  %5863 = vrot.lane.b32.xlu0 %v10959_v19, %s14165_s27  ;;  %8179 = vmatprep.subr.msk.bf16.mxu0 %vm11319_vm2, %v5026_v41  ;;  %v14492_v41 = vld [vmem:[#allocation50_spill] sm:$0xff] }
 0x4a6   : > { %14478 = vst [vmem:[#allocation12_spill] sm:$0xff] %v11496_v15  ;;  %v14499_v15 = vld [vmem:[#allocation24_spill] sm:$0xff] }
 0x4a7   : > { %5580 = vrot.lane.b32.xlu1 %v10891_v56, %s14192_s30  ;;  %v11504_v24 = vpop.permute.xlu0 %5010 }
 0x4a8   : > { %14479 = vst [vmem:[#allocation13_spill] sm:$0xff] %v11504_v24  ;;  %5197 = vmatpush1.bf16.msra.mxu0 %v5147_v43 }
 0x4a9   : > { %v11514_v57 = vpop.permute.xlu1 %4978  ;;  %5586 = vrot.lane.b32.xlu0 %v10931_v62, %s14192_s30  ;;  %8180 = vmatprep.subr.msk.bf16.mxu0 %vm11319_vm2, %v5025_v46  ;;  %v14493_v46 = vld [vmem:[#allocation48_spill] sm:$0xff] }
 0x4aa   : > { %14481 = vst [vmem:[#allocation40_spill] sm:$0xff] %v11514_v57  ;;  %v14497_v57 = vld [vmem:[#allocation55_spill] sm:$0xff] }
 0x4ab   : > { %5853 = vrot.lane.b32.xlu1 %v10891_v56, %s14165_s27  ;;  %v11522_v38 = vpop.permute.xlu0 %4700 }
 0x4ac   : > { %5199 = vmatpush1.bf16.msra.mxu0 %v5145_v49 }
 0x4ad   : > { %v11526_v34 = vpop.permute.xlu1 %4668  ;;  %5859 = vrot.lane.b32.xlu0 %v10931_v62, %s14165_s27 }
 0x4af   : > { %5576 = vrot.lane.b32.xlu1 %v10859_v28, %s14192_s30  ;;  %v11532_v55 = vpop.permute.xlu0 %4475 }
 0x4b0   : > { %14482 = vst [vmem:[#allocation14_spill] sm:$0xff] %v11532_v55 }
 0x4b1   : > { %v11534_v11 = vpop.permute.xlu1 %4427  ;;  %5582 = vrot.lane.b32.xlu0 %v10897_v29, %s14192_s30 }
 0x4b2   : > { %14483 = vst [vmem:[#allocation44_spill] sm:$0xff] %v11534_v11 }
 0x4b3   : > { %5849 = vrot.lane.b32.xlu1 %v10859_v28, %s14165_s27  ;;  %v11540_v45 = vpop.permute.xlu0 %5012 }
 0x4b4   : > { %14484 = vst [vmem:[#allocation18_spill] sm:$0xff] %v11540_v45  ;;  %v8172_v45 = vld [vmem:[%s13892_s10 + $0x58] sm:$0xff] }
 0x4b5   : > { %v11542_v4 = vpop.permute.xlu1 %4980  ;;  %5855 = vrot.lane.b32.xlu0 %v10897_v29, %s14165_s27 }
 0x4b6   : > { %14485 = vst [vmem:[#allocation42_spill] sm:$0xff] %v11542_v4 }
 0x4b7   : > { %5572 = vrot.lane.b32.xlu1 %v14486_v36, %s14192_s30  ;;  %v11548_v26 = vpop.permute.xlu0 %4702 }
 0x4b9   : > { %v11550_v5 = vpop.permute.xlu1 %4670  ;;  %5578 = vrot.lane.b32.xlu0 %v14487_v10, %s14192_s30 }
 0x4bb   : > { %5845 = vrot.lane.b32.xlu1 %v14486_v36, %s14165_s27  ;;  %v11556_v13 = vpop.permute.xlu0 %4477 }
 0x4bc   : > { %14488 = vst [vmem:[#allocation20_spill] sm:$0xff] %v11556_v13 }
 0x4bd   : > { %v11558_v58 = vpop.permute.xlu1 %4429  ;;  %5851 = vrot.lane.b32.xlu0 %v14487_v10, %s14165_s27 }
 0x4be   : > { %14489 = vst [vmem:[#allocation21_spill] sm:$0xff] %v11558_v58 }
 0x4bf   : > { %4437 = vrot.lane.b32.xlu1 %v11250_v1, %s14383_s18  ;;  %v11564_v12 = vpop.permute.xlu0 %5014 }
 0x4c0   : > { %14490 = vst [vmem:[#allocation19_spill] sm:$0xff] %v11564_v12  ;;  %v14500_v12 = vld [vmem:[#allocation25_spill] sm:$0xff] }
 0x4c1   : > { %v11566_v35 = vpop.permute.xlu1 %4982  ;;  %5574 = vrot.lane.b32.xlu0 %v14492_v41, %s14192_s30 }
 0x4c2   : > { %14491 = vst [vmem:[#allocation41_spill] sm:$0xff] %v11566_v35 }
 0x4c3   : > { %4990 = vrot.lane.b32.xlu1 %v11250_v1, %s14182_s0  ;;  %v11572_v43 = vpop.permute.xlu0 %4704 }
 0x4c5   : > { %v11574_v2 = vpop.permute.xlu1 %4672  ;;  %5847 = vrot.lane.b32.xlu0 %v14492_v41, %s14165_s27 }
 0x4c7   : > { %5568 = vrot.lane.b32.xlu1 %v14493_v46, %s14192_s30  ;;  %v11580_v49 = vpop.permute.xlu0 %4479 }
 0x4c9   : > { %v11582_v63 = vpop.permute.xlu1 %4431  ;;  %5570 = vrot.lane.b32.xlu0 %v14494_v6, %s14192_s30 }
 0x4cb   : > { %5841 = vrot.lane.b32.xlu1 %v14493_v46, %s14165_s27  ;;  %v11588_v48 = vpop.permute.xlu0 %5016 }
 0x4cc   : > { %14495 = vst [vmem:[#allocation45_spill] sm:$0xff] %v11588_v48 }
 0x4cd   : > { %v11590_v60 = vpop.permute.xlu1 %4984  ;;  %5843 = vrot.lane.b32.xlu0 %v14494_v6, %s14165_s27  ;;  %v8170_v6 = vld [vmem:[%s13892_s10 + $0x48] sm:$0xff] }
 0x4ce   : > { %14496 = vst [vmem:[#allocation46_spill] sm:$0xff] %v11590_v60 }
 0x4cf   : > { %5564 = vrot.lane.b32.xlu1 %v14497_v57, %s14192_s30  ;;  %v4707_v24 = vpop.permute.xlu0 %4706 }
 0x4d1   : > { %v4675_v3 = vpop.permute.xlu1 %4674  ;;  %5566 = vrot.lane.b32.xlu0 %v14498_v9, %s14192_s30 }
 0x4d3   : > { %5837 = vrot.lane.b32.xlu1 %v14497_v57, %s14165_s27  ;;  %v11600_v4 = vpop.permute.xlu0 %4481  ;;  %v5183_v57 = vpack.c.bf16 %v8172_v45, %v8170_v6 }
 0x4d5   : > { %v11602_v46 = vpop.permute.xlu1 %4433  ;;  %5839 = vrot.lane.b32.xlu0 %v14498_v9, %s14165_s27  ;;  %5216 = vmatprep.mubr.bf16.mxu0 %v5183_v57 }
 0x4d7   : > { %5560 = vrot.lane.b32.xlu1 %v14499_v15, %s14192_s30  ;;  %v11614_v16 = vpop.permute.xlu0 %5018 }
 0x4d9   : > { %v11616_v35 = vpop.permute.xlu1 %4986  ;;  %5562 = vrot.lane.b32.xlu0 %v14500_v12, %s14192_s30 }
 0x4db   : > { %5833 = vrot.lane.b32.xlu1 %v14499_v15, %s14165_s27  ;;  %v11622_v9 = vpop.permute.xlu0 %5291 }
 0x4dc   : > { %14501 = vst [vmem:[#allocation5_spill] sm:$0xff] %v11622_v9 }
 0x4dd   : > { %v11624_v11 = vpop.permute.xlu1 %5259  ;;  %5835 = vrot.lane.b32.xlu0 %v14500_v12, %s14165_s27  ;;  %v14503_v12 = vld [vmem:[#allocation32_spill] sm:$0xff] }
 0x4de   : > { %14502 = vst [vmem:[#allocation4_spill] sm:$0xff] %v11624_v11 }
 0x4df   : > { %5620 = vrot.lane.b32.xlu1 %v11237_v42, %s14192_s30  ;;  %v4709_v6 = vpop.permute.xlu0 %4708 }
 0x4e1   : > { %v4677_v45 = vpop.permute.xlu1 %4676  ;;  %5618 = vrot.lane.b32.xlu0 %v11192_v20, %s14192_s30 }
 0x4e3   : > { %5893 = vrot.lane.b32.xlu1 %v11237_v42, %s14165_s27  ;;  %v11634_v57 = vpop.permute.xlu0 %4483 }
 0x4e5   : > { %v11636_v15 = vpop.permute.xlu1 %4435  ;;  %5891 = vrot.lane.b32.xlu0 %v11192_v20, %s14165_s27  ;;  %v14506_v20 = vld [vmem:[#allocation34_spill] sm:$0xff] }
 0x4e7   : > { %5616 = vrot.lane.b32.xlu1 %v11183_v52, %s14192_s30  ;;  %v11642_v11 = vpop.permute.xlu0 %5020 }
 0x4e9   : > { %v11644_v9 = vpop.permute.xlu1 %4988  ;;  %5614 = vrot.lane.b32.xlu0 %v14503_v12, %s14192_s30 }
 0x4eb   : > { %5889 = vrot.lane.b32.xlu1 %v11183_v52, %s14165_s27  ;;  %v11650_v42 = vpop.permute.xlu0 %5293  ;;  %v4727_v52 = vsel %vm14508_vm11, %v4709_v6, %v4677_v45  ;;  %vm14514_vm11 = vmmov %vm14511_vm0 }
 0x4ec   : > { %14504 = vst [vmem:[#allocation3_spill] sm:$0xff] %v11650_v42 }
 0x4ed   : > { %v11652_v55 = vpop.permute.xlu1 %5261  ;;  %5887 = vrot.lane.b32.xlu0 %v14503_v12, %s14165_s27  ;;  %v4803_v12 = vsel %vm14509_vm6, %v4677_v45, %v4709_v6  ;;  %vm14515_vm6 = vmmov %vm14511_vm0 }
 0x4ee   : > { %14505 = vst [vmem:[#allocation57_spill] sm:$0xff] %v11652_v55 }
 0x4ef   : > { %5612 = vrot.lane.b32.xlu1 %v14506_v20, %s14192_s30  ;;  %v4711_v36 = vpop.permute.xlu0 %4710 }
 0x4f1   : > { %v4679_v60 = vpop.permute.xlu1 %4678  ;;  %5610 = vrot.lane.b32.xlu0 %v11117_v53, %s14192_s30 }
 0x4f2   : > { %v4728_v48 = vsel %vm14472_vm9, %v4711_v36, %v4679_v60  ;;  %v4807_v58 = vsel %vm14507_vm10, %v4679_v60, %v4711_v36  ;;  %v4390_v60 = vld [vmem:[%s13885_s3] ss:$8 sm:$0x3]  ;;  %v4726_v36 = vsel %vm14510_vm1, %v4707_v24, %v4675_v3  ;;  %vm14512_vm9 = vmmov %vm14511_vm0 }
 0x4f3   : > { %5885 = vrot.lane.b32.xlu1 %v14506_v20, %s14165_s27  ;;  %8144 = vmatprep.subr.msk.bf16.mxu1 %vm11277_vm13, %v4728_v48  ;;  %v11666_v55 = vpop.permute.xlu0 %4485  ;;  %v4863_v42 = vsel %vm11289_vm8, %v4807_v58, 0  ;;  %v4861_v48 = vsel %vm11289_vm8, %v4803_v12, 0  ;;  %v4799_v58 = vsel %vm14511_vm0, %v4675_v3, %v4707_v24  ;;  %vm4584_vm12 = vcmp.ne.f32.partialorder %v4390_v60, 0.0  ;;  %vm14513_vm10 = vmmov %vm14511_vm0 }
 0x4f4   : > { %4889 = vmatpush2.bf16.msra.mxu1 %v4863_v42  ;;  %v4859_v12 = vsel %vm11289_vm8, %v4799_v58, 0  ;;  %v4725_v3 = vsel %vm14512_vm9, %v11572_v43, %v11574_v2  ;;  %v4795_v24 = vsel %vm14513_vm10, %v11574_v2, %v11572_v43  ;;  %v4585_v45 = vsel %vm4584_vm12, 1, %v14421_v22  ;;  %vm14521_vm12 = vmmov %vm14515_vm6 }
 0x4f5   : > { %v11672_v13 = vpop.permute.xlu1 %5257  ;;  %5883 = vrot.lane.b32.xlu0 %v11117_v53, %s14165_s27  ;;  %8145 = vmatprep.subr.msk.bf16.mxu1 %vm11277_vm13, %v4727_v52  ;;  %v4589_v43 = vrot.slane %v4585_v45, %v8727_v8  ;;  %v4593_v2 = vrot.slane %v4585_v45, %v14422_v31  ;;  %v4724_v58 = vsel %vm14514_vm11, %v11548_v26, %v11550_v5  ;;  %vm14522_vm9 = vmmov %vm14515_vm6 }
 0x4f6   : > { %vm14523_vm11 = vmmov %vm14515_vm6 }
 0x4f7   : > { %5608 = vrot.lane.b32.xlu1 %v11111_v18, %s14192_s30  ;;  %v11683_v42 = vpop.permute.xlu0 %5022  ;;  %vm11740_vm1 = vcmp.eq.s32.totalorder %v4589_v43, 1  ;;  %vm11744_vm0 = vcmp.eq.s32.totalorder %v4593_v2, 1  ;;  %v4783_v2 = vsel %vm14515_vm6, %v11471_v59, %v11456_v54 }
 0x4f8   : > { %4891 = vmatpush2.bf16.msra.mxu1 %v4861_v48  ;;  %vm4596_vm10 = vmpackc.low %vm11744_vm0, %vm11740_vm1 }
 0x4f9   : > { %v11689_v6 = vpop.permute.xlu1 %5255  ;;  %5606 = vrot.lane.b32.xlu0 %v11085_v7, %s14192_s30  ;;  %8146 = vmatprep.subr.msk.bf16.mxu1 %vm11277_vm13, %v4726_v36  ;;  %v4857_v36 = vsel %vm11289_vm8, %v4795_v24, 0  ;;  %vm14525_vm1 = vmmov %vm14515_vm6 }
 0x4fa   : > { %vm14526_vm0 = vmmov %vm14525_vm1 }
 0x4fb   : > { %5881 = vrot.lane.b32.xlu1 %v11111_v18, %s14165_s27  ;;  %v11697_v52 = vpop.permute.xlu0 %5295 }
 0x4fc   : > { %4893 = vmatpush2.bf16.msra.mxu1 %v4859_v12  ;;  %v4791_v12 = vsel %vm14515_vm6, %v11550_v5, %v11548_v26  ;;  %v4723_v5 = vsel %vm14521_vm12, %v11522_v38, %v11526_v34 }
 0x4fd   : > { %v11708_v60 = vpop.permute.xlu1 %5253  ;;  %5879 = vrot.lane.b32.xlu0 %v11085_v7, %s14165_s27  ;;  %8147 = vmatprep.subr.msk.bf16.mxu1 %vm11277_vm13, %v4725_v3  ;;  %v4855_v45 = vsel %vm11289_vm8, %v4791_v12, 0 }
 0x4ff   : > { %5263 = vrot.lane.b32.xlu1 %v11250_v1, %s14384_s29  ;;  %v11716_v48 = vpop.permute.xlu0 %5289 }
 0x500   : > { %4895 = vmatpush2.bf16.msra.mxu1 %v4857_v36 }
 0x501   : > { %v11728_v3 = vpop.permute.xlu1 %5251  ;;  %5602 = vrot.lane.b32.xlu0 %v11053_v0, %s14192_s30  ;;  %8148 = vmatprep.subr.msk.bf16.mxu1 %vm11277_vm13, %v4724_v58  ;;  %v4787_v58 = vsel %vm14522_vm9, %v11526_v34, %v11522_v38  ;;  %v4722_v34 = vsel %vm14523_vm11, %v11456_v54, %v11471_v59  ;;  %v4851_v54 = vsel %vm11289_vm8, %v4783_v2, 0  ;;  %v4721_v59 = vsel %vm14525_vm1, %v11372_v37, %v11387_v40 }
 0x502   : > { %14516 = vst [vmem:[#allocation50_spill] sm:$0xff] %v11728_v3  ;;  %v4853_v38 = vsel %vm11289_vm8, %v4787_v58, 0  ;;  %v8132_v58 = vld [vmem:[%s13892_s10 + $0x20] sm:$0xff] }
 0x503   : > { %5604 = vrot.lane.b32.xlu1 %v11079_v21, %s14192_s30  ;;  %v11736_v24 = vpop.permute.xlu0 %5287 }
 0x504   : > { %4897 = vmatpush2.bf16.msra.mxu1 %v4855_v45  ;;  %v4597_v45 = vsel %vm4596_vm10, 65537, %v14421_v22 }
 0x505   : > { %v11754_v3 = vpop.permute.xlu1 %5249  ;;  %5875 = vrot.lane.b32.xlu0 %v11053_v0, %s14165_s27  ;;  %8149 = vmatprep.subr.msk.bf16.mxu1 %vm11277_vm13, %v4723_v5  ;;  %v4605_v36 = vrot.slane %v4597_v45, %v11244_v61  ;;  %v4779_v5 = vsel %vm14526_vm0, %v11387_v40, %v11372_v37  ;;  %v4641_v37 = vld [vmem:[%s13892_s10 + $0x8] sm:$0xff]  ;;  %v4643_v40 = vld [vmem:[%s13892_s10 + $0x18] sm:$0xff]  ;;  %v4601_v2 = vrot.slane %v4597_v45, %v8727_v8 }
 0x506   : > { %v4849_v27 = vsel %vm11289_vm8, %v4779_v5, 0 }
 0x507   : > { %5877 = vrot.lane.b32.xlu1 %v11079_v21, %s14165_s27  ;;  %v11766_v43 = vpop.permute.xlu0 %5285  ;;  %vm11815_vm12 = vcmp.ne.s16.totalorder %v4605_v36, 0  ;;  %v4645_v36 = vpack.c.bf16 %v4643_v40, %v4641_v37  ;;  %vm11837_vm8 = vcmp.ne.s16.totalorder %v4601_v2, 0 }
 0x508   : > { %4899 = vmatpush2.bf16.msra.mxu1 %v4853_v38  ;;  %v8134_v38 = vld [vmem:[%s13892_s10 + $0x30] sm:$0xff] }
 0x509   : > { %v11776_v12 = vpop.permute.xlu1 %5588  ;;  %5598 = vrot.lane.b32.xlu0 %v11021_v17, %s14192_s30  ;;  %8150 = vmatprep.subr.msk.bf16.mxu1 %vm11277_vm13, %v4722_v34 }
 0x50a   : > { %14524 = vst [vmem:[#allocation34_spill] sm:$0xff] %v11776_v12 }
 0x50b   : > { %5600 = vrot.lane.b32.xlu1 %v11047_v50, %s14192_s30  ;;  %v11786_v26 = vpop.permute.xlu0 %5283 }
 0x50c   : > { %4901 = vmatpush2.bf16.msra.mxu1 %v4851_v54 }
 0x50d   : > { %v11802_v34 = vpop.permute.xlu1 %5861  ;;  %5871 = vrot.lane.b32.xlu0 %v11021_v17, %s14165_s27  ;;  %8151 = vmatprep.subr.msk.bf16.mxu1 %vm11277_vm13, %v4721_v59  ;;  %v4870_v59 = vpack.c.bf16 %v8134_v38, %v8132_v58  ;;  %vm14530_vm13 = vcmask 138240   ;;  %v14535_v58 = vld [vmem:[#allocation38_spill] sm:$0xff] }
 0x50e   : > { %14527 = vst [vmem:[#allocation71_spill] sm:$0xff] %v11802_v34  ;;  %v4550_v12 = vsel %vm14530_vm13, %v11305_v44, %v11297_v25  ;;  %vm14531_vm9 = vmmov %vm14530_vm13 }
 0x50f   : > { %5873 = vrot.lane.b32.xlu1 %v11047_v50, %s14165_s27  ;;  %v11821_v34 = vpop.permute.xlu0 %5281  ;;  %v4495_v45 = vsel %vm14531_vm9, %v11297_v25, %v11305_v44  ;;  %v4622_v44 = vsel %vm11837_vm8, %v4550_v12, 0  ;;  %v14534_v25 = vld [vmem:[#allocation63_spill] sm:$0xff]  ;;  %vm14536_vm10 = vmmov %vm14531_vm9 }
 0x510   : > { %4903 = vmatpush2.bf16.msra.mxu1 %v4849_v27  ;;  %v4546_v38 = vsel %vm14536_vm10, %v14535_v58, %v14534_v25  ;;  %vm14537_vm11 = vmmov %vm14531_vm9  ;;  %v14539_v27 = vld [vmem:[#allocation54_spill] sm:$0xff] }
 0x511   : > { %v11831_v17 = vpop.permute.xlu1 %5584  ;;  %5594 = vrot.lane.b32.xlu0 %v10993_v32, %s14192_s30  ;;  %8152 = vmatprep.subr.msk.bf16.mxu1 %vm11815_vm12, %v4495_v45  ;;  %v4494_v37 = vsel %vm14537_vm11, %v14534_v25, %v14535_v58  ;;  %v4620_v2 = vsel %vm11837_vm8, %v4546_v38, 0  ;;  %vm14541_vm6 = vmmov %vm14531_vm9  ;;  %v14545_v38 = vld [vmem:[#allocation7_spill] sm:$0xff] }
 0x512   : > { %vm14542_vm1 = vmmov %vm14541_vm6 }
 0x513   : > { %5596 = vrot.lane.b32.xlu1 %v11015_v47, %s14192_s30  ;;  %v11843_v5 = vpop.permute.xlu0 %5590  ;;  %4905 = vmatmul.mubr.bf16.vlgmr.msra.gmra.mxu1 %v4870_v59  ;;  %v14540_v59 = vld [vmem:[#allocation37_spill] sm:$0xff]  ;;  %vm14547_vm0 = vmmov %vm14542_vm1 }
 0x514   : > { %4916 = vmatpush1.bf16.msra.mxu1 %v4622_v44  ;;  %4947 = vmatprep.mubr.bf16.mxu1 %v4645_v36  ;;  %v4542_v45 = vsel %vm14541_vm6, %v14540_v59, %v14539_v27  ;;  %v4493_v36 = vsel %vm14542_vm1, %v14539_v27, %v14540_v59  ;;  %vm14548_vm13 = vmmov %vm14547_vm0 }
 0x515   : > { %v11853_v40 = vpop.permute.xlu1 %5857  ;;  %5867 = vrot.lane.b32.xlu0 %v10993_v32, %s14165_s27  ;;  %8153 = vmatprep.subr.msk.bf16.mxu1 %vm11815_vm12, %v4494_v37  ;;  %v4618_v58 = vsel %vm11837_vm8, %v4542_v45, 0  ;;  %v14546_v37 = vld [vmem:[#allocation6_spill] sm:$0xff]  ;;  %vm14552_vm9 = vmmov %vm14547_vm0 }
 0x516   : > { %14538 = vst [vmem:[#allocation63_spill] sm:$0xff] %v11853_v40  ;;  %v4492_v27 = vsel %vm14548_vm13, %v14545_v38, %v14546_v37  ;;  %vm14553_vm10 = vmmov %vm14547_vm0  ;;  %v14557_v40 = vld [vmem:[#allocation56_spill] sm:$0xff] }
 0x517   : > { %5869 = vrot.lane.b32.xlu1 %v11015_v47, %s14165_s27  ;;  %v11861_v12 = vpop.permute.xlu0 %5863  ;;  %vm14558_vm11 = vmmov %vm14547_vm0 }
 0x518   : > { %4918 = vmatpush1.bf16.msra.mxu1 %v4620_v2  ;;  %v4538_v2 = vsel %vm14547_vm0, %v14546_v37, %v14545_v38  ;;  %vm14559_vm6 = vmmov %vm14547_vm0 }
 0x519   : > { %v11871_v44 = vpop.permute.xlu1 %5580  ;;  %6136 = vrot.lane.b32.xlu0 %v10959_v19, %s14544_s1  ;;  %8154 = vmatprep.subr.msk.bf16.mxu1 %vm11815_vm12, %v4493_v36  ;;  %v4616_v36 = vsel %vm11837_vm8, %v4538_v2, 0  ;;  %vm14564_vm1 = vmmov %vm14547_vm0 }
 0x51a   : > { %14543 = vst [vmem:[#allocation38_spill] sm:$0xff] %v11871_v44  ;;  %v14551_v44 = vld [vmem:[#allocation64_spill] sm:$0xff]  ;;  %vm14568_vm13 = vmmov %vm14547_vm0 }
 0x51b   : > { %5592 = vrot.lane.b32.xlu1 %v10987_v39, %s14192_s30  ;;  %v11879_v25 = vpop.permute.xlu0 %5586 }
 0x51c   : > { %4920 = vmatpush1.bf16.msra.mxu1 %v4618_v58  ;;  %v14550_v58 = vld [vmem:[#allocation31_spill] sm:$0xff] }
 0x51d   : > { %v11889_v59 = vpop.permute.xlu1 %5853  ;;  %6409 = vrot.lane.b32.xlu0 %v10959_v19, %s14208_s24  ;;  %8155 = vmatprep.subr.msk.bf16.mxu1 %vm11815_vm12, %v4492_v27  ;;  %v4534_v38 = vsel %vm14552_vm9, %v14551_v44, %v14550_v58  ;;  %v4491_v37 = vsel %vm14553_vm10, %v14550_v58, %v14551_v44  ;;  %vm14569_vm9 = vmmov %vm14547_vm0 }
 0x51e   : > { %14549 = vst [vmem:[#allocation54_spill] sm:$0xff] %v11889_v59  ;;  %v4614_v27 = vsel %vm11837_vm8, %v4534_v38, 0  ;;  %vm14572_vm10 = vmmov %vm14547_vm0 }
 0x51f   : > { %5865 = vrot.lane.b32.xlu1 %v10987_v39, %s14165_s27  ;;  %v11897_v45 = vpop.permute.xlu0 %5859 }
 0x520   : > { %4922 = vmatpush1.bf16.msra.mxu1 %v4616_v36  ;;  %v14556_v36 = vld [vmem:[#allocation61_spill] sm:$0xff] }
 0x521   : > { %v11907_v59 = vpop.permute.xlu1 %5576  ;;  %6132 = vrot.lane.b32.xlu0 %v10931_v62, %s14544_s1  ;;  %8156 = vmatprep.subr.msk.bf16.mxu1 %vm11815_vm12, %v4491_v37  ;;  %v4530_v44 = vsel %vm14558_vm11, %v14557_v40, %v14556_v36  ;;  %v4490_v58 = vsel %vm14559_vm6, %v14556_v36, %v14557_v40  ;;  %vm14573_vm11 = vmmov %vm14547_vm0 }
 0x522   : > { %14554 = vst [vmem:[#allocation37_spill] sm:$0xff] %v11907_v59  ;;  %v4612_v37 = vsel %vm11837_vm8, %v4530_v44, 0  ;;  %vm14575_vm6 = vmmov %vm14547_vm0 }
 0x523   : > { %6134 = vrot.lane.b32.xlu1 %v10955_v30, %s14544_s1  ;;  %v11915_v2 = vpop.permute.xlu0 %5582 }
 0x524   : > { %14555 = vst [vmem:[#allocation7_spill] sm:$0xff] %v11915_v2  ;;  %4924 = vmatpush1.bf16.msra.mxu1 %v4614_v27  ;;  %v14562_v27 = vld [vmem:[#allocation28_spill] sm:$0xff]  ;;  %v14563_v2 = vld [vmem:[#allocation51_spill] sm:$0xff] }
 0x525   : > { %v11925_v59 = vpop.permute.xlu1 %5849  ;;  %6405 = vrot.lane.b32.xlu0 %v10931_v62, %s14208_s24  ;;  %8157 = vmatprep.subr.msk.bf16.mxu1 %vm11815_vm12, %v4490_v58  ;;  %v4526_v40 = vsel %vm14564_vm1, %v14563_v2, %v14562_v27  ;;  %v4489_v36 = vsel %vm14547_vm0, %v14562_v27, %v14563_v2  ;;  %vm14576_vm1 = vmmov %vm14547_vm0  ;;  %vm14577_vm0 = vcmask 121856  }
 0x526   : > { %14560 = vst [vmem:[#allocation6_spill] sm:$0xff] %v11925_v59  ;;  %v4610_v58 = vsel %vm11837_vm8, %v4526_v40, 0 }
 0x527   : > { %6407 = vrot.lane.b32.xlu1 %v10955_v30, %s14208_s24  ;;  %v11933_v38 = vpop.permute.xlu0 %5855 }
 0x528   : > { %14561 = vst [vmem:[#allocation31_spill] sm:$0xff] %v11933_v38  ;;  %4926 = vmatpush1.bf16.msra.mxu1 %v4612_v37  ;;  %v14566_v37 = vld [vmem:[#allocation16_spill] sm:$0xff]  ;;  %v14567_v38 = vld [vmem:[#allocation17_spill] sm:$0xff] }
 0x529   : > { %v11943_v59 = vpop.permute.xlu1 %5572  ;;  %6128 = vrot.lane.b32.xlu0 %v10897_v29, %s14544_s1  ;;  %8158 = vmatprep.subr.msk.bf16.mxu1 %vm11815_vm12, %v4489_v36  ;;  %v4522_v2 = vsel %vm14568_vm13, %v14567_v38, %v14566_v37  ;;  %v4488_v27 = vsel %vm14569_vm9, %v14566_v37, %v14567_v38  ;;  %vm14578_vm13 = vmmov %vm14577_vm0 }
 0x52a   : > { %14565 = vst [vmem:[#allocation64_spill] sm:$0xff] %v11943_v59  ;;  %v4608_v36 = vsel %vm11837_vm8, %v4522_v2, 0  ;;  %vm14580_vm9 = vmmov %vm14576_vm1 }
 0x52b   : > { %6130 = vrot.lane.b32.xlu1 %v10927_v23, %s14544_s1  ;;  %v11951_v44 = vpop.permute.xlu0 %5578 }
 0x52c   : > { %4928 = vmatpush1.bf16.msra.mxu1 %v4610_v58 }
 0x52d   : > { %v11961_v59 = vpop.permute.xlu1 %5845  ;;  %6401 = vrot.lane.b32.xlu0 %v10897_v29, %s14208_s24  ;;  %8159 = vmatprep.subr.msk.bf16.mxu1 %vm11815_vm12, %v4488_v27 }
 0x52e   : > { %14570 = vst [vmem:[#allocation61_spill] sm:$0xff] %v11961_v59 }
 0x52f   : > { %6403 = vrot.lane.b32.xlu1 %v10927_v23, %s14208_s24  ;;  %v11969_v40 = vpop.permute.xlu0 %5851 }
 0x530   : > { %14571 = vst [vmem:[#allocation56_spill] sm:$0xff] %v11969_v40  ;;  %4930 = vmatpush1.bf16.msra.mxu1 %v4608_v36  ;;  %v4578_v36 = vsel %vm14575_vm6, %v11636_v15, %v11634_v57  ;;  %vm14584_vm6 = vmmov %vm14577_vm0 }
 0x531   : > { %v4438_v58 = vpop.permute.xlu1 %4437  ;;  %6124 = vrot.lane.b32.xlu0 %v14487_v10, %s14544_s1 }
 0x532   : > { %v4582_v38 = vsel %vm14572_vm10, %v4438_v58, %v11666_v55  ;;  %v4503_v37 = vsel %vm14573_vm11, %v11666_v55, %v4438_v58  ;;  %v4502_v55 = vsel %vm14576_vm1, %v11634_v57, %v11636_v15  ;;  %v4636_v57 = vsel %vm11837_vm8, %v4578_v36, 0  ;;  %vm14581_vm10 = vmmov %vm14577_vm0 }
 0x533   : > { %6126 = vrot.lane.b32.xlu1 %v10891_v56, %s14544_s1  ;;  %8160 = vmatprep.subr.msk.bf16.mxu1 %vm11815_vm12, %v4503_v37  ;;  %v11983_v27 = vpop.permute.xlu0 %5574  ;;  %v4638_v2 = vsel %vm11837_vm8, %v4582_v38, 0  ;;  %vm14582_vm11 = vmmov %vm14576_vm1  ;;  %v5039_v36 = vsel %vm14584_vm6, %v11642_v11, %v11644_v9 }
 0x534   : > { %14574 = vst [vmem:[#allocation28_spill] sm:$0xff] %v11983_v27  ;;  %4932 = vmatpush2.bf16.msra.mxu1 %v4638_v2  ;;  %v8189_v2 = vld [vmem:[%s13885_s3 + $0x3] ss:$8 sm:$0x3]  ;;  %v14640_v27 = vld [vmem:[#allocation10_spill] sm:$0xff] }
 0x535   : > { %v4991_v58 = vpop.permute.xlu1 %4990  ;;  %6397 = vrot.lane.b32.xlu0 %v14487_v10, %s14208_s24  ;;  %8161 = vmatprep.subr.msk.bf16.mxu1 %vm11815_vm12, %v4502_v55  ;;  %vm5394_vm1 = vcmp.ne.f32.partialorder %v8189_v2, 0.0 }
 0x536   : > { %v5119_v37 = vsel %vm14577_vm0, %v4991_v58, %v11683_v42  ;;  %v5040_v38 = vsel %vm14578_vm13, %v11683_v42, %v4991_v58  ;;  %v4574_v42 = vsel %vm14580_vm9, %v11602_v46, %v11600_v4  ;;  %v5115_v58 = vsel %vm14581_vm10, %v11644_v9, %v11642_v11  ;;  %vm14586_vm0 = vmmov %vm14580_vm9 }
 0x537   : > { %6399 = vrot.lane.b32.xlu1 %v10891_v56, %s14208_s24  ;;  %8181 = vmatprep.subr.msk.bf16.mxu0 %vm11319_vm2, %v5040_v38  ;;  %v12008_v15 = vpop.permute.xlu0 %5847  ;;  %v5175_v55 = vsel %vm11332_vm7, %v5119_v37, 0  ;;  %v4501_v38 = vsel %vm14582_vm11, %v11600_v4, %v11602_v46  ;;  %v4634_v46 = vsel %vm11837_vm8, %v4574_v42, 0  ;;  %v5173_v37 = vsel %vm11332_vm7, %v5115_v58, 0  ;;  %vm14587_vm13 = vmmov %vm14584_vm6 }
 0x538   : > { %14579 = vst [vmem:[#allocation51_spill] sm:$0xff] %v12008_v15  ;;  %4934 = vmatpush2.bf16.msra.mxu1 %v4636_v57  ;;  %5201 = vmatpush2.bf16.msra.mxu0 %v5175_v55  ;;  %v4570_v57 = vsel %vm14586_vm0, %v11582_v63, %v11580_v49  ;;  %v5111_v9 = vsel %vm14587_vm13, %v11616_v35, %v11614_v16  ;;  %vm14588_vm9 = vmmov %vm14586_vm0  ;;  %v5395_v2 = vsel %vm5394_vm1, 1, %v14421_v22 }
 0x539   : > { %v12023_v59 = vpop.permute.xlu1 %5568  ;;  %6120 = vrot.lane.b32.xlu0 %v14492_v41, %s14544_s1  ;;  %8162 = vmatprep.subr.msk.bf16.mxu1 %vm11815_vm12, %v4501_v38  ;;  %v4500_v11 = vsel %vm14588_vm9, %v11580_v49, %v11582_v63  ;;  %vm14590_vm10 = vmmov %vm14584_vm6  ;;  %v4632_v49 = vsel %vm11837_vm8, %v4570_v57, 0  ;;  %v5171_v58 = vsel %vm11332_vm7, %v5111_v9, 0  ;;  %v5399_v38 = vrot.slane %v5395_v2, %v8727_v8 }
 0x53a   : > { %14583 = vst [vmem:[#allocation16_spill] sm:$0xff] %v12023_v59  ;;  %8182 = vmatprep.subr.msk.bf16.mxu0 %vm11319_vm2, %v5039_v36  ;;  %v5038_v42 = vsel %vm14590_vm10, %v11614_v16, %v11616_v35  ;;  %v5403_v36 = vrot.slane %v5395_v2, %v14422_v31  ;;  %v14593_v16 = vld [vmem:[#allocation21_spill] sm:$0xff]  ;;  %vm14594_vm11 = vmmov %vm14586_vm0  ;;  %v14600_v2 = vld [vmem:[#allocation26_spill] sm:$0xff] }
 0x53b   : > { %6122 = vrot.lane.b32.xlu1 %v10859_v28, %s14544_s1  ;;  %v12036_v4 = vpop.permute.xlu0 %5570  ;;  %vm14597_vm1 = vmmov %vm14586_vm0  ;;  %vm12101_vm13 = vcmp.eq.s32.totalorder %v5399_v38, 1 }
 0x53c   : > { %14585 = vst [vmem:[#allocation17_spill] sm:$0xff] %v12036_v4  ;;  %4936 = vmatpush2.bf16.msra.mxu1 %v4634_v46  ;;  %5203 = vmatpush2.bf16.msra.mxu0 %v5173_v37  ;;  %v14592_v46 = vld [vmem:[#allocation20_spill] sm:$0xff]  ;;  %v14595_v37 = vld [vmem:[#allocation45_spill] sm:$0xff]  ;;  %vm14599_vm0 = vmmov %vm14584_vm6  ;;  %vm12105_vm9 = vcmp.eq.s32.totalorder %v5403_v36, 1 }
 0x53d   : > { %v12052_v55 = vpop.permute.xlu1 %5841  ;;  %5622 = vrot.lane.b32.xlu0 %v11250_v1, %s14192_s30  ;;  %8163 = vmatprep.subr.msk.bf16.mxu1 %vm11815_vm12, %v4500_v11  ;;  %v4566_v35 = vsel %vm14594_vm11, %v14593_v16, %v14592_v46  ;;  %v14596_v11 = vld [vmem:[#allocation46_spill] sm:$0xff]  ;;  %v4499_v57 = vsel %vm14597_vm1, %v14592_v46, %v14593_v16  ;;  %vm14608_vm10 = vmmov %vm14597_vm1 }
 0x53e   : > { %14589 = vst [vmem:[#allocation72_spill] sm:$0xff] %v12052_v55  ;;  %8183 = vmatprep.subr.msk.bf16.mxu0 %vm11319_vm2, %v5038_v42  ;;  %v5107_v42 = vsel %vm14584_vm6, %v14596_v11, %v14595_v37  ;;  %v5037_v9 = vsel %vm14599_vm0, %v14595_v37, %v14596_v11  ;;  %v14606_v11 = vld [vmem:[#allocation14_spill] sm:$0xff]  ;;  %vm14611_vm11 = vmmov %vm14599_vm0 }
 0x53f   : > { %6395 = vrot.lane.b32.xlu1 %v10859_v28, %s14208_s24  ;;  %v12065_v63 = vpop.permute.xlu0 %5843  ;;  %v5169_v46 = vsel %vm11332_vm7, %v5107_v42, 0  ;;  %vm14612_vm6 = vmmov %vm14597_vm1  ;;  %v14615_v42 = vld [vmem:[#allocation11_spill] sm:$0xff]  ;;  %v14620_v16 = vld [vmem:[#allocation42_spill] sm:$0xff] }
 0x540   : > { %14591 = vst [vmem:[#allocation73_spill] sm:$0xff] %v12065_v63  ;;  %4938 = vmatpush2.bf16.msra.mxu1 %v4632_v49  ;;  %5205 = vmatpush2.bf16.msra.mxu0 %v5171_v58  ;;  %v4630_v58 = vsel %vm11837_vm8, %v4566_v35, 0  ;;  %vm14614_vm1 = vmmov %vm14599_vm0 }
 0x541   : > { %v12082_v55 = vpop.permute.xlu1 %5564  ;;  %5895 = vrot.lane.b32.xlu0 %v11250_v1, %s14165_s27  ;;  %8164 = vmatprep.subr.msk.bf16.mxu1 %vm11815_vm12, %v4499_v57  ;;  %v14607_v57 = vld [vmem:[#allocation44_spill] sm:$0xff]  ;;  %vm5406_vm0 = vmpackc.low %vm12105_vm9, %vm12101_vm13 }
 0x542   : > { %14598 = vst [vmem:[#allocation20_spill] sm:$0xff] %v12082_v55  ;;  %8184 = vmatprep.subr.msk.bf16.mxu0 %vm11319_vm2, %v5037_v9  ;;  %v4562_v9 = vsel %vm14608_vm10, %v14607_v57, %v14606_v11  ;;  %v14609_v55 = vld [vmem:[#allocation19_spill] sm:$0xff]  ;;  %v4498_v38 = vsel %vm14612_vm6, %v14606_v11, %v14607_v57  ;;  %vm14617_vm10 = vmmov %vm14612_vm6  ;;  %v14619_v57 = vld [vmem:[#allocation18_spill] sm:$0xff] }
 0x543   : > { %6118 = vrot.lane.b32.xlu1 %v14600_v2, %s14544_s1  ;;  %v12095_v49 = vpop.permute.xlu0 %5566  ;;  %vm14622_vm13 = vmmov %vm14612_vm6 }
 0x544   : > { %14601 = vst [vmem:[#allocation21_spill] sm:$0xff] %v12095_v49  ;;  %v14610_v49 = vld [vmem:[#allocation41_spill] sm:$0xff]  ;;  %4940 = vmatpush2.bf16.msra.mxu1 %v4630_v58  ;;  %5207 = vmatpush2.bf16.msra.mxu0 %v5169_v46  ;;  %v14616_v58 = vld [vmem:[#allocation12_spill] sm:$0xff]  ;;  %vm14623_vm9 = vmmov %vm14614_vm1 }
 0x545   : > { %v5103_v63 = vsel %vm14611_vm11, %v14610_v49, %v14609_v55  ;;  %v12118_v35 = vpop.permute.xlu1 %5837  ;;  %8165 = vmatprep.subr.msk.bf16.mxu1 %vm11815_vm12, %v4498_v38  ;;  %6393 = vrot.lane.b32.xlu0 %v14492_v41, %s14208_s24  ;;  %v5036_v36 = vsel %vm14614_vm1, %v14609_v55, %v14610_v49  ;;  %v4558_v46 = vsel %vm14617_vm10, %v14616_v58, %v14615_v42  ;;  %v4628_v55 = vsel %vm11837_vm8, %v4562_v9, 0  ;;  %vm14621_vm11 = vmmov %vm14614_vm1  ;;  %v14625_v9 = vld [vmem:[#allocation49_spill] sm:$0xff] }
 0x546   : > { %14613 = vst [vmem:[#allocation45_spill] sm:$0xff] %v12118_v35  ;;  %8185 = vmatprep.subr.msk.bf16.mxu0 %vm11319_vm2, %v5036_v36  ;;  %v5167_v49 = vsel %vm11332_vm7, %v5103_v63, 0  ;;  %v5099_v37 = vsel %vm14621_vm11, %v14620_v16, %v14619_v57  ;;  %v4497_v38 = vsel %vm14622_vm13, %v14615_v42, %v14616_v58  ;;  %v5035_v36 = vsel %vm14623_vm9, %v14619_v57, %v14620_v16  ;;  %v14626_v42 = vld [vmem:[#allocation8_spill] sm:$0xff]  ;;  %v14627_v58 = vld [vmem:[#allocation9_spill] sm:$0xff]  ;;  %vm14633_vm10 = vmmov %vm14614_vm1 }
 0x547   : > { %6391 = vrot.lane.b32.xlu1 %v14600_v2, %s14208_s24  ;;  %v12138_v11 = vpop.permute.xlu0 %5839  ;;  %v5407_v63 = vsel %vm5406_vm0, 65537, %v14421_v22  ;;  %v14628_v57 = vld [vmem:[#allocation48_spill] sm:$0xff]  ;;  %vm14632_vm0 = vmmov %vm14612_vm6 }
 0x548   : > { %14618 = vst [vmem:[#allocation46_spill] sm:$0xff] %v12138_v11  ;;  %4942 = vmatpush2.bf16.msra.mxu1 %v4628_v55  ;;  %5209 = vmatpush2.bf16.msra.mxu0 %v5167_v49  ;;  %v5415_v55 = vrot.slane %v5407_v63, %v11244_v61  ;;  %v4554_v49 = vsel %vm14612_vm6, %v14627_v58, %v14626_v42  ;;  %v14631_v11 = vld [vmem:[#allocation40_spill] sm:$0xff] }
 0x549   : > { %v12153_v35 = vpop.permute.xlu1 %5560  ;;  %8166 = vmatprep.subr.msk.bf16.mxu1 %vm11815_vm12, %v4497_v38  ;;  %8186 = vmatprep.subr.msk.bf16.mxu0 %vm11319_vm2, %v5035_v36  ;;  %v4626_v38 = vsel %vm11837_vm8, %v4558_v46, 0  ;;  %v5165_v36 = vsel %vm11332_vm7, %v5099_v37, 0  ;;  %v4496_v4 = vsel %vm14632_vm0, %v14626_v42, %v14627_v58  ;;  %v4640_v46 = vld [vmem:[%s13892_s10] sm:$0xff]  ;;  %v4642_v37 = vld [vmem:[%s13892_s10 + $0x10] sm:$0xff] }
 0x54a   : > { %14624 = vst [vmem:[#allocation26_spill] sm:$0xff] %v12153_v35  ;;  %6116 = vrot.lane.b32.xlu0 %v14625_v9, %s14544_s1  ;;  %v14630_v35 = vld [vmem:[#allocation13_spill] sm:$0xff]  ;;  %vm12198_vm11 = vcmp.ne.s16.totalorder %v5415_v55, 0  ;;  %v14637_v42 = vld [vmem:[#allocation15_spill] sm:$0xff] }
 0x54b   : > { %6114 = vrot.lane.b32.xlu1 %v14628_v57, %s14544_s1  ;;  %v12168_v16 = vpop.permute.xlu0 %5562  ;;  %v5095_v59 = vsel %vm14614_vm1, %v14631_v11, %v14630_v35  ;;  %v14638_v58 = vld [vmem:[#allocation39_spill] sm:$0xff] }
 0x54c   : > { %14629 = vst [vmem:[#allocation14_spill] sm:$0xff] %v12168_v16  ;;  %4944 = vmatpush2.bf16.msra.mxu1 %v4626_v38  ;;  %5211 = vmatpush2.bf16.msra.mxu0 %v5165_v36  ;;  %v5034_v16 = vsel %vm14633_vm10, %v14630_v35, %v14631_v11  ;;  %v5411_v35 = vrot.slane %v5407_v63, %v8727_v8  ;;  %v8191_v55 = vld [vmem:[%s13892_s10 + $0x68] sm:$0xff]  ;;  %v8193_v36 = vld [vmem:[%s13892_s10 + $0x78] sm:$0xff] }
 0x54d   : > { %v12189_v15 = vpop.permute.xlu1 %5833  ;;  %8167 = vmatprep.subr.msk.bf16.mxu1 %vm11815_vm12, %v4496_v4  ;;  %8187 = vmatprep.subr.msk.bf16.mxu0 %vm11319_vm2, %v5034_v16  ;;  %v5360_v38 = vsel %vm2013_vm14, %v14638_v58, %v14637_v42  ;;  %v4624_v4 = vsel %vm11837_vm8, %v4554_v49, 0  ;;  %v5163_v16 = vsel %vm11332_vm7, %v5095_v59, 0  ;;  %v4644_v63 = vpack.c.bf16 %v4642_v37, %v4640_v46  ;;  %vm14641_vm12 = vmmov %vm14614_vm1  ;;  %v8169_v49 = vld [vmem:[%s13892_s10 + $0x40] sm:$0xff]  ;;  %v8171_v46 = vld [vmem:[%s13892_s10 + $0x50] sm:$0xff] }
 0x54e   : > { %14634 = vst [vmem:[#allocation44_spill] sm:$0xff] %v12189_v15  ;;  %6389 = vrot.lane.b32.xlu0 %v14625_v9, %s14208_s24  ;;  %v14639_v15 = vld [vmem:[#allocation43_spill] sm:$0xff]  ;;  %vm14642_vm8 = vmmov %vm14614_vm1  ;;  %v5305_v59 = vsel %vm2013_vm14, %v14637_v42, %v14638_v58  ;;  %vm12240_vm13 = vcmp.ne.s16.totalorder %v5411_v35, 0  ;;  %v5456_v42 = vpack.c.bf16 %v8193_v36, %v8191_v55  ;;  %v5182_v35 = vpack.c.bf16 %v8171_v46, %v8169_v49  ;;  %v8213_v55 = vld [vmem:[%s13892_s10 + $0x98] sm:$0xff] }
 0x54f   : > { %6387 = vrot.lane.b32.xlu1 %v14628_v57, %s14208_s24  ;;  %v12207_v54 = vpop.permute.xlu0 %5835  ;;  %v5091_v40 = vsel %vm14641_vm12, %v14640_v27, %v14639_v15  ;;  %v5033_v33 = vsel %vm14642_vm8, %v14639_v15, %v14640_v27  ;;  %v14645_v15 = vld [vmem:[#allocation47_spill] sm:$0xff]  ;;  %v14647_v36 = vld [vmem:[#allocation66_spill] sm:$0xff] }
 0x550   : > { %4946 = vmatpush2.bf16.msra.mxu1 %v4624_v4  ;;  %5213 = vmatpush2.bf16.msra.mxu0 %v5163_v16  ;;  %v14646_v58 = vld [vmem:[#allocation55_spill] sm:$0xff]  ;;  %v5161_v14 = vsel %vm11332_vm7, %v5091_v40, 0  ;;  %v5432_v16 = vsel %vm12240_vm13, %v5360_v38, 0 }
 0x551   : > { %v12234_v37 = vpop.permute.xlu1 %5620  ;;  %8188 = vmatprep.subr.msk.bf16.mxu0 %vm11319_vm2, %v5033_v33  ;;  %8194 = vmatprep.subr.msk.bf16.mxu1 %vm12198_vm11, %v5305_v59  ;;  %v8211_v33 = vld [vmem:[%s13892_s10 + $0x88] sm:$0xff] }
 0x552   : > { %6112 = vrot.lane.b32.xlu0 %v14645_v15, %s14544_s1  ;;  %v14648_v59 = vld [vmem:[#allocation67_spill] sm:$0xff]  ;;  %v5510_v38 = vpack.c.bf16 %v8213_v55, %v8211_v33  ;;  %v14652_v33 = vld [vmem:[#allocation24_spill] sm:$0xff] }
 0x553   : > { %6110 = vrot.lane.b32.xlu1 %v14646_v58, %s14544_s1  ;;  %4948 = vmatmul.mubr.bf16.vlgmr.msra.gmra.mxu1 %v4644_v63  ;;  %v12248_v4 = vpop.permute.xlu0 %5618  ;;  %v5356_v63 = vsel %vm2013_vm14, %v14648_v59, %v14647_v36  ;;  %v5304_v51 = vsel %vm2013_vm14, %v14647_v36, %v14648_v59  ;;  %v14653_v59 = vld [vmem:[#allocation53_spill] sm:$0xff] }
 0x554   : > { %5215 = vmatpush2.bf16.msra.mxu0 %v5161_v14  ;;  %5458 = vmatpush1.bf16.msra.mxu1 %v5432_v16  ;;  %v5430_v46 = vsel %vm12240_vm13, %v5356_v63, 0  ;;  %v14649_v14 = vld [vmem:[#allocation70_spill] sm:$0xff]  ;;  %v14654_v63 = vld [vmem:[#allocation36_spill] sm:$0xff] }
 0x555   : > { %v12266_v40 = vpop.permute.xlu1 %5893  ;;  %8195 = vmatprep.subr.msk.bf16.mxu1 %vm12198_vm11, %v5304_v51  ;;  %5511 = vmatprep.subr.bf16.mxu0 %v10959_v19  ;;  %v14650_v16 = vld [vmem:[#allocation62_spill] sm:$0xff]  ;;  %v5348_v51 = vsel %vm2013_vm14, %v14654_v63, %v14653_v59 }
 0x556   : > { %6385 = vrot.lane.b32.xlu0 %v14645_v15, %s14208_s24  ;;  %5489 = vmatprep.mubr.bf16.mxu1 %v5456_v42  ;;  %v5352_v36 = vsel %vm2013_vm14, %v14650_v16, %v14649_v14  ;;  %v5303_v19 = vsel %vm2013_vm14, %v14649_v14, %v14650_v16  ;;  %v14655_v14 = vld [vmem:[#allocation65_spill] sm:$0xff] }
 0x557   : > { %6383 = vrot.lane.b32.xlu1 %v14646_v58, %s14208_s24  ;;  %5217 = vmatmul.mubr.bf16.vlgmr.msra.gmra.mxu0 %v5182_v35  ;;  %v12275_v49 = vpop.permute.xlu0 %5891  ;;  %v14651_v35 = vld [vmem:[#allocation25_spill] sm:$0xff] }
 0x558   : > { %5460 = vmatpush1.bf16.msra.mxu1 %v5430_v46  ;;  %5512 = vmatpush1.bf16.msra.mxu0 %v10955_v30  ;;  %v5428_v30 = vsel %vm12240_vm13, %v5352_v36, 0  ;;  %v14656_v16 = vld [vmem:[#allocation33_spill] sm:$0xff] }
 0x559   : > { %v12286_v42 = vpop.permute.xlu1 %5616  ;;  %8196 = vmatprep.subr.msk.bf16.mxu1 %vm12198_vm11, %v5303_v19  ;;  %5513 = vmatprep.subr.bf16.mxu0 %v10931_v62  ;;  %v5302_v62 = vsel %vm2013_vm14, %v14653_v59, %v14654_v63  ;;  %v5344_v36 = vsel %vm2013_vm14, %v14656_v16, %v14655_v14  ;;  %v14658_v59 = vld [vmem:[#allocation69_spill] sm:$0xff] }
 0x55a   : > { %6108 = vrot.lane.b32.xlu0 %v14651_v35, %s14544_s1  ;;  %5543 = vmatprep.mubr.bf16.mxu0 %v5510_v38 }
 0x55b   : > { %6106 = vrot.lane.b32.xlu1 %v14652_v33, %s14544_s1  ;;  %v12295_v55 = vpop.permute.xlu0 %5614 }
 0x55c   : > { %5462 = vmatpush1.bf16.msra.mxu1 %v5428_v30  ;;  %5514 = vmatpush1.bf16.msra.mxu0 %v10927_v23  ;;  %v5426_v23 = vsel %vm12240_vm13, %v5348_v51, 0  ;;  %v14657_v30 = vld [vmem:[#allocation68_spill] sm:$0xff]  ;;  %v14659_v51 = vld [vmem:[#allocation58_spill] sm:$0xff] }
 0x55d   : > { %v12306_v38 = vpop.permute.xlu1 %5889  ;;  %8197 = vmatprep.subr.msk.bf16.mxu1 %vm12198_vm11, %v5302_v62  ;;  %5515 = vmatprep.subr.bf16.mxu0 %v10897_v29  ;;  %v5301_v29 = vsel %vm2013_vm14, %v14655_v14, %v14656_v16  ;;  %v14660_v62 = vld [vmem:[#allocation30_spill] sm:$0xff] }
 0x55e   : > { %6381 = vrot.lane.b32.xlu0 %v14651_v35, %s14208_s24 }
 0x55f   : > { %6379 = vrot.lane.b32.xlu1 %v14652_v33, %s14208_s24  ;;  %v12315_v46 = vpop.permute.xlu0 %5887 }
 0x560   : > { %5464 = vmatpush1.bf16.msra.mxu1 %v5426_v23  ;;  %5516 = vmatpush1.bf16.msra.mxu0 %v10891_v56  ;;  %v5424_v56 = vsel %vm12240_vm13, %v5344_v36, 0  ;;  %v5340_v23 = vsel %vm2013_vm14, %v14660_v62, %v14659_v51  ;;  %v14661_v36 = vld [vmem:[#allocation29_spill] sm:$0xff] }
 0x561   : > { %v12326_v19 = vpop.permute.xlu1 %5612  ;;  %8198 = vmatprep.subr.msk.bf16.mxu1 %vm12198_vm11, %v5301_v29  ;;  %5517 = vmatprep.subr.bf16.mxu0 %v14487_v10  ;;  %v5300_v10 = vsel %vm2013_vm14, %v14659_v51, %v14660_v62  ;;  %v14662_v29 = vld [vmem:[#allocation60_spill] sm:$0xff] }
 0x562   : > { %6164 = vrot.lane.b32.xlu0 %v14657_v30, %s14544_s1  ;;  %v14663_v62 = vld [vmem:[#allocation32_spill] sm:$0xff] }
 0x563   : > { %6166 = vrot.lane.b32.xlu1 %v14658_v59, %s14544_s1  ;;  %v12335_v63 = vpop.permute.xlu0 %5610 }
 0x564   : > { %5466 = vmatpush1.bf16.msra.mxu1 %v5424_v56  ;;  %5518 = vmatpush1.bf16.msra.mxu0 %v10859_v28  ;;  %v5422_v28 = vsel %vm12240_vm13, %v5340_v23, 0  ;;  %v5336_v56 = vsel %vm2013_vm14, %v14662_v29, %v14661_v36  ;;  %v14664_v23 = vld [vmem:[#allocation35_spill] sm:$0xff] }
 0x565   : > { %v12346_v14 = vpop.permute.xlu1 %5885  ;;  %8199 = vmatprep.subr.msk.bf16.mxu1 %vm12198_vm11, %v5300_v10  ;;  %5519 = vmatprep.subr.bf16.mxu0 %v14492_v41  ;;  %v5299_v41 = vsel %vm2013_vm14, %v14661_v36, %v14662_v29  ;;  %v14666_v36 = vld [vmem:[#allocation59_spill] sm:$0xff] }
 0x566   : > { %6437 = vrot.lane.b32.xlu0 %v14657_v30, %s14208_s24 }
 0x567   : > { %6439 = vrot.lane.b32.xlu1 %v14658_v59, %s14208_s24  ;;  %v12355_v16 = vpop.permute.xlu0 %5883 }
 0x568   : > { %5468 = vmatpush1.bf16.msra.mxu1 %v5422_v28  ;;  %5520 = vmatpush1.bf16.msra.mxu0 %v14600_v2  ;;  %v5420_v2 = vsel %vm12240_vm13, %v5336_v56, 0  ;;  %v14665_v28 = vld [vmem:[#allocation27_spill] sm:$0xff] }
 0x569   : > { %v12366_v51 = vpop.permute.xlu1 %5608  ;;  %8200 = vmatprep.subr.msk.bf16.mxu1 %vm12198_vm11, %v5299_v41  ;;  %5521 = vmatprep.subr.bf16.mxu0 %v14625_v9  ;;  %v5332_v29 = vsel %vm2013_vm14, %v14666_v36, %v14665_v28  ;;  %v5298_v9 = vsel %vm2013_vm14, %v14665_v28, %v14666_v36 }
 0x56a   : > { %6160 = vrot.lane.b32.xlu0 %v14663_v62, %s14544_s1 }
 0x56b   : > { %6162 = vrot.lane.b32.xlu1 %v14664_v23, %s14544_s1  ;;  %v12375_v10 = vpop.permute.xlu0 %5606 }
 0x56c   : > { %5470 = vmatpush1.bf16.msra.mxu1 %v5420_v2  ;;  %5522 = vmatpush1.bf16.msra.mxu0 %v14628_v57  ;;  %v5418_v57 = vsel %vm12240_vm13, %v5332_v29, 0  ;;  %v14668_v29 = vld [vmem:[#allocation57_spill] sm:$0xff] }
 0x56d   : > { %v12386_v41 = vpop.permute.xlu1 %5881  ;;  %8201 = vmatprep.subr.msk.bf16.mxu1 %vm12198_vm11, %v5298_v9  ;;  %5523 = vmatprep.subr.bf16.mxu0 %v14645_v15 }
 0x56e   : > { %6433 = vrot.lane.b32.xlu0 %v14663_v62, %s14208_s24 }
 0x56f   : > { %6435 = vrot.lane.b32.xlu1 %v14664_v23, %s14208_s24  ;;  %v12395_v56 = vpop.permute.xlu0 %5879 }
 0x570   : > { %5472 = vmatpush1.bf16.msra.mxu1 %v5418_v57  ;;  %5524 = vmatpush1.bf16.msra.mxu0 %v14646_v58 }
 0x571   : > { %v5264_v2 = vpop.permute.xlu1 %5263  ;;  %5525 = vmatprep.subr.bf16.mxu0 %v14651_v35  ;;  %v14667_v35 = vld [vmem:[#allocation3_spill] sm:$0xff] }
 0x572   : > { %v5392_v15 = vsel %vm2013_vm14, %v5264_v2, %v11697_v52  ;;  %6156 = vrot.lane.b32.xlu0 %v11117_v53, %s14544_s1  ;;  %v5313_v28 = vsel %vm2013_vm14, %v11697_v52, %v5264_v2  ;;  %v5388_v9 = vsel %vm2013_vm14, %v14668_v29, %v14667_v35  ;;  %v5312_v52 = vsel %vm2013_vm14, %v14667_v35, %v14668_v29  ;;  %v8214_v2 = vld [vmem:[%s13885_s3 + $0x5] ss:$8 sm:$0x3] }
 0x573   : > { %6158 = vrot.lane.b32.xlu1 %v14506_v20, %s14544_s1  ;;  %8202 = vmatprep.subr.msk.bf16.mxu1 %vm12198_vm11, %v5313_v28  ;;  %v12411_v36 = vpop.permute.xlu0 %5602  ;;  %v5448_v58 = vsel %vm12240_vm13, %v5392_v15, 0  ;;  %v5446_v15 = vsel %vm12240_vm13, %v5388_v9, 0  ;;  %v14669_v28 = vld [vmem:[#allocation5_spill] sm:$0xff]  ;;  %vm5721_vm2 = vcmp.ne.f32.partialorder %v8214_v2, 0.0 }
 0x574   : > { %5474 = vmatpush2.bf16.msra.mxu1 %v5448_v58  ;;  %5526 = vmatpush1.bf16.msra.mxu0 %v14652_v33  ;;  %v14670_v58 = vld [vmem:[#allocation4_spill] sm:$0xff] }
 0x575   : > { %v12422_v57 = vpop.permute.xlu1 %5604  ;;  %8203 = vmatprep.subr.msk.bf16.mxu1 %vm12198_vm11, %v5312_v52  ;;  %5527 = vmatprep.subr.bf16.mxu0 %v11250_v1  ;;  %v5384_v35 = vsel %vm2013_vm14, %v14670_v58, %v14669_v28  ;;  %v5311_v29 = vsel %vm2013_vm14, %v14669_v28, %v14670_v58  ;;  %v8235_v9 = vld [vmem:[%s13885_s3 + $0x6] ss:$8 sm:$0x3]  ;;  %v5310_v28 = vsel %vm2013_vm14, %v11716_v48, %v11672_v13 }
 0x576   : > { %6429 = vrot.lane.b32.xlu0 %v11117_v53, %s14208_s24  ;;  %v5444_v2 = vsel %vm12240_vm13, %v5384_v35, 0  ;;  %vm5994_vm7 = vcmp.ne.f32.partialorder %v8235_v9, 0.0 }
 0x577   : > { %6431 = vrot.lane.b32.xlu1 %v14506_v20, %s14208_s24  ;;  %v12434_v33 = vpop.permute.xlu0 %5875  ;;  %v5995_v9 = vsel %vm5994_vm7, 1, %v14421_v22 }
 0x578   : > { %5476 = vmatpush2.bf16.msra.mxu1 %v5446_v15  ;;  %5528 = vmatpush2.bf16.msra.mxu0 %v14658_v59  ;;  %v5722_v15 = vsel %vm5721_vm2, 1, %v14421_v22 }
 0x579   : > { %v12445_v52 = vpop.permute.xlu1 %5877  ;;  %8204 = vmatprep.subr.msk.bf16.mxu1 %vm12198_vm11, %v5311_v29  ;;  %5529 = vmatprep.subr.bf16.mxu0 %v14657_v30  ;;  %v5380_v30 = vsel %vm2013_vm14, %v11672_v13, %v11716_v48  ;;  %v5726_v35 = vrot.slane %v5722_v15, %v8727_v8  ;;  %v5730_v48 = vrot.slane %v5722_v15, %v14422_v31 }
 0x57a   : > { %6152 = vrot.lane.b32.xlu0 %v11085_v7, %s14544_s1  ;;  %v5442_v13 = vsel %vm12240_vm13, %v5380_v30, 0  ;;  %v5309_v29 = vsel %vm2013_vm14, %v11736_v24, %v11689_v6  ;;  %v5372_v30 = vsel %vm2013_vm14, %v11708_v60, %v11766_v43 }
 0x57b   : > { %6154 = vrot.lane.b32.xlu1 %v11111_v18, %s14544_s1  ;;  %v12457_v59 = vpop.permute.xlu0 %5598  ;;  %vm12499_vm9 = vcmp.eq.s32.totalorder %v5726_v35, 1  ;;  %vm12509_vm6 = vcmp.eq.s32.totalorder %v5730_v48, 1 }
 0x57c   : > { %5478 = vmatpush2.bf16.msra.mxu1 %v5444_v2  ;;  %5530 = vmatpush2.bf16.msra.mxu0 %v14664_v23  ;;  %vm5733_vm1 = vmpackc.low %vm12509_vm6, %vm12499_vm9 }
 0x57d   : > { %v12469_v58 = vpop.permute.xlu1 %5600  ;;  %8205 = vmatprep.subr.msk.bf16.mxu1 %vm12198_vm11, %v5310_v28  ;;  %5531 = vmatprep.subr.bf16.mxu0 %v14663_v62  ;;  %v5376_v62 = vsel %vm2013_vm14, %v11689_v6, %v11736_v24  ;;  %v5308_v28 = vsel %vm2013_vm14, %v11766_v43, %v11708_v60  ;;  %v5438_v60 = vsel %vm12240_vm13, %v5372_v30, 0  ;;  %v5306_v24 = vsel %vm2013_vm14, %v11821_v34, %v11754_v3  ;;  %v8192_v30 = vld [vmem:[%s13892_s10 + $0x70] sm:$0xff] }
 0x57e   : > { %6168 = vrot.lane.b32.xlu0 %v11250_v1, %s14544_s1  ;;  %v5440_v6 = vsel %vm12240_vm13, %v5376_v62, 0 }
 0x57f   : > { %6427 = vrot.lane.b32.xlu1 %v11111_v18, %s14208_s24  ;;  %v12479_v23 = vpop.permute.xlu0 %5871 }
 0x580   : > { %5480 = vmatpush2.bf16.msra.mxu1 %v5442_v13  ;;  %5532 = vmatpush2.bf16.msra.mxu0 %v14506_v20 }
 0x581   : > { %v12492_v2 = vpop.permute.xlu1 %5873  ;;  %8206 = vmatprep.subr.msk.bf16.mxu1 %vm12198_vm11, %v5309_v29  ;;  %5533 = vmatprep.subr.bf16.mxu0 %v11117_v53  ;;  %v5999_v53 = vrot.slane %v5995_v9, %v8727_v8 }
 0x582   : > { %6441 = vrot.lane.b32.xlu0 %v11250_v1, %s14208_s24  ;;  %v6003_v1 = vrot.slane %v5995_v9, %v14422_v31  ;;  %v5734_v9 = vsel %vm5733_vm1, 65537, %v14421_v22 }
 0x583   : > { %6150 = vrot.lane.b32.xlu1 %v11079_v21, %s14544_s1  ;;  %v12505_v20 = vpop.permute.xlu0 %5594  ;;  %vm12539_vm0 = vcmp.eq.s32.totalorder %v5999_v53, 1  ;;  %v5742_v15 = vrot.slane %v5734_v9, %v11244_v61  ;;  %v5738_v53 = vrot.slane %v5734_v9, %v8727_v8 }
 0x584   : > { %5482 = vmatpush2.bf16.msra.mxu1 %v5440_v6  ;;  %5534 = vmatpush2.bf16.msra.mxu0 %v11111_v18  ;;  %vm12543_vm10 = vcmp.eq.s32.totalorder %v6003_v1, 1  ;;  %v5364_v6 = vsel %vm2013_vm14, %v11754_v3, %v11821_v34  ;;  %v8190_v1 = vld [vmem:[%s13892_s10 + $0x60] sm:$0xff] }
 0x585   : > { %v12522_v35 = vpop.permute.xlu1 %5596  ;;  %8207 = vmatprep.subr.msk.bf16.mxu1 %vm12198_vm11, %v5308_v28  ;;  %5535 = vmatprep.subr.bf16.mxu0 %v11085_v7  ;;  %vm6006_vm12 = vmpackc.low %vm12543_vm10, %vm12539_vm0  ;;  %vm12595_vm8 = vcmp.ne.s16.totalorder %v5742_v15, 0  ;;  %v5434_v11 = vsel %vm12240_vm13, %v5364_v6, 0  ;;  %v8212_v6 = vld [vmem:[%s13892_s10 + $0x90] sm:$0xff] }
 0x586   : > { %6425 = vrot.lane.b32.xlu0 %v11085_v7, %s14208_s24  ;;  %v14679_v7 = vld [vmem:[#allocation50_spill] sm:$0xff]  ;;  %v6007_v43 = vsel %vm6006_vm12, 65537, %v14421_v22 }
 0x587   : > { %6423 = vrot.lane.b32.xlu1 %v11079_v21, %s14208_s24  ;;  %v12535_v18 = vpop.permute.xlu0 %5867  ;;  %v5368_v48 = vsel %vm2013_vm14, %v14679_v7, %v11786_v26  ;;  %v5307_v62 = vsel %vm2013_vm14, %v11786_v26, %v14679_v7  ;;  %v6015_v34 = vrot.slane %v6007_v43, %v11244_v61  ;;  %v5455_v7 = vpack.c.bf16 %v8192_v30, %v8190_v1  ;;  %v14688_v1 = vld [vmem:[#allocation71_spill] sm:$0xff] }
 0x588   : > { %5484 = vmatpush2.bf16.msra.mxu1 %v5438_v60  ;;  %5536 = vmatpush2.bf16.msra.mxu0 %v11079_v21  ;;  %v5436_v26 = vsel %vm12240_vm13, %v5368_v48, 0  ;;  %v14680_v60 = vld [vmem:[#allocation52_spill] sm:$0xff]  ;;  %v6011_v15 = vrot.slane %v6007_v43, %v8727_v8  ;;  %v5905_v30 = vsel %vm2540_vm3, %v14688_v1, %v11861_v12 }
 0x589   : > { %v12554_v29 = vpop.permute.xlu1 %5869  ;;  %8208 = vmatprep.subr.msk.bf16.mxu1 %vm12198_vm11, %v5307_v62  ;;  %5537 = vmatprep.subr.bf16.mxu0 %v11053_v0  ;;  %v8216_v48 = vld [vmem:[%s13892_s10 + $0xa8] sm:$0xff]  ;;  %v14683_v62 = vld [vmem:[#allocation34_spill] sm:$0xff]  ;;  %vm12637_vm13 = vcmp.ne.s16.totalorder %v6015_v34, 0 }
 0x58a   : > { %6148 = vrot.lane.b32.xlu0 %v11053_v0, %s14544_s1  ;;  %v5632_v9 = vsel %vm2198_vm15, %v14683_v62, %v11843_v5  ;;  %v8237_v34 = vld [vmem:[%s13892_s10 + $0xc8] sm:$0xff]  ;;  %vm12666_vm2 = vcmp.ne.s16.totalorder %v6011_v15, 0 }
 0x58b   : > { %6146 = vrot.lane.b32.xlu1 %v11047_v50, %s14544_s1  ;;  %v12569_v21 = vpop.permute.xlu0 %6136 }
 0x58c   : > { %5486 = vmatpush2.bf16.msra.mxu1 %v5436_v26  ;;  %5538 = vmatpush2.bf16.msra.mxu0 %v11047_v50  ;;  %v8210_v26 = vld [vmem:[%s13892_s10 + $0x80] sm:$0xff] }
 0x58d   : > { %v12587_v28 = vpop.permute.xlu1 %5592  ;;  %8209 = vmatprep.subr.msk.bf16.mxu1 %vm12198_vm11, %v5306_v24  ;;  %5539 = vmatprep.subr.bf16.mxu0 %v14680_v60  ;;  %vm12619_vm11 = vcmp.ne.s16.totalorder %v5738_v53, 0 }
 0x58e   : > { %6421 = vrot.lane.b32.xlu0 %v11053_v0, %s14208_s24  ;;  %v8218_v0 = vld [vmem:[%s13892_s10 + $0xb8] sm:$0xff] }
 0x58f   : > { %6419 = vrot.lane.b32.xlu1 %v11047_v50, %s14208_s24  ;;  %v12602_v13 = vpop.permute.xlu0 %6409  ;;  %v5687_v50 = vsel %vm2198_vm15, %v11843_v5, %v14683_v62  ;;  %v5783_v53 = vpack.c.bf16 %v8218_v0, %v8216_v48  ;;  %v5509_v62 = vpack.c.bf16 %v8212_v6, %v8210_v26  ;;  %v8239_v48 = vld [vmem:[%s13892_s10 + $0xd8] sm:$0xff]  ;;  %v5631_v0 = vsel %vm2198_vm15, %v11831_v17, %v11879_v25 }
 0x590   : > { %5488 = vmatpush2.bf16.msra.mxu1 %v5434_v11  ;;  %5540 = vmatpush2.bf16.msra.mxu0 %v11015_v47  ;;  %v5759_v11 = vsel %vm12619_vm11, %v5632_v9, 0  ;;  %v5960_v9 = vsel %vm2540_vm3, %v11861_v12, %v14688_v1  ;;  %v5757_v6 = vsel %vm12619_vm11, %v5631_v0, 0  ;;  %v6032_v1 = vsel %vm12666_vm2, %v5905_v30, 0  ;;  %v14694_v30 = vld [vmem:[#allocation31_spill] sm:$0xff] }
 0x591   : > { %v12630_v24 = vpop.permute.xlu1 %5865  ;;  %5541 = vmatprep.subr.bf16.mxu0 %v10993_v32  ;;  %8219 = vmatprep.subr.msk.bf16.mxu1 %vm12595_vm8, %v5687_v50 }
 0x592   : > { %6144 = vrot.lane.b32.xlu0 %v14680_v60, %s14544_s1 }
 0x593   : > { %6142 = vrot.lane.b32.xlu1 %v11015_v47, %s14544_s1  ;;  %5490 = vmatmul.mubr.bf16.vlgmr.msra.gmra.mxu1 %v5455_v7  ;;  %v12646_v43 = vpop.permute.xlu0 %6132  ;;  %v5683_v7 = vsel %vm2198_vm15, %v11879_v25, %v11831_v17  ;;  %v6056_v17 = vpack.c.bf16 %v8239_v48, %v8237_v34  ;;  %v14691_v25 = vld [vmem:[#allocation63_spill] sm:$0xff]  ;;  %v14695_v48 = vld [vmem:[#allocation54_spill] sm:$0xff] }
 0x594   : > { %5542 = vmatpush2.bf16.msra.mxu0 %v10987_v39  ;;  %5785 = vmatpush1.bf16.msra.mxu1 %v5759_v11  ;;  %v5904_v12 = vsel %vm2540_vm3, %v14691_v25, %v11897_v45  ;;  %v14692_v11 = vld [vmem:[#allocation7_spill] sm:$0xff]  ;;  %v5903_v0 = vsel %vm2540_vm3, %v14695_v48, %v14694_v30 }
 0x595   : > { %v12670_v26 = vpop.permute.xlu1 %6134  ;;  %8220 = vmatprep.subr.msk.bf16.mxu1 %vm12595_vm8, %v5683_v7  ;;  %8240 = vmatprep.subr.msk.bf16.mxu0 %vm12637_vm13, %v5960_v9  ;;  %v6030_v9 = vsel %vm12666_vm2, %v5904_v12, 0  ;;  %v14697_v12 = vld [vmem:[#allocation56_spill] sm:$0xff] }
 0x596   : > { %6417 = vrot.lane.b32.xlu0 %v14680_v60, %s14208_s24  ;;  %5816 = vmatprep.mubr.bf16.mxu1 %v5783_v53  ;;  %v14693_v60 = vld [vmem:[#allocation38_spill] sm:$0xff] }
 0x597   : > { %6415 = vrot.lane.b32.xlu1 %v11015_v47, %s14208_s24  ;;  %5544 = vmatmul.mubr.bf16.vlgmr.msra.gmra.mxu0 %v5509_v62  ;;  %v12683_v15 = vpop.permute.xlu0 %6405  ;;  %v5630_v53 = vsel %vm2198_vm15, %v14693_v60, %v14692_v11  ;;  %v5679_v34 = vsel %vm2198_vm15, %v14692_v11, %v14693_v60  ;;  %v5956_v47 = vsel %vm2540_vm3, %v11897_v45, %v14691_v25  ;;  %v14696_v25 = vld [vmem:[#allocation37_spill] sm:$0xff]  ;;  %v14698_v60 = vld [vmem:[#allocation6_spill] sm:$0xff] }
 0x598   : > { %5787 = vmatpush1.bf16.msra.mxu1 %v5757_v6  ;;  %6058 = vmatpush1.bf16.msra.mxu0 %v6032_v1  ;;  %v5755_v7 = vsel %vm12619_vm11, %v5630_v53, 0  ;;  %v5629_v6 = vsel %vm2198_vm15, %v14696_v25, %v11951_v44  ;;  %v5952_v1 = vsel %vm2540_vm3, %v14694_v30, %v14695_v48  ;;  %v5902_v53 = vsel %vm2540_vm3, %v14698_v60, %v14697_v12  ;;  %v6650_v30 = vld [vmem:[%s13893_s11] sm:$0xff]  ;;  %v14700_v48 = vld [vmem:[#allocation64_spill] sm:$0xff] }
 0x599   : > { %v12698_v62 = vpop.permute.xlu1 %6407  ;;  %8221 = vmatprep.subr.msk.bf16.mxu1 %vm12595_vm8, %v5679_v34  ;;  %8241 = vmatprep.subr.msk.bf16.mxu0 %vm12637_vm13, %v5956_v47  ;;  %v5753_v34 = vsel %vm12619_vm11, %v5629_v6, 0  ;;  %v6028_v47 = vsel %vm12666_vm2, %v5903_v0, 0  ;;  %v6651_v0 = vld [vmem:[%s13893_s11 + $0x8] sm:$0xff] }
 0x59a   : > { %6140 = vrot.lane.b32.xlu0 %v10993_v32, %s14544_s1  ;;  %6089 = vmatprep.mubr.bf16.mxu0 %v6056_v17  ;;  %v5675_v17 = vsel %vm2198_vm15, %v11951_v44, %v14696_v25  ;;  %v14701_v6 = vld [vmem:[#allocation51_spill] sm:$0xff] }
 0x59b   : > { %6138 = vrot.lane.b32.xlu1 %v10987_v39, %s14544_s1  ;;  %v12711_v45 = vpop.permute.xlu0 %6128 }
 0x59c   : > { %5789 = vmatpush1.bf16.msra.mxu1 %v5755_v7  ;;  %6060 = vmatpush1.bf16.msra.mxu0 %v6030_v9  ;;  %v5948_v9 = vsel %vm2540_vm3, %v14697_v12, %v14698_v60  ;;  %v6026_v60 = vsel %vm12666_vm2, %v5902_v53, 0  ;;  %v14706_v53 = vld [vmem:[#allocation73_spill] sm:$0xff] }
 0x59d   : > { %v12726_v11 = vpop.permute.xlu1 %6130  ;;  %8222 = vmatprep.subr.msk.bf16.mxu1 %vm12595_vm8, %v5675_v17  ;;  %8242 = vmatprep.subr.msk.bf16.mxu0 %vm12637_vm13, %v5952_v1  ;;  %v14702_v17 = vld [vmem:[#allocation61_spill] sm:$0xff] }
 0x59e   : > { %6413 = vrot.lane.b32.xlu0 %v10993_v32, %s14208_s24  ;;  %v14699_v32 = vld [vmem:[#allocation28_spill] sm:$0xff]  ;;  %v5901_v1 = vsel %vm2540_vm3, %v14702_v17, %v14701_v6 }
 0x59f   : > { %6411 = vrot.lane.b32.xlu1 %v10987_v39, %s14208_s24  ;;  %v12739_v44 = vpop.permute.xlu0 %6401  ;;  %v5628_v7 = vsel %vm2198_vm15, %v14700_v48, %v14699_v32  ;;  %v5671_v39 = vsel %vm2198_vm15, %v14699_v32, %v14700_v48  ;;  %v14705_v32 = vld [vmem:[#allocation16_spill] sm:$0xff] }
 0x5a0   : > { %5791 = vmatpush1.bf16.msra.mxu1 %v5753_v34  ;;  %6062 = vmatpush1.bf16.msra.mxu0 %v6028_v47  ;;  %v5751_v12 = vsel %vm12619_vm11, %v5628_v7, 0  ;;  %v14704_v47 = vld [vmem:[#allocation17_spill] sm:$0xff]  ;;  %v14707_v7 = vld [vmem:[#allocation72_spill] sm:$0xff] }
 0x5a1   : > { %v12760_v25 = vpop.permute.xlu1 %6403  ;;  %8223 = vmatprep.subr.msk.bf16.mxu1 %vm12595_vm8, %v5671_v39  ;;  %8243 = vmatprep.subr.msk.bf16.mxu0 %vm12637_vm13, %v5948_v9  ;;  %v5627_v48 = vsel %vm2198_vm15, %v14705_v32, %v14704_v47  ;;  %v5944_v39 = vsel %vm2540_vm3, %v14701_v6, %v14702_v17  ;;  %v6024_v6 = vsel %vm12666_vm2, %v5901_v1, 0  ;;  %v14709_v17 = vld [vmem:[#allocation21_spill] sm:$0xff]  ;;  %v14711_v1 = vld [vmem:[#allocation46_spill] sm:$0xff] }
 0x5a2   : > { %6654 = vperm.xlu0 %8363, %v6650_v30   ;;  %v5667_v30 = vsel %vm2198_vm15, %v14704_v47, %v14705_v32  ;;  %v14710_v47 = vld [vmem:[#allocation20_spill] sm:$0xff] }
 0x5a3   : > { %6659 = vperm.xlu1 %8362, %v6651_v0   ;;  %v12769_v34 = vpop.permute.xlu0 %6124  ;;  %v5900_v0 = vsel %vm2540_vm3, %v14707_v7, %v14706_v53  ;;  %v5626_v32 = vsel %vm2198_vm15, %v14710_v47, %v14709_v17 }
 0x5a4   : > { %14703 = vst [vmem:[#allocation19_spill] sm:$0xff] %v12769_v34  ;;  %5793 = vmatpush1.bf16.msra.mxu1 %v5751_v12  ;;  %6064 = vmatpush1.bf16.msra.mxu0 %v6026_v60  ;;  %v5749_v60 = vsel %vm12619_vm11, %v5627_v48, 0  ;;  %v14712_v48 = vld [vmem:[#allocation45_spill] sm:$0xff] }
 0x5a5   : > { %v12784_v9 = vpop.permute.xlu1 %6126  ;;  %8224 = vmatprep.subr.msk.bf16.mxu1 %vm12595_vm8, %v5667_v30  ;;  %8244 = vmatprep.subr.msk.bf16.mxu0 %vm12637_vm13, %v5944_v39  ;;  %v5663_v30 = vsel %vm2198_vm15, %v14709_v17, %v14710_v47  ;;  %v5940_v39 = vsel %vm2540_vm3, %v14706_v53, %v14707_v7  ;;  %v5747_v17 = vsel %vm12619_vm11, %v5626_v32, 0  ;;  %v6022_v53 = vsel %vm12666_vm2, %v5900_v0, 0  ;;  %v14714_v7 = vld [vmem:[#allocation14_spill] sm:$0xff]  ;;  %v14716_v0 = vld [vmem:[#allocation44_spill] sm:$0xff] }
 0x5a6   : > { %v14715_v47 = vld [vmem:[#allocation26_spill] sm:$0xff]  ;;  %v5898_v32 = vsel %vm2540_vm3, %v14716_v0, %v12207_v54 }
 0x5a7   : > { %v12793_v12 = vpop.permute.xlu0 %6397  ;;  %v5625_v34 = vsel %vm2198_vm15, %v14715_v47, %v14714_v7 }
 0x5a8   : > { %14708 = vst [vmem:[#allocation41_spill] sm:$0xff] %v12793_v12  ;;  %5795 = vmatpush1.bf16.msra.mxu1 %v5749_v60  ;;  %6066 = vmatpush1.bf16.msra.mxu0 %v6024_v6  ;;  %v5899_v60 = vsel %vm2540_vm3, %v14712_v48, %v14711_v1 }
 0x5a9   : > { %v12808_v12 = vpop.permute.xlu1 %6399  ;;  %8225 = vmatprep.subr.msk.bf16.mxu1 %vm12595_vm8, %v5663_v30  ;;  %8245 = vmatprep.subr.msk.bf16.mxu0 %vm12637_vm13, %v5940_v39  ;;  %v5659_v30 = vsel %vm2198_vm15, %v14714_v7, %v14715_v47  ;;  %v5936_v39 = vsel %vm2540_vm3, %v14711_v1, %v14712_v48  ;;  %v6020_v7 = vsel %vm12666_vm2, %v5899_v60, 0  ;;  %v5932_v47 = vsel %vm2540_vm3, %v12207_v54, %v14716_v0 }
 0x5aa   : > { %v5715_v0 = vsel %vm2198_vm15, %v12248_v4, %v12286_v42 }
 0x5ab   : > { %v12817_v6 = vpop.permute.xlu0 %6120 }
 0x5ac   : > { %14713 = vst [vmem:[#allocation11_spill] sm:$0xff] %v12817_v6  ;;  %5797 = vmatpush1.bf16.msra.mxu1 %v5747_v17  ;;  %6068 = vmatpush1.bf16.msra.mxu0 %v6022_v53  ;;  %v5745_v53 = vsel %vm12619_vm11, %v5625_v34, 0  ;;  %v5639_v34 = vsel %vm2198_vm15, %v12286_v42, %v12248_v4 }
 0x5ad   : > { %v12832_v6 = vpop.permute.xlu1 %6122  ;;  %8226 = vmatprep.subr.msk.bf16.mxu1 %vm12595_vm8, %v5659_v30  ;;  %8246 = vmatprep.subr.msk.bf16.mxu0 %vm12637_vm13, %v5936_v39  ;;  %v6018_v39 = vsel %vm12666_vm2, %v5898_v32, 0  ;;  %v5912_v32 = vsel %vm2540_vm3, %v12306_v38, %v12275_v49 }
 0x5af   : > { %v5623_v17 = vpop.permute.xlu0 %5622 }
 0x5b0   : > { %v5640_v1 = vsel %vm2198_vm15, %v12234_v37, %v5623_v17  ;;  %5799 = vmatpush1.bf16.msra.mxu1 %v5745_v53  ;;  %6070 = vmatpush1.bf16.msra.mxu0 %v6020_v7  ;;  %v5719_v48 = vsel %vm2198_vm15, %v5623_v17, %v12234_v37  ;;  %v8256_v53 = vld [vmem:[%s13885_s3 + $0x7] ss:$8 sm:$0x3] }
 0x5b1   : > { %v12852_v30 = vpop.permute.xlu1 %6395  ;;  %8227 = vmatprep.subr.msk.bf16.mxu1 %vm12595_vm8, %v5719_v48  ;;  %8247 = vmatprep.subr.msk.bf16.mxu0 %vm12637_vm13, %v5932_v47  ;;  %v5775_v37 = vsel %vm12619_vm11, %v5640_v1, 0  ;;  %vm6267_vm7 = vcmp.ne.f32.partialorder %v8256_v53, 0.0  ;;  %v5638_v1 = vsel %vm2198_vm15, %v12326_v19, %v12295_v55  ;;  %v5711_v48 = vsel %vm2198_vm15, %v12295_v55, %v12326_v19 }
 0x5b2   : > { %v5988_v47 = vsel %vm2540_vm3, %v12275_v49, %v12306_v38  ;;  %v5911_v55 = vsel %vm2540_vm3, %v12346_v14, %v12315_v46  ;;  %v5771_v49 = vsel %vm12619_vm11, %v5638_v1, 0  ;;  %v6046_v38 = vsel %vm12666_vm2, %v5912_v32, 0 }
 0x5b3   : > { %v5896_v60 = vpop.permute.xlu0 %5895  ;;  %v5637_v19 = vsel %vm2198_vm15, %v12366_v51, %v12335_v63  ;;  %v5703_v1 = vsel %vm2198_vm15, %v12375_v10, %v12422_v57 }
 0x5b4   : > { %v5913_v54 = vsel %vm2540_vm3, %v12266_v40, %v5896_v60  ;;  %5801 = vmatpush2.bf16.msra.mxu1 %v5775_v37  ;;  %6072 = vmatpush1.bf16.msra.mxu0 %v6018_v39  ;;  %v5992_v17 = vsel %vm2540_vm3, %v5896_v60, %v12266_v40  ;;  %v5773_v40 = vsel %vm12619_vm11, %v5639_v34, 0  ;;  %v8277_v34 = vld [vmem:[%s13885_s3 + $0x10] ss:$8 sm:$0x3]  ;;  %v6268_v37 = vsel %vm6267_vm7, 1, %v14421_v22 }
 0x5b5   : > { %v12875_v7 = vpop.permute.xlu1 %6118  ;;  %8228 = vmatprep.subr.msk.bf16.mxu1 %vm12595_vm8, %v5715_v0  ;;  %8248 = vmatprep.subr.msk.bf16.mxu0 %vm12637_vm13, %v5992_v17  ;;  %v6048_v42 = vsel %vm12666_vm2, %v5913_v54, 0  ;;  %vm6540_vm9 = vcmp.ne.f32.partialorder %v8277_v34, 0.0  ;;  %v5707_v54 = vsel %vm2198_vm15, %v12335_v63, %v12366_v51  ;;  %v5984_v0 = vsel %vm2540_vm3, %v12315_v46, %v12346_v14 }
 0x5b6   : > { %v6272_v53 = vrot.slane %v6268_v37, %v8727_v8  ;;  %v6276_v32 = vrot.slane %v6268_v37, %v14422_v31  ;;  %v5910_v63 = vsel %vm2540_vm3, %v12386_v41, %v12355_v16  ;;  %v5769_v46 = vsel %vm12619_vm11, %v5637_v19, 0 }
 0x5b7   : > { %v12884_v4 = vpop.permute.xlu0 %6393  ;;  %v6044_v14 = vsel %vm12666_vm2, %v5911_v55, 0  ;;  %v5636_v51 = vsel %vm2198_vm15, %v12422_v57, %v12375_v10  ;;  %v6042_v55 = vsel %vm12666_vm2, %v5910_v63, 0  ;;  %v5699_v19 = vsel %vm2198_vm15, %v12411_v36, %v12469_v58 }
 0x5b8   : > { %5803 = vmatpush2.bf16.msra.mxu1 %v5773_v40  ;;  %6074 = vmatpush2.bf16.msra.mxu0 %v6048_v42  ;;  %v6541_v40 = vsel %vm6540_vm9, 1, %v14421_v22  ;;  %vm12960_vm6 = vcmp.eq.s32.totalorder %v6272_v53, 1  ;;  %vm12964_vm1 = vcmp.eq.s32.totalorder %v6276_v32, 1  ;;  %v5767_v57 = vsel %vm12619_vm11, %v5636_v51, 0 }
 0x5b9   : > { %v12902_v60 = vpop.permute.xlu1 %6391  ;;  %8229 = vmatprep.subr.msk.bf16.mxu1 %vm12595_vm8, %v5711_v48  ;;  %8249 = vmatprep.subr.msk.bf16.mxu0 %vm12637_vm13, %v5988_v47  ;;  %v5980_v48 = vsel %vm2540_vm3, %v12355_v16, %v12386_v41  ;;  %v6545_v10 = vrot.slane %v6541_v40, %v8727_v8  ;;  %v6549_v16 = vrot.slane %v6541_v40, %v14422_v31  ;;  %vm6279_vm0 = vmpackc.low %vm12964_vm1, %vm12960_vm6 }
 0x5ba   : > { %v5909_v41 = vsel %vm2540_vm3, %v12445_v52, %v12395_v56  ;;  %v6280_v32 = vsel %vm6279_vm0, 65537, %v14421_v22  ;;  %v5634_v40 = vsel %vm2198_vm15, %v12522_v35, %v12457_v59  ;;  %v5633_v34 = vsel %vm2198_vm15, %v12587_v28, %v12505_v20 }
 0x5bb   : > { %vm12998_vm10 = vcmp.eq.s32.totalorder %v6545_v10, 1  ;;  %vm13002_vm12 = vcmp.eq.s32.totalorder %v6549_v16, 1  ;;  %v5691_v10 = vsel %vm2198_vm15, %v12505_v20, %v12587_v28  ;;  %v5968_v16 = vsel %vm2540_vm3, %v12479_v23, %v12554_v29 }
 0x5bc   : > { %v12919_v39 = vpop.permute.xlu0 %6116  ;;  %5805 = vmatpush2.bf16.msra.mxu1 %v5771_v49  ;;  %6076 = vmatpush2.bf16.msra.mxu0 %v6046_v38  ;;  %v5635_v49 = vsel %vm2198_vm15, %v12469_v58, %v12411_v36  ;;  %v6040_v58 = vsel %vm12666_vm2, %v5909_v41, 0  ;;  %vm6552_vm7 = vmpackc.low %vm13002_vm12, %vm12998_vm10  ;;  %v8217_v41 = vld [vmem:[%s13892_s10 + $0xb0] sm:$0xff]  ;;  %v5906_v28 = vsel %vm2540_vm3, %v12630_v24, %v12535_v18  ;;  %v5964_v36 = vsel %vm2540_vm3, %v12535_v18, %v12630_v24 }
 0x5bd   : > { %v12927_v17 = vpop.permute.xlu1 %6114  ;;  %8230 = vmatprep.subr.msk.bf16.mxu1 %vm12595_vm8, %v5707_v54  ;;  %8250 = vmatprep.subr.msk.bf16.mxu0 %vm12637_vm13, %v5984_v0  ;;  %v5976_v54 = vsel %vm2540_vm3, %v12395_v56, %v12445_v52  ;;  %v5908_v56 = vsel %vm2540_vm3, %v12492_v2, %v12434_v33  ;;  %v5765_v52 = vsel %vm12619_vm11, %v5635_v49, 0  ;;  %v6451_v24 = vsel %vm2768_vm5, %v12698_v62, %v12602_v13 }
 0x5be   : > { %vm14741_vm10 = vcmask 138240  }
 0x5bf   : > { %vm14742_vm12 = vmmov %vm14741_vm10 }
 0x5c0   : > { %v12946_v42 = vpop.permute.xlu0 %6389  ;;  %5807 = vmatpush2.bf16.msra.mxu1 %v5769_v46  ;;  %6078 = vmatpush2.bf16.msra.mxu0 %v6044_v14  ;;  %v5695_v46 = vsel %vm2198_vm15, %v12457_v59, %v12522_v35  ;;  %v5972_v14 = vsel %vm2540_vm3, %v12434_v33, %v12492_v2  ;;  %v6288_v59 = vrot.slane %v6280_v32, %v11244_v61  ;;  %v5763_v2 = vsel %vm12619_vm11, %v5634_v40, 0 }
 0x5c1   : > { %v12954_v47 = vpop.permute.xlu1 %6387  ;;  %8231 = vmatprep.subr.msk.bf16.mxu1 %vm12595_vm8, %v5703_v1  ;;  %8251 = vmatprep.subr.msk.bf16.mxu0 %vm12637_vm13, %v5980_v48  ;;  %v6284_v1 = vrot.slane %v6280_v32, %v8727_v8  ;;  %v5907_v33 = vsel %vm2540_vm3, %v12554_v29, %v12479_v23  ;;  %v6038_v35 = vsel %vm12666_vm2, %v5908_v56, 0  ;;  %v6553_v48 = vsel %vm6552_vm7, 65537, %v14421_v22  ;;  %v8215_v22 = vld [vmem:[%s13892_s10 + $0xa0] sm:$0xff]  ;;  %vm14743_vm7 = vmmov %vm14741_vm10 }
 0x5c2   : > { %v6557_v20 = vrot.slane %v6553_v48, %v8727_v8  ;;  %vm13069_vm9 = vcmp.ne.s16.totalorder %v6288_v59, 0  ;;  %v6561_v29 = vrot.slane %v6553_v48, %v11244_v61  ;;  %v6036_v3 = vsel %vm12666_vm2, %v5907_v33, 0 }
 0x5c3   : > { %v5782_v49 = vpack.c.bf16 %v8217_v41, %v8215_v22  ;;  %v6178_v61 = vsel %vm2654_vm4, %v12670_v26, %v12569_v21  ;;  %v6233_v56 = vsel %vm2654_vm4, %v12569_v21, %v12670_v26  ;;  %v6034_v26 = vsel %vm12666_vm2, %v5906_v28, 0 }
 0x5c4   : > { %v12980_v38 = vpop.permute.xlu0 %6112  ;;  %5809 = vmatpush2.bf16.msra.mxu1 %v5767_v57  ;;  %6080 = vmatpush2.bf16.msra.mxu0 %v6042_v55  ;;  %v5761_v55 = vsel %vm12619_vm11, %v5633_v34, 0  ;;  %vm13114_vm11 = vcmp.ne.s16.totalorder %v6561_v29, 0  ;;  %v6229_v33 = vsel %vm2654_vm4, %v12646_v43, %v12726_v11  ;;  %v6450_v34 = vsel %vm2768_vm5, %v12760_v25, %v12683_v15 }
 0x5c5   : > { %v12992_v0 = vpop.permute.xlu1 %6110  ;;  %8232 = vmatprep.subr.msk.bf16.mxu1 %vm12595_vm8, %v5699_v19  ;;  %8252 = vmatprep.subr.msk.bf16.mxu0 %vm12637_vm13, %v5976_v54  ;;  %v8258_v19 = vld [vmem:[%s13892_s10 + $0xe8] sm:$0xff]  ;;  %v8260_v54 = vld [vmem:[%s13892_s10 + $0xf8] sm:$0xff]  ;;  %v6449_v41 = vsel %vm2768_vm5, %v12808_v12, %v12739_v44  ;;  %v6498_v28 = vsel %vm2768_vm5, %v12739_v44, %v12808_v12  ;;  %vm14737_vm2 = vcmask 130048  }
 0x5c6   : > { %v6329_v21 = vpack.c.bf16 %v8260_v54, %v8258_v19  ;;  %v14735_v54 = vld [vmem:[#allocation11_spill] sm:$0xff]  ;;  %vm14738_vm6 = vmmov %vm14737_vm2 }
 0x5c7   : > { %v6174_v44 = vsel %vm2654_vm4, %v12875_v7, %v14735_v54  ;;  %vm14739_vm1 = vmmov %vm14737_vm2 }
 0x5c8   : > { %v13017_v63 = vpop.permute.xlu0 %6385  ;;  %5811 = vmatpush2.bf16.msra.mxu1 %v5765_v52  ;;  %6082 = vmatpush2.bf16.msra.mxu0 %v6040_v58  ;;  %v8236_v52 = vld [vmem:[%s13892_s10 + $0xc0] sm:$0xff]  ;;  %v8238_v58 = vld [vmem:[%s13892_s10 + $0xd0] sm:$0xff]  ;;  %vm14740_vm0 = vmmov %vm14739_vm1 }
 0x5c9   : > { %v13029_v51 = vpop.permute.xlu1 %6383  ;;  %8233 = vmatprep.subr.msk.bf16.mxu1 %vm12595_vm8, %v5695_v46  ;;  %8253 = vmatprep.subr.msk.bf16.mxu0 %vm12637_vm13, %v5972_v14  ;;  %v6055_v40 = vpack.c.bf16 %v8238_v58, %v8236_v52  ;;  %v8279_v46 = vld [vmem:[%s13892_s10 + $0x108] sm:$0xff]  ;;  %v8281_v14 = vld [vmem:[%s13892_s10 + $0x118] sm:$0xff]  ;;  %v6447_v52 = vsel %vm2768_vm5, %v12902_v60, %v12884_v4 }
 0x5ca   : > { %v6602_v48 = vpack.c.bf16 %v8281_v14, %v8279_v46  ;;  %v6486_v14 = vsel %vm2768_vm5, %v12946_v42, %v12954_v47 }
 0x5cc   : > { %v13048_v37 = vpop.permute.xlu0 %6108  ;;  %5813 = vmatpush2.bf16.msra.mxu1 %v5763_v2  ;;  %6084 = vmatpush2.bf16.msra.mxu0 %v6038_v35  ;;  %v6506_v2 = vsel %vm2768_vm5, %v12602_v13, %v12698_v62  ;;  %v6176_v62 = vsel %vm2654_vm4, %v12784_v9, %v12711_v45 }
 0x5cd   : > { %v13062_v57 = vpop.permute.xlu1 %6106  ;;  %8234 = vmatprep.subr.msk.bf16.mxu1 %vm12595_vm8, %v5691_v10  ;;  %8254 = vmatprep.subr.msk.bf16.mxu0 %vm12637_vm13, %v5968_v16  ;;  %vm13090_vm8 = vcmp.ne.s16.totalorder %v6284_v1, 0  ;;  %v6177_v1 = vsel %vm2654_vm4, %v12726_v11, %v12646_v43  ;;  %v6225_v10 = vsel %vm2654_vm4, %v12711_v45, %v12784_v9  ;;  %v6502_v16 = vsel %vm2768_vm5, %v12683_v15, %v12760_v25  ;;  %v14733_v15 = vld [vmem:[#allocation19_spill] sm:$0xff] }
 0x5ce   : > { %v6305_v5 = vsel %vm13090_vm8, %v6178_v61, 0  ;;  %v6303_v43 = vsel %vm13090_vm8, %v6177_v1, 0  ;;  %v6301_v45 = vsel %vm13090_vm8, %v6176_v62, 0  ;;  %v6175_v25 = vsel %vm2654_vm4, %v12832_v6, %v14733_v15 }
 0x5cf   : > { %v6221_v29 = vsel %vm2654_vm4, %v14733_v15, %v12832_v6  ;;  %v6299_v19 = vsel %vm13090_vm8, %v6175_v25, 0  ;;  %v6217_v61 = vsel %vm2654_vm4, %v14735_v54, %v12875_v7  ;;  %v6297_v58 = vsel %vm13090_vm8, %v6174_v44, 0 }
 0x5d0   : > { %v13094_v27 = vpop.permute.xlu0 %6381  ;;  %5815 = vmatpush2.bf16.msra.mxu1 %v5761_v55  ;;  %6086 = vmatpush2.bf16.msra.mxu0 %v6036_v3  ;;  %v14734_v3 = vld [vmem:[#allocation41_spill] sm:$0xff] }
 0x5d1   : > { %v13108_v32 = vpop.permute.xlu1 %6379  ;;  %8255 = vmatprep.subr.msk.bf16.mxu0 %vm12637_vm13, %v5964_v36  ;;  %8261 = vmatprep.subr.msk.bf16.mxu1 %vm13069_vm9, %v6233_v56  ;;  %vm13134_vm13 = vcmp.ne.s16.totalorder %v6557_v20, 0  ;;  %v6494_v36 = vsel %vm2768_vm5, %v14734_v3, %v12852_v30 }
 0x5d2   : > { %v6578_v13 = vsel %vm13134_vm13, %v6451_v24, 0  ;;  %v6576_v9 = vsel %vm13134_vm13, %v6450_v34, 0  ;;  %v6574_v6 = vsel %vm13134_vm13, %v6449_v41, 0  ;;  %v6213_v24 = vsel %vm2654_vm4, %v12919_v39, %v12927_v17 }
 0x5d3   : > { %5817 = vmatmul.mubr.bf16.vlgmr.msra.gmra.mxu1 %v5782_v49  ;;  %v6448_v49 = vsel %vm2768_vm5, %v12852_v30, %v14734_v3  ;;  %v6173_v30 = vsel %vm2654_vm4, %v12927_v17, %v12919_v39  ;;  %v6570_v39 = vsel %vm13134_vm13, %v6447_v52, 0  ;;  %v6209_v17 = vsel %vm2654_vm4, %v12980_v38, %v12992_v0 }
 0x5d4   : > { %v13138_v50 = vpop.permute.xlu0 %6164  ;;  %6088 = vmatpush2.bf16.msra.mxu0 %v6034_v26  ;;  %6331 = vmatpush1.bf16.msra.mxu1 %v6305_v5  ;;  %v6572_v7 = vsel %vm13134_vm13, %v6448_v49, 0  ;;  %v6490_v26 = vsel %vm2768_vm5, %v12884_v4, %v12902_v60  ;;  %v6295_v46 = vsel %vm13090_vm8, %v6173_v30, 0  ;;  %v6172_v4 = vsel %vm2654_vm4, %v12992_v0, %v12980_v38 }
 0x5d5   : > { %v13146_v35 = vpop.permute.xlu1 %6166  ;;  %8262 = vmatprep.subr.msk.bf16.mxu1 %vm13069_vm9, %v6229_v33  ;;  %8282 = vmatprep.subr.msk.bf16.mxu0 %vm13114_vm11, %v6506_v2  ;;  %v6445_v33 = vsel %vm2768_vm5, %v13029_v51, %v13017_v63  ;;  %v6293_v2 = vsel %vm13090_vm8, %v6172_v4, 0 }
 0x5d6   : > { %6362 = vmatprep.mubr.bf16.mxu1 %v6329_v21 }
 0x5d7   : > { %6090 = vmatmul.mubr.bf16.vlgmr.msra.gmra.mxu0 %v6055_v40  ;;  %v6446_v40 = vsel %vm2768_vm5, %v12954_v47, %v12946_v42  ;;  %v6171_v42 = vsel %vm2654_vm4, %v13062_v57, %v13048_v37  ;;  %v6205_v47 = vsel %vm2654_vm4, %v13048_v37, %v13062_v57  ;;  %v6566_v37 = vsel %vm13134_vm13, %v6445_v33, 0 }
 0x5d8   : > { %v13162_v11 = vpop.permute.xlu0 %6437  ;;  %6333 = vmatpush1.bf16.msra.mxu1 %v6303_v43  ;;  %6604 = vmatpush1.bf16.msra.mxu0 %v6578_v13  ;;  %v6568_v38 = vsel %vm13134_vm13, %v6446_v40, 0  ;;  %v6291_v43 = vsel %vm13090_vm8, %v6171_v42, 0  ;;  %v6444_v57 = vsel %vm2768_vm5, %v13108_v32, %v13094_v27 }
 0x5d9   : > { %v13170_v22 = vpop.permute.xlu1 %6439  ;;  %8263 = vmatprep.subr.msk.bf16.mxu1 %vm13069_vm9, %v6225_v10  ;;  %8283 = vmatprep.subr.msk.bf16.mxu0 %vm13114_vm11, %v6502_v16  ;;  %v6564_v16 = vsel %vm13134_vm13, %v6444_v57, 0 }
 0x5da   : > { %6635 = vmatprep.mubr.bf16.mxu0 %v6602_v48  ;;  %v6482_v48 = vsel %vm2768_vm5, %v13017_v63, %v13029_v51  ;;  %v6478_v63 = vsel %vm2768_vm5, %v13094_v27, %v13108_v32 }
 0x5dc   : > { %v13186_v20 = vpop.permute.xlu0 %6160  ;;  %6335 = vmatpush1.bf16.msra.mxu1 %v6301_v45  ;;  %6606 = vmatpush1.bf16.msra.mxu0 %v6576_v9 }
 0x5dd   : > { %v13194_v55 = vpop.permute.xlu1 %6162  ;;  %8264 = vmatprep.subr.msk.bf16.mxu1 %vm13069_vm9, %v6221_v29  ;;  %8284 = vmatprep.subr.msk.bf16.mxu0 %vm13114_vm11, %v6498_v28 }
 0x5de   : > { %v6185_v32 = vsel %vm2654_vm4, %v13194_v55, %v13138_v50 }
 0x5df   : > { %v6319_v25 = vsel %vm13090_vm8, %v6185_v32, 0 }
 0x5e0   : > { %v13210_v12 = vpop.permute.xlu0 %6433  ;;  %6337 = vmatpush1.bf16.msra.mxu1 %v6299_v19  ;;  %6608 = vmatpush1.bf16.msra.mxu0 %v6574_v6 }
 0x5e1   : > { %v13218_v56 = vpop.permute.xlu1 %6435  ;;  %8265 = vmatprep.subr.msk.bf16.mxu1 %vm13069_vm9, %v6217_v61  ;;  %8285 = vmatprep.subr.msk.bf16.mxu0 %vm13114_vm11, %v6494_v36 }
 0x5e4   : > { %v13234_v21 = vpop.permute.xlu0 %6156  ;;  %6339 = vmatpush1.bf16.msra.mxu1 %v6297_v58  ;;  %6610 = vmatpush1.bf16.msra.mxu0 %v6572_v7 }
 0x5e5   : > { %v6159_v5 = vpop.permute.xlu1 %6158  ;;  %8266 = vmatprep.subr.msk.bf16.mxu1 %vm13069_vm9, %v6213_v24  ;;  %8286 = vmatprep.subr.msk.bf16.mxu0 %vm13114_vm11, %v6490_v26 }
 0x5e6   : > { %v6184_v28 = vsel %vm2654_vm4, %v6159_v5, %v13186_v20 }
 0x5e8   : > { %v13256_v60 = vpop.permute.xlu0 %6429  ;;  %6341 = vmatpush1.bf16.msra.mxu1 %v6295_v46  ;;  %6612 = vmatpush1.bf16.msra.mxu0 %v6570_v39 }
 0x5e9   : > { %v6432_v1 = vpop.permute.xlu1 %6431  ;;  %8267 = vmatprep.subr.msk.bf16.mxu1 %vm13069_vm9, %v6209_v17  ;;  %8287 = vmatprep.subr.msk.bf16.mxu0 %vm13114_vm11, %v6486_v14 }
 0x5ea   : > { %v6457_v6 = vsel %vm2768_vm5, %v6432_v1, %v13210_v12 }
 0x5ec   : > { %v6153_v0 = vpop.permute.xlu0 %6152  ;;  %6343 = vmatpush1.bf16.msra.mxu1 %v6293_v2  ;;  %6614 = vmatpush1.bf16.msra.mxu0 %v6568_v38 }
 0x5ed   : > { %v6155_v34 = vpop.permute.xlu1 %6154  ;;  %8268 = vmatprep.subr.msk.bf16.mxu1 %vm13069_vm9, %v6205_v47  ;;  %8288 = vmatprep.subr.msk.bf16.mxu0 %vm13114_vm11, %v6482_v48 }
 0x5ee   : > { %v6183_v54 = vsel %vm2654_vm4, %v6155_v34, %v13234_v21  ;;  %v6253_v44 = vsel %vm2654_vm4, %v13234_v21, %v6155_v34 }
 0x5f0   : > { %v6169_v51 = vpop.permute.xlu0 %6168  ;;  %6345 = vmatpush1.bf16.msra.mxu1 %v6291_v43  ;;  %6616 = vmatpush1.bf16.msra.mxu0 %v6566_v37 }
 0x5f1   : > { %v6186_v13 = vsel %vm2654_vm4, %v13146_v35, %v6169_v51  ;;  %v6265_v62 = vsel %vm2654_vm4, %v6169_v51, %v13146_v35  ;;  %v6428_v10 = vpop.permute.xlu1 %6427  ;;  %8289 = vmatprep.subr.msk.bf16.mxu0 %vm13114_vm11, %v6478_v63  ;;  %v6261_v35 = vsel %vm2654_vm4, %v13138_v50, %v13194_v55  ;;  %v6458_v50 = vsel %vm2768_vm5, %v13218_v56, %v13162_v11  ;;  %v8257_v63 = vld [vmem:[%s13892_s10 + $0xe0] sm:$0xff]  ;;  %v8259_v51 = vld [vmem:[%s13892_s10 + $0xf0] sm:$0xff] }
 0x5f2   : > { %8269 = vmatprep.subr.msk.bf16.mxu1 %vm13069_vm9, %v6265_v62  ;;  %v6321_v27 = vsel %vm13090_vm8, %v6186_v13, 0  ;;  %v6257_v55 = vsel %vm2654_vm4, %v13186_v20, %v6159_v5  ;;  %v6592_v19 = vsel %vm13134_vm13, %v6458_v50, 0  ;;  %v6530_v20 = vsel %vm2768_vm5, %v13210_v12, %v6432_v1 }
 0x5f3   : > { %v6315_v12 = vsel %vm13090_vm8, %v6183_v54, 0  ;;  %v6456_v52 = vsel %vm2768_vm5, %v6428_v10, %v13256_v60  ;;  %v6526_v58 = vsel %vm2768_vm5, %v13256_v60, %v6428_v10  ;;  %v6328_v32 = vpack.c.bf16 %v8259_v51, %v8257_v63 }
 0x5f4   : > { %v6442_v41 = vpop.permute.xlu0 %6441  ;;  %6347 = vmatpush2.bf16.msra.mxu1 %v6321_v27  ;;  %6618 = vmatpush1.bf16.msra.mxu0 %v6564_v16  ;;  %v6588_v26 = vsel %vm13134_vm13, %v6456_v52, 0  ;;  %v14736_v50 = vmov 0.0  }
 0x5f5   : > { %v6459_v45 = vsel %vm2768_vm5, %v13170_v22, %v6442_v41  ;;  %v6538_v9 = vsel %vm2768_vm5, %v6442_v41, %v13170_v22  ;;  %v6151_v15 = vpop.permute.xlu1 %6150  ;;  %8270 = vmatprep.subr.msk.bf16.mxu1 %vm13069_vm9, %v6261_v35  ;;  %v6534_v22 = vsel %vm2768_vm5, %v13162_v11, %v13218_v56  ;;  %v6317_v11 = vsel %vm13090_vm8, %v6184_v28, 0  ;;  %v8278_v35 = vld [vmem:[%s13892_s10 + $0x100] sm:$0xff]  ;;  %v8280_v41 = vld [vmem:[%s13892_s10 + $0x110] sm:$0xff] }
 0x5f6   : > { %8290 = vmatprep.subr.msk.bf16.mxu0 %vm13114_vm11, %v6538_v9  ;;  %v6594_v29 = vsel %vm13134_vm13, %v6459_v45, 0  ;;  %v6590_v56 = vsel %vm13134_vm13, %v6457_v6, 0  ;;  %v6182_v7 = vsel %vm2654_vm4, %v6151_v15, %v6153_v0  ;;  %v6249_v30 = vsel %vm2654_vm4, %v6153_v0, %v6151_v15 }
 0x5f7   : > { %v6313_v5 = vsel %vm13090_vm8, %v6182_v7, 0 }
 0x5f8   : > { %v6426_v3 = vpop.permute.xlu0 %6425  ;;  %6349 = vmatpush2.bf16.msra.mxu1 %v6319_v25  ;;  %6620 = vmatpush2.bf16.msra.mxu0 %v6594_v29  ;;  %v6601_v25 = vpack.c.bf16 %v8280_v41, %v8278_v35  ;;  %v4906_v29 = vpop.f32.mrf.mxu1 }
 0x5f9   : > { %v6424_v49 = vpop.permute.xlu1 %6423  ;;  %8271 = vmatprep.subr.msk.bf16.mxu1 %vm13069_vm9, %v6257_v55  ;;  %8291 = vmatprep.subr.msk.bf16.mxu0 %vm13114_vm11, %v6534_v22 }
 0x5fa   : > { %v6455_v40 = vsel %vm2768_vm5, %v6424_v49, %v6426_v3  ;;  %v6522_v46 = vsel %vm2768_vm5, %v6426_v3, %v6424_v49  ;;  %v4908_v22 = vpop.f32.mrf.mxu1 }
 0x5fb   : > { %v6586_v14 = vsel %vm13134_vm13, %v6455_v40, 0 }
 0x5fc   : > { %v6149_v61 = vpop.permute.xlu0 %6148  ;;  %6351 = vmatpush2.bf16.msra.mxu1 %v6317_v11  ;;  %6622 = vmatpush2.bf16.msra.mxu0 %v6592_v19  ;;  %v4910_v28 = vpop.f32.mrf.mxu1 }
 0x5fd   : > { %v6147_v36 = vpop.permute.xlu1 %6146  ;;  %8272 = vmatprep.subr.msk.bf16.mxu1 %vm13069_vm9, %v6253_v44  ;;  %8292 = vmatprep.subr.msk.bf16.mxu0 %vm13114_vm11, %v6530_v20 }
 0x5fe   : > { %v6181_v39 = vsel %vm2654_vm4, %v6147_v36, %v6149_v61  ;;  %v6245_v4 = vsel %vm2654_vm4, %v6149_v61, %v6147_v36  ;;  %v13432_v55 = vpop.f32.mrf.mxu1 }
 0x5ff   : > { %v6311_v1 = vsel %vm13090_vm8, %v6181_v39, 0 }
 0x600   : > { %v6422_v21 = vpop.permute.xlu0 %6421  ;;  %6353 = vmatpush2.bf16.msra.mxu1 %v6315_v12  ;;  %6624 = vmatpush2.bf16.msra.mxu0 %v6590_v56 }
 0x601   : > { %v6420_v24 = vpop.permute.xlu1 %6419  ;;  %8273 = vmatprep.subr.msk.bf16.mxu1 %vm13069_vm9, %v6249_v30  ;;  %8293 = vmatprep.subr.msk.bf16.mxu0 %vm13114_vm11, %v6526_v58 }
 0x602   : > { %v6454_v33 = vsel %vm2768_vm5, %v6420_v24, %v6422_v21  ;;  %v6518_v2 = vsel %vm2768_vm5, %v6422_v21, %v6420_v24 }
 0x603   : > { %v6584_v48 = vsel %vm13134_vm13, %v6454_v33, 0 }
 0x604   : > { %v6145_v60 = vpop.permute.xlu0 %6144  ;;  %6355 = vmatpush2.bf16.msra.mxu1 %v6313_v5  ;;  %6626 = vmatpush2.bf16.msra.mxu0 %v6588_v26 }
 0x605   : > { %v6143_v17 = vpop.permute.xlu1 %6142  ;;  %8274 = vmatprep.subr.msk.bf16.mxu1 %vm13069_vm9, %v6245_v4  ;;  %8294 = vmatprep.subr.msk.bf16.mxu0 %vm13114_vm11, %v6522_v46 }
 0x606   : > { %v6180_v38 = vsel %vm2654_vm4, %v6143_v17, %v6145_v60  ;;  %v6241_v42 = vsel %vm2654_vm4, %v6145_v60, %v6143_v17 }
 0x607   : > { %v6309_v34 = vsel %vm13090_vm8, %v6180_v38, 0 }
 0x608   : > { %v6418_v47 = vpop.permute.xlu0 %6417  ;;  %6357 = vmatpush2.bf16.msra.mxu1 %v6311_v1  ;;  %6628 = vmatpush2.bf16.msra.mxu0 %v6586_v14 }
 0x609   : > { %v6416_v0 = vpop.permute.xlu1 %6415  ;;  %8275 = vmatprep.subr.msk.bf16.mxu1 %vm13069_vm9, %v6241_v42  ;;  %8295 = vmatprep.subr.msk.bf16.mxu0 %vm13114_vm11, %v6518_v2 }
 0x60a   : > { %v6453_v43 = vsel %vm2768_vm5, %v6416_v0, %v6418_v47  ;;  %v6514_v37 = vsel %vm2768_vm5, %v6418_v47, %v6416_v0 }
 0x60b   : > { %v6582_v16 = vsel %vm13134_vm13, %v6453_v43, 0 }
 0x60c   : > { %v6141_v57 = vpop.permute.xlu0 %6140  ;;  %6359 = vmatpush2.bf16.msra.mxu1 %v6309_v34  ;;  %6630 = vmatpush2.bf16.msra.mxu0 %v6584_v48 }
 0x60d   : > { %v6139_v13 = vpop.permute.xlu1 %6138  ;;  %8296 = vmatprep.subr.msk.bf16.mxu0 %vm13114_vm11, %v6514_v37 }
 0x60e   : > { %v6179_v62 = vsel %vm2654_vm4, %v6139_v13, %v6141_v57  ;;  %v6237_v10 = vsel %vm2654_vm4, %v6141_v57, %v6139_v13 }
 0x60f   : > { %v6307_v27 = vsel %vm13090_vm8, %v6179_v62, 0  ;;  %8276 = vmatprep.subr.msk.bf16.mxu1 %vm13069_vm9, %v6237_v10  ;;  %vm14744_vm9 = vmmov %vm14743_vm7 }
 0x610   : > { %6361 = vmatpush2.bf16.msra.mxu1 %v6307_v27  ;;  %6632 = vmatpush2.bf16.msra.mxu0 %v6582_v16  ;;  %v6414_v45 = vpop.permute.xlu0 %6413  ;;  %vm14745_vm8 = vmmov %vm14740_vm0 }
 0x611   : > { %v6412_v9 = vpop.permute.xlu1 %6411 }
 0x612   : > { %v6452_v15 = vsel %vm2768_vm5, %v6412_v9, %v6414_v45  ;;  %v6510_v53 = vsel %vm2768_vm5, %v6414_v45, %v6412_v9 }
 0x613   : > { %v6580_v23 = vsel %vm13134_vm13, %v6452_v15, 0  ;;  %6363 = vmatmul.mubr.bf16.vlgmr.msra.gmra.mxu1 %v6328_v32  ;;  %8297 = vmatprep.subr.msk.bf16.mxu0 %vm13114_vm11, %v6510_v53  ;;  %v4949_v3 = vpop.f32.mrf.mxu1  ;;  %vm14746_vm11 = vcmask 121856  }
 0x614   : > { %6634 = vmatpush2.bf16.msra.mxu0 %v6580_v23  ;;  %6810 = vmatprep.mubr.f32.mxu1 %v14736_v50  ;;  %v4950_v24 = vadd.f32 %v4949_v3, %v4906_v29  ;;  %vm14747_vm13 = vmmov %vm14746_vm11 }
 0x615   : > { %v4951_v49 = vpop.f32.mrf.mxu1 }
 0x616   : > { %v4952_v46 = vadd.f32 %v4951_v49, %v4908_v22 }
 0x617   : > { %6636 = vmatmul.mubr.bf16.vlgmr.msra.gmra.mxu0 %v6601_v25  ;;  %v5218_v59 = vpop.f32.mrf.mxu0  ;;  %v4953_v19 = vpop.f32.mrf.mxu1 }
 0x618   : > { %6884 = vmatprep.mubr.f32.mxu0 %v14736_v50  ;;  %v5227_v26 = vadd.f32 %v5218_v59, %v4950_v24  ;;  %v4954_v27 = vadd.f32 %v4953_v19, %v4910_v28  ;;  %v8319_v24 = vld [vmem:[%s13896_s14 + $0x14] sm:$0x7] }
 0x619   : > { %v5220_v11 = vpop.f32.mrf.mxu0  ;;  %v4955_v6 = vpop.f32.mrf.mxu1 }
 0x61a   : > { %v5228_v4 = vadd.f32 %v5220_v11, %v4952_v46  ;;  %v4956_v29 = vadd.f32 %v4955_v6, %v13432_v55 }
 0x61b   : > { %v5222_v18 = vpop.f32.mrf.mxu0 }
 0x61c   : > { %v5229_v32 = vadd.f32 %v5222_v18, %v4954_v27 }
 0x61d   : > { %v5224_v54 = vpop.f32.mrf.mxu0  ;;  %v6655_v63 = vpop.permute.xlu0 %6654 }
 0x61e   : > { %v5230_v28 = vadd.f32 %v5224_v54, %v4956_v29  ;;  %v6660_v59 = vpop.permute.xlu1 %6659 }
 0x653   : > { %v5491_v20 = vpop.f32.mrf.mxu1 }
 0x654   : > { %v5500_v39 = vadd.f32 %v5491_v20, %v5227_v26  ;;  %v8320_v26 = vld [vmem:[%s13896_s14 + $0x18] sm:$0x7] }
 0x655   : > { %v5493_v44 = vpop.f32.mrf.mxu1 }
 0x656   : > { %v5501_v1 = vadd.f32 %v5493_v44, %v5228_v4 }
 0x657   : > { %v5545_v61 = vpop.f32.mrf.mxu0  ;;  %v5495_v36 = vpop.f32.mrf.mxu1 }
 0x658   : > { %v5554_v60 = vadd.f32 %v5545_v61, %v5500_v39  ;;  %v5502_v41 = vadd.f32 %v5495_v36, %v5229_v32 }
 0x659   : > { %v5547_v56 = vpop.f32.mrf.mxu0  ;;  %v5497_v12 = vpop.f32.mrf.mxu1 }
 0x65a   : > { %v5555_v38 = vadd.f32 %v5547_v56, %v5501_v1  ;;  %v5503_v49 = vadd.f32 %v5497_v12, %v5230_v28  ;;  %v7635_v12 = vld [vmem:[%s13895_s13] sm:$0x7] }
 0x65b   : > { %v5549_v52 = vpop.f32.mrf.mxu0 }
 0x65c   : > { %v5556_v45 = vadd.f32 %v5549_v52, %v5502_v41  ;;  %v7656_v52 = vld [vmem:[%s13896_s14] sm:$0x7] }
 0x65d   : > { %v5551_v7 = vpop.f32.mrf.mxu0 }
 0x65e   : > { %v5557_v19 = vadd.f32 %v5551_v7, %v5503_v49  ;;  %v8316_v7 = vld [vmem:[%s13896_s14 + $0x8] sm:$0x7] }
 0x693   : > { %v5818_v58 = vpop.f32.mrf.mxu1 }
 0x694   : > { %v5827_v33 = vadd.f32 %v5818_v58, %v5554_v60  ;;  %v8315_v58 = vld [vmem:[%s13896_s14 + $0x4] sm:$0x7] }
 0x695   : > { %v5820_v30 = vpop.f32.mrf.mxu1 }
 0x696   : > { %v5828_v0 = vadd.f32 %v5820_v30, %v5555_v38  ;;  %v8317_v30 = vld [vmem:[%s13896_s14 + $0xc] sm:$0x7] }
 0x697   : > { %v6091_v21 = vpop.f32.mrf.mxu0  ;;  %v5822_v5 = vpop.f32.mrf.mxu1 }
 0x698   : > { %v6100_v42 = vadd.f32 %v6091_v21, %v5827_v33  ;;  %v5829_v15 = vadd.f32 %v5822_v5, %v5556_v45  ;;  %v8318_v21 = vld [vmem:[%s13896_s14 + $0x10] sm:$0x7]  ;;  %v8321_v5 = vld [vmem:[%s13896_s14 + $0x1c] sm:$0x7] }
 0x699   : > { %v6093_v40 = vpop.f32.mrf.mxu0  ;;  %v5824_v17 = vpop.f32.mrf.mxu1 }
 0x69a   : > { %v6101_v37 = vadd.f32 %v6093_v40, %v5828_v0  ;;  %v5830_v55 = vadd.f32 %v5824_v17, %v5557_v19  ;;  %v8298_v19 = vld [vmem:[%s13894_s12 + $0x4] sm:$0x7] }
 0x69b   : > { %v6095_v14 = vpop.f32.mrf.mxu0 }
 0x69c   : > { %v6102_v23 = vadd.f32 %v6095_v14, %v5829_v15 }
 0x69d   : > { %v6097_v47 = vpop.f32.mrf.mxu0 }
 0x69e   : > { %v6103_v18 = vadd.f32 %v6097_v47, %v5830_v55 }
 0x6d3   : > { %v6364_v2 = vpop.f32.mrf.mxu1 }
 0x6d4   : > { %v6373_v48 = vadd.f32 %v6364_v2, %v6100_v42 }
 0x6d5   : > { %v6366_v34 = vpop.f32.mrf.mxu1 }
 0x6d6   : > { %v6374_v13 = vadd.f32 %v6366_v34, %v6101_v37 }
 0x6d7   : > { %v6637_v43 = vpop.f32.mrf.mxu0  ;;  %v6368_v53 = vpop.f32.mrf.mxu1 }
 0x6d8   : > { %v6646_v57 = vadd.f32 %v6637_v43, %v6373_v48  ;;  %v6375_v22 = vadd.f32 %v6368_v53, %v6102_v23  ;;  %v8572_v53 = vld [vmem:[%s13885_s3] ss:$8 sm:$0x3] }
 0x6d9   : > { %v6639_v51 = vpop.f32.mrf.mxu0  ;;  %v6370_v6 = vpop.f32.mrf.mxu1  ;;  %v13572_v23 = vrot.slane %v8572_v53, %v8727_v8 }
 0x6da   : > { %v6662_v62 = vadd.f32 %v6655_v63, %v6646_v57  ;;  %v6647_v16 = vadd.f32 %v6639_v51, %v6374_v13  ;;  %v6376_v44 = vadd.f32 %v6370_v6, %v6103_v18  ;;  %v8571_v57 = vld [vmem:[%s13885_s3 + $0x1] ss:$8 sm:$0x3] }
 0x6db   : > { %v6641_v25 = vpop.f32.mrf.mxu0  ;;  %v13559_v51 = vrot.slane %v8571_v57, %v14422_v31 }
 0x6dc   : > { %v13434_v10 = vmax.f32 %v6662_v62, 0.0  ;;  %v6663_v35 = vadd.f32 %v6655_v63, %v6647_v16  ;;  %v6648_v3 = vadd.f32 %v6641_v25, %v6375_v22  ;;  %v13556_v63 = vrot.slane %v8571_v57, %v8727_v8 }
 0x6dd   : > { %v6643_v54 = vpop.f32.mrf.mxu0  ;;  %v13575_v25 = vrot.slane %v8572_v53, %v14422_v31 }
 0x6de   : > { %7191 = vrot.lane.b32.xlu1 %v13434_v10, %s14192_s30  ;;  %6714 = vrot.lane.b32.xlu0 %v13434_v10, %s14382_s22  ;;  %v13444_v9 = vmax.f32 %v6663_v35, 0.0  ;;  %v6664_v11 = vadd.f32 %v6660_v59, %v6648_v3  ;;  %v6649_v61 = vadd.f32 %v6643_v54, %v6376_v44  ;;  %v8573_v54 = vld [vmem:[%s13885_s3 + $0x2] ss:$8 sm:$0x3] }
 0x6df   : > { %v13594_v44 = vrot.slane %v8573_v54, %v8727_v8 }
 0x6e0   : > { %v13463_v20 = vmax.f32 %v6664_v11, 0.0  ;;  %v6665_v36 = vadd.f32 %v6660_v59, %v6649_v61  ;;  %v13597_v61 = vrot.slane %v8573_v54, %v14422_v31 }
 0x6e2   : > { %7302 = vrot.lane.b32.xlu1 %v13434_v10, %s14165_s27  ;;  %6680 = vrot.lane.b32.xlu0 %v13434_v10, %s14383_s18  ;;  %v13477_v56 = vmax.f32 %v6665_v36, 0.0 }
 0x6e6   : > { %6708 = vrot.lane.b32.xlu1 %v13444_v9, %s14382_s22  ;;  %6897 = vrot.lane.b32.xlu0 %v13434_v10, %s14182_s0 }
 0x6ea   : > { %6672 = vrot.lane.b32.xlu1 %v13444_v9, %s14383_s18  ;;  %7008 = vrot.lane.b32.xlu0 %v13434_v10, %s14384_s29 }
 0x6ee   : > { %6891 = vrot.lane.b32.xlu1 %v13444_v9, %s14182_s0  ;;  %7193 = vrot.lane.b32.xlu0 %v13444_v9, %s14192_s30 }
 0x6f2   : > { %7002 = vrot.lane.b32.xlu1 %v13444_v9, %s14384_s29  ;;  %7304 = vrot.lane.b32.xlu0 %v13444_v9, %s14165_s27 }
 0x6f6   : > { %7195 = vrot.lane.b32.xlu1 %v13463_v20, %s14192_s30  ;;  %6716 = vrot.lane.b32.xlu0 %v13463_v20, %s14382_s22 }
 0x6fa   : > { %7306 = vrot.lane.b32.xlu1 %v13463_v20, %s14165_s27  ;;  %6682 = vrot.lane.b32.xlu0 %v13463_v20, %s14383_s18 }
 0x6fe   : > { %7417 = vrot.lane.b32.xlu1 %v13463_v20, %s14544_s1  ;;  %6899 = vrot.lane.b32.xlu0 %v13463_v20, %s14182_s0 }
 0x702   : > { %6710 = vrot.lane.b32.xlu1 %v13477_v56, %s14382_s22  ;;  %7010 = vrot.lane.b32.xlu0 %v13463_v20, %s14384_s29 }
 0x706   : > { %6674 = vrot.lane.b32.xlu1 %v13477_v56, %s14383_s18  ;;  %7415 = vrot.lane.b32.xlu0 %v13444_v9, %s14544_s1 }
 0x70a   : > { %6893 = vrot.lane.b32.xlu1 %v13477_v56, %s14182_s0  ;;  %7197 = vrot.lane.b32.xlu0 %v13477_v56, %s14192_s30 }
 0x70e   : > { %7004 = vrot.lane.b32.xlu1 %v13477_v56, %s14384_s29  ;;  %7308 = vrot.lane.b32.xlu0 %v13477_v56, %s14165_s27 }
 0x712   : > { %7413 = vrot.lane.b32.xlu1 %v13434_v10, %s14544_s1  ;;  %7419 = vrot.lane.b32.xlu0 %v13477_v56, %s14544_s1 }
 0x716   : > { %7528 = vrot.lane.b32.xlu1 %v13463_v20, %s14208_s24  ;;  %7530 = vrot.lane.b32.xlu0 %v13477_v56, %s14208_s24 }
 0x71a   : > { %7524 = vrot.lane.b32.xlu1 %v13434_v10, %s14208_s24  ;;  %7526 = vrot.lane.b32.xlu0 %v13444_v9, %s14208_s24 }
 0x71e   : > { %7638 = vperm.xlu1 %8362, %v7635_v12   ;;  %7659 = vperm.xlu0 %8363, %v7656_v52  }
 0x722   : > { %7696 = vperm.xlu1 %8362, %v8315_v58   ;;  %7732 = vperm.xlu0 %8363, %v8316_v7  }
 0x726   : > { %7768 = vperm.xlu1 %8362, %v8317_v30   ;;  %7793 = vperm.xlu0 %8363, %v8318_v21   ;;  %v6707_v21 = vld [vmem:[%s13894_s12] sm:$0x7] }
 0x72a   : > { %7829 = vperm.xlu1 %8362, %v8319_v24   ;;  %7865 = vperm.xlu0 %8363, %v8320_v26  }
 0x72e   : > { %7901 = vperm.xlu1 %8362, %v8321_v5  }
 0x750   : > { %v13534_v40 = vpop.permute.xlu1 %7191  ;;  %v6715_v46 = vpop.permute.xlu0 %6714 }
 0x754   : > { %v13536_v39 = vpop.permute.xlu1 %7302  ;;  %v6681_v4 = vpop.permute.xlu0 %6680 }
 0x758   : > { %v6709_v60 = vpop.permute.xlu1 %6708  ;;  %v6898_v17 = vpop.permute.xlu0 %6897 }
 0x759   : > { %v6718_v16 = vsel %vm14737_vm2, %v6715_v46, %v6709_v60  ;;  %v6724_v35 = vsel %vm14740_vm0, %v6709_v60, %v6715_v46  ;;  %vm14748_vm2 = vmmov %vm14746_vm11 }
 0x75a   : > { %v6738_v15 = vmul.f32 %v13559_v51, %v6718_v16  ;;  %v6737_v28 = vmul.f32 %v13556_v63, %v6724_v35 }
 0x75c   : > { %v6673_v14 = vpop.permute.xlu1 %6672  ;;  %v13538_v1 = vpop.permute.xlu0 %7008 }
 0x75d   : > { %v6684_v3 = vsel %vm14741_vm10, %v6681_v4, %v6673_v14  ;;  %v6690_v11 = vsel %vm14744_vm9, %v6673_v14, %v6681_v4  ;;  %v8574_v4 = vld [vmem:[%s13885_s3 + $0x3] ss:$8 sm:$0x3]  ;;  %vm14751_vm10 = vmmov %vm14740_vm0 }
 0x75e   : > { %v6704_v18 = vmul.f32 %v13575_v25, %v6684_v3  ;;  %v6703_v52 = vmul.f32 %v13572_v23, %v6690_v11  ;;  %v13616_v60 = vrot.slane %v8574_v4, %v8727_v8  ;;  %v13619_v14 = vrot.slane %v8574_v4, %v14422_v31  ;;  %v8577_v3 = vld [vmem:[%s13885_s3 + $0x7] ss:$8 sm:$0x3]  ;;  %v8307_v4 = vld [vmem:[%s13894_s12 + $0x14] sm:$0x7]  ;;  %vm14754_vm9 = vmmov %vm14740_vm0 }
 0x760   : > { %v6892_v33 = vpop.permute.xlu1 %6891  ;;  %v13540_v2 = vpop.permute.xlu0 %7193 }
 0x761   : > { %v6901_v58 = vsel %vm14746_vm11, %v6898_v17, %v6892_v33  ;;  %vm14756_vm11 = vmmov %vm14740_vm0 }
 0x762   : > { %v6921_v46 = vmul.f32 %v13597_v61, %v6901_v58  ;;  %v7199_v58 = vsel %vm2198_vm15, %v13534_v40, %v13540_v2 }
 0x764   : > { %v13542_v38 = vpop.permute.xlu1 %7002  ;;  %v13544_v42 = vpop.permute.xlu0 %7304 }
 0x765   : > { %v7012_v57 = vsel %vm2013_vm14, %v13538_v1, %v13542_v38  ;;  %v7018_v35 = vsel %vm2013_vm14, %v13542_v38, %v13538_v1 }
 0x766   : > { %v7032_v38 = vmul.f32 %v13619_v14, %v7012_v57 }
 0x768   : > { %v13546_v47 = vpop.permute.xlu1 %7195  ;;  %v6717_v0 = vpop.permute.xlu0 %6716 }
 0x76c   : > { %v13548_v48 = vpop.permute.xlu1 %7306  ;;  %v6683_v34 = vpop.permute.xlu0 %6682 }
 0x770   : > { %v13550_v43 = vpop.permute.xlu1 %7417  ;;  %v6900_v37 = vpop.permute.xlu0 %6899 }
 0x774   : > { %v6711_v13 = vpop.permute.xlu1 %6710  ;;  %v7011_v62 = vpop.permute.xlu0 %7010 }
 0x775   : > { %v6719_v27 = vsel %vm14738_vm6, %v6717_v0, %v6711_v13  ;;  %v6725_v32 = vsel %vm14739_vm1, %v6711_v13, %v6717_v0  ;;  %vm14749_vm6 = vmmov %vm14748_vm2 }
 0x776   : > { %v6739_v41 = vmul.f32 %v13556_v63, %v6725_v32  ;;  %v6740_v45 = vmul.f32 %v13559_v51, %v6719_v27  ;;  %v6907_v24 = vsel %vm14749_vm6, %v6892_v33, %v6898_v17  ;;  %vm14750_vm1 = vmmov %vm14740_vm0  ;;  %v8301_v27 = vld [vmem:[%s13894_s12 + $0x8] sm:$0x7]  ;;  %v8575_v32 = vld [vmem:[%s13885_s3 + $0x5] ss:$8 sm:$0x3] }
 0x777   : > { %v6920_v0 = vmul.f32 %v13594_v44, %v6907_v24 }
 0x778   : > { %v6675_v29 = vpop.permute.xlu1 %6674  ;;  %6774 = vmatprep.subr.mxu1 %v6740_v45  ;;  %v13577_v22 = vpop.permute.xlu0 %7415  ;;  %v8576_v45 = vld [vmem:[%s13885_s3 + $0x6] ss:$8 sm:$0x3] }
 0x779   : > { %v6685_v49 = vsel %vm14742_vm12, %v6683_v34, %v6675_v29  ;;  %v6691_v59 = vsel %vm14743_vm7, %v6675_v29, %v6683_v34  ;;  %6775 = vmatpush1.msra.mxu1 %v6739_v41  ;;  %v13644_v41 = vrot.slane %v8575_v32, %v14422_v31  ;;  %v13653_v53 = vrot.slane %v8576_v45, %v14422_v31  ;;  %vm14752_vm12 = vmmov %vm14740_vm0 }
 0x77a   : > { %v6705_v55 = vmul.f32 %v13572_v23, %v6691_v59  ;;  %v6706_v6 = vmul.f32 %v13575_v25, %v6685_v49  ;;  %6776 = vmatprep.subr.mxu1 %v6738_v15  ;;  %v13650_v15 = vrot.slane %v8576_v45, %v8727_v8  ;;  %v13665_v49 = vrot.slane %v8577_v3, %v8727_v8  ;;  %vm14753_vm7 = vmmov %vm14740_vm0 }
 0x77b   : > { %6777 = vmatpush1.msra.mxu1 %v6737_v28  ;;  %v13668_v59 = vrot.slane %v8577_v3, %v14422_v31 }
 0x77c   : > { %v6894_v36 = vpop.permute.xlu1 %6893  ;;  %6848 = vmatprep.subr.mxu0 %v6706_v6  ;;  %v7198_v12 = vpop.permute.xlu0 %7197  ;;  %8299 = vmatmul.mubr.msk.f32.vlgmr.msra.gmra.mxu1 %vm14745_vm8, %v8298_v19  ;;  %v7031_v19 = vmul.f32 %v13616_v60, %v7018_v35  ;;  %v8578_v6 = vld [vmem:[%s13885_s3 + $0x10] ss:$8 sm:$0x3]  ;;  %vm14755_vm8 = vmmov %vm14740_vm0 }
 0x77d   : > { %v6902_v7 = vsel %vm14747_vm13, %v6900_v37, %v6894_v36  ;;  %v6908_v30 = vsel %vm14748_vm2, %v6894_v36, %v6900_v37  ;;  %6849 = vmatpush1.msra.mxu0 %v6705_v55  ;;  %6993 = vmatprep.mubr.f32.mxu1 %v14736_v50  ;;  %v7208_v28 = vsel %vm2198_vm15, %v7198_v12, %v13546_v47  ;;  %v8303_v55 = vld [vmem:[%s13894_s12 + $0xc] sm:$0x7]  ;;  %vm7664_vm13 = vcmask 1042432  }
 0x77e   : > { %v6922_v26 = vmul.f32 %v13594_v44, %v6908_v30  ;;  %v6923_v5 = vmul.f32 %v13597_v61, %v6902_v7  ;;  %6850 = vmatprep.subr.mxu0 %v6704_v18  ;;  %v13684_v18 = vrot.slane %v8578_v6, %v8727_v8  ;;  %v7200_v54 = vsel %vm2198_vm15, %v13546_v47, %v7198_v12 }
 0x77f   : > { %6851 = vmatpush1.msra.mxu0 %v6703_v52  ;;  %v13692_v52 = vrot.slane %v8578_v6, %v14422_v31  ;;  %v7318_v7 = vsel %vm2540_vm3, %v13544_v42, %v13536_v39  ;;  %v7223_v30 = vmul.f32 %v13644_v41, %v7208_v28  ;;  %v8305_v31 = vld [vmem:[%s13894_s12 + $0x10] sm:$0x7]  ;;  %vm14758_vm2 = vcmask 138240  }
 0x780   : > { %v7005_v17 = vpop.permute.xlu1 %7004  ;;  %6957 = vmatprep.subr.mxu1 %v6923_v5  ;;  %v7309_v33 = vpop.permute.xlu0 %7308  ;;  %8300 = vmatmul.mubr.msk.f32.vlgmr.msra.gmra.mxu0 %vm14750_vm1, %v6707_v21  ;;  %v7332_v24 = vmul.f32 %v13653_v53, %v7318_v7  ;;  %vm14759_vm6 = vmmov %vm14758_vm2  ;;  %vm14760_vm1 = vcmask 121856  }
 0x781   : > { %v7013_v34 = vsel %vm2013_vm14, %v7011_v62, %v7005_v17  ;;  %v7019_v37 = vsel %vm2013_vm14, %v7005_v17, %v7011_v62  ;;  %6958 = vmatpush1.msra.mxu1 %v6922_v26  ;;  %v13637_v62 = vrot.slane %v8575_v32, %v8727_v8  ;;  %7104 = vmatprep.mubr.f32.mxu0 %v14736_v50 }
 0x782   : > { %v7033_v13 = vmul.f32 %v13616_v60, %v7019_v37  ;;  %v7034_v16 = vmul.f32 %v13619_v14, %v7013_v34  ;;  %6959 = vmatprep.subr.mxu1 %v6921_v46  ;;  %v7319_v11 = vsel %vm2540_vm3, %v7309_v33, %v13548_v48  ;;  %v7311_v36 = vsel %vm2540_vm3, %v13548_v48, %v7309_v33 }
 0x783   : > { %6960 = vmatpush1.msra.mxu1 %v6920_v0  ;;  %v7333_v12 = vmul.f32 %v13650_v15, %v7311_v36 }
 0x784   : > { %v13655_v29 = vpop.permute.xlu1 %7413  ;;  %7068 = vmatprep.subr.mxu0 %v7034_v16  ;;  %7146 = vmatprep.subr.mxu1 %v13477_v56  ;;  %v7420_v1 = vpop.permute.xlu0 %7419  ;;  %v7207_v56 = vsel %vm2198_vm15, %v13540_v2, %v13534_v40  ;;  %v7310_v40 = vsel %vm2540_vm3, %v13536_v39, %v13544_v42  ;;  %v7334_v2 = vmul.f32 %v13653_v53, %v7319_v11  ;;  %v8309_v16 = vld [vmem:[%s13894_s12 + $0x18] sm:$0x7] }
 0x785   : > { %8302 = vmatmul.mubr.msk.f32.vlgmr.msra.gmra.mxu1 %vm14740_vm0, %v8301_v27  ;;  %7069 = vmatpush1.msra.mxu0 %v7033_v13  ;;  %v7430_v39 = vsel %vm2654_vm4, %v7420_v1, %v13550_v43  ;;  %v7331_v26 = vmul.f32 %v13650_v15, %v7310_v40  ;;  %v7429_v5 = vsel %vm2654_vm4, %v13577_v22, %v13655_v29  ;;  %vm14761_vm0 = vmmov %vm14760_vm1 }
 0x786   : > { %7147 = vmatpush1.msra.mxu1 %v13463_v20  ;;  %7070 = vmatprep.subr.mxu0 %v7032_v38  ;;  %v7221_v20 = vmul.f32 %v13644_v41, %v7207_v56  ;;  %v7422_v33 = vsel %vm2654_vm4, %v13550_v43, %v7420_v1  ;;  %v7445_v37 = vmul.f32 %v13668_v59, %v7430_v39 }
 0x787   : > { %7148 = vmatprep.subr.mxu1 %v13444_v9  ;;  %7071 = vmatpush1.msra.mxu0 %v7031_v19  ;;  %v7222_v9 = vmul.f32 %v13637_v62, %v7200_v54  ;;  %v7421_v43 = vsel %vm2654_vm4, %v13655_v29, %v13577_v22  ;;  %v7444_v27 = vmul.f32 %v13665_v49, %v7422_v33  ;;  %v8311_v22 = vld [vmem:[%s13894_s12 + $0x1c] sm:$0x7]  ;;  %v8313_v29 = vld [vmem:[%s13894_s12 + $0x20] sm:$0x7] }
 0x788   : > { %v7529_v47 = vpop.permute.xlu1 %7528  ;;  %v7531_v48 = vpop.permute.xlu0 %7530  ;;  %7149 = vmatpush1.msra.mxu1 %v13434_v10  ;;  %8304 = vmatmul.mubr.msk.f32.vlgmr.msra.gmra.mxu0 %vm14751_vm10, %v8303_v55  ;;  %v7220_v10 = vmul.f32 %v13637_v62, %v7199_v58  ;;  %v7443_v35 = vmul.f32 %v13668_v59, %v7429_v5  ;;  %v7442_v1 = vmul.f32 %v13665_v49, %v7421_v43  ;;  %vm14762_vm10 = vmmov %vm14753_vm7 }
 0x789   : > { %7182 = vmatprep.mubr.f32.mxu1 %v14736_v50  ;;  %7257 = vmatprep.subr.mxu0 %v7223_v30  ;;  %v7541_v21 = vsel %vm2768_vm5, %v7531_v48, %v7529_v47  ;;  %v7533_v42 = vsel %vm2768_vm5, %v7529_v47, %v7531_v48 }
 0x78a   : > { %7368 = vmatprep.subr.mxu1 %v7334_v2  ;;  %8306 = vmatmul.mubr.msk.f32.vlgmr.msra.gmra.mxu1 %vm14752_vm12, %v8305_v31  ;;  %v7556_v0 = vmul.f32 %v13692_v52, %v7541_v21  ;;  %v7555_v57 = vmul.f32 %v13684_v18, %v7533_v42  ;;  %vm14763_vm12 = vmmov %vm14753_vm7 }
 0x78b   : > { %7258 = vmatpush1.msra.mxu0 %v7222_v9  ;;  %7369 = vmatpush1.msra.mxu1 %v7333_v12 }
 0x78c   : > { %v7525_v46 = vpop.permute.xlu1 %7524  ;;  %v7527_v17 = vpop.permute.xlu0 %7526  ;;  %7259 = vmatprep.subr.mxu0 %v7221_v20  ;;  %7370 = vmatprep.subr.mxu1 %v7332_v24 }
 0x78d   : > { %v7540_v34 = vsel %vm2768_vm5, %v7527_v17, %v7525_v46  ;;  %7260 = vmatpush1.msra.mxu0 %v7220_v10  ;;  %7293 = vmatprep.mubr.f32.mxu0 %v14736_v50  ;;  %v7532_v13 = vsel %vm2768_vm5, %v7525_v46, %v7527_v17 }
 0x78e   : > { %7371 = vmatpush1.msra.mxu1 %v7331_v26  ;;  %8308 = vmatmul.mubr.msk.f32.vlgmr.msra.gmra.mxu0 %vm14753_vm7, %v8307_v4  ;;  %v7554_v32 = vmul.f32 %v13692_v52, %v7540_v34  ;;  %v7553_v45 = vmul.f32 %v13684_v18, %v7532_v13  ;;  %v8322_v13 = vld [vmem:[%s13896_s14 + $0x20] sm:$0x7] }
 0x78f   : > { %7404 = vmatprep.mubr.f32.mxu1 %v14736_v50  ;;  %7479 = vmatprep.subr.mxu0 %v7445_v37 }
 0x790   : > { %7590 = vmatprep.subr.mxu1 %v7556_v0  ;;  %8310 = vmatmul.mubr.msk.f32.vlgmr.msra.gmra.mxu1 %vm14754_vm9, %v8309_v16  ;;  %v7958_v16 = vld [vmem:[#allocation2] sm:$0x1] }
 0x791   : > { %7480 = vmatpush1.msra.mxu0 %v7444_v27  ;;  %7591 = vmatpush1.msra.mxu1 %v7555_v57 }
 0x792   : > { %7481 = vmatprep.subr.mxu0 %v7443_v35  ;;  %7515 = vmatprep.mubr.f32.mxu0 %v14736_v50 }
 0x793   : > { %7482 = vmatpush1.msra.mxu0 %v7442_v1  ;;  %7592 = vmatprep.subr.mxu1 %v7554_v32 }
 0x794   : > { %8312 = vmatmul.mubr.msk.f32.vlgmr.msra.gmra.mxu0 %vm14755_vm8, %v8311_v22  ;;  %7593 = vmatpush1.msra.mxu1 %v7553_v45 }
 0x795   : > { %7626 = vmatprep.mubr.f32.mxu1 %v14736_v50 }
 0x796   : > { %8314 = vmatmul.mubr.msk.f32.vlgmr.msra.gmra.mxu1 %vm14756_vm11, %v8313_v29 }
 0x799   : > { %v7639_v46 = vpop.permute.xlu1 %7638  ;;  %v7660_v43 = vpop.permute.xlu0 %7659 }
 0x79d   : > { %v7697_v27 = vpop.permute.xlu1 %7696  ;;  %v7733_v32 = vpop.permute.xlu0 %7732 }
 0x7a1   : > { %v13780_v35 = vpop.permute.xlu1 %7768  ;;  %v7794_v45 = vpop.permute.xlu0 %7793 }
 0x7a5   : > { %v13782_v1 = vpop.permute.xlu1 %7829  ;;  %v13784_v22 = vpop.permute.xlu0 %7865 }
 0x7a9   : > { %v13786_v29 = vpop.permute.xlu1 %7901 }
 0x83c   : > { %v6812_v38 = vpop.f32.mrf.mxu1 }
 0x83e   : > { %v6814_v28 = vpop.f32.mrf.mxu1 }
 0x840   : > { %v6886_v3 = vpop.f32.mrf.mxu0 }
 0x841   : > { %v6887_v56 = vadd.f32 %v6886_v3, %v6812_v38 }
 0x842   : > { %v6888_v11 = vpop.f32.mrf.mxu0 }
 0x843   : > { %v6889_v36 = vadd.f32 %v6888_v11, %v6814_v28 }
 0x845   : > { %v6995_v19 = vpop.f32.mrf.mxu1 }
 0x846   : > { %v7000_v6 = vadd.f32 %v6995_v19, %v6887_v56 }
 0x847   : > { %v6997_v55 = vpop.f32.mrf.mxu1 }
 0x848   : > { %v7106_v54 = vpop.f32.mrf.mxu0  ;;  %v7001_v47 = vadd.f32 %v6997_v55, %v6889_v36 }
 0x849   : > { %v7111_v58 = vadd.f32 %v7106_v54, %v7000_v6 }
 0x84a   : > { %v7108_v7 = vpop.f32.mrf.mxu0  ;;  %v7184_v30 = vpop.f32.mrf.mxu1 }
 0x84b   : > { %v7189_v48 = vadd.f32 %v7184_v30, %v7111_v58  ;;  %v7112_v20 = vadd.f32 %v7108_v7, %v7001_v47 }
 0x84c   : > { %v7186_v31 = vpop.f32.mrf.mxu1 }
 0x84d   : > { %v7190_v12 = vadd.f32 %v7186_v31, %v7112_v20 }
 0x84e   : > { %v7295_v50 = vpop.f32.mrf.mxu0 }
 0x84f   : > { %v7300_v40 = vadd.f32 %v7295_v50, %v7189_v48 }
 0x850   : > { %v7297_v2 = vpop.f32.mrf.mxu0  ;;  %v7406_v9 = vpop.f32.mrf.mxu1 }
 0x851   : > { %v7411_v21 = vadd.f32 %v7406_v9, %v7300_v40  ;;  %v7301_v42 = vadd.f32 %v7297_v2, %v7190_v12 }
 0x852   : > { %v7408_v24 = vpop.f32.mrf.mxu1 }
 0x853   : > { %v7412_v4 = vadd.f32 %v7408_v24, %v7301_v42 }
 0x854   : > { %v7517_v39 = vpop.f32.mrf.mxu0 }
 0x855   : > { %v7522_v10 = vadd.f32 %v7517_v39, %v7411_v21 }
 0x856   : > { %v7628_v26 = vpop.f32.mrf.mxu1  ;;  %v7519_v33 = vpop.f32.mrf.mxu0 }
 0x857   : > { %v7633_v5 = vadd.f32 %v7628_v26, %v7522_v10  ;;  %v7523_v0 = vadd.f32 %v7519_v33, %v7412_v4 }
 0x858   : > { %v7630_v34 = vpop.f32.mrf.mxu1 }
 0x859   : > { %v7641_v17 = vadd.f32 %v7639_v46, %v7633_v5  ;;  %v7634_v37 = vadd.f32 %v7630_v34, %v7523_v0 }
 0x85b   : > { %7720 = vrot.lane.b32.xlu0 %v7641_v17, %s14182_s0  ;;  %7648 = vrot.lane.b32.xlu1 %v7641_v17, %s14383_s18  ;;  %v7642_v57 = vadd.f32 %v7639_v46, %v7634_v37  ;;  %v7796_v3 = vmul.f32 %v7794_v45, %v7641_v17 }
 0x85d   : > { %v7797_v11 = vmul.f32 %v7794_v45, %v7642_v57  ;;  %v7798_v55 = vsel %vm7664_vm13, %v7796_v3, 0.0 }
 0x85e   : > { %v7799_v36 = vrot.slane %v7798_v55, 4 }
 0x85f   : > { %7814 = vrot.lane.b32.xlu0 %v7641_v17, %s14192_s30  ;;  %7684 = vrot.lane.b32.xlu1 %v7641_v17, %s14382_s22  ;;  %v7805_v58 = vsel %vm7664_vm13, %v7797_v11, 0.0 }
 0x860   : > { %v7800_v47 = vadd.f32 %v7799_v36, %v7798_v55  ;;  %v7806_v48 = vrot.slane %v7805_v58, 4 }
 0x862   : > { %v7801_v24 = vrot.slane %v7800_v47, 2  ;;  %v7807_v39 = vadd.f32 %v7806_v48, %v7805_v58 }
 0x863   : > { %7886 = vrot.lane.b32.xlu0 %v7641_v17, %s14544_s1  ;;  %7756 = vrot.lane.b32.xlu1 %v7641_v17, %s14384_s29 }
 0x864   : > { %v7808_v55 = vrot.slane %v7807_v39, 2 }
 0x867   : > { %7850 = vrot.lane.b32.xlu1 %v7641_v17, %s14757_s17  ;;  %7644 = vrot.lane.b32.xlu0 %v7642_v57, %s14383_s18 }
 0x86b   : > { %7717 = vrot.lane.b32.xlu1 %v7642_v57, %s14182_s0  ;;  %7681 = vrot.lane.b32.xlu0 %v7642_v57, %s14382_s22 }
 0x86f   : > { %7816 = vrot.lane.b32.xlu1 %v7642_v57, %s14192_s30  ;;  %7753 = vrot.lane.b32.xlu0 %v7642_v57, %s14384_s29 }
 0x873   : > { %7888 = vrot.lane.b32.xlu1 %v7642_v57, %s14544_s1  ;;  %7937 = vperm.xlu0 %8363, %v8322_v13  }
 0x877   : > { %7922 = vrot.lane.b32.xlu1 %v7641_v17, %s14208_s24  ;;  %7852 = vrot.lane.b32.xlu0 %v7642_v57, %s14757_s17 }
 0x87b   : > { %7961 = vperm.xlu1 %8362, %v7958_v16   ;;  %7924 = vrot.lane.b32.xlu0 %v7642_v57, %s14208_s24  ;;  %s543_s24 = scalar_lea.vmem %s13898_s16, %s8748_s21 }
 0x8cd   : > { %v7649_v38 = vpop.permute.xlu1 %7648  ;;  %v7721_v28 = vpop.permute.xlu0 %7720 }
 0x8d1   : > { %v7685_v56 = vpop.permute.xlu1 %7684  ;;  %v7815_v19 = vpop.permute.xlu0 %7814 }
 0x8d5   : > { %v13789_v6 = vpop.permute.xlu1 %7756  ;;  %v13791_v54 = vpop.permute.xlu0 %7886 }
 0x8d9   : > { %v13794_v7 = vpop.permute.xlu1 %7850  ;;  %v7645_v30 = vpop.permute.xlu0 %7644 }
 0x8da   : > { %v7650_v31 = vsel %vm14758_vm2, %v7649_v38, %v7645_v30  ;;  %v7653_v20 = vsel %vm14759_vm6, %v7645_v30, %v7649_v38 }
 0x8db   : > { %v7654_v50 = vmul.f32 %v7653_v20, %v13572_v23  ;;  %v7655_v40 = vmul.f32 %v7650_v31, %v13575_v25 }
 0x8dd   : > { %v7662_v2 = vmul.f32 %v7660_v43, %v7654_v50  ;;  %v7663_v9 = vmul.f32 %v7660_v43, %v7655_v40  ;;  %v7718_v12 = vpop.permute.xlu1 %7717  ;;  %v7682_v21 = vpop.permute.xlu0 %7681 }
 0x8de   : > { %v7722_v42 = vsel %vm14760_vm1, %v7721_v28, %v7718_v12  ;;  %v7725_v10 = vsel %vm14761_vm0, %v7718_v12, %v7721_v28  ;;  %v7686_v26 = vsel %vm14762_vm10, %v7685_v56, %v7682_v21  ;;  %v7689_v5 = vsel %vm14763_vm12, %v7682_v21, %v7685_v56 }
 0x8df   : > { %v7665_v46 = vsel %vm7664_vm13, %v7662_v2, 0.0  ;;  %v7672_v23 = vsel %vm7664_vm13, %v7663_v9, 0.0  ;;  %v7726_v25 = vmul.f32 %v7725_v10, %v13594_v44  ;;  %v7727_v4 = vmul.f32 %v7722_v42, %v13597_v61 }
 0x8e0   : > { %v7666_v17 = vrot.slane %v7665_v46, 4  ;;  %v7673_v33 = vrot.slane %v7672_v23, 4  ;;  %v7690_v0 = vmul.f32 %v7689_v5, %v13556_v63  ;;  %v7691_v34 = vmul.f32 %v7686_v26, %v13559_v51 }
 0x8e1   : > { %v7735_v37 = vmul.f32 %v7733_v32, %v7726_v25  ;;  %v7736_v57 = vmul.f32 %v7733_v32, %v7727_v4  ;;  %v7817_v13 = vpop.permute.xlu1 %7816  ;;  %v7802_v63 = vadd.f32 %v7801_v24, %v7800_v47  ;;  %v13820_v12 = vadd.f32 %v7808_v55, %v7807_v39  ;;  %v7754_v42 = vpop.permute.xlu0 %7753 }
 0x8e2   : > { %v7667_v16 = vadd.f32 %v7666_v17, %v7665_v46  ;;  %v7674_v43 = vadd.f32 %v7673_v33, %v7672_v23  ;;  %v7699_v45 = vmul.f32 %v7697_v27, %v7690_v0  ;;  %v7700_v38 = vmul.f32 %v7697_v27, %v7691_v34 }
 0x8e3   : > { %v7737_v28 = vsel %vm7664_vm13, %v7735_v37, 0.0  ;;  %v7744_v3 = vsel %vm7664_vm13, %v7736_v57, 0.0  ;;  %v7818_v44 = vsel %vm2198_vm15, %v7815_v19, %v7817_v13  ;;  %v7822_v61 = vsel %vm2198_vm15, %v7817_v13, %v7815_v19 }
 0x8e4   : > { %v7738_v56 = vrot.slane %v7737_v28, 4  ;;  %v7745_v11 = vrot.slane %v7744_v3, 4  ;;  %v7701_v51 = vsel %vm7664_vm13, %v7699_v45, 0.0  ;;  %v7708_v32 = vsel %vm7664_vm13, %v7700_v38, 0.0 }
 0x8e5   : > { %v7823_v36 = vmul.f32 %v7818_v44, %v13637_v62  ;;  %v7824_v27 = vmul.f32 %v7822_v61, %v13644_v41  ;;  %v7668_v58 = vrot.slane %v7667_v16, 2  ;;  %v7675_v30 = vrot.slane %v7674_v43, 2 }
 0x8e6   : > { %v7739_v48 = vadd.f32 %v7738_v56, %v7737_v28  ;;  %v7746_v31 = vadd.f32 %v7745_v11, %v7744_v3  ;;  %v7702_v20 = vrot.slane %v7701_v51, 4  ;;  %v7709_v50 = vrot.slane %v7708_v32, 4 }
 0x8e7   : > { %v7832_v19 = vmul.f32 %v13782_v1, %v7823_v36  ;;  %v7833_v40 = vmul.f32 %v13782_v1, %v7824_v27  ;;  %v7803_v9 = vrot.slane %v7802_v63, 1  ;;  %v7669_v10 = vadd.f32 %v7668_v58, %v7667_v16  ;;  %v7889_v16 = vpop.permute.xlu1 %7888 }
 0x8e8   : > { %v7740_v47 = vrot.slane %v7739_v48, 2  ;;  %v7747_v2 = vrot.slane %v7746_v31, 2  ;;  %v7703_v21 = vadd.f32 %v7702_v20, %v7701_v51  ;;  %v7710_v24 = vadd.f32 %v7709_v50, %v7708_v32 }
 0x8e9   : > { %v7834_v62 = vsel %vm7664_vm13, %v7832_v19, 0.0  ;;  %v7841_v41 = vsel %vm7664_vm13, %v7833_v40, 0.0  ;;  %v7676_v26 = vadd.f32 %v7675_v30, %v7674_v43  ;;  %v13824_v17 = vadd.f32 %v7803_v9, %v7802_v63 }
 0x8ea   : > { %v7741_v5 = vadd.f32 %v7740_v47, %v7739_v48  ;;  %v7748_v46 = vadd.f32 %v7747_v2, %v7746_v31  ;;  %v7704_v23 = vrot.slane %v7703_v21, 2  ;;  %v7711_v25 = vrot.slane %v7710_v24, 2 }
 0x8eb   : > { %v7835_v4 = vrot.slane %v7834_v62, 4  ;;  %v7842_v1 = vrot.slane %v7841_v41, 4  ;;  %v7810_v39 = vrot.slane %v13820_v12, 1  ;;  %v7758_v33 = vsel %vm2013_vm14, %v13789_v6, %v7754_v42 }
 0x8ec   : > { %v7761_v0 = vsel %vm2013_vm14, %v7754_v42, %v13789_v6  ;;  %v7705_v34 = vadd.f32 %v7704_v23, %v7703_v21  ;;  %v7712_v37 = vadd.f32 %v7711_v25, %v7710_v24  ;;  %v7670_v43 = vrot.slane %v7669_v10, 1 }
 0x8ed   : > { %v7836_v57 = vadd.f32 %v7835_v4, %v7834_v62  ;;  %v7843_v13 = vadd.f32 %v7842_v1, %v7841_v41  ;;  %v7677_v45 = vrot.slane %v7676_v26, 1  ;;  %v7762_v38 = vmul.f32 %v7761_v0, %v13616_v60  ;;  %v7923_v4 = vpop.permute.xlu1 %7922 }
 0x8ee   : > { %v7763_v28 = vmul.f32 %v7758_v33, %v13619_v14  ;;  %v13833_v3 = vpop.permute.xlu0 %7937  ;;  %v7742_v44 = vrot.slane %v7741_v5, 1  ;;  %v7749_v61 = vrot.slane %v7748_v46, 1  ;;  %v7706_v56 = vrot.slane %v7705_v34, 1 }
 0x8ef   : > { %v7713_v11 = vrot.slane %v7712_v37, 1  ;;  %v7771_v63 = vmul.f32 %v13780_v35, %v7762_v38  ;;  %v7890_v55 = vsel %vm2654_vm4, %v13791_v54, %v7889_v16  ;;  %v7894_v51 = vsel %vm2654_vm4, %v7889_v16, %v13791_v54 }
 0x8f0   : > { %v7772_v6 = vmul.f32 %v13780_v35, %v7763_v28  ;;  %v7707_v32 = vadd.f32 %v7706_v56, %v7705_v34  ;;  %v7837_v36 = vrot.slane %v7836_v57, 2  ;;  %v7844_v14 = vrot.slane %v7843_v13, 2 }
 0x8f1   : > { %v7714_v60 = vadd.f32 %v7713_v11, %v7712_v37  ;;  %v7773_v27 = vsel %vm7664_vm13, %v7771_v63, 0.0  ;;  %v7895_v30 = vmul.f32 %v7890_v55, %v13665_v49  ;;  %v7896_v48 = vmul.f32 %v7894_v51, %v13668_v59 }
 0x8f2   : > { %v7780_v58 = vsel %vm7664_vm13, %v7772_v6, 0.0  ;;  %v7853_v31 = vpop.permute.xlu0 %7852  ;;  %v7671_v35 = vadd.f32 %v7670_v43, %v7669_v10  ;;  %v7678_v20 = vadd.f32 %v7677_v45, %v7676_v26  ;;  %v7743_v50 = vadd.f32 %v7742_v44, %v7741_v5 }
 0x8f3   : > { %v7750_v19 = vadd.f32 %v7749_v61, %v7748_v46  ;;  %v7774_v40 = vrot.slane %v7773_v27, 4  ;;  %v7781_v47 = vrot.slane %v7780_v58, 4  ;;  %v7904_v54 = vmul.f32 %v13786_v29, %v7895_v30 }
 0x8f4   : > { %v7905_v2 = vmul.f32 %v13786_v29, %v7896_v48  ;;  %v7715_v9 = vadd.f32 %v7707_v32, %v7671_v35  ;;  %v7716_v21 = vadd.f32 %v7714_v60, %v7678_v20  ;;  %v7838_v24 = vadd.f32 %v7837_v36, %v7836_v57 }
 0x8f5   : > { %v7845_v62 = vadd.f32 %v7844_v14, %v7843_v13  ;;  %v7775_v41 = vadd.f32 %v7774_v40, %v7773_v27  ;;  %v7782_v42 = vadd.f32 %v7781_v47, %v7780_v58  ;;  %v7906_v49 = vsel %vm7664_vm13, %v7904_v54, 0.0 }
 0x8f6   : > { %v7913_v59 = vsel %vm7664_vm13, %v7905_v2, 0.0  ;;  %v7925_v10 = vpop.permute.xlu0 %7924  ;;  %v7907_v26 = vrot.slane %v7906_v49, 4  ;;  %v7854_v46 = vsel %vm2540_vm3, %v13794_v7, %v7853_v31  ;;  %v7858_v23 = vsel %vm2540_vm3, %v7853_v31, %v13794_v7 }
 0x8f7   : > { %v7914_v5 = vrot.slane %v7913_v59, 4  ;;  %v7776_v29 = vrot.slane %v7775_v41, 2  ;;  %v7783_v25 = vrot.slane %v7782_v42, 2  ;;  %v7859_v1 = vmul.f32 %v7854_v46, %v13650_v15 }
 0x8f8   : > { %v7860_v33 = vmul.f32 %v7858_v23, %v13653_v53  ;;  %v7751_v0 = vadd.f32 %v7743_v50, %v7715_v9  ;;  %v7908_v34 = vadd.f32 %v7907_v26, %v7906_v49  ;;  %v7926_v57 = vsel %vm2768_vm5, %v7923_v4, %v7925_v10 }
 0x8f9   : > { %v7915_v37 = vadd.f32 %v7914_v5, %v7913_v59  ;;  %v7777_v13 = vadd.f32 %v7776_v29, %v7775_v41  ;;  %v7784_v16 = vadd.f32 %v7783_v25, %v7782_v42  ;;  %v7868_v43 = vmul.f32 %v13784_v22, %v7859_v1 }
 0x8fa   : > { %v7869_v45 = vmul.f32 %v13784_v22, %v7860_v33  ;;  %v7752_v38 = vadd.f32 %v7750_v19, %v7716_v21  ;;  %v7909_v7 = vrot.slane %v7908_v34, 2  ;;  %v7930_v28 = vsel %vm2768_vm5, %v7925_v10, %v7923_v4 }
 0x8fb   : > { %v7931_v44 = vmul.f32 %v7926_v57, %v13684_v18  ;;  %v7778_v15 = vrot.slane %v7777_v13, 1  ;;  %v7785_v61 = vrot.slane %v7784_v16, 1  ;;  %v7870_v53 = vsel %vm7664_vm13, %v7868_v43, 0.0 }
 0x8fc   : > { %v7877_v56 = vsel %vm7664_vm13, %v7869_v45, 0.0  ;;  %v7839_v11 = vrot.slane %v7838_v24, 1  ;;  %v7916_v63 = vrot.slane %v7915_v37, 2  ;;  %v7871_v6 = vrot.slane %v7870_v53, 4 }
 0x8fd   : > { %v7878_v55 = vrot.slane %v7877_v56, 4  ;;  %v7779_v51 = vadd.f32 %v7778_v15, %v7777_v13  ;;  %v7786_v32 = vadd.f32 %v7785_v61, %v7784_v16  ;;  %v7932_v22 = vmul.f32 %v7930_v28, %v13692_v52  ;;  %v14764_v15 = vld [vmem:[#allocation23_spill] sm:$0xff] }
 0x8fe   : > { %v7940_v60 = vmul.f32 %v13833_v3, %v7931_v44  ;;  %v7846_v36 = vrot.slane %v7845_v62, 1  ;;  %v7910_v14 = vadd.f32 %v7909_v7, %v7908_v34  ;;  %v7872_v27 = vadd.f32 %v7871_v6, %v7870_v53  ;;  %v14765_v53 = vld [vmem:[#allocation22_spill] sm:$0xff] }
 0x8ff   : > { %v7879_v18 = vadd.f32 %v7878_v55, %v7877_v56  ;;  %v7787_v58 = vadd.f32 %v7779_v51, %v7751_v0  ;;  %v7788_v30 = vadd.f32 %v7786_v32, %v7752_v38  ;;  %v7941_v48 = vmul.f32 %v13833_v3, %v7932_v22 }
 0x900   : > { %v7942_v31 = vsel %vm7664_vm13, %v7940_v60, 0.0  ;;  %v7811_v35 = vadd.f32 %v7810_v39, %v13820_v12  ;;  %v7917_v20 = vadd.f32 %v7916_v63, %v7915_v37  ;;  %v7873_v50 = vrot.slane %v7872_v27, 2  ;;  %v8579_v63 = vld [vmem:[%s8774_s28] sm:$0xff] }
 0x901   : > { %v7880_v19 = vrot.slane %v7879_v18, 2  ;;  %v7812_v52 = vadd.f32 %v13824_v17, %v7787_v58  ;;  %v7943_v40 = vrot.slane %v7942_v31, 4  ;;  %v7949_v47 = vsel %vm7664_vm13, %v7941_v48, 0.0 }
 0x902   : > { %v7813_v54 = vadd.f32 %v7811_v35, %v7788_v30  ;;  %v7874_v2 = vadd.f32 %v7873_v50, %v7872_v27  ;;  %v7950_v21 = vrot.slane %v7949_v47, 4  ;;  %v7840_v41 = vadd.f32 %v7839_v11, %v7838_v24 }
 0x903   : > { %v7881_v9 = vadd.f32 %v7880_v19, %v7879_v18  ;;  %v7847_v3 = vadd.f32 %v7846_v36, %v7845_v62  ;;  %v7911_v42 = vrot.slane %v7910_v14, 1  ;;  %v7944_v49 = vadd.f32 %v7943_v40, %v7942_v31  ;;  %v7962_v62 = vpop.permute.xlu1 %7961 }
 0x904   : > { %v7918_v59 = vrot.slane %v7917_v20, 1  ;;  %v7875_v10 = vrot.slane %v7874_v2, 1  ;;  %v7951_v12 = vadd.f32 %v7950_v21, %v7949_v47  ;;  %v7848_v39 = vadd.f32 %v7840_v41, %v7812_v52 }
 0x905   : > { %v7882_v26 = vrot.slane %v7881_v9, 1  ;;  %v7945_v5 = vrot.slane %v7944_v49, 2  ;;  %v7849_v46 = vadd.f32 %v7847_v3, %v7813_v54  ;;  %v7912_v25 = vadd.f32 %v7911_v42, %v7910_v14 }
 0x906   : > { %v7876_v23 = vadd.f32 %v7875_v10, %v7874_v2  ;;  %v7952_v29 = vrot.slane %v7951_v12, 2  ;;  %v7919_v1 = vadd.f32 %v7918_v59, %v7917_v20  ;;  %v7967_v45 = vrot.slane %v7962_v62, %v8727_v8 }
 0x907   : > { %v7883_v17 = vadd.f32 %v7882_v26, %v7881_v9  ;;  %v7946_v4 = vadd.f32 %v7945_v5, %v7944_v49 }
 0x908   : > { %v7884_v33 = vadd.f32 %v7876_v23, %v7848_v39  ;;  %v7953_v34 = vadd.f32 %v7952_v29, %v7951_v12 }
 0x909   : > { %v7885_v0 = vadd.f32 %v7883_v17, %v7849_v46  ;;  %v7947_v24 = vrot.slane %v7946_v4, 1 }
 0x90a   : > { %v7920_v37 = vadd.f32 %v7912_v25, %v7884_v33  ;;  %v7954_v13 = vrot.slane %v7953_v34, 1 }
 0x90b   : > { %v7921_v57 = vadd.f32 %v7919_v1, %v7885_v0  ;;  %v7948_v16 = vadd.f32 %v7947_v24, %v7946_v4 }
 0x90c   : > { %v7955_v43 = vadd.f32 %v7954_v13, %v7953_v34 }
 0x90d   : > { %v7956_v38 = vadd.f32 %v7948_v16, %v7920_v37 }
 0x90e   : > { %v7957_v7 = vadd.f32 %v7955_v43, %v7921_v57 }
 0x90f   : > { %v7968_v28 = vadd.f32 %v7967_v45, %v7956_v38 }
 0x910   : > { %v7969_v44 = vadd.f32 %v7967_v45, %v7957_v7 }
 0x911   : > { %v7986_v61 = vmul.f32 %v14764_v15, %v7968_v28 }
 0x912   : > { %v7987_v56 = vmul.f32 %v14765_v53, %v7969_v44 }
 0x914   : > { %v7990_v11 = vcombine.low %v7986_v61, %v7987_v56 }
 0x916   : > { %v7992_v6 = vadd.f32 %v8579_v63, %v7990_v11 }
 0x918   : > { %7993 = vst [vmem:[%s543_s24] sm:$0xff] %v7992_v6 }
 0x919 PF: > { %s28_s23 = sadd.s32 1, %s8586_s23  }
 0x91a   : > { %p25_p4 = scmp.ge.s32.totalorder %s28_s23, 4  }
 0x91c   :  { %27 = sbr.rel (!%p25_p4) target bundleno = 6 (0x6), region = 175 }

</bundles_post_ra>
